<compile_context>
chip_gen: v6e
topology: v6e:2x2x1
jax: 0.10.0
libtpu: 0.0.40
codegen_flags: <defaults>
</compile_context>

<pallas_src>
import functools

import jax
import jax.numpy as jnp
from jax.experimental import pallas as pl
from jax.experimental.pallas import tpu as pltpu  # noqa: F401  (TPU backend)

# ----------------------------- config (small) --------------------------------
DIM_WEMB = 16
DIM_ENC = 16          # per-direction; ctx feature dim = 2*DIM_ENC = 32
DIM_DEC = 32
DIM_ATT = 16
SRC_WORDS = 24
TRG_WORDS = 24
TX = 8
TY = 6
BN = 4


# ------------------------- single fused forward kernel ------------------------
def nmt_fused_kernel(x_emb_ref, xm_ref, y_emb_ref, y_tgt_ref, y_msk_ref,
                     wih_f_ref, whh_f_ref, b_f_ref,
                     wih_r_ref, whh_r_ref, b_r_ref,
                     wacf_ref, wacr_ref, ba_tile_ref,
                     whc0_f_ref, whc0_r_ref, b_hc0_ref,
                     w_y_ref, b_y_ref, w_h_ref, w_cf_ref, w_cr_ref, wro_h_ref,
                     w2_blk_ref, ba2_ref, wlo_ref, blo_ref,
                     loss_ref, *, tx, ty, bp, inv_bn):
    W = wih_f_ref.shape[0]            # word-embedding dim
    H = whh_f_ref.shape[0]            # per-direction encoder dim
    D = wro_h_ref.shape[0]            # decoder dim
    V = wlo_ref.shape[1]              # target vocabulary
    ND = 4 * D                        # fused LSTMCell gate block width (=128)
    TA = w2_blk_ref.shape[0]          # Tx * dim_att (=128), lane-dense att width

    # ------------------ bidirectional encoder (fully unrolled) ------------------
    xm = xm_ref[...]                                      # (Bp, Tx) source mask
    x_flat = x_emb_ref[...]                               # (Tx*Bp, W) time-major
    # hoisted input projections: one big matmul per direction; only the h->h
    # matmul + elementwise stay on the recurrent path.
    gx_f = (jnp.dot(x_flat, wih_f_ref[...], preferred_element_type=jnp.float32)
            + b_f_ref[...])                               # (Tx*Bp, 4H)
    gx_r = (jnp.dot(x_flat, wih_r_ref[...], preferred_element_type=jnp.float32)
            + b_r_ref[...])
    whh_f = whh_f_ref[...]
    whh_r = whh_r_ref[...]

    def lstm_step(gx_t, m_t, h, c, whh):
        # gate columns [i|f|o|g]: one sigmoid slab + one tanh slab
        gates = gx_t + jnp.dot(h, whh, preferred_element_type=jnp.float32)
        sig = jax.nn.sigmoid(gates[:, :3 * H])
        ig, fg, og = sig[:, :H], sig[:, H:2 * H], sig[:, 2 * H:]
        gg = jnp.tanh(gates[:, 3 * H:])
        c_new = fg * c + ig * gg
        h_new = og * jnp.tanh(c_new)
        h_t = m_t * h_new + (1.0 - m_t) * h               # masked step keeps state
        c_t = m_t * c_new + (1.0 - m_t) * c
        return h_t, c_t

    zero = jnp.zeros((bp, H), jnp.float32)
    h_f, c_f, h_r, c_r = zero, zero, zero, zero
    hf_list = [None] * tx                                 # masked fwd ctx halves
    hr_list = [None] * tx                                 # masked rev ctx halves
    # lane-dense att_pre accumulator (att1 bias folded in via ba_tile)
    att_pre = jnp.zeros((bp, TA), jnp.float32) + ba_tile_ref[...]
    for t in range(tx):
        tr = tx - 1 - t
        m_f = xm[:, t:t + 1]
        m_r = xm[:, tr:tr + 1]
        h_f, c_f = lstm_step(gx_f[t * bp:(t + 1) * bp, :], m_f, h_f, c_f, whh_f)
        h_r, c_r = lstm_step(gx_r[tr * bp:(tr + 1) * bp, :], m_r, h_r, c_r, whh_r)
        hf_m = h_f * m_f                                  # mask at produce time
        hr_m = h_r * m_r
        hf_list[t] = hf_m
        hr_list[tr] = hr_m
        # hoisted attention ctx projection, accumulated lane-dense via
        # per-timestep "placed" weights (built in the wrapper): one dense
        # (Bp,128) slab instead of a (Tx,Bn,16) tensor.
        att_pre = (att_pre
                   + jnp.dot(hf_m, wacf_ref[t], preferred_element_type=jnp.float32)
                   + jnp.dot(hr_m, wacr_ref[tr], preferred_element_type=jnp.float32))

    # decoder initial state from the masked mean context (h0|c0 fused along N)
    sum_f, sum_r = hf_list[0], hr_list[0]
    for t in range(1, tx):
        sum_f = sum_f + hf_list[t]
        sum_r = sum_r + hr_list[t]
    denom = jnp.maximum(jnp.sum(xm, axis=1, keepdims=True), 1e-6)
    mean_f = sum_f / denom
    mean_r = sum_r / denom
    hc0 = jnp.tanh(
        jnp.dot(mean_f, whc0_f_ref[...], preferred_element_type=jnp.float32)
        + jnp.dot(mean_r, whc0_r_ref[...], preferred_element_type=jnp.float32)
        + b_hc0_ref[...])                                  # (Bp, 2D) = [h0 | c0]
    htm, ctm = hc0[:, :D], hc0[:, D:]

    # ---------------- decoder (teacher forcing, fully unrolled) -----------------
    y_emb_all = y_emb_ref[...]                             # (Ty*Bp, W)
    y_tgt_all = y_tgt_ref[...]                             # (Ty*Bp, 1) int32
    y_msk_all = y_msk_ref[...]                             # (Ty*Bp, 1)

    loss_acc = jnp.zeros((bp, 1), jnp.float32)
    for t in range(ty):
        r0, r1 = t * bp, (t + 1) * bp
        yemb = y_emb_all[r0:r1, :]                         # (Bp, W)

        # fused same-LHS matmuls; column blocks [cell | att(tiled Tx) | readout]
        gy = (jnp.dot(yemb, w_y_ref[...], preferred_element_type=jnp.float32)
              + b_y_ref[...])                              # (Bp, 4D+TA+2W)
        gh = jnp.dot(htm, w_h_ref[...], preferred_element_type=jnp.float32)  # (Bp, 4D+TA)

        # --- attention, lane-dense over Tx*A ---
        att1 = jnp.tanh(att_pre + gy[:, ND:ND + TA] + gh[:, ND:ND + TA])     # (Bp, 128)
        att2 = (jnp.dot(att1, w2_blk_ref[...], preferred_element_type=jnp.float32)
                + ba2_ref[...])                            # (Bp, Tx)
        att2 = att2 - jnp.max(att2, axis=1, keepdims=True)  # per-batch-row max
        ealpha = jnp.exp(att2) * xm
        rden = pl.reciprocal(jnp.sum(ealpha, axis=1, keepdims=True) + 1e-15,
                             approx=True)
        alpha = ealpha * rden                              # (Bp, Tx)

        ctx_f = alpha[:, 0:1] * hf_list[0]
        ctx_r = alpha[:, 0:1] * hr_list[0]
        for s in range(1, tx):
            ctx_f = ctx_f + alpha[:, s:s + 1] * hf_list[s]
            ctx_r = ctx_r + alpha[:, s:s + 1] * hr_list[s]  # ctx_t = [ctx_f|ctx_r]

        # --- LSTMCell step + readout; ctx_t matmul covers [wi_c | wro_c] ---
        gc = (jnp.dot(ctx_f, w_cf_ref[...], preferred_element_type=jnp.float32)
              + jnp.dot(ctx_r, w_cr_ref[...], preferred_element_type=jnp.float32))
        gates = gy[:, :ND] + gh[:, :ND] + gc[:, :ND]       # (Bp, 128)
        sig = jax.nn.sigmoid(gates[:, :3 * D])
        ig, fg, og = sig[:, :D], sig[:, D:2 * D], sig[:, 2 * D:]
        gg = jnp.tanh(gates[:, 3 * D:])
        ct = fg * ctm + ig * gg
        ht = og * jnp.tanh(ct)

        # maxout readout: single (., 2W) sum; branches are the column halves
        ro = (gc[:, ND:] + gy[:, ND + TA:]
              + jnp.dot(ht, wro_h_ref[...], preferred_element_type=jnp.float32))
        read_max = jnp.maximum(ro[:, :W], ro[:, W:])       # (Bp, W)
        logit = (jnp.dot(read_max, wlo_ref[...], preferred_element_type=jnp.float32)
                 + blo_ref[...])                           # (Bp, V)

        # --- masked NLL of log_softmax(logit) at the target id (iota compare) ---
        z = logit - jnp.max(logit, axis=1, keepdims=True)
        lse = jnp.log(jnp.sum(jnp.exp(z), axis=1, keepdims=True))
        tgt = y_tgt_all[r0:r1, :]                          # (Bp, 1) int32
        onehot = (jax.lax.broadcasted_iota(jnp.int32, (bp, V), 1)
                  == tgt).astype(jnp.float32)
        z_tgt = jnp.sum(z * onehot, axis=1, keepdims=True)
        loss_acc = loss_acc + (lse - z_tgt) * y_msk_all[r0:r1, :]

        htm, ctm = ht, ct

    # single store of the scalar loss (normalized by the real batch size)
    loss_ref[...] = jnp.sum(loss_acc, axis=0, keepdims=True) * inv_bn


# ------------------------ wrapper-side weight packing --------------------------
def _block_diag(w, reps):
    """(K,N) -> (reps*K, reps*N) block-diagonal with `w` repeated on the diagonal."""
    k, n = w.shape
    eye = jnp.eye(reps, dtype=w.dtype)
    return (eye[:, None, :, None] * w[None, :, None, :]).reshape(reps * k, reps * n)


def _placed(w, reps):
    """(K,N) -> (reps, K, reps*N); slab [t] holds `w` at columns [t*N:(t+1)*N]."""
    k, n = w.shape
    eye = jnp.eye(reps, dtype=w.dtype)
    return (eye[:, None, :, None] * w[None, :, None, :]).reshape(reps, k, reps * n)


def pack_kernel_weights(p, tx):
    A = DIM_ATT
    H = DIM_ENC
    return dict(
        wih_f=p['enc_f_wih'], whh_f=p['enc_f_whh'], b_f=p['enc_f_b'],
        wih_r=p['enc_r_wih'], whh_r=p['enc_r_whh'], b_r=p['enc_r_b'],
        # per-timestep placed attention-ctx weights (lane-dense att_pre)
        wacf=_placed(p['wa_cf'], tx),                       # (Tx, H, Tx*A)
        wacr=_placed(p['wa_cr'], tx),                       # (Tx, H, Tx*A)
        ba_tile=jnp.tile(p['ba'], (1, tx)),                 # (1, Tx*A)
        # h0/c0 fused along N: mean_ctx @ [wh0 | wc0]
        whc0_f=jnp.concatenate([p['wh0_f'], p['wc0_f']], axis=1),   # (H, 2D)
        whc0_r=jnp.concatenate([p['wh0_r'], p['wc0_r']], axis=1),
        b_hc0=jnp.concatenate([p['bh0'], p['bc0']], axis=1),        # (1, 2D)
        # same-LHS fusions (128-wide blocks first -> vreg-aligned slices)
        w_y=jnp.concatenate(
            [p['wi_y'], jnp.tile(p['wa_y'], (1, tx)), p['wro_y']], axis=1),
        b_y=jnp.concatenate(
            [p['b_cell'], jnp.zeros((1, tx * A), jnp.float32), p['b_ro']], axis=1),
        w_h=jnp.concatenate([p['whh_dec'], jnp.tile(p['wa_h'], (1, tx))], axis=1),
        w_cf=jnp.concatenate([p['wi_c'][:H], p['wro_c'][:H]], axis=1),  # (H, 4D+2W)
        w_cr=jnp.concatenate([p['wi_c'][H:], p['wro_c'][H:]], axis=1),
        wro_h=p['wro_h'],
        w2_blk=_block_diag(p['wa2'].T, tx),                 # (Tx*A, Tx)
        ba2=p['ba2'],
        wlo=p['wlo'], blo=p['blo'],
    )


def run_nmt(x_emb, xm_bt, y_emb, y_tgt, y_msk, kp, tx, ty, bp, bn):
    kernel = functools.partial(nmt_fused_kernel, tx=tx, ty=ty, bp=bp,
                               inv_bn=1.0 / float(bn))
    return pl.pallas_call(
        kernel,
        out_shape=jax.ShapeDtypeStruct((1, 1), jnp.float32),
    )(x_emb, xm_bt, y_emb, y_tgt, y_msk,
      kp['wih_f'], kp['whh_f'], kp['b_f'],
      kp['wih_r'], kp['whh_r'], kp['b_r'],
      kp['wacf'], kp['wacr'], kp['ba_tile'],
      kp['whc0_f'], kp['whc0_r'], kp['b_hc0'],
      kp['w_y'], kp['b_y'], kp['w_h'], kp['w_cf'], kp['w_cr'], kp['wro_h'],
      kp['w2_blk'], kp['ba2'], kp['wlo'], kp['blo'])


# ------------------------------- full forward ---------------------------------
def att_nmt_forward(params, x_data, x_mask, y_data, y_mask):
    Tx, Bn = x_data.shape
    Ty = y_data.shape[0]

    # pad batch (sublane) dim to a multiple of 8; padded rows are fully masked
    Bp = max(8, ((Bn + 7) // 8) * 8)
    pad = Bp - Bn
    if pad:
        x_data = jnp.pad(x_data, ((0, 0), (0, pad)))
        x_mask = jnp.pad(x_mask, ((0, 0), (0, pad)))
        y_data = jnp.pad(y_data, ((0, 0), (0, pad)))
        y_mask = jnp.pad(y_mask, ((0, 0), (0, pad)))

    # embedding gathers for all steps at once (wrapper side)
    x_emb = params['src_emb'][x_data].reshape(Tx * Bp, DIM_WEMB)
    xm_bt = jnp.transpose(x_mask)                          # (Bp, Tx), lane-dense

    # teacher forcing: previous tokens = [<bos>=0, y_data[:-1]]
    y_prev = jnp.concatenate(
        [jnp.zeros((1, Bp), dtype=y_data.dtype), y_data[:-1]], axis=0)
    y_emb = params['dec_emb'][y_prev].reshape(Ty * Bp, DIM_WEMB)
    y_tgt = y_data.reshape(Ty * Bp, 1)
    y_msk = y_mask.reshape(Ty * Bp, 1)

    kp = pack_kernel_weights(params, Tx)
    loss = run_nmt(x_emb, xm_bt, y_emb, y_tgt, y_msk, kp,
                   Tx, Ty, Bp, Bn)                         # divide by real Bn
    return loss[0, 0]


# ----------------------------- deterministic init ------------------------------
def init_params(key):
    keys = iter(jax.random.split(key, 64))

    def mat(shape, scale=0.1):
        return (scale * jax.random.normal(next(keys), shape)).astype(jnp.float32)

    p = {}
    p['src_emb'] = mat((SRC_WORDS, DIM_WEMB))
    p['dec_emb'] = mat((TRG_WORDS, DIM_WEMB))
    # encoder LSTMs, gate column order [i|f|o|g] (equivalent reparameterization)
    for d in ('f', 'r'):
        p[f'enc_{d}_wih'] = mat((DIM_WEMB, 4 * DIM_ENC))
        p[f'enc_{d}_whh'] = mat((DIM_ENC, 4 * DIM_ENC))
        p[f'enc_{d}_b'] = mat((1, 4 * DIM_ENC))
    # dec_h0 / dec_c0 Linear(2E -> D), split by ctx halves [fwd | rev]
    p['wh0_f'] = mat((DIM_ENC, DIM_DEC)); p['wh0_r'] = mat((DIM_ENC, DIM_DEC))
    p['bh0'] = mat((1, DIM_DEC))
    p['wc0_f'] = mat((DIM_ENC, DIM_DEC)); p['wc0_r'] = mat((DIM_ENC, DIM_DEC))
    p['bc0'] = mat((1, DIM_DEC))
    # att1 Linear(2E + W + D -> A) split by input blocks [ctx_f|ctx_r|y_emb|htm]
    p['wa_cf'] = mat((DIM_ENC, DIM_ATT)); p['wa_cr'] = mat((DIM_ENC, DIM_ATT))
    p['ba'] = mat((1, DIM_ATT))
    p['wa_y'] = mat((DIM_WEMB, DIM_ATT)); p['wa_h'] = mat((DIM_DEC, DIM_ATT))
    p['wa2'] = mat((1, DIM_ATT)); p['ba2'] = mat((1, 1))
    # LSTMCell(W + 2E -> D) split by input blocks [y_emb | ctx_t], gates [i|f|o|g]
    p['wi_y'] = mat((DIM_WEMB, 4 * DIM_DEC))
    p['wi_c'] = mat((2 * DIM_ENC, 4 * DIM_DEC))
    p['whh_dec'] = mat((DIM_DEC, 4 * DIM_DEC))
    p['b_cell'] = mat((1, 4 * DIM_DEC))
    # readout Linear(2E + D + W -> 2W) split by input blocks; output columns
    # arranged as [maxout branch a | maxout branch b]
    p['wro_c'] = mat((2 * DIM_ENC, 2 * DIM_WEMB))
    p['wro_h'] = mat((DIM_DEC, 2 * DIM_WEMB))
    p['wro_y'] = mat((DIM_WEMB, 2 * DIM_WEMB))
    p['b_ro'] = mat((1, 2 * DIM_WEMB))
    p['wlo'] = mat((DIM_WEMB, TRG_WORDS)); p['blo'] = mat((1, TRG_WORDS))
    return p


if __name__ == "__main__":
    root = jax.random.PRNGKey(0)
    pkey, k1, k2 = jax.random.split(root, 3)
    params = init_params(pkey)

    x_data = jax.random.randint(k1, (TX, BN), 1, SRC_WORDS, dtype=jnp.int32)
    y_data = jax.random.randint(k2, (TY, BN), 1, TRG_WORDS, dtype=jnp.int32)
    x_lens = jnp.array([TX, TX - 2, TX - 1, TX - 3], dtype=jnp.int32)
    y_lens = jnp.array([TY, TY - 2, TY - 1, TY - 3], dtype=jnp.int32)
    x_mask = (jnp.arange(TX)[:, None] < x_lens[None, :]).astype(jnp.float32)
    y_mask = (jnp.arange(TY)[:, None] < y_lens[None, :]).astype(jnp.float32)

    fwd = jax.jit(att_nmt_forward)
    loss = fwd(params, x_data, x_mask, y_data, y_mask)
    loss = jax.block_until_ready(loss)
    assert jnp.isfinite(loss), "loss is not finite"
    print("KERNEL_OK")
</pallas_src>

<mosaic_0001>
module attributes {stable_mosaic.version = 11 : i64} {
  func.func @nmt_fused_kernel(%arg0: memref<64x16xf32, #tpu.memory_space<vmem>>, %arg1: memref<8x8xf32, #tpu.memory_space<vmem>>, %arg2: memref<48x16xf32, #tpu.memory_space<vmem>>, %arg3: memref<48x1xi32, #tpu.memory_space<vmem>>, %arg4: memref<48x1xf32, #tpu.memory_space<vmem>>, %arg5: memref<16x64xf32, #tpu.memory_space<vmem>>, %arg6: memref<16x64xf32, #tpu.memory_space<vmem>>, %arg7: memref<1x64xf32, #tpu.memory_space<vmem>>, %arg8: memref<16x64xf32, #tpu.memory_space<vmem>>, %arg9: memref<16x64xf32, #tpu.memory_space<vmem>>, %arg10: memref<1x64xf32, #tpu.memory_space<vmem>>, %arg11: memref<8x16x128xf32, #tpu.memory_space<vmem>>, %arg12: memref<8x16x128xf32, #tpu.memory_space<vmem>>, %arg13: memref<1x128xf32, #tpu.memory_space<vmem>>, %arg14: memref<16x64xf32, #tpu.memory_space<vmem>>, %arg15: memref<16x64xf32, #tpu.memory_space<vmem>>, %arg16: memref<1x64xf32, #tpu.memory_space<vmem>>, %arg17: memref<16x288xf32, #tpu.memory_space<vmem>>, %arg18: memref<1x288xf32, #tpu.memory_space<vmem>>, %arg19: memref<32x256xf32, #tpu.memory_space<vmem>>, %arg20: memref<16x160xf32, #tpu.memory_space<vmem>>, %arg21: memref<16x160xf32, #tpu.memory_space<vmem>>, %arg22: memref<32x32xf32, #tpu.memory_space<vmem>>, %arg23: memref<128x8xf32, #tpu.memory_space<vmem>>, %arg24: memref<1x1xf32, #tpu.memory_space<vmem>>, %arg25: memref<16x24xf32, #tpu.memory_space<vmem>>, %arg26: memref<1x24xf32, #tpu.memory_space<vmem>>, %arg27: memref<1x1xf32, #tpu.memory_space<vmem>>) attributes {dimension_semantics = [], scalar_prefetch = 0 : i64, scratch_operands = 0 : i64, tpu.core_type = #tpu.core_type<tc>} {
    %c0 = arith.constant 0 : index
    %c0_0 = arith.constant 0 : index
    %0 = vector.load %arg1[%c0, %c0_0] : memref<8x8xf32, #tpu.memory_space<vmem>>, vector<8x8xf32>
    %c0_1 = arith.constant 0 : index
    %c0_2 = arith.constant 0 : index
    %1 = vector.load %arg0[%c0_1, %c0_2] : memref<64x16xf32, #tpu.memory_space<vmem>>, vector<64x16xf32>
    %c0_3 = arith.constant 0 : index
    %c0_4 = arith.constant 0 : index
    %2 = vector.load %arg5[%c0_3, %c0_4] : memref<16x64xf32, #tpu.memory_space<vmem>>, vector<16x64xf32>
    %cst = arith.constant dense<0.000000e+00> : vector<64x64xf32>
    %3 = tpu.matmul %1, %2, %cst {dimension_numbers = #tpu.dot_dimension_numbers<[1], [0], [0], [1], [0, 0, 1, 1], [], []>} : vector<64x16xf32>, vector<16x64xf32>, vector<64x64xf32> -> vector<64x64xf32>
    %c0_5 = arith.constant 0 : index
    %c0_6 = arith.constant 0 : index
    %4 = vector.load %arg7[%c0_5, %c0_6] : memref<1x64xf32, #tpu.memory_space<vmem>>, vector<1x64xf32>
    %5 = vector.broadcast %4 : vector<1x64xf32> to vector<64x64xf32>
    %6 = arith.addf %3, %5 : vector<64x64xf32>
    %c0_7 = arith.constant 0 : index
    %c0_8 = arith.constant 0 : index
    %7 = vector.load %arg8[%c0_7, %c0_8] : memref<16x64xf32, #tpu.memory_space<vmem>>, vector<16x64xf32>
    %cst_9 = arith.constant dense<0.000000e+00> : vector<64x64xf32>
    %8 = tpu.matmul %1, %7, %cst_9 {dimension_numbers = #tpu.dot_dimension_numbers<[1], [0], [0], [1], [0, 0, 1, 1], [], []>} : vector<64x16xf32>, vector<16x64xf32>, vector<64x64xf32> -> vector<64x64xf32>
    %c0_10 = arith.constant 0 : index
    %c0_11 = arith.constant 0 : index
    %9 = vector.load %arg10[%c0_10, %c0_11] : memref<1x64xf32, #tpu.memory_space<vmem>>, vector<1x64xf32>
    %10 = vector.broadcast %9 : vector<1x64xf32> to vector<64x64xf32>
    %11 = arith.addf %8, %10 : vector<64x64xf32>
    %c0_12 = arith.constant 0 : index
    %c0_13 = arith.constant 0 : index
    %12 = vector.load %arg6[%c0_12, %c0_13] : memref<16x64xf32, #tpu.memory_space<vmem>>, vector<16x64xf32>
    %c0_14 = arith.constant 0 : index
    %c0_15 = arith.constant 0 : index
    %13 = vector.load %arg9[%c0_14, %c0_15] : memref<16x64xf32, #tpu.memory_space<vmem>>, vector<16x64xf32>
    %cst_16 = arith.constant 0.000000e+00 : f32
    %14 = vector.broadcast %cst_16 : f32 to vector<8x16xf32>
    %cst_17 = arith.constant 0.000000e+00 : f32
    %15 = vector.broadcast %cst_17 : f32 to vector<8x128xf32>
    %c0_18 = arith.constant 0 : index
    %c0_19 = arith.constant 0 : index
    %16 = vector.load %arg13[%c0_18, %c0_19] : memref<1x128xf32, #tpu.memory_space<vmem>>, vector<1x128xf32>
    %17 = vector.broadcast %16 : vector<1x128xf32> to vector<8x128xf32>
    %18 = arith.addf %15, %17 : vector<8x128xf32>
    %19 = vector.extract_strided_slice %0 {offsets = [0, 0], sizes = [8, 1], strides = [1, 1]} : vector<8x8xf32> to vector<8x1xf32>
    %20 = vector.extract_strided_slice %0 {offsets = [0, 7], sizes = [8, 1], strides = [1, 1]} : vector<8x8xf32> to vector<8x1xf32>
    %21 = vector.extract_strided_slice %6 {offsets = [0, 0], sizes = [8, 64], strides = [1, 1]} : vector<64x64xf32> to vector<8x64xf32>
    %cst_20 = arith.constant dense<0.000000e+00> : vector<8x64xf32>
    %22 = tpu.matmul %14, %12, %cst_20 {dimension_numbers = #tpu.dot_dimension_numbers<[1], [0], [0], [1], [0, 0, 1, 1], [], []>} : vector<8x16xf32>, vector<16x64xf32>, vector<8x64xf32> -> vector<8x64xf32>
    %23 = arith.addf %21, %22 : vector<8x64xf32>
    %24 = vector.extract_strided_slice %23 {offsets = [0, 0], sizes = [8, 48], strides = [1, 1]} : vector<8x64xf32> to vector<8x48xf32>
    %25 = arith.negf %24 : vector<8x48xf32>
    %26 = math.exp %25 : vector<8x48xf32>
    %cst_21 = arith.constant 1.000000e+00 : f32
    %27 = vector.broadcast %cst_21 : f32 to vector<8x48xf32>
    %28 = arith.addf %27, %26 : vector<8x48xf32>
    %29 = arith.divf %27, %28 : vector<8x48xf32>
    %30 = vector.extract_strided_slice %29 {offsets = [0, 0], sizes = [8, 16], strides = [1, 1]} : vector<8x48xf32> to vector<8x16xf32>
    %31 = vector.extract_strided_slice %29 {offsets = [0, 16], sizes = [8, 16], strides = [1, 1]} : vector<8x48xf32> to vector<8x16xf32>
    %32 = vector.extract_strided_slice %29 {offsets = [0, 32], sizes = [8, 16], strides = [1, 1]} : vector<8x48xf32> to vector<8x16xf32>
    %33 = vector.extract_strided_slice %23 {offsets = [0, 48], sizes = [8, 16], strides = [1, 1]} : vector<8x64xf32> to vector<8x16xf32>
    %34 = math.tanh %33 : vector<8x16xf32>
    %35 = arith.mulf %31, %14 : vector<8x16xf32>
    %36 = arith.mulf %30, %34 : vector<8x16xf32>
    %37 = arith.addf %35, %36 : vector<8x16xf32>
    %38 = math.tanh %37 : vector<8x16xf32>
    %39 = arith.mulf %32, %38 : vector<8x16xf32>
    %40 = vector.broadcast %19 : vector<8x1xf32> to vector<8x16xf32>
    %41 = arith.mulf %40, %39 : vector<8x16xf32>
    %cst_22 = arith.constant 1.000000e+00 : f32
    %42 = vector.broadcast %cst_22 : f32 to vector<8x1xf32>
    %43 = arith.subf %42, %19 : vector<8x1xf32>
    %44 = vector.broadcast %43 : vector<8x1xf32> to vector<8x16xf32>
    %45 = arith.mulf %44, %14 : vector<8x16xf32>
    %46 = arith.addf %41, %45 : vector<8x16xf32>
    %47 = vector.broadcast %19 : vector<8x1xf32> to vector<8x16xf32>
    %48 = arith.mulf %47, %37 : vector<8x16xf32>
    %cst_23 = arith.constant 1.000000e+00 : f32
    %49 = vector.broadcast %cst_23 : f32 to vector<8x1xf32>
    %50 = arith.subf %49, %19 : vector<8x1xf32>
    %51 = vector.broadcast %50 : vector<8x1xf32> to vector<8x16xf32>
    %52 = arith.mulf %51, %14 : vector<8x16xf32>
    %53 = arith.addf %48, %52 : vector<8x16xf32>
    %54 = vector.extract_strided_slice %11 {offsets = [56, 0], sizes = [8, 64], strides = [1, 1]} : vector<64x64xf32> to vector<8x64xf32>
    %cst_24 = arith.constant dense<0.000000e+00> : vector<8x64xf32>
    %55 = tpu.matmul %14, %13, %cst_24 {dimension_numbers = #tpu.dot_dimension_numbers<[1], [0], [0], [1], [0, 0, 1, 1], [], []>} : vector<8x16xf32>, vector<16x64xf32>, vector<8x64xf32> -> vector<8x64xf32>
    %56 = arith.addf %54, %55 : vector<8x64xf32>
    %57 = vector.extract_strided_slice %56 {offsets = [0, 0], sizes = [8, 48], strides = [1, 1]} : vector<8x64xf32> to vector<8x48xf32>
    %58 = arith.negf %57 : vector<8x48xf32>
    %59 = math.exp %58 : vector<8x48xf32>
    %cst_25 = arith.constant 1.000000e+00 : f32
    %60 = vector.broadcast %cst_25 : f32 to vector<8x48xf32>
    %61 = arith.addf %60, %59 : vector<8x48xf32>
    %62 = arith.divf %60, %61 : vector<8x48xf32>
    %63 = vector.extract_strided_slice %62 {offsets = [0, 0], sizes = [8, 16], strides = [1, 1]} : vector<8x48xf32> to vector<8x16xf32>
    %64 = vector.extract_strided_slice %62 {offsets = [0, 16], sizes = [8, 16], strides = [1, 1]} : vector<8x48xf32> to vector<8x16xf32>
    %65 = vector.extract_strided_slice %62 {offsets = [0, 32], sizes = [8, 16], strides = [1, 1]} : vector<8x48xf32> to vector<8x16xf32>
    %66 = vector.extract_strided_slice %56 {offsets = [0, 48], sizes = [8, 16], strides = [1, 1]} : vector<8x64xf32> to vector<8x16xf32>
    %67 = math.tanh %66 : vector<8x16xf32>
    %68 = arith.mulf %64, %14 : vector<8x16xf32>
    %69 = arith.mulf %63, %67 : vector<8x16xf32>
    %70 = arith.addf %68, %69 : vector<8x16xf32>
    %71 = math.tanh %70 : vector<8x16xf32>
    %72 = arith.mulf %65, %71 : vector<8x16xf32>
    %73 = vector.broadcast %20 : vector<8x1xf32> to vector<8x16xf32>
    %74 = arith.mulf %73, %72 : vector<8x16xf32>
    %cst_26 = arith.constant 1.000000e+00 : f32
    %75 = vector.broadcast %cst_26 : f32 to vector<8x1xf32>
    %76 = arith.subf %75, %20 : vector<8x1xf32>
    %77 = vector.broadcast %76 : vector<8x1xf32> to vector<8x16xf32>
    %78 = arith.mulf %77, %14 : vector<8x16xf32>
    %79 = arith.addf %74, %78 : vector<8x16xf32>
    %80 = vector.broadcast %20 : vector<8x1xf32> to vector<8x16xf32>
    %81 = arith.mulf %80, %70 : vector<8x16xf32>
    %cst_27 = arith.constant 1.000000e+00 : f32
    %82 = vector.broadcast %cst_27 : f32 to vector<8x1xf32>
    %83 = arith.subf %82, %20 : vector<8x1xf32>
    %84 = vector.broadcast %83 : vector<8x1xf32> to vector<8x16xf32>
    %85 = arith.mulf %84, %14 : vector<8x16xf32>
    %86 = arith.addf %81, %85 : vector<8x16xf32>
    %87 = vector.broadcast %19 : vector<8x1xf32> to vector<8x16xf32>
    %88 = arith.mulf %46, %87 : vector<8x16xf32>
    %89 = vector.broadcast %20 : vector<8x1xf32> to vector<8x16xf32>
    %90 = arith.mulf %79, %89 : vector<8x16xf32>
    %c0_28 = arith.constant 0 : index
    %c0_29 = arith.constant 0 : index
    %c0_30 = arith.constant 0 : index
    %91 = vector.load %arg11[%c0_28, %c0_29, %c0_30] : memref<8x16x128xf32, #tpu.memory_space<vmem>>, vector<1x16x128xf32>
    %92 = vector.shape_cast %91 : vector<1x16x128xf32> to vector<16x128xf32>
    %cst_31 = arith.constant dense<0.000000e+00> : vector<8x128xf32>
    %93 = tpu.matmul %88, %92, %cst_31 {dimension_numbers = #tpu.dot_dimension_numbers<[1], [0], [0], [1], [0, 0, 1, 1], [], []>} : vector<8x16xf32>, vector<16x128xf32>, vector<8x128xf32> -> vector<8x128xf32>
    %94 = arith.addf %18, %93 : vector<8x128xf32>
    %c7 = arith.constant 7 : index
    %c0_32 = arith.constant 0 : index
    %c0_33 = arith.constant 0 : index
    %95 = vector.load %arg12[%c7, %c0_32, %c0_33] : memref<8x16x128xf32, #tpu.memory_space<vmem>>, vector<1x16x128xf32>
    %96 = vector.shape_cast %95 : vector<1x16x128xf32> to vector<16x128xf32>
    %cst_34 = arith.constant dense<0.000000e+00> : vector<8x128xf32>
    %97 = tpu.matmul %90, %96, %cst_34 {dimension_numbers = #tpu.dot_dimension_numbers<[1], [0], [0], [1], [0, 0, 1, 1], [], []>} : vector<8x16xf32>, vector<16x128xf32>, vector<8x128xf32> -> vector<8x128xf32>
    %98 = arith.addf %94, %97 : vector<8x128xf32>
    %99 = vector.extract_strided_slice %0 {offsets = [0, 1], sizes = [8, 1], strides = [1, 1]} : vector<8x8xf32> to vector<8x1xf32>
    %100 = vector.extract_strided_slice %0 {offsets = [0, 6], sizes = [8, 1], strides = [1, 1]} : vector<8x8xf32> to vector<8x1xf32>
    %101 = vector.extract_strided_slice %6 {offsets = [8, 0], sizes = [8, 64], strides = [1, 1]} : vector<64x64xf32> to vector<8x64xf32>
    %cst_35 = arith.constant dense<0.000000e+00> : vector<8x64xf32>
    %102 = tpu.matmul %46, %12, %cst_35 {dimension_numbers = #tpu.dot_dimension_numbers<[1], [0], [0], [1], [0, 0, 1, 1], [], []>} : vector<8x16xf32>, vector<16x64xf32>, vector<8x64xf32> -> vector<8x64xf32>
    %103 = arith.addf %101, %102 : vector<8x64xf32>
    %104 = vector.extract_strided_slice %103 {offsets = [0, 0], sizes = [8, 48], strides = [1, 1]} : vector<8x64xf32> to vector<8x48xf32>
    %105 = arith.negf %104 : vector<8x48xf32>
    %106 = math.exp %105 : vector<8x48xf32>
    %cst_36 = arith.constant 1.000000e+00 : f32
    %107 = vector.broadcast %cst_36 : f32 to vector<8x48xf32>
    %108 = arith.addf %107, %106 : vector<8x48xf32>
    %109 = arith.divf %107, %108 : vector<8x48xf32>
    %110 = vector.extract_strided_slice %109 {offsets = [0, 0], sizes = [8, 16], strides = [1, 1]} : vector<8x48xf32> to vector<8x16xf32>
    %111 = vector.extract_strided_slice %109 {offsets = [0, 16], sizes = [8, 16], strides = [1, 1]} : vector<8x48xf32> to vector<8x16xf32>
    %112 = vector.extract_strided_slice %109 {offsets = [0, 32], sizes = [8, 16], strides = [1, 1]} : vector<8x48xf32> to vector<8x16xf32>
    %113 = vector.extract_strided_slice %103 {offsets = [0, 48], sizes = [8, 16], strides = [1, 1]} : vector<8x64xf32> to vector<8x16xf32>
    %114 = math.tanh %113 : vector<8x16xf32>
    %115 = arith.mulf %111, %53 : vector<8x16xf32>
    %116 = arith.mulf %110, %114 : vector<8x16xf32>
    %117 = arith.addf %115, %116 : vector<8x16xf32>
    %118 = math.tanh %117 : vector<8x16xf32>
    %119 = arith.mulf %112, %118 : vector<8x16xf32>
    %120 = vector.broadcast %99 : vector<8x1xf32> to vector<8x16xf32>
    %121 = arith.mulf %120, %119 : vector<8x16xf32>
    %cst_37 = arith.constant 1.000000e+00 : f32
    %122 = vector.broadcast %cst_37 : f32 to vector<8x1xf32>
    %123 = arith.subf %122, %99 : vector<8x1xf32>
    %124 = vector.broadcast %123 : vector<8x1xf32> to vector<8x16xf32>
    %125 = arith.mulf %124, %46 : vector<8x16xf32>
    %126 = arith.addf %121, %125 : vector<8x16xf32>
    %127 = vector.broadcast %99 : vector<8x1xf32> to vector<8x16xf32>
    %128 = arith.mulf %127, %117 : vector<8x16xf32>
    %cst_38 = arith.constant 1.000000e+00 : f32
    %129 = vector.broadcast %cst_38 : f32 to vector<8x1xf32>
    %130 = arith.subf %129, %99 : vector<8x1xf32>
    %131 = vector.broadcast %130 : vector<8x1xf32> to vector<8x16xf32>
    %132 = arith.mulf %131, %53 : vector<8x16xf32>
    %133 = arith.addf %128, %132 : vector<8x16xf32>
    %134 = vector.extract_strided_slice %11 {offsets = [48, 0], sizes = [8, 64], strides = [1, 1]} : vector<64x64xf32> to vector<8x64xf32>
    %cst_39 = arith.constant dense<0.000000e+00> : vector<8x64xf32>
    %135 = tpu.matmul %79, %13, %cst_39 {dimension_numbers = #tpu.dot_dimension_numbers<[1], [0], [0], [1], [0, 0, 1, 1], [], []>} : vector<8x16xf32>, vector<16x64xf32>, vector<8x64xf32> -> vector<8x64xf32>
    %136 = arith.addf %134, %135 : vector<8x64xf32>
    %137 = vector.extract_strided_slice %136 {offsets = [0, 0], sizes = [8, 48], strides = [1, 1]} : vector<8x64xf32> to vector<8x48xf32>
    %138 = arith.negf %137 : vector<8x48xf32>
    %139 = math.exp %138 : vector<8x48xf32>
    %cst_40 = arith.constant 1.000000e+00 : f32
    %140 = vector.broadcast %cst_40 : f32 to vector<8x48xf32>
    %141 = arith.addf %140, %139 : vector<8x48xf32>
    %142 = arith.divf %140, %141 : vector<8x48xf32>
    %143 = vector.extract_strided_slice %142 {offsets = [0, 0], sizes = [8, 16], strides = [1, 1]} : vector<8x48xf32> to vector<8x16xf32>
    %144 = vector.extract_strided_slice %142 {offsets = [0, 16], sizes = [8, 16], strides = [1, 1]} : vector<8x48xf32> to vector<8x16xf32>
    %145 = vector.extract_strided_slice %142 {offsets = [0, 32], sizes = [8, 16], strides = [1, 1]} : vector<8x48xf32> to vector<8x16xf32>
    %146 = vector.extract_strided_slice %136 {offsets = [0, 48], sizes = [8, 16], strides = [1, 1]} : vector<8x64xf32> to vector<8x16xf32>
    %147 = math.tanh %146 : vector<8x16xf32>
    %148 = arith.mulf %144, %86 : vector<8x16xf32>
    %149 = arith.mulf %143, %147 : vector<8x16xf32>
    %150 = arith.addf %148, %149 : vector<8x16xf32>
    %151 = math.tanh %150 : vector<8x16xf32>
    %152 = arith.mulf %145, %151 : vector<8x16xf32>
    %153 = vector.broadcast %100 : vector<8x1xf32> to vector<8x16xf32>
    %154 = arith.mulf %153, %152 : vector<8x16xf32>
    %cst_41 = arith.constant 1.000000e+00 : f32
    %155 = vector.broadcast %cst_41 : f32 to vector<8x1xf32>
    %156 = arith.subf %155, %100 : vector<8x1xf32>
    %157 = vector.broadcast %156 : vector<8x1xf32> to vector<8x16xf32>
    %158 = arith.mulf %157, %79 : vector<8x16xf32>
    %159 = arith.addf %154, %158 : vector<8x16xf32>
    %160 = vector.broadcast %100 : vector<8x1xf32> to vector<8x16xf32>
    %161 = arith.mulf %160, %150 : vector<8x16xf32>
    %cst_42 = arith.constant 1.000000e+00 : f32
    %162 = vector.broadcast %cst_42 : f32 to vector<8x1xf32>
    %163 = arith.subf %162, %100 : vector<8x1xf32>
    %164 = vector.broadcast %163 : vector<8x1xf32> to vector<8x16xf32>
    %165 = arith.mulf %164, %86 : vector<8x16xf32>
    %166 = arith.addf %161, %165 : vector<8x16xf32>
    %167 = vector.broadcast %99 : vector<8x1xf32> to vector<8x16xf32>
    %168 = arith.mulf %126, %167 : vector<8x16xf32>
    %169 = vector.broadcast %100 : vector<8x1xf32> to vector<8x16xf32>
    %170 = arith.mulf %159, %169 : vector<8x16xf32>
    %c1 = arith.constant 1 : index
    %c0_43 = arith.constant 0 : index
    %c0_44 = arith.constant 0 : index
    %171 = vector.load %arg11[%c1, %c0_43, %c0_44] : memref<8x16x128xf32, #tpu.memory_space<vmem>>, vector<1x16x128xf32>
    %172 = vector.shape_cast %171 : vector<1x16x128xf32> to vector<16x128xf32>
    %cst_45 = arith.constant dense<0.000000e+00> : vector<8x128xf32>
    %173 = tpu.matmul %168, %172, %cst_45 {dimension_numbers = #tpu.dot_dimension_numbers<[1], [0], [0], [1], [0, 0, 1, 1], [], []>} : vector<8x16xf32>, vector<16x128xf32>, vector<8x128xf32> -> vector<8x128xf32>
    %174 = arith.addf %98, %173 : vector<8x128xf32>
    %c6 = arith.constant 6 : index
    %c0_46 = arith.constant 0 : index
    %c0_47 = arith.constant 0 : index
    %175 = vector.load %arg12[%c6, %c0_46, %c0_47] : memref<8x16x128xf32, #tpu.memory_space<vmem>>, vector<1x16x128xf32>
    %176 = vector.shape_cast %175 : vector<1x16x128xf32> to vector<16x128xf32>
    %cst_48 = arith.constant dense<0.000000e+00> : vector<8x128xf32>
    %177 = tpu.matmul %170, %176, %cst_48 {dimension_numbers = #tpu.dot_dimension_numbers<[1], [0], [0], [1], [0, 0, 1, 1], [], []>} : vector<8x16xf32>, vector<16x128xf32>, vector<8x128xf32> -> vector<8x128xf32>
    %178 = arith.addf %174, %177 : vector<8x128xf32>
    %179 = vector.extract_strided_slice %0 {offsets = [0, 2], sizes = [8, 1], strides = [1, 1]} : vector<8x8xf32> to vector<8x1xf32>
    %180 = vector.extract_strided_slice %0 {offsets = [0, 5], sizes = [8, 1], strides = [1, 1]} : vector<8x8xf32> to vector<8x1xf32>
    %181 = vector.extract_strided_slice %6 {offsets = [16, 0], sizes = [8, 64], strides = [1, 1]} : vector<64x64xf32> to vector<8x64xf32>
    %cst_49 = arith.constant dense<0.000000e+00> : vector<8x64xf32>
    %182 = tpu.matmul %126, %12, %cst_49 {dimension_numbers = #tpu.dot_dimension_numbers<[1], [0], [0], [1], [0, 0, 1, 1], [], []>} : vector<8x16xf32>, vector<16x64xf32>, vector<8x64xf32> -> vector<8x64xf32>
    %183 = arith.addf %181, %182 : vector<8x64xf32>
    %184 = vector.extract_strided_slice %183 {offsets = [0, 0], sizes = [8, 48], strides = [1, 1]} : vector<8x64xf32> to vector<8x48xf32>
    %185 = arith.negf %184 : vector<8x48xf32>
    %186 = math.exp %185 : vector<8x48xf32>
    %cst_50 = arith.constant 1.000000e+00 : f32
    %187 = vector.broadcast %cst_50 : f32 to vector<8x48xf32>
    %188 = arith.addf %187, %186 : vector<8x48xf32>
    %189 = arith.divf %187, %188 : vector<8x48xf32>
    %190 = vector.extract_strided_slice %189 {offsets = [0, 0], sizes = [8, 16], strides = [1, 1]} : vector<8x48xf32> to vector<8x16xf32>
    %191 = vector.extract_strided_slice %189 {offsets = [0, 16], sizes = [8, 16], strides = [1, 1]} : vector<8x48xf32> to vector<8x16xf32>
    %192 = vector.extract_strided_slice %189 {offsets = [0, 32], sizes = [8, 16], strides = [1, 1]} : vector<8x48xf32> to vector<8x16xf32>
    %193 = vector.extract_strided_slice %183 {offsets = [0, 48], sizes = [8, 16], strides = [1, 1]} : vector<8x64xf32> to vector<8x16xf32>
    %194 = math.tanh %193 : vector<8x16xf32>
    %195 = arith.mulf %191, %133 : vector<8x16xf32>
    %196 = arith.mulf %190, %194 : vector<8x16xf32>
    %197 = arith.addf %195, %196 : vector<8x16xf32>
    %198 = math.tanh %197 : vector<8x16xf32>
    %199 = arith.mulf %192, %198 : vector<8x16xf32>
    %200 = vector.broadcast %179 : vector<8x1xf32> to vector<8x16xf32>
    %201 = arith.mulf %200, %199 : vector<8x16xf32>
    %cst_51 = arith.constant 1.000000e+00 : f32
    %202 = vector.broadcast %cst_51 : f32 to vector<8x1xf32>
    %203 = arith.subf %202, %179 : vector<8x1xf32>
    %204 = vector.broadcast %203 : vector<8x1xf32> to vector<8x16xf32>
    %205 = arith.mulf %204, %126 : vector<8x16xf32>
    %206 = arith.addf %201, %205 : vector<8x16xf32>
    %207 = vector.broadcast %179 : vector<8x1xf32> to vector<8x16xf32>
    %208 = arith.mulf %207, %197 : vector<8x16xf32>
    %cst_52 = arith.constant 1.000000e+00 : f32
    %209 = vector.broadcast %cst_52 : f32 to vector<8x1xf32>
    %210 = arith.subf %209, %179 : vector<8x1xf32>
    %211 = vector.broadcast %210 : vector<8x1xf32> to vector<8x16xf32>
    %212 = arith.mulf %211, %133 : vector<8x16xf32>
    %213 = arith.addf %208, %212 : vector<8x16xf32>
    %214 = vector.extract_strided_slice %11 {offsets = [40, 0], sizes = [8, 64], strides = [1, 1]} : vector<64x64xf32> to vector<8x64xf32>
    %cst_53 = arith.constant dense<0.000000e+00> : vector<8x64xf32>
    %215 = tpu.matmul %159, %13, %cst_53 {dimension_numbers = #tpu.dot_dimension_numbers<[1], [0], [0], [1], [0, 0, 1, 1], [], []>} : vector<8x16xf32>, vector<16x64xf32>, vector<8x64xf32> -> vector<8x64xf32>
    %216 = arith.addf %214, %215 : vector<8x64xf32>
    %217 = vector.extract_strided_slice %216 {offsets = [0, 0], sizes = [8, 48], strides = [1, 1]} : vector<8x64xf32> to vector<8x48xf32>
    %218 = arith.negf %217 : vector<8x48xf32>
    %219 = math.exp %218 : vector<8x48xf32>
    %cst_54 = arith.constant 1.000000e+00 : f32
    %220 = vector.broadcast %cst_54 : f32 to vector<8x48xf32>
    %221 = arith.addf %220, %219 : vector<8x48xf32>
    %222 = arith.divf %220, %221 : vector<8x48xf32>
    %223 = vector.extract_strided_slice %222 {offsets = [0, 0], sizes = [8, 16], strides = [1, 1]} : vector<8x48xf32> to vector<8x16xf32>
    %224 = vector.extract_strided_slice %222 {offsets = [0, 16], sizes = [8, 16], strides = [1, 1]} : vector<8x48xf32> to vector<8x16xf32>
    %225 = vector.extract_strided_slice %222 {offsets = [0, 32], sizes = [8, 16], strides = [1, 1]} : vector<8x48xf32> to vector<8x16xf32>
    %226 = vector.extract_strided_slice %216 {offsets = [0, 48], sizes = [8, 16], strides = [1, 1]} : vector<8x64xf32> to vector<8x16xf32>
    %227 = math.tanh %226 : vector<8x16xf32>
    %228 = arith.mulf %224, %166 : vector<8x16xf32>
    %229 = arith.mulf %223, %227 : vector<8x16xf32>
    %230 = arith.addf %228, %229 : vector<8x16xf32>
    %231 = math.tanh %230 : vector<8x16xf32>
    %232 = arith.mulf %225, %231 : vector<8x16xf32>
    %233 = vector.broadcast %180 : vector<8x1xf32> to vector<8x16xf32>
    %234 = arith.mulf %233, %232 : vector<8x16xf32>
    %cst_55 = arith.constant 1.000000e+00 : f32
    %235 = vector.broadcast %cst_55 : f32 to vector<8x1xf32>
    %236 = arith.subf %235, %180 : vector<8x1xf32>
    %237 = vector.broadcast %236 : vector<8x1xf32> to vector<8x16xf32>
    %238 = arith.mulf %237, %159 : vector<8x16xf32>
    %239 = arith.addf %234, %238 : vector<8x16xf32>
    %240 = vector.broadcast %180 : vector<8x1xf32> to vector<8x16xf32>
    %241 = arith.mulf %240, %230 : vector<8x16xf32>
    %cst_56 = arith.constant 1.000000e+00 : f32
    %242 = vector.broadcast %cst_56 : f32 to vector<8x1xf32>
    %243 = arith.subf %242, %180 : vector<8x1xf32>
    %244 = vector.broadcast %243 : vector<8x1xf32> to vector<8x16xf32>
    %245 = arith.mulf %244, %166 : vector<8x16xf32>
    %246 = arith.addf %241, %245 : vector<8x16xf32>
    %247 = vector.broadcast %179 : vector<8x1xf32> to vector<8x16xf32>
    %248 = arith.mulf %206, %247 : vector<8x16xf32>
    %249 = vector.broadcast %180 : vector<8x1xf32> to vector<8x16xf32>
    %250 = arith.mulf %239, %249 : vector<8x16xf32>
    %c2 = arith.constant 2 : index
    %c0_57 = arith.constant 0 : index
    %c0_58 = arith.constant 0 : index
    %251 = vector.load %arg11[%c2, %c0_57, %c0_58] : memref<8x16x128xf32, #tpu.memory_space<vmem>>, vector<1x16x128xf32>
    %252 = vector.shape_cast %251 : vector<1x16x128xf32> to vector<16x128xf32>
    %cst_59 = arith.constant dense<0.000000e+00> : vector<8x128xf32>
    %253 = tpu.matmul %248, %252, %cst_59 {dimension_numbers = #tpu.dot_dimension_numbers<[1], [0], [0], [1], [0, 0, 1, 1], [], []>} : vector<8x16xf32>, vector<16x128xf32>, vector<8x128xf32> -> vector<8x128xf32>
    %254 = arith.addf %178, %253 : vector<8x128xf32>
    %c5 = arith.constant 5 : index
    %c0_60 = arith.constant 0 : index
    %c0_61 = arith.constant 0 : index
    %255 = vector.load %arg12[%c5, %c0_60, %c0_61] : memref<8x16x128xf32, #tpu.memory_space<vmem>>, vector<1x16x128xf32>
    %256 = vector.shape_cast %255 : vector<1x16x128xf32> to vector<16x128xf32>
    %cst_62 = arith.constant dense<0.000000e+00> : vector<8x128xf32>
    %257 = tpu.matmul %250, %256, %cst_62 {dimension_numbers = #tpu.dot_dimension_numbers<[1], [0], [0], [1], [0, 0, 1, 1], [], []>} : vector<8x16xf32>, vector<16x128xf32>, vector<8x128xf32> -> vector<8x128xf32>
    %258 = arith.addf %254, %257 : vector<8x128xf32>
    %259 = vector.extract_strided_slice %0 {offsets = [0, 3], sizes = [8, 1], strides = [1, 1]} : vector<8x8xf32> to vector<8x1xf32>
    %260 = vector.extract_strided_slice %0 {offsets = [0, 4], sizes = [8, 1], strides = [1, 1]} : vector<8x8xf32> to vector<8x1xf32>
    %261 = vector.extract_strided_slice %6 {offsets = [24, 0], sizes = [8, 64], strides = [1, 1]} : vector<64x64xf32> to vector<8x64xf32>
    %cst_63 = arith.constant dense<0.000000e+00> : vector<8x64xf32>
    %262 = tpu.matmul %206, %12, %cst_63 {dimension_numbers = #tpu.dot_dimension_numbers<[1], [0], [0], [1], [0, 0, 1, 1], [], []>} : vector<8x16xf32>, vector<16x64xf32>, vector<8x64xf32> -> vector<8x64xf32>
    %263 = arith.addf %261, %262 : vector<8x64xf32>
    %264 = vector.extract_strided_slice %263 {offsets = [0, 0], sizes = [8, 48], strides = [1, 1]} : vector<8x64xf32> to vector<8x48xf32>
    %265 = arith.negf %264 : vector<8x48xf32>
    %266 = math.exp %265 : vector<8x48xf32>
    %cst_64 = arith.constant 1.000000e+00 : f32
    %267 = vector.broadcast %cst_64 : f32 to vector<8x48xf32>
    %268 = arith.addf %267, %266 : vector<8x48xf32>
    %269 = arith.divf %267, %268 : vector<8x48xf32>
    %270 = vector.extract_strided_slice %269 {offsets = [0, 0], sizes = [8, 16], strides = [1, 1]} : vector<8x48xf32> to vector<8x16xf32>
    %271 = vector.extract_strided_slice %269 {offsets = [0, 16], sizes = [8, 16], strides = [1, 1]} : vector<8x48xf32> to vector<8x16xf32>
    %272 = vector.extract_strided_slice %269 {offsets = [0, 32], sizes = [8, 16], strides = [1, 1]} : vector<8x48xf32> to vector<8x16xf32>
    %273 = vector.extract_strided_slice %263 {offsets = [0, 48], sizes = [8, 16], strides = [1, 1]} : vector<8x64xf32> to vector<8x16xf32>
    %274 = math.tanh %273 : vector<8x16xf32>
    %275 = arith.mulf %271, %213 : vector<8x16xf32>
    %276 = arith.mulf %270, %274 : vector<8x16xf32>
    %277 = arith.addf %275, %276 : vector<8x16xf32>
    %278 = math.tanh %277 : vector<8x16xf32>
    %279 = arith.mulf %272, %278 : vector<8x16xf32>
    %280 = vector.broadcast %259 : vector<8x1xf32> to vector<8x16xf32>
    %281 = arith.mulf %280, %279 : vector<8x16xf32>
    %cst_65 = arith.constant 1.000000e+00 : f32
    %282 = vector.broadcast %cst_65 : f32 to vector<8x1xf32>
    %283 = arith.subf %282, %259 : vector<8x1xf32>
    %284 = vector.broadcast %283 : vector<8x1xf32> to vector<8x16xf32>
    %285 = arith.mulf %284, %206 : vector<8x16xf32>
    %286 = arith.addf %281, %285 : vector<8x16xf32>
    %287 = vector.broadcast %259 : vector<8x1xf32> to vector<8x16xf32>
    %288 = arith.mulf %287, %277 : vector<8x16xf32>
    %cst_66 = arith.constant 1.000000e+00 : f32
    %289 = vector.broadcast %cst_66 : f32 to vector<8x1xf32>
    %290 = arith.subf %289, %259 : vector<8x1xf32>
    %291 = vector.broadcast %290 : vector<8x1xf32> to vector<8x16xf32>
    %292 = arith.mulf %291, %213 : vector<8x16xf32>
    %293 = arith.addf %288, %292 : vector<8x16xf32>
    %294 = vector.extract_strided_slice %11 {offsets = [32, 0], sizes = [8, 64], strides = [1, 1]} : vector<64x64xf32> to vector<8x64xf32>
    %cst_67 = arith.constant dense<0.000000e+00> : vector<8x64xf32>
    %295 = tpu.matmul %239, %13, %cst_67 {dimension_numbers = #tpu.dot_dimension_numbers<[1], [0], [0], [1], [0, 0, 1, 1], [], []>} : vector<8x16xf32>, vector<16x64xf32>, vector<8x64xf32> -> vector<8x64xf32>
    %296 = arith.addf %294, %295 : vector<8x64xf32>
    %297 = vector.extract_strided_slice %296 {offsets = [0, 0], sizes = [8, 48], strides = [1, 1]} : vector<8x64xf32> to vector<8x48xf32>
    %298 = arith.negf %297 : vector<8x48xf32>
    %299 = math.exp %298 : vector<8x48xf32>
    %cst_68 = arith.constant 1.000000e+00 : f32
    %300 = vector.broadcast %cst_68 : f32 to vector<8x48xf32>
    %301 = arith.addf %300, %299 : vector<8x48xf32>
    %302 = arith.divf %300, %301 : vector<8x48xf32>
    %303 = vector.extract_strided_slice %302 {offsets = [0, 0], sizes = [8, 16], strides = [1, 1]} : vector<8x48xf32> to vector<8x16xf32>
    %304 = vector.extract_strided_slice %302 {offsets = [0, 16], sizes = [8, 16], strides = [1, 1]} : vector<8x48xf32> to vector<8x16xf32>
    %305 = vector.extract_strided_slice %302 {offsets = [0, 32], sizes = [8, 16], strides = [1, 1]} : vector<8x48xf32> to vector<8x16xf32>
    %306 = vector.extract_strided_slice %296 {offsets = [0, 48], sizes = [8, 16], strides = [1, 1]} : vector<8x64xf32> to vector<8x16xf32>
    %307 = math.tanh %306 : vector<8x16xf32>
    %308 = arith.mulf %304, %246 : vector<8x16xf32>
    %309 = arith.mulf %303, %307 : vector<8x16xf32>
    %310 = arith.addf %308, %309 : vector<8x16xf32>
    %311 = math.tanh %310 : vector<8x16xf32>
    %312 = arith.mulf %305, %311 : vector<8x16xf32>
    %313 = vector.broadcast %260 : vector<8x1xf32> to vector<8x16xf32>
    %314 = arith.mulf %313, %312 : vector<8x16xf32>
    %cst_69 = arith.constant 1.000000e+00 : f32
    %315 = vector.broadcast %cst_69 : f32 to vector<8x1xf32>
    %316 = arith.subf %315, %260 : vector<8x1xf32>
    %317 = vector.broadcast %316 : vector<8x1xf32> to vector<8x16xf32>
    %318 = arith.mulf %317, %239 : vector<8x16xf32>
    %319 = arith.addf %314, %318 : vector<8x16xf32>
    %320 = vector.broadcast %260 : vector<8x1xf32> to vector<8x16xf32>
    %321 = arith.mulf %320, %310 : vector<8x16xf32>
    %cst_70 = arith.constant 1.000000e+00 : f32
    %322 = vector.broadcast %cst_70 : f32 to vector<8x1xf32>
    %323 = arith.subf %322, %260 : vector<8x1xf32>
    %324 = vector.broadcast %323 : vector<8x1xf32> to vector<8x16xf32>
    %325 = arith.mulf %324, %246 : vector<8x16xf32>
    %326 = arith.addf %321, %325 : vector<8x16xf32>
    %327 = vector.broadcast %259 : vector<8x1xf32> to vector<8x16xf32>
    %328 = arith.mulf %286, %327 : vector<8x16xf32>
    %329 = vector.broadcast %260 : vector<8x1xf32> to vector<8x16xf32>
    %330 = arith.mulf %319, %329 : vector<8x16xf32>
    %c3 = arith.constant 3 : index
    %c0_71 = arith.constant 0 : index
    %c0_72 = arith.constant 0 : index
    %331 = vector.load %arg11[%c3, %c0_71, %c0_72] : memref<8x16x128xf32, #tpu.memory_space<vmem>>, vector<1x16x128xf32>
    %332 = vector.shape_cast %331 : vector<1x16x128xf32> to vector<16x128xf32>
    %cst_73 = arith.constant dense<0.000000e+00> : vector<8x128xf32>
    %333 = tpu.matmul %328, %332, %cst_73 {dimension_numbers = #tpu.dot_dimension_numbers<[1], [0], [0], [1], [0, 0, 1, 1], [], []>} : vector<8x16xf32>, vector<16x128xf32>, vector<8x128xf32> -> vector<8x128xf32>
    %334 = arith.addf %258, %333 : vector<8x128xf32>
    %c4 = arith.constant 4 : index
    %c0_74 = arith.constant 0 : index
    %c0_75 = arith.constant 0 : index
    %335 = vector.load %arg12[%c4, %c0_74, %c0_75] : memref<8x16x128xf32, #tpu.memory_space<vmem>>, vector<1x16x128xf32>
    %336 = vector.shape_cast %335 : vector<1x16x128xf32> to vector<16x128xf32>
    %cst_76 = arith.constant dense<0.000000e+00> : vector<8x128xf32>
    %337 = tpu.matmul %330, %336, %cst_76 {dimension_numbers = #tpu.dot_dimension_numbers<[1], [0], [0], [1], [0, 0, 1, 1], [], []>} : vector<8x16xf32>, vector<16x128xf32>, vector<8x128xf32> -> vector<8x128xf32>
    %338 = arith.addf %334, %337 : vector<8x128xf32>
    %339 = vector.extract_strided_slice %0 {offsets = [0, 4], sizes = [8, 1], strides = [1, 1]} : vector<8x8xf32> to vector<8x1xf32>
    %340 = vector.extract_strided_slice %0 {offsets = [0, 3], sizes = [8, 1], strides = [1, 1]} : vector<8x8xf32> to vector<8x1xf32>
    %341 = vector.extract_strided_slice %6 {offsets = [32, 0], sizes = [8, 64], strides = [1, 1]} : vector<64x64xf32> to vector<8x64xf32>
    %cst_77 = arith.constant dense<0.000000e+00> : vector<8x64xf32>
    %342 = tpu.matmul %286, %12, %cst_77 {dimension_numbers = #tpu.dot_dimension_numbers<[1], [0], [0], [1], [0, 0, 1, 1], [], []>} : vector<8x16xf32>, vector<16x64xf32>, vector<8x64xf32> -> vector<8x64xf32>
    %343 = arith.addf %341, %342 : vector<8x64xf32>
    %344 = vector.extract_strided_slice %343 {offsets = [0, 0], sizes = [8, 48], strides = [1, 1]} : vector<8x64xf32> to vector<8x48xf32>
    %345 = arith.negf %344 : vector<8x48xf32>
    %346 = math.exp %345 : vector<8x48xf32>
    %cst_78 = arith.constant 1.000000e+00 : f32
    %347 = vector.broadcast %cst_78 : f32 to vector<8x48xf32>
    %348 = arith.addf %347, %346 : vector<8x48xf32>
    %349 = arith.divf %347, %348 : vector<8x48xf32>
    %350 = vector.extract_strided_slice %349 {offsets = [0, 0], sizes = [8, 16], strides = [1, 1]} : vector<8x48xf32> to vector<8x16xf32>
    %351 = vector.extract_strided_slice %349 {offsets = [0, 16], sizes = [8, 16], strides = [1, 1]} : vector<8x48xf32> to vector<8x16xf32>
    %352 = vector.extract_strided_slice %349 {offsets = [0, 32], sizes = [8, 16], strides = [1, 1]} : vector<8x48xf32> to vector<8x16xf32>
    %353 = vector.extract_strided_slice %343 {offsets = [0, 48], sizes = [8, 16], strides = [1, 1]} : vector<8x64xf32> to vector<8x16xf32>
    %354 = math.tanh %353 : vector<8x16xf32>
    %355 = arith.mulf %351, %293 : vector<8x16xf32>
    %356 = arith.mulf %350, %354 : vector<8x16xf32>
    %357 = arith.addf %355, %356 : vector<8x16xf32>
    %358 = math.tanh %357 : vector<8x16xf32>
    %359 = arith.mulf %352, %358 : vector<8x16xf32>
    %360 = vector.broadcast %339 : vector<8x1xf32> to vector<8x16xf32>
    %361 = arith.mulf %360, %359 : vector<8x16xf32>
    %cst_79 = arith.constant 1.000000e+00 : f32
    %362 = vector.broadcast %cst_79 : f32 to vector<8x1xf32>
    %363 = arith.subf %362, %339 : vector<8x1xf32>
    %364 = vector.broadcast %363 : vector<8x1xf32> to vector<8x16xf32>
    %365 = arith.mulf %364, %286 : vector<8x16xf32>
    %366 = arith.addf %361, %365 : vector<8x16xf32>
    %367 = vector.broadcast %339 : vector<8x1xf32> to vector<8x16xf32>
    %368 = arith.mulf %367, %357 : vector<8x16xf32>
    %cst_80 = arith.constant 1.000000e+00 : f32
    %369 = vector.broadcast %cst_80 : f32 to vector<8x1xf32>
    %370 = arith.subf %369, %339 : vector<8x1xf32>
    %371 = vector.broadcast %370 : vector<8x1xf32> to vector<8x16xf32>
    %372 = arith.mulf %371, %293 : vector<8x16xf32>
    %373 = arith.addf %368, %372 : vector<8x16xf32>
    %374 = vector.extract_strided_slice %11 {offsets = [24, 0], sizes = [8, 64], strides = [1, 1]} : vector<64x64xf32> to vector<8x64xf32>
    %cst_81 = arith.constant dense<0.000000e+00> : vector<8x64xf32>
    %375 = tpu.matmul %319, %13, %cst_81 {dimension_numbers = #tpu.dot_dimension_numbers<[1], [0], [0], [1], [0, 0, 1, 1], [], []>} : vector<8x16xf32>, vector<16x64xf32>, vector<8x64xf32> -> vector<8x64xf32>
    %376 = arith.addf %374, %375 : vector<8x64xf32>
    %377 = vector.extract_strided_slice %376 {offsets = [0, 0], sizes = [8, 48], strides = [1, 1]} : vector<8x64xf32> to vector<8x48xf32>
    %378 = arith.negf %377 : vector<8x48xf32>
    %379 = math.exp %378 : vector<8x48xf32>
    %cst_82 = arith.constant 1.000000e+00 : f32
    %380 = vector.broadcast %cst_82 : f32 to vector<8x48xf32>
    %381 = arith.addf %380, %379 : vector<8x48xf32>
    %382 = arith.divf %380, %381 : vector<8x48xf32>
    %383 = vector.extract_strided_slice %382 {offsets = [0, 0], sizes = [8, 16], strides = [1, 1]} : vector<8x48xf32> to vector<8x16xf32>
    %384 = vector.extract_strided_slice %382 {offsets = [0, 16], sizes = [8, 16], strides = [1, 1]} : vector<8x48xf32> to vector<8x16xf32>
    %385 = vector.extract_strided_slice %382 {offsets = [0, 32], sizes = [8, 16], strides = [1, 1]} : vector<8x48xf32> to vector<8x16xf32>
    %386 = vector.extract_strided_slice %376 {offsets = [0, 48], sizes = [8, 16], strides = [1, 1]} : vector<8x64xf32> to vector<8x16xf32>
    %387 = math.tanh %386 : vector<8x16xf32>
    %388 = arith.mulf %384, %326 : vector<8x16xf32>
    %389 = arith.mulf %383, %387 : vector<8x16xf32>
    %390 = arith.addf %388, %389 : vector<8x16xf32>
    %391 = math.tanh %390 : vector<8x16xf32>
    %392 = arith.mulf %385, %391 : vector<8x16xf32>
    %393 = vector.broadcast %340 : vector<8x1xf32> to vector<8x16xf32>
    %394 = arith.mulf %393, %392 : vector<8x16xf32>
    %cst_83 = arith.constant 1.000000e+00 : f32
    %395 = vector.broadcast %cst_83 : f32 to vector<8x1xf32>
    %396 = arith.subf %395, %340 : vector<8x1xf32>
    %397 = vector.broadcast %396 : vector<8x1xf32> to vector<8x16xf32>
    %398 = arith.mulf %397, %319 : vector<8x16xf32>
    %399 = arith.addf %394, %398 : vector<8x16xf32>
    %400 = vector.broadcast %340 : vector<8x1xf32> to vector<8x16xf32>
    %401 = arith.mulf %400, %390 : vector<8x16xf32>
    %cst_84 = arith.constant 1.000000e+00 : f32
    %402 = vector.broadcast %cst_84 : f32 to vector<8x1xf32>
    %403 = arith.subf %402, %340 : vector<8x1xf32>
    %404 = vector.broadcast %403 : vector<8x1xf32> to vector<8x16xf32>
    %405 = arith.mulf %404, %326 : vector<8x16xf32>
    %406 = arith.addf %401, %405 : vector<8x16xf32>
    %407 = vector.broadcast %339 : vector<8x1xf32> to vector<8x16xf32>
    %408 = arith.mulf %366, %407 : vector<8x16xf32>
    %409 = vector.broadcast %340 : vector<8x1xf32> to vector<8x16xf32>
    %410 = arith.mulf %399, %409 : vector<8x16xf32>
    %c4_85 = arith.constant 4 : index
    %c0_86 = arith.constant 0 : index
    %c0_87 = arith.constant 0 : index
    %411 = vector.load %arg11[%c4_85, %c0_86, %c0_87] : memref<8x16x128xf32, #tpu.memory_space<vmem>>, vector<1x16x128xf32>
    %412 = vector.shape_cast %411 : vector<1x16x128xf32> to vector<16x128xf32>
    %cst_88 = arith.constant dense<0.000000e+00> : vector<8x128xf32>
    %413 = tpu.matmul %408, %412, %cst_88 {dimension_numbers = #tpu.dot_dimension_numbers<[1], [0], [0], [1], [0, 0, 1, 1], [], []>} : vector<8x16xf32>, vector<16x128xf32>, vector<8x128xf32> -> vector<8x128xf32>
    %414 = arith.addf %338, %413 : vector<8x128xf32>
    %c3_89 = arith.constant 3 : index
    %c0_90 = arith.constant 0 : index
    %c0_91 = arith.constant 0 : index
    %415 = vector.load %arg12[%c3_89, %c0_90, %c0_91] : memref<8x16x128xf32, #tpu.memory_space<vmem>>, vector<1x16x128xf32>
    %416 = vector.shape_cast %415 : vector<1x16x128xf32> to vector<16x128xf32>
    %cst_92 = arith.constant dense<0.000000e+00> : vector<8x128xf32>
    %417 = tpu.matmul %410, %416, %cst_92 {dimension_numbers = #tpu.dot_dimension_numbers<[1], [0], [0], [1], [0, 0, 1, 1], [], []>} : vector<8x16xf32>, vector<16x128xf32>, vector<8x128xf32> -> vector<8x128xf32>
    %418 = arith.addf %414, %417 : vector<8x128xf32>
    %419 = vector.extract_strided_slice %0 {offsets = [0, 5], sizes = [8, 1], strides = [1, 1]} : vector<8x8xf32> to vector<8x1xf32>
    %420 = vector.extract_strided_slice %0 {offsets = [0, 2], sizes = [8, 1], strides = [1, 1]} : vector<8x8xf32> to vector<8x1xf32>
    %421 = vector.extract_strided_slice %6 {offsets = [40, 0], sizes = [8, 64], strides = [1, 1]} : vector<64x64xf32> to vector<8x64xf32>
    %cst_93 = arith.constant dense<0.000000e+00> : vector<8x64xf32>
    %422 = tpu.matmul %366, %12, %cst_93 {dimension_numbers = #tpu.dot_dimension_numbers<[1], [0], [0], [1], [0, 0, 1, 1], [], []>} : vector<8x16xf32>, vector<16x64xf32>, vector<8x64xf32> -> vector<8x64xf32>
    %423 = arith.addf %421, %422 : vector<8x64xf32>
    %424 = vector.extract_strided_slice %423 {offsets = [0, 0], sizes = [8, 48], strides = [1, 1]} : vector<8x64xf32> to vector<8x48xf32>
    %425 = arith.negf %424 : vector<8x48xf32>
    %426 = math.exp %425 : vector<8x48xf32>
    %cst_94 = arith.constant 1.000000e+00 : f32
    %427 = vector.broadcast %cst_94 : f32 to vector<8x48xf32>
    %428 = arith.addf %427, %426 : vector<8x48xf32>
    %429 = arith.divf %427, %428 : vector<8x48xf32>
    %430 = vector.extract_strided_slice %429 {offsets = [0, 0], sizes = [8, 16], strides = [1, 1]} : vector<8x48xf32> to vector<8x16xf32>
    %431 = vector.extract_strided_slice %429 {offsets = [0, 16], sizes = [8, 16], strides = [1, 1]} : vector<8x48xf32> to vector<8x16xf32>
    %432 = vector.extract_strided_slice %429 {offsets = [0, 32], sizes = [8, 16], strides = [1, 1]} : vector<8x48xf32> to vector<8x16xf32>
    %433 = vector.extract_strided_slice %423 {offsets = [0, 48], sizes = [8, 16], strides = [1, 1]} : vector<8x64xf32> to vector<8x16xf32>
    %434 = math.tanh %433 : vector<8x16xf32>
    %435 = arith.mulf %431, %373 : vector<8x16xf32>
    %436 = arith.mulf %430, %434 : vector<8x16xf32>
    %437 = arith.addf %435, %436 : vector<8x16xf32>
    %438 = math.tanh %437 : vector<8x16xf32>
    %439 = arith.mulf %432, %438 : vector<8x16xf32>
    %440 = vector.broadcast %419 : vector<8x1xf32> to vector<8x16xf32>
    %441 = arith.mulf %440, %439 : vector<8x16xf32>
    %cst_95 = arith.constant 1.000000e+00 : f32
    %442 = vector.broadcast %cst_95 : f32 to vector<8x1xf32>
    %443 = arith.subf %442, %419 : vector<8x1xf32>
    %444 = vector.broadcast %443 : vector<8x1xf32> to vector<8x16xf32>
    %445 = arith.mulf %444, %366 : vector<8x16xf32>
    %446 = arith.addf %441, %445 : vector<8x16xf32>
    %447 = vector.broadcast %419 : vector<8x1xf32> to vector<8x16xf32>
    %448 = arith.mulf %447, %437 : vector<8x16xf32>
    %cst_96 = arith.constant 1.000000e+00 : f32
    %449 = vector.broadcast %cst_96 : f32 to vector<8x1xf32>
    %450 = arith.subf %449, %419 : vector<8x1xf32>
    %451 = vector.broadcast %450 : vector<8x1xf32> to vector<8x16xf32>
    %452 = arith.mulf %451, %373 : vector<8x16xf32>
    %453 = arith.addf %448, %452 : vector<8x16xf32>
    %454 = vector.extract_strided_slice %11 {offsets = [16, 0], sizes = [8, 64], strides = [1, 1]} : vector<64x64xf32> to vector<8x64xf32>
    %cst_97 = arith.constant dense<0.000000e+00> : vector<8x64xf32>
    %455 = tpu.matmul %399, %13, %cst_97 {dimension_numbers = #tpu.dot_dimension_numbers<[1], [0], [0], [1], [0, 0, 1, 1], [], []>} : vector<8x16xf32>, vector<16x64xf32>, vector<8x64xf32> -> vector<8x64xf32>
    %456 = arith.addf %454, %455 : vector<8x64xf32>
    %457 = vector.extract_strided_slice %456 {offsets = [0, 0], sizes = [8, 48], strides = [1, 1]} : vector<8x64xf32> to vector<8x48xf32>
    %458 = arith.negf %457 : vector<8x48xf32>
    %459 = math.exp %458 : vector<8x48xf32>
    %cst_98 = arith.constant 1.000000e+00 : f32
    %460 = vector.broadcast %cst_98 : f32 to vector<8x48xf32>
    %461 = arith.addf %460, %459 : vector<8x48xf32>
    %462 = arith.divf %460, %461 : vector<8x48xf32>
    %463 = vector.extract_strided_slice %462 {offsets = [0, 0], sizes = [8, 16], strides = [1, 1]} : vector<8x48xf32> to vector<8x16xf32>
    %464 = vector.extract_strided_slice %462 {offsets = [0, 16], sizes = [8, 16], strides = [1, 1]} : vector<8x48xf32> to vector<8x16xf32>
    %465 = vector.extract_strided_slice %462 {offsets = [0, 32], sizes = [8, 16], strides = [1, 1]} : vector<8x48xf32> to vector<8x16xf32>
    %466 = vector.extract_strided_slice %456 {offsets = [0, 48], sizes = [8, 16], strides = [1, 1]} : vector<8x64xf32> to vector<8x16xf32>
    %467 = math.tanh %466 : vector<8x16xf32>
    %468 = arith.mulf %464, %406 : vector<8x16xf32>
    %469 = arith.mulf %463, %467 : vector<8x16xf32>
    %470 = arith.addf %468, %469 : vector<8x16xf32>
    %471 = math.tanh %470 : vector<8x16xf32>
    %472 = arith.mulf %465, %471 : vector<8x16xf32>
    %473 = vector.broadcast %420 : vector<8x1xf32> to vector<8x16xf32>
    %474 = arith.mulf %473, %472 : vector<8x16xf32>
    %cst_99 = arith.constant 1.000000e+00 : f32
    %475 = vector.broadcast %cst_99 : f32 to vector<8x1xf32>
    %476 = arith.subf %475, %420 : vector<8x1xf32>
    %477 = vector.broadcast %476 : vector<8x1xf32> to vector<8x16xf32>
    %478 = arith.mulf %477, %399 : vector<8x16xf32>
    %479 = arith.addf %474, %478 : vector<8x16xf32>
    %480 = vector.broadcast %420 : vector<8x1xf32> to vector<8x16xf32>
    %481 = arith.mulf %480, %470 : vector<8x16xf32>
    %cst_100 = arith.constant 1.000000e+00 : f32
    %482 = vector.broadcast %cst_100 : f32 to vector<8x1xf32>
    %483 = arith.subf %482, %420 : vector<8x1xf32>
    %484 = vector.broadcast %483 : vector<8x1xf32> to vector<8x16xf32>
    %485 = arith.mulf %484, %406 : vector<8x16xf32>
    %486 = arith.addf %481, %485 : vector<8x16xf32>
    %487 = vector.broadcast %419 : vector<8x1xf32> to vector<8x16xf32>
    %488 = arith.mulf %446, %487 : vector<8x16xf32>
    %489 = vector.broadcast %420 : vector<8x1xf32> to vector<8x16xf32>
    %490 = arith.mulf %479, %489 : vector<8x16xf32>
    %c5_101 = arith.constant 5 : index
    %c0_102 = arith.constant 0 : index
    %c0_103 = arith.constant 0 : index
    %491 = vector.load %arg11[%c5_101, %c0_102, %c0_103] : memref<8x16x128xf32, #tpu.memory_space<vmem>>, vector<1x16x128xf32>
    %492 = vector.shape_cast %491 : vector<1x16x128xf32> to vector<16x128xf32>
    %cst_104 = arith.constant dense<0.000000e+00> : vector<8x128xf32>
    %493 = tpu.matmul %488, %492, %cst_104 {dimension_numbers = #tpu.dot_dimension_numbers<[1], [0], [0], [1], [0, 0, 1, 1], [], []>} : vector<8x16xf32>, vector<16x128xf32>, vector<8x128xf32> -> vector<8x128xf32>
    %494 = arith.addf %418, %493 : vector<8x128xf32>
    %c2_105 = arith.constant 2 : index
    %c0_106 = arith.constant 0 : index
    %c0_107 = arith.constant 0 : index
    %495 = vector.load %arg12[%c2_105, %c0_106, %c0_107] : memref<8x16x128xf32, #tpu.memory_space<vmem>>, vector<1x16x128xf32>
    %496 = vector.shape_cast %495 : vector<1x16x128xf32> to vector<16x128xf32>
    %cst_108 = arith.constant dense<0.000000e+00> : vector<8x128xf32>
    %497 = tpu.matmul %490, %496, %cst_108 {dimension_numbers = #tpu.dot_dimension_numbers<[1], [0], [0], [1], [0, 0, 1, 1], [], []>} : vector<8x16xf32>, vector<16x128xf32>, vector<8x128xf32> -> vector<8x128xf32>
    %498 = arith.addf %494, %497 : vector<8x128xf32>
    %499 = vector.extract_strided_slice %0 {offsets = [0, 6], sizes = [8, 1], strides = [1, 1]} : vector<8x8xf32> to vector<8x1xf32>
    %500 = vector.extract_strided_slice %0 {offsets = [0, 1], sizes = [8, 1], strides = [1, 1]} : vector<8x8xf32> to vector<8x1xf32>
    %501 = vector.extract_strided_slice %6 {offsets = [48, 0], sizes = [8, 64], strides = [1, 1]} : vector<64x64xf32> to vector<8x64xf32>
    %cst_109 = arith.constant dense<0.000000e+00> : vector<8x64xf32>
    %502 = tpu.matmul %446, %12, %cst_109 {dimension_numbers = #tpu.dot_dimension_numbers<[1], [0], [0], [1], [0, 0, 1, 1], [], []>} : vector<8x16xf32>, vector<16x64xf32>, vector<8x64xf32> -> vector<8x64xf32>
    %503 = arith.addf %501, %502 : vector<8x64xf32>
    %504 = vector.extract_strided_slice %503 {offsets = [0, 0], sizes = [8, 48], strides = [1, 1]} : vector<8x64xf32> to vector<8x48xf32>
    %505 = arith.negf %504 : vector<8x48xf32>
    %506 = math.exp %505 : vector<8x48xf32>
    %cst_110 = arith.constant 1.000000e+00 : f32
    %507 = vector.broadcast %cst_110 : f32 to vector<8x48xf32>
    %508 = arith.addf %507, %506 : vector<8x48xf32>
    %509 = arith.divf %507, %508 : vector<8x48xf32>
    %510 = vector.extract_strided_slice %509 {offsets = [0, 0], sizes = [8, 16], strides = [1, 1]} : vector<8x48xf32> to vector<8x16xf32>
    %511 = vector.extract_strided_slice %509 {offsets = [0, 16], sizes = [8, 16], strides = [1, 1]} : vector<8x48xf32> to vector<8x16xf32>
    %512 = vector.extract_strided_slice %509 {offsets = [0, 32], sizes = [8, 16], strides = [1, 1]} : vector<8x48xf32> to vector<8x16xf32>
    %513 = vector.extract_strided_slice %503 {offsets = [0, 48], sizes = [8, 16], strides = [1, 1]} : vector<8x64xf32> to vector<8x16xf32>
    %514 = math.tanh %513 : vector<8x16xf32>
    %515 = arith.mulf %511, %453 : vector<8x16xf32>
    %516 = arith.mulf %510, %514 : vector<8x16xf32>
    %517 = arith.addf %515, %516 : vector<8x16xf32>
    %518 = math.tanh %517 : vector<8x16xf32>
    %519 = arith.mulf %512, %518 : vector<8x16xf32>
    %520 = vector.broadcast %499 : vector<8x1xf32> to vector<8x16xf32>
    %521 = arith.mulf %520, %519 : vector<8x16xf32>
    %cst_111 = arith.constant 1.000000e+00 : f32
    %522 = vector.broadcast %cst_111 : f32 to vector<8x1xf32>
    %523 = arith.subf %522, %499 : vector<8x1xf32>
    %524 = vector.broadcast %523 : vector<8x1xf32> to vector<8x16xf32>
    %525 = arith.mulf %524, %446 : vector<8x16xf32>
    %526 = arith.addf %521, %525 : vector<8x16xf32>
    %527 = vector.broadcast %499 : vector<8x1xf32> to vector<8x16xf32>
    %528 = arith.mulf %527, %517 : vector<8x16xf32>
    %cst_112 = arith.constant 1.000000e+00 : f32
    %529 = vector.broadcast %cst_112 : f32 to vector<8x1xf32>
    %530 = arith.subf %529, %499 : vector<8x1xf32>
    %531 = vector.broadcast %530 : vector<8x1xf32> to vector<8x16xf32>
    %532 = arith.mulf %531, %453 : vector<8x16xf32>
    %533 = arith.addf %528, %532 : vector<8x16xf32>
    %534 = vector.extract_strided_slice %11 {offsets = [8, 0], sizes = [8, 64], strides = [1, 1]} : vector<64x64xf32> to vector<8x64xf32>
    %cst_113 = arith.constant dense<0.000000e+00> : vector<8x64xf32>
    %535 = tpu.matmul %479, %13, %cst_113 {dimension_numbers = #tpu.dot_dimension_numbers<[1], [0], [0], [1], [0, 0, 1, 1], [], []>} : vector<8x16xf32>, vector<16x64xf32>, vector<8x64xf32> -> vector<8x64xf32>
    %536 = arith.addf %534, %535 : vector<8x64xf32>
    %537 = vector.extract_strided_slice %536 {offsets = [0, 0], sizes = [8, 48], strides = [1, 1]} : vector<8x64xf32> to vector<8x48xf32>
    %538 = arith.negf %537 : vector<8x48xf32>
    %539 = math.exp %538 : vector<8x48xf32>
    %cst_114 = arith.constant 1.000000e+00 : f32
    %540 = vector.broadcast %cst_114 : f32 to vector<8x48xf32>
    %541 = arith.addf %540, %539 : vector<8x48xf32>
    %542 = arith.divf %540, %541 : vector<8x48xf32>
    %543 = vector.extract_strided_slice %542 {offsets = [0, 0], sizes = [8, 16], strides = [1, 1]} : vector<8x48xf32> to vector<8x16xf32>
    %544 = vector.extract_strided_slice %542 {offsets = [0, 16], sizes = [8, 16], strides = [1, 1]} : vector<8x48xf32> to vector<8x16xf32>
    %545 = vector.extract_strided_slice %542 {offsets = [0, 32], sizes = [8, 16], strides = [1, 1]} : vector<8x48xf32> to vector<8x16xf32>
    %546 = vector.extract_strided_slice %536 {offsets = [0, 48], sizes = [8, 16], strides = [1, 1]} : vector<8x64xf32> to vector<8x16xf32>
    %547 = math.tanh %546 : vector<8x16xf32>
    %548 = arith.mulf %544, %486 : vector<8x16xf32>
    %549 = arith.mulf %543, %547 : vector<8x16xf32>
    %550 = arith.addf %548, %549 : vector<8x16xf32>
    %551 = math.tanh %550 : vector<8x16xf32>
    %552 = arith.mulf %545, %551 : vector<8x16xf32>
    %553 = vector.broadcast %500 : vector<8x1xf32> to vector<8x16xf32>
    %554 = arith.mulf %553, %552 : vector<8x16xf32>
    %cst_115 = arith.constant 1.000000e+00 : f32
    %555 = vector.broadcast %cst_115 : f32 to vector<8x1xf32>
    %556 = arith.subf %555, %500 : vector<8x1xf32>
    %557 = vector.broadcast %556 : vector<8x1xf32> to vector<8x16xf32>
    %558 = arith.mulf %557, %479 : vector<8x16xf32>
    %559 = arith.addf %554, %558 : vector<8x16xf32>
    %560 = vector.broadcast %500 : vector<8x1xf32> to vector<8x16xf32>
    %561 = arith.mulf %560, %550 : vector<8x16xf32>
    %cst_116 = arith.constant 1.000000e+00 : f32
    %562 = vector.broadcast %cst_116 : f32 to vector<8x1xf32>
    %563 = arith.subf %562, %500 : vector<8x1xf32>
    %564 = vector.broadcast %563 : vector<8x1xf32> to vector<8x16xf32>
    %565 = arith.mulf %564, %486 : vector<8x16xf32>
    %566 = arith.addf %561, %565 : vector<8x16xf32>
    %567 = vector.broadcast %499 : vector<8x1xf32> to vector<8x16xf32>
    %568 = arith.mulf %526, %567 : vector<8x16xf32>
    %569 = vector.broadcast %500 : vector<8x1xf32> to vector<8x16xf32>
    %570 = arith.mulf %559, %569 : vector<8x16xf32>
    %c6_117 = arith.constant 6 : index
    %c0_118 = arith.constant 0 : index
    %c0_119 = arith.constant 0 : index
    %571 = vector.load %arg11[%c6_117, %c0_118, %c0_119] : memref<8x16x128xf32, #tpu.memory_space<vmem>>, vector<1x16x128xf32>
    %572 = vector.shape_cast %571 : vector<1x16x128xf32> to vector<16x128xf32>
    %cst_120 = arith.constant dense<0.000000e+00> : vector<8x128xf32>
    %573 = tpu.matmul %568, %572, %cst_120 {dimension_numbers = #tpu.dot_dimension_numbers<[1], [0], [0], [1], [0, 0, 1, 1], [], []>} : vector<8x16xf32>, vector<16x128xf32>, vector<8x128xf32> -> vector<8x128xf32>
    %574 = arith.addf %498, %573 : vector<8x128xf32>
    %c1_121 = arith.constant 1 : index
    %c0_122 = arith.constant 0 : index
    %c0_123 = arith.constant 0 : index
    %575 = vector.load %arg12[%c1_121, %c0_122, %c0_123] : memref<8x16x128xf32, #tpu.memory_space<vmem>>, vector<1x16x128xf32>
    %576 = vector.shape_cast %575 : vector<1x16x128xf32> to vector<16x128xf32>
    %cst_124 = arith.constant dense<0.000000e+00> : vector<8x128xf32>
    %577 = tpu.matmul %570, %576, %cst_124 {dimension_numbers = #tpu.dot_dimension_numbers<[1], [0], [0], [1], [0, 0, 1, 1], [], []>} : vector<8x16xf32>, vector<16x128xf32>, vector<8x128xf32> -> vector<8x128xf32>
    %578 = arith.addf %574, %577 : vector<8x128xf32>
    %579 = vector.extract_strided_slice %0 {offsets = [0, 7], sizes = [8, 1], strides = [1, 1]} : vector<8x8xf32> to vector<8x1xf32>
    %580 = vector.extract_strided_slice %0 {offsets = [0, 0], sizes = [8, 1], strides = [1, 1]} : vector<8x8xf32> to vector<8x1xf32>
    %581 = vector.extract_strided_slice %6 {offsets = [56, 0], sizes = [8, 64], strides = [1, 1]} : vector<64x64xf32> to vector<8x64xf32>
    %cst_125 = arith.constant dense<0.000000e+00> : vector<8x64xf32>
    %582 = tpu.matmul %526, %12, %cst_125 {dimension_numbers = #tpu.dot_dimension_numbers<[1], [0], [0], [1], [0, 0, 1, 1], [], []>} : vector<8x16xf32>, vector<16x64xf32>, vector<8x64xf32> -> vector<8x64xf32>
    %583 = arith.addf %581, %582 : vector<8x64xf32>
    %584 = vector.extract_strided_slice %583 {offsets = [0, 0], sizes = [8, 48], strides = [1, 1]} : vector<8x64xf32> to vector<8x48xf32>
    %585 = arith.negf %584 : vector<8x48xf32>
    %586 = math.exp %585 : vector<8x48xf32>
    %cst_126 = arith.constant 1.000000e+00 : f32
    %587 = vector.broadcast %cst_126 : f32 to vector<8x48xf32>
    %588 = arith.addf %587, %586 : vector<8x48xf32>
    %589 = arith.divf %587, %588 : vector<8x48xf32>
    %590 = vector.extract_strided_slice %589 {offsets = [0, 0], sizes = [8, 16], strides = [1, 1]} : vector<8x48xf32> to vector<8x16xf32>
    %591 = vector.extract_strided_slice %589 {offsets = [0, 16], sizes = [8, 16], strides = [1, 1]} : vector<8x48xf32> to vector<8x16xf32>
    %592 = vector.extract_strided_slice %589 {offsets = [0, 32], sizes = [8, 16], strides = [1, 1]} : vector<8x48xf32> to vector<8x16xf32>
    %593 = vector.extract_strided_slice %583 {offsets = [0, 48], sizes = [8, 16], strides = [1, 1]} : vector<8x64xf32> to vector<8x16xf32>
    %594 = math.tanh %593 : vector<8x16xf32>
    %595 = arith.mulf %591, %533 : vector<8x16xf32>
    %596 = arith.mulf %590, %594 : vector<8x16xf32>
    %597 = arith.addf %595, %596 : vector<8x16xf32>
    %598 = math.tanh %597 : vector<8x16xf32>
    %599 = arith.mulf %592, %598 : vector<8x16xf32>
    %600 = vector.broadcast %579 : vector<8x1xf32> to vector<8x16xf32>
    %601 = arith.mulf %600, %599 : vector<8x16xf32>
    %cst_127 = arith.constant 1.000000e+00 : f32
    %602 = vector.broadcast %cst_127 : f32 to vector<8x1xf32>
    %603 = arith.subf %602, %579 : vector<8x1xf32>
    %604 = vector.broadcast %603 : vector<8x1xf32> to vector<8x16xf32>
    %605 = arith.mulf %604, %526 : vector<8x16xf32>
    %606 = arith.addf %601, %605 : vector<8x16xf32>
    %607 = vector.extract_strided_slice %11 {offsets = [0, 0], sizes = [8, 64], strides = [1, 1]} : vector<64x64xf32> to vector<8x64xf32>
    %cst_128 = arith.constant dense<0.000000e+00> : vector<8x64xf32>
    %608 = tpu.matmul %559, %13, %cst_128 {dimension_numbers = #tpu.dot_dimension_numbers<[1], [0], [0], [1], [0, 0, 1, 1], [], []>} : vector<8x16xf32>, vector<16x64xf32>, vector<8x64xf32> -> vector<8x64xf32>
    %609 = arith.addf %607, %608 : vector<8x64xf32>
    %610 = vector.extract_strided_slice %609 {offsets = [0, 0], sizes = [8, 48], strides = [1, 1]} : vector<8x64xf32> to vector<8x48xf32>
    %611 = arith.negf %610 : vector<8x48xf32>
    %612 = math.exp %611 : vector<8x48xf32>
    %cst_129 = arith.constant 1.000000e+00 : f32
    %613 = vector.broadcast %cst_129 : f32 to vector<8x48xf32>
    %614 = arith.addf %613, %612 : vector<8x48xf32>
    %615 = arith.divf %613, %614 : vector<8x48xf32>
    %616 = vector.extract_strided_slice %615 {offsets = [0, 0], sizes = [8, 16], strides = [1, 1]} : vector<8x48xf32> to vector<8x16xf32>
    %617 = vector.extract_strided_slice %615 {offsets = [0, 16], sizes = [8, 16], strides = [1, 1]} : vector<8x48xf32> to vector<8x16xf32>
    %618 = vector.extract_strided_slice %615 {offsets = [0, 32], sizes = [8, 16], strides = [1, 1]} : vector<8x48xf32> to vector<8x16xf32>
    %619 = vector.extract_strided_slice %609 {offsets = [0, 48], sizes = [8, 16], strides = [1, 1]} : vector<8x64xf32> to vector<8x16xf32>
    %620 = math.tanh %619 : vector<8x16xf32>
    %621 = arith.mulf %617, %566 : vector<8x16xf32>
    %622 = arith.mulf %616, %620 : vector<8x16xf32>
    %623 = arith.addf %621, %622 : vector<8x16xf32>
    %624 = math.tanh %623 : vector<8x16xf32>
    %625 = arith.mulf %618, %624 : vector<8x16xf32>
    %626 = vector.broadcast %580 : vector<8x1xf32> to vector<8x16xf32>
    %627 = arith.mulf %626, %625 : vector<8x16xf32>
    %cst_130 = arith.constant 1.000000e+00 : f32
    %628 = vector.broadcast %cst_130 : f32 to vector<8x1xf32>
    %629 = arith.subf %628, %580 : vector<8x1xf32>
    %630 = vector.broadcast %629 : vector<8x1xf32> to vector<8x16xf32>
    %631 = arith.mulf %630, %559 : vector<8x16xf32>
    %632 = arith.addf %627, %631 : vector<8x16xf32>
    %633 = vector.broadcast %579 : vector<8x1xf32> to vector<8x16xf32>
    %634 = arith.mulf %606, %633 : vector<8x16xf32>
    %635 = vector.broadcast %580 : vector<8x1xf32> to vector<8x16xf32>
    %636 = arith.mulf %632, %635 : vector<8x16xf32>
    %c7_131 = arith.constant 7 : index
    %c0_132 = arith.constant 0 : index
    %c0_133 = arith.constant 0 : index
    %637 = vector.load %arg11[%c7_131, %c0_132, %c0_133] : memref<8x16x128xf32, #tpu.memory_space<vmem>>, vector<1x16x128xf32>
    %638 = vector.shape_cast %637 : vector<1x16x128xf32> to vector<16x128xf32>
    %cst_134 = arith.constant dense<0.000000e+00> : vector<8x128xf32>
    %639 = tpu.matmul %634, %638, %cst_134 {dimension_numbers = #tpu.dot_dimension_numbers<[1], [0], [0], [1], [0, 0, 1, 1], [], []>} : vector<8x16xf32>, vector<16x128xf32>, vector<8x128xf32> -> vector<8x128xf32>
    %640 = arith.addf %578, %639 : vector<8x128xf32>
    %c0_135 = arith.constant 0 : index
    %c0_136 = arith.constant 0 : index
    %c0_137 = arith.constant 0 : index
    %641 = vector.load %arg12[%c0_135, %c0_136, %c0_137] : memref<8x16x128xf32, #tpu.memory_space<vmem>>, vector<1x16x128xf32>
    %642 = vector.shape_cast %641 : vector<1x16x128xf32> to vector<16x128xf32>
    %cst_138 = arith.constant dense<0.000000e+00> : vector<8x128xf32>
    %643 = tpu.matmul %636, %642, %cst_138 {dimension_numbers = #tpu.dot_dimension_numbers<[1], [0], [0], [1], [0, 0, 1, 1], [], []>} : vector<8x16xf32>, vector<16x128xf32>, vector<8x128xf32> -> vector<8x128xf32>
    %644 = arith.addf %640, %643 : vector<8x128xf32>
    %645 = arith.addf %88, %168 : vector<8x16xf32>
    %646 = arith.addf %636, %570 : vector<8x16xf32>
    %647 = arith.addf %645, %248 : vector<8x16xf32>
    %648 = arith.addf %646, %490 : vector<8x16xf32>
    %649 = arith.addf %647, %328 : vector<8x16xf32>
    %650 = arith.addf %648, %410 : vector<8x16xf32>
    %651 = arith.addf %649, %408 : vector<8x16xf32>
    %652 = arith.addf %650, %330 : vector<8x16xf32>
    %653 = arith.addf %651, %488 : vector<8x16xf32>
    %654 = arith.addf %652, %250 : vector<8x16xf32>
    %655 = arith.addf %653, %568 : vector<8x16xf32>
    %656 = arith.addf %654, %170 : vector<8x16xf32>
    %657 = arith.addf %655, %634 : vector<8x16xf32>
    %658 = arith.addf %656, %90 : vector<8x16xf32>
    %cst_139 = arith.constant dense<0.000000e+00> : vector<8xf32>
    %659 = vector.multi_reduction <add>, %0, %cst_139 [1] : vector<8x8xf32> to vector<8xf32>
    %660 = vector.shape_cast %659 : vector<8xf32> to vector<8x1xf32>
    %cst_140 = arith.constant 9.99999997E-7 : f32
    %661 = vector.broadcast %cst_140 : f32 to vector<8x1xf32>
    %662 = arith.maximumf %660, %661 : vector<8x1xf32>
    %663 = vector.broadcast %662 : vector<8x1xf32> to vector<8x16xf32>
    %664 = arith.divf %657, %663 : vector<8x16xf32>
    %665 = vector.broadcast %662 : vector<8x1xf32> to vector<8x16xf32>
    %666 = arith.divf %658, %665 : vector<8x16xf32>
    %c0_141 = arith.constant 0 : index
    %c0_142 = arith.constant 0 : index
    %667 = vector.load %arg14[%c0_141, %c0_142] : memref<16x64xf32, #tpu.memory_space<vmem>>, vector<16x64xf32>
    %cst_143 = arith.constant dense<0.000000e+00> : vector<8x64xf32>
    %668 = tpu.matmul %664, %667, %cst_143 {dimension_numbers = #tpu.dot_dimension_numbers<[1], [0], [0], [1], [0, 0, 1, 1], [], []>} : vector<8x16xf32>, vector<16x64xf32>, vector<8x64xf32> -> vector<8x64xf32>
    %c0_144 = arith.constant 0 : index
    %c0_145 = arith.constant 0 : index
    %669 = vector.load %arg15[%c0_144, %c0_145] : memref<16x64xf32, #tpu.memory_space<vmem>>, vector<16x64xf32>
    %cst_146 = arith.constant dense<0.000000e+00> : vector<8x64xf32>
    %670 = tpu.matmul %666, %669, %cst_146 {dimension_numbers = #tpu.dot_dimension_numbers<[1], [0], [0], [1], [0, 0, 1, 1], [], []>} : vector<8x16xf32>, vector<16x64xf32>, vector<8x64xf32> -> vector<8x64xf32>
    %671 = arith.addf %668, %670 : vector<8x64xf32>
    %c0_147 = arith.constant 0 : index
    %c0_148 = arith.constant 0 : index
    %672 = vector.load %arg16[%c0_147, %c0_148] : memref<1x64xf32, #tpu.memory_space<vmem>>, vector<1x64xf32>
    %673 = vector.broadcast %672 : vector<1x64xf32> to vector<8x64xf32>
    %674 = arith.addf %671, %673 : vector<8x64xf32>
    %675 = math.tanh %674 : vector<8x64xf32>
    %676 = vector.extract_strided_slice %675 {offsets = [0, 0], sizes = [8, 32], strides = [1, 1]} : vector<8x64xf32> to vector<8x32xf32>
    %677 = vector.extract_strided_slice %675 {offsets = [0, 32], sizes = [8, 32], strides = [1, 1]} : vector<8x64xf32> to vector<8x32xf32>
    %c0_149 = arith.constant 0 : index
    %c0_150 = arith.constant 0 : index
    %678 = vector.load %arg2[%c0_149, %c0_150] : memref<48x16xf32, #tpu.memory_space<vmem>>, vector<48x16xf32>
    %c0_151 = arith.constant 0 : index
    %c0_152 = arith.constant 0 : index
    %679 = vector.load %arg3[%c0_151, %c0_152] : memref<48x1xi32, #tpu.memory_space<vmem>>, vector<48x1xi32>
    %c0_153 = arith.constant 0 : index
    %c0_154 = arith.constant 0 : index
    %680 = vector.load %arg4[%c0_153, %c0_154] : memref<48x1xf32, #tpu.memory_space<vmem>>, vector<48x1xf32>
    %cst_155 = arith.constant 0.000000e+00 : f32
    %681 = vector.broadcast %cst_155 : f32 to vector<8x1xf32>
    %682 = vector.extract_strided_slice %678 {offsets = [0, 0], sizes = [8, 16], strides = [1, 1]} : vector<48x16xf32> to vector<8x16xf32>
    %c0_156 = arith.constant 0 : index
    %c0_157 = arith.constant 0 : index
    %683 = vector.load %arg17[%c0_156, %c0_157] : memref<16x288xf32, #tpu.memory_space<vmem>>, vector<16x288xf32>
    %cst_158 = arith.constant dense<0.000000e+00> : vector<8x288xf32>
    %684 = tpu.matmul %682, %683, %cst_158 {dimension_numbers = #tpu.dot_dimension_numbers<[1], [0], [0], [1], [0, 0, 1, 1], [], []>} : vector<8x16xf32>, vector<16x288xf32>, vector<8x288xf32> -> vector<8x288xf32>
    %c0_159 = arith.constant 0 : index
    %c0_160 = arith.constant 0 : index
    %685 = vector.load %arg18[%c0_159, %c0_160] : memref<1x288xf32, #tpu.memory_space<vmem>>, vector<1x288xf32>
    %686 = vector.broadcast %685 : vector<1x288xf32> to vector<8x288xf32>
    %687 = arith.addf %684, %686 : vector<8x288xf32>
    %c0_161 = arith.constant 0 : index
    %c0_162 = arith.constant 0 : index
    %688 = vector.load %arg19[%c0_161, %c0_162] : memref<32x256xf32, #tpu.memory_space<vmem>>, vector<32x256xf32>
    %cst_163 = arith.constant dense<0.000000e+00> : vector<8x256xf32>
    %689 = tpu.matmul %676, %688, %cst_163 {dimension_numbers = #tpu.dot_dimension_numbers<[1], [0], [0], [1], [0, 0, 1, 1], [], []>} : vector<8x32xf32>, vector<32x256xf32>, vector<8x256xf32> -> vector<8x256xf32>
    %690 = vector.extract_strided_slice %687 {offsets = [0, 128], sizes = [8, 128], strides = [1, 1]} : vector<8x288xf32> to vector<8x128xf32>
    %691 = arith.addf %644, %690 : vector<8x128xf32>
    %692 = vector.extract_strided_slice %689 {offsets = [0, 128], sizes = [8, 128], strides = [1, 1]} : vector<8x256xf32> to vector<8x128xf32>
    %693 = arith.addf %691, %692 : vector<8x128xf32>
    %694 = math.tanh %693 : vector<8x128xf32>
    %c0_164 = arith.constant 0 : index
    %c0_165 = arith.constant 0 : index
    %695 = vector.load %arg23[%c0_164, %c0_165] : memref<128x8xf32, #tpu.memory_space<vmem>>, vector<128x8xf32>
    %cst_166 = arith.constant dense<0.000000e+00> : vector<8x8xf32>
    %696 = tpu.matmul %694, %695, %cst_166 {dimension_numbers = #tpu.dot_dimension_numbers<[1], [0], [0], [1], [0, 0, 1, 1], [], []>} : vector<8x128xf32>, vector<128x8xf32>, vector<8x8xf32> -> vector<8x8xf32>
    %c0_167 = arith.constant 0 : index
    %c0_168 = arith.constant 0 : index
    %697 = vector.load %arg24[%c0_167, %c0_168] : memref<1x1xf32, #tpu.memory_space<vmem>>, vector<1x1xf32>
    %698 = vector.broadcast %697 : vector<1x1xf32> to vector<8x8xf32>
    %699 = arith.addf %696, %698 : vector<8x8xf32>
    %cst_169 = arith.constant dense<0xFF800000> : vector<8xf32>
    %700 = vector.multi_reduction <maximumf>, %699, %cst_169 [1] : vector<8x8xf32> to vector<8xf32>
    %701 = vector.shape_cast %700 : vector<8xf32> to vector<8x1xf32>
    %702 = vector.broadcast %701 : vector<8x1xf32> to vector<8x8xf32>
    %703 = arith.subf %699, %702 : vector<8x8xf32>
    %704 = math.exp %703 : vector<8x8xf32>
    %705 = arith.mulf %704, %0 : vector<8x8xf32>
    %cst_170 = arith.constant dense<0.000000e+00> : vector<8xf32>
    %706 = vector.multi_reduction <add>, %705, %cst_170 [1] : vector<8x8xf32> to vector<8xf32>
    %707 = vector.shape_cast %706 : vector<8xf32> to vector<8x1xf32>
    %cst_171 = arith.constant 1.000000e-15 : f32
    %708 = vector.broadcast %cst_171 : f32 to vector<8x1xf32>
    %709 = arith.addf %707, %708 : vector<8x1xf32>
    %710 = tpu.reciprocal %709 {approx = true} : vector<8x1xf32> -> vector<8x1xf32>
    %711 = vector.broadcast %710 : vector<8x1xf32> to vector<8x8xf32>
    %712 = arith.mulf %705, %711 : vector<8x8xf32>
    %713 = vector.extract_strided_slice %712 {offsets = [0, 0], sizes = [8, 1], strides = [1, 1]} : vector<8x8xf32> to vector<8x1xf32>
    %714 = vector.broadcast %713 : vector<8x1xf32> to vector<8x16xf32>
    %715 = arith.mulf %714, %88 : vector<8x16xf32>
    %716 = vector.extract_strided_slice %712 {offsets = [0, 0], sizes = [8, 1], strides = [1, 1]} : vector<8x8xf32> to vector<8x1xf32>
    %717 = vector.broadcast %716 : vector<8x1xf32> to vector<8x16xf32>
    %718 = arith.mulf %717, %636 : vector<8x16xf32>
    %719 = vector.extract_strided_slice %712 {offsets = [0, 1], sizes = [8, 1], strides = [1, 1]} : vector<8x8xf32> to vector<8x1xf32>
    %720 = vector.broadcast %719 : vector<8x1xf32> to vector<8x16xf32>
    %721 = arith.mulf %720, %168 : vector<8x16xf32>
    %722 = arith.addf %715, %721 : vector<8x16xf32>
    %723 = vector.extract_strided_slice %712 {offsets = [0, 1], sizes = [8, 1], strides = [1, 1]} : vector<8x8xf32> to vector<8x1xf32>
    %724 = vector.broadcast %723 : vector<8x1xf32> to vector<8x16xf32>
    %725 = arith.mulf %724, %570 : vector<8x16xf32>
    %726 = arith.addf %718, %725 : vector<8x16xf32>
    %727 = vector.extract_strided_slice %712 {offsets = [0, 2], sizes = [8, 1], strides = [1, 1]} : vector<8x8xf32> to vector<8x1xf32>
    %728 = vector.broadcast %727 : vector<8x1xf32> to vector<8x16xf32>
    %729 = arith.mulf %728, %248 : vector<8x16xf32>
    %730 = arith.addf %722, %729 : vector<8x16xf32>
    %731 = vector.extract_strided_slice %712 {offsets = [0, 2], sizes = [8, 1], strides = [1, 1]} : vector<8x8xf32> to vector<8x1xf32>
    %732 = vector.broadcast %731 : vector<8x1xf32> to vector<8x16xf32>
    %733 = arith.mulf %732, %490 : vector<8x16xf32>
    %734 = arith.addf %726, %733 : vector<8x16xf32>
    %735 = vector.extract_strided_slice %712 {offsets = [0, 3], sizes = [8, 1], strides = [1, 1]} : vector<8x8xf32> to vector<8x1xf32>
    %736 = vector.broadcast %735 : vector<8x1xf32> to vector<8x16xf32>
    %737 = arith.mulf %736, %328 : vector<8x16xf32>
    %738 = arith.addf %730, %737 : vector<8x16xf32>
    %739 = vector.extract_strided_slice %712 {offsets = [0, 3], sizes = [8, 1], strides = [1, 1]} : vector<8x8xf32> to vector<8x1xf32>
    %740 = vector.broadcast %739 : vector<8x1xf32> to vector<8x16xf32>
    %741 = arith.mulf %740, %410 : vector<8x16xf32>
    %742 = arith.addf %734, %741 : vector<8x16xf32>
    %743 = vector.extract_strided_slice %712 {offsets = [0, 4], sizes = [8, 1], strides = [1, 1]} : vector<8x8xf32> to vector<8x1xf32>
    %744 = vector.broadcast %743 : vector<8x1xf32> to vector<8x16xf32>
    %745 = arith.mulf %744, %408 : vector<8x16xf32>
    %746 = arith.addf %738, %745 : vector<8x16xf32>
    %747 = vector.extract_strided_slice %712 {offsets = [0, 4], sizes = [8, 1], strides = [1, 1]} : vector<8x8xf32> to vector<8x1xf32>
    %748 = vector.broadcast %747 : vector<8x1xf32> to vector<8x16xf32>
    %749 = arith.mulf %748, %330 : vector<8x16xf32>
    %750 = arith.addf %742, %749 : vector<8x16xf32>
    %751 = vector.extract_strided_slice %712 {offsets = [0, 5], sizes = [8, 1], strides = [1, 1]} : vector<8x8xf32> to vector<8x1xf32>
    %752 = vector.broadcast %751 : vector<8x1xf32> to vector<8x16xf32>
    %753 = arith.mulf %752, %488 : vector<8x16xf32>
    %754 = arith.addf %746, %753 : vector<8x16xf32>
    %755 = vector.extract_strided_slice %712 {offsets = [0, 5], sizes = [8, 1], strides = [1, 1]} : vector<8x8xf32> to vector<8x1xf32>
    %756 = vector.broadcast %755 : vector<8x1xf32> to vector<8x16xf32>
    %757 = arith.mulf %756, %250 : vector<8x16xf32>
    %758 = arith.addf %750, %757 : vector<8x16xf32>
    %759 = vector.extract_strided_slice %712 {offsets = [0, 6], sizes = [8, 1], strides = [1, 1]} : vector<8x8xf32> to vector<8x1xf32>
    %760 = vector.broadcast %759 : vector<8x1xf32> to vector<8x16xf32>
    %761 = arith.mulf %760, %568 : vector<8x16xf32>
    %762 = arith.addf %754, %761 : vector<8x16xf32>
    %763 = vector.extract_strided_slice %712 {offsets = [0, 6], sizes = [8, 1], strides = [1, 1]} : vector<8x8xf32> to vector<8x1xf32>
    %764 = vector.broadcast %763 : vector<8x1xf32> to vector<8x16xf32>
    %765 = arith.mulf %764, %170 : vector<8x16xf32>
    %766 = arith.addf %758, %765 : vector<8x16xf32>
    %767 = vector.extract_strided_slice %712 {offsets = [0, 7], sizes = [8, 1], strides = [1, 1]} : vector<8x8xf32> to vector<8x1xf32>
    %768 = vector.broadcast %767 : vector<8x1xf32> to vector<8x16xf32>
    %769 = arith.mulf %768, %634 : vector<8x16xf32>
    %770 = arith.addf %762, %769 : vector<8x16xf32>
    %771 = vector.extract_strided_slice %712 {offsets = [0, 7], sizes = [8, 1], strides = [1, 1]} : vector<8x8xf32> to vector<8x1xf32>
    %772 = vector.broadcast %771 : vector<8x1xf32> to vector<8x16xf32>
    %773 = arith.mulf %772, %90 : vector<8x16xf32>
    %774 = arith.addf %766, %773 : vector<8x16xf32>
    %c0_172 = arith.constant 0 : index
    %c0_173 = arith.constant 0 : index
    %775 = vector.load %arg20[%c0_172, %c0_173] : memref<16x160xf32, #tpu.memory_space<vmem>>, vector<16x160xf32>
    %cst_174 = arith.constant dense<0.000000e+00> : vector<8x160xf32>
    %776 = tpu.matmul %770, %775, %cst_174 {dimension_numbers = #tpu.dot_dimension_numbers<[1], [0], [0], [1], [0, 0, 1, 1], [], []>} : vector<8x16xf32>, vector<16x160xf32>, vector<8x160xf32> -> vector<8x160xf32>
    %c0_175 = arith.constant 0 : index
    %c0_176 = arith.constant 0 : index
    %777 = vector.load %arg21[%c0_175, %c0_176] : memref<16x160xf32, #tpu.memory_space<vmem>>, vector<16x160xf32>
    %cst_177 = arith.constant dense<0.000000e+00> : vector<8x160xf32>
    %778 = tpu.matmul %774, %777, %cst_177 {dimension_numbers = #tpu.dot_dimension_numbers<[1], [0], [0], [1], [0, 0, 1, 1], [], []>} : vector<8x16xf32>, vector<16x160xf32>, vector<8x160xf32> -> vector<8x160xf32>
    %779 = arith.addf %776, %778 : vector<8x160xf32>
    %780 = vector.extract_strided_slice %687 {offsets = [0, 0], sizes = [8, 128], strides = [1, 1]} : vector<8x288xf32> to vector<8x128xf32>
    %781 = vector.extract_strided_slice %689 {offsets = [0, 0], sizes = [8, 128], strides = [1, 1]} : vector<8x256xf32> to vector<8x128xf32>
    %782 = arith.addf %780, %781 : vector<8x128xf32>
    %783 = vector.extract_strided_slice %779 {offsets = [0, 0], sizes = [8, 128], strides = [1, 1]} : vector<8x160xf32> to vector<8x128xf32>
    %784 = arith.addf %782, %783 : vector<8x128xf32>
    %785 = vector.extract_strided_slice %784 {offsets = [0, 0], sizes = [8, 96], strides = [1, 1]} : vector<8x128xf32> to vector<8x96xf32>
    %786 = arith.negf %785 : vector<8x96xf32>
    %787 = math.exp %786 : vector<8x96xf32>
    %cst_178 = arith.constant 1.000000e+00 : f32
    %788 = vector.broadcast %cst_178 : f32 to vector<8x96xf32>
    %789 = arith.addf %788, %787 : vector<8x96xf32>
    %790 = arith.divf %788, %789 : vector<8x96xf32>
    %791 = vector.extract_strided_slice %790 {offsets = [0, 0], sizes = [8, 32], strides = [1, 1]} : vector<8x96xf32> to vector<8x32xf32>
    %792 = vector.extract_strided_slice %790 {offsets = [0, 32], sizes = [8, 32], strides = [1, 1]} : vector<8x96xf32> to vector<8x32xf32>
    %793 = vector.extract_strided_slice %790 {offsets = [0, 64], sizes = [8, 32], strides = [1, 1]} : vector<8x96xf32> to vector<8x32xf32>
    %794 = vector.extract_strided_slice %784 {offsets = [0, 96], sizes = [8, 32], strides = [1, 1]} : vector<8x128xf32> to vector<8x32xf32>
    %795 = math.tanh %794 : vector<8x32xf32>
    %796 = arith.mulf %792, %677 : vector<8x32xf32>
    %797 = arith.mulf %791, %795 : vector<8x32xf32>
    %798 = arith.addf %796, %797 : vector<8x32xf32>
    %799 = math.tanh %798 : vector<8x32xf32>
    %800 = arith.mulf %793, %799 : vector<8x32xf32>
    %801 = vector.extract_strided_slice %779 {offsets = [0, 128], sizes = [8, 32], strides = [1, 1]} : vector<8x160xf32> to vector<8x32xf32>
    %802 = vector.extract_strided_slice %687 {offsets = [0, 256], sizes = [8, 32], strides = [1, 1]} : vector<8x288xf32> to vector<8x32xf32>
    %803 = arith.addf %801, %802 : vector<8x32xf32>
    %c0_179 = arith.constant 0 : index
    %c0_180 = arith.constant 0 : index
    %804 = vector.load %arg22[%c0_179, %c0_180] : memref<32x32xf32, #tpu.memory_space<vmem>>, vector<32x32xf32>
    %cst_181 = arith.constant dense<0.000000e+00> : vector<8x32xf32>
    %805 = tpu.matmul %800, %804, %cst_181 {dimension_numbers = #tpu.dot_dimension_numbers<[1], [0], [0], [1], [0, 0, 1, 1], [], []>} : vector<8x32xf32>, vector<32x32xf32>, vector<8x32xf32> -> vector<8x32xf32>
    %806 = arith.addf %803, %805 : vector<8x32xf32>
    %807 = vector.extract_strided_slice %806 {offsets = [0, 0], sizes = [8, 16], strides = [1, 1]} : vector<8x32xf32> to vector<8x16xf32>
    %808 = vector.extract_strided_slice %806 {offsets = [0, 16], sizes = [8, 16], strides = [1, 1]} : vector<8x32xf32> to vector<8x16xf32>
    %809 = arith.maximumf %807, %808 : vector<8x16xf32>
    %c0_182 = arith.constant 0 : index
    %c0_183 = arith.constant 0 : index
    %810 = vector.load %arg25[%c0_182, %c0_183] : memref<16x24xf32, #tpu.memory_space<vmem>>, vector<16x24xf32>
    %cst_184 = arith.constant dense<0.000000e+00> : vector<8x24xf32>
    %811 = tpu.matmul %809, %810, %cst_184 {dimension_numbers = #tpu.dot_dimension_numbers<[1], [0], [0], [1], [0, 0, 1, 1], [], []>} : vector<8x16xf32>, vector<16x24xf32>, vector<8x24xf32> -> vector<8x24xf32>
    %c0_185 = arith.constant 0 : index
    %c0_186 = arith.constant 0 : index
    %812 = vector.load %arg26[%c0_185, %c0_186] : memref<1x24xf32, #tpu.memory_space<vmem>>, vector<1x24xf32>
    %813 = vector.broadcast %812 : vector<1x24xf32> to vector<8x24xf32>
    %814 = arith.addf %811, %813 : vector<8x24xf32>
    %cst_187 = arith.constant dense<0xFF800000> : vector<8xf32>
    %815 = vector.multi_reduction <maximumf>, %814, %cst_187 [1] : vector<8x24xf32> to vector<8xf32>
    %816 = vector.shape_cast %815 : vector<8xf32> to vector<8x1xf32>
    %817 = vector.broadcast %816 : vector<8x1xf32> to vector<8x24xf32>
    %818 = arith.subf %814, %817 : vector<8x24xf32>
    %819 = math.exp %818 : vector<8x24xf32>
    %cst_188 = arith.constant dense<0.000000e+00> : vector<8xf32>
    %820 = vector.multi_reduction <add>, %819, %cst_188 [1] : vector<8x24xf32> to vector<8xf32>
    %821 = vector.shape_cast %820 : vector<8xf32> to vector<8x1xf32>
    %822 = math.log %821 : vector<8x1xf32>
    %823 = vector.extract_strided_slice %679 {offsets = [0, 0], sizes = [8, 1], strides = [1, 1]} : vector<48x1xi32> to vector<8x1xi32>
    %824 = tpu.iota {dimensions = array<i32: 1>} : vector<8x24xi32>
    %825 = vector.broadcast %823 : vector<8x1xi32> to vector<8x24xi32>
    %826 = arith.cmpi eq, %824, %825 : vector<8x24xi32>
    %827 = arith.extui %826 : vector<8x24xi1> to vector<8x24xi32>
    %828 = arith.sitofp %827 : vector<8x24xi32> to vector<8x24xf32>
    %829 = arith.mulf %818, %828 : vector<8x24xf32>
    %cst_189 = arith.constant dense<0.000000e+00> : vector<8xf32>
    %830 = vector.multi_reduction <add>, %829, %cst_189 [1] : vector<8x24xf32> to vector<8xf32>
    %831 = vector.shape_cast %830 : vector<8xf32> to vector<8x1xf32>
    %832 = arith.subf %822, %831 : vector<8x1xf32>
    %833 = vector.extract_strided_slice %680 {offsets = [0, 0], sizes = [8, 1], strides = [1, 1]} : vector<48x1xf32> to vector<8x1xf32>
    %834 = arith.mulf %832, %833 : vector<8x1xf32>
    %835 = arith.addf %681, %834 : vector<8x1xf32>
    %836 = vector.extract_strided_slice %678 {offsets = [8, 0], sizes = [8, 16], strides = [1, 1]} : vector<48x16xf32> to vector<8x16xf32>
    %c0_190 = arith.constant 0 : index
    %c0_191 = arith.constant 0 : index
    %837 = vector.load %arg17[%c0_190, %c0_191] : memref<16x288xf32, #tpu.memory_space<vmem>>, vector<16x288xf32>
    %cst_192 = arith.constant dense<0.000000e+00> : vector<8x288xf32>
    %838 = tpu.matmul %836, %837, %cst_192 {dimension_numbers = #tpu.dot_dimension_numbers<[1], [0], [0], [1], [0, 0, 1, 1], [], []>} : vector<8x16xf32>, vector<16x288xf32>, vector<8x288xf32> -> vector<8x288xf32>
    %c0_193 = arith.constant 0 : index
    %c0_194 = arith.constant 0 : index
    %839 = vector.load %arg18[%c0_193, %c0_194] : memref<1x288xf32, #tpu.memory_space<vmem>>, vector<1x288xf32>
    %840 = vector.broadcast %839 : vector<1x288xf32> to vector<8x288xf32>
    %841 = arith.addf %838, %840 : vector<8x288xf32>
    %c0_195 = arith.constant 0 : index
    %c0_196 = arith.constant 0 : index
    %842 = vector.load %arg19[%c0_195, %c0_196] : memref<32x256xf32, #tpu.memory_space<vmem>>, vector<32x256xf32>
    %cst_197 = arith.constant dense<0.000000e+00> : vector<8x256xf32>
    %843 = tpu.matmul %800, %842, %cst_197 {dimension_numbers = #tpu.dot_dimension_numbers<[1], [0], [0], [1], [0, 0, 1, 1], [], []>} : vector<8x32xf32>, vector<32x256xf32>, vector<8x256xf32> -> vector<8x256xf32>
    %844 = vector.extract_strided_slice %841 {offsets = [0, 128], sizes = [8, 128], strides = [1, 1]} : vector<8x288xf32> to vector<8x128xf32>
    %845 = arith.addf %644, %844 : vector<8x128xf32>
    %846 = vector.extract_strided_slice %843 {offsets = [0, 128], sizes = [8, 128], strides = [1, 1]} : vector<8x256xf32> to vector<8x128xf32>
    %847 = arith.addf %845, %846 : vector<8x128xf32>
    %848 = math.tanh %847 : vector<8x128xf32>
    %c0_198 = arith.constant 0 : index
    %c0_199 = arith.constant 0 : index
    %849 = vector.load %arg23[%c0_198, %c0_199] : memref<128x8xf32, #tpu.memory_space<vmem>>, vector<128x8xf32>
    %cst_200 = arith.constant dense<0.000000e+00> : vector<8x8xf32>
    %850 = tpu.matmul %848, %849, %cst_200 {dimension_numbers = #tpu.dot_dimension_numbers<[1], [0], [0], [1], [0, 0, 1, 1], [], []>} : vector<8x128xf32>, vector<128x8xf32>, vector<8x8xf32> -> vector<8x8xf32>
    %c0_201 = arith.constant 0 : index
    %c0_202 = arith.constant 0 : index
    %851 = vector.load %arg24[%c0_201, %c0_202] : memref<1x1xf32, #tpu.memory_space<vmem>>, vector<1x1xf32>
    %852 = vector.broadcast %851 : vector<1x1xf32> to vector<8x8xf32>
    %853 = arith.addf %850, %852 : vector<8x8xf32>
    %cst_203 = arith.constant dense<0xFF800000> : vector<8xf32>
    %854 = vector.multi_reduction <maximumf>, %853, %cst_203 [1] : vector<8x8xf32> to vector<8xf32>
    %855 = vector.shape_cast %854 : vector<8xf32> to vector<8x1xf32>
    %856 = vector.broadcast %855 : vector<8x1xf32> to vector<8x8xf32>
    %857 = arith.subf %853, %856 : vector<8x8xf32>
    %858 = math.exp %857 : vector<8x8xf32>
    %859 = arith.mulf %858, %0 : vector<8x8xf32>
    %cst_204 = arith.constant dense<0.000000e+00> : vector<8xf32>
    %860 = vector.multi_reduction <add>, %859, %cst_204 [1] : vector<8x8xf32> to vector<8xf32>
    %861 = vector.shape_cast %860 : vector<8xf32> to vector<8x1xf32>
    %cst_205 = arith.constant 1.000000e-15 : f32
    %862 = vector.broadcast %cst_205 : f32 to vector<8x1xf32>
    %863 = arith.addf %861, %862 : vector<8x1xf32>
    %864 = tpu.reciprocal %863 {approx = true} : vector<8x1xf32> -> vector<8x1xf32>
    %865 = vector.broadcast %864 : vector<8x1xf32> to vector<8x8xf32>
    %866 = arith.mulf %859, %865 : vector<8x8xf32>
    %867 = vector.extract_strided_slice %866 {offsets = [0, 0], sizes = [8, 1], strides = [1, 1]} : vector<8x8xf32> to vector<8x1xf32>
    %868 = vector.broadcast %867 : vector<8x1xf32> to vector<8x16xf32>
    %869 = arith.mulf %868, %88 : vector<8x16xf32>
    %870 = vector.extract_strided_slice %866 {offsets = [0, 0], sizes = [8, 1], strides = [1, 1]} : vector<8x8xf32> to vector<8x1xf32>
    %871 = vector.broadcast %870 : vector<8x1xf32> to vector<8x16xf32>
    %872 = arith.mulf %871, %636 : vector<8x16xf32>
    %873 = vector.extract_strided_slice %866 {offsets = [0, 1], sizes = [8, 1], strides = [1, 1]} : vector<8x8xf32> to vector<8x1xf32>
    %874 = vector.broadcast %873 : vector<8x1xf32> to vector<8x16xf32>
    %875 = arith.mulf %874, %168 : vector<8x16xf32>
    %876 = arith.addf %869, %875 : vector<8x16xf32>
    %877 = vector.extract_strided_slice %866 {offsets = [0, 1], sizes = [8, 1], strides = [1, 1]} : vector<8x8xf32> to vector<8x1xf32>
    %878 = vector.broadcast %877 : vector<8x1xf32> to vector<8x16xf32>
    %879 = arith.mulf %878, %570 : vector<8x16xf32>
    %880 = arith.addf %872, %879 : vector<8x16xf32>
    %881 = vector.extract_strided_slice %866 {offsets = [0, 2], sizes = [8, 1], strides = [1, 1]} : vector<8x8xf32> to vector<8x1xf32>
    %882 = vector.broadcast %881 : vector<8x1xf32> to vector<8x16xf32>
    %883 = arith.mulf %882, %248 : vector<8x16xf32>
    %884 = arith.addf %876, %883 : vector<8x16xf32>
    %885 = vector.extract_strided_slice %866 {offsets = [0, 2], sizes = [8, 1], strides = [1, 1]} : vector<8x8xf32> to vector<8x1xf32>
    %886 = vector.broadcast %885 : vector<8x1xf32> to vector<8x16xf32>
    %887 = arith.mulf %886, %490 : vector<8x16xf32>
    %888 = arith.addf %880, %887 : vector<8x16xf32>
    %889 = vector.extract_strided_slice %866 {offsets = [0, 3], sizes = [8, 1], strides = [1, 1]} : vector<8x8xf32> to vector<8x1xf32>
    %890 = vector.broadcast %889 : vector<8x1xf32> to vector<8x16xf32>
    %891 = arith.mulf %890, %328 : vector<8x16xf32>
    %892 = arith.addf %884, %891 : vector<8x16xf32>
    %893 = vector.extract_strided_slice %866 {offsets = [0, 3], sizes = [8, 1], strides = [1, 1]} : vector<8x8xf32> to vector<8x1xf32>
    %894 = vector.broadcast %893 : vector<8x1xf32> to vector<8x16xf32>
    %895 = arith.mulf %894, %410 : vector<8x16xf32>
    %896 = arith.addf %888, %895 : vector<8x16xf32>
    %897 = vector.extract_strided_slice %866 {offsets = [0, 4], sizes = [8, 1], strides = [1, 1]} : vector<8x8xf32> to vector<8x1xf32>
    %898 = vector.broadcast %897 : vector<8x1xf32> to vector<8x16xf32>
    %899 = arith.mulf %898, %408 : vector<8x16xf32>
    %900 = arith.addf %892, %899 : vector<8x16xf32>
    %901 = vector.extract_strided_slice %866 {offsets = [0, 4], sizes = [8, 1], strides = [1, 1]} : vector<8x8xf32> to vector<8x1xf32>
    %902 = vector.broadcast %901 : vector<8x1xf32> to vector<8x16xf32>
    %903 = arith.mulf %902, %330 : vector<8x16xf32>
    %904 = arith.addf %896, %903 : vector<8x16xf32>
    %905 = vector.extract_strided_slice %866 {offsets = [0, 5], sizes = [8, 1], strides = [1, 1]} : vector<8x8xf32> to vector<8x1xf32>
    %906 = vector.broadcast %905 : vector<8x1xf32> to vector<8x16xf32>
    %907 = arith.mulf %906, %488 : vector<8x16xf32>
    %908 = arith.addf %900, %907 : vector<8x16xf32>
    %909 = vector.extract_strided_slice %866 {offsets = [0, 5], sizes = [8, 1], strides = [1, 1]} : vector<8x8xf32> to vector<8x1xf32>
    %910 = vector.broadcast %909 : vector<8x1xf32> to vector<8x16xf32>
    %911 = arith.mulf %910, %250 : vector<8x16xf32>
    %912 = arith.addf %904, %911 : vector<8x16xf32>
    %913 = vector.extract_strided_slice %866 {offsets = [0, 6], sizes = [8, 1], strides = [1, 1]} : vector<8x8xf32> to vector<8x1xf32>
    %914 = vector.broadcast %913 : vector<8x1xf32> to vector<8x16xf32>
    %915 = arith.mulf %914, %568 : vector<8x16xf32>
    %916 = arith.addf %908, %915 : vector<8x16xf32>
    %917 = vector.extract_strided_slice %866 {offsets = [0, 6], sizes = [8, 1], strides = [1, 1]} : vector<8x8xf32> to vector<8x1xf32>
    %918 = vector.broadcast %917 : vector<8x1xf32> to vector<8x16xf32>
    %919 = arith.mulf %918, %170 : vector<8x16xf32>
    %920 = arith.addf %912, %919 : vector<8x16xf32>
    %921 = vector.extract_strided_slice %866 {offsets = [0, 7], sizes = [8, 1], strides = [1, 1]} : vector<8x8xf32> to vector<8x1xf32>
    %922 = vector.broadcast %921 : vector<8x1xf32> to vector<8x16xf32>
    %923 = arith.mulf %922, %634 : vector<8x16xf32>
    %924 = arith.addf %916, %923 : vector<8x16xf32>
    %925 = vector.extract_strided_slice %866 {offsets = [0, 7], sizes = [8, 1], strides = [1, 1]} : vector<8x8xf32> to vector<8x1xf32>
    %926 = vector.broadcast %925 : vector<8x1xf32> to vector<8x16xf32>
    %927 = arith.mulf %926, %90 : vector<8x16xf32>
    %928 = arith.addf %920, %927 : vector<8x16xf32>
    %c0_206 = arith.constant 0 : index
    %c0_207 = arith.constant 0 : index
    %929 = vector.load %arg20[%c0_206, %c0_207] : memref<16x160xf32, #tpu.memory_space<vmem>>, vector<16x160xf32>
    %cst_208 = arith.constant dense<0.000000e+00> : vector<8x160xf32>
    %930 = tpu.matmul %924, %929, %cst_208 {dimension_numbers = #tpu.dot_dimension_numbers<[1], [0], [0], [1], [0, 0, 1, 1], [], []>} : vector<8x16xf32>, vector<16x160xf32>, vector<8x160xf32> -> vector<8x160xf32>
    %c0_209 = arith.constant 0 : index
    %c0_210 = arith.constant 0 : index
    %931 = vector.load %arg21[%c0_209, %c0_210] : memref<16x160xf32, #tpu.memory_space<vmem>>, vector<16x160xf32>
    %cst_211 = arith.constant dense<0.000000e+00> : vector<8x160xf32>
    %932 = tpu.matmul %928, %931, %cst_211 {dimension_numbers = #tpu.dot_dimension_numbers<[1], [0], [0], [1], [0, 0, 1, 1], [], []>} : vector<8x16xf32>, vector<16x160xf32>, vector<8x160xf32> -> vector<8x160xf32>
    %933 = arith.addf %930, %932 : vector<8x160xf32>
    %934 = vector.extract_strided_slice %841 {offsets = [0, 0], sizes = [8, 128], strides = [1, 1]} : vector<8x288xf32> to vector<8x128xf32>
    %935 = vector.extract_strided_slice %843 {offsets = [0, 0], sizes = [8, 128], strides = [1, 1]} : vector<8x256xf32> to vector<8x128xf32>
    %936 = arith.addf %934, %935 : vector<8x128xf32>
    %937 = vector.extract_strided_slice %933 {offsets = [0, 0], sizes = [8, 128], strides = [1, 1]} : vector<8x160xf32> to vector<8x128xf32>
    %938 = arith.addf %936, %937 : vector<8x128xf32>
    %939 = vector.extract_strided_slice %938 {offsets = [0, 0], sizes = [8, 96], strides = [1, 1]} : vector<8x128xf32> to vector<8x96xf32>
    %940 = arith.negf %939 : vector<8x96xf32>
    %941 = math.exp %940 : vector<8x96xf32>
    %cst_212 = arith.constant 1.000000e+00 : f32
    %942 = vector.broadcast %cst_212 : f32 to vector<8x96xf32>
    %943 = arith.addf %942, %941 : vector<8x96xf32>
    %944 = arith.divf %942, %943 : vector<8x96xf32>
    %945 = vector.extract_strided_slice %944 {offsets = [0, 0], sizes = [8, 32], strides = [1, 1]} : vector<8x96xf32> to vector<8x32xf32>
    %946 = vector.extract_strided_slice %944 {offsets = [0, 32], sizes = [8, 32], strides = [1, 1]} : vector<8x96xf32> to vector<8x32xf32>
    %947 = vector.extract_strided_slice %944 {offsets = [0, 64], sizes = [8, 32], strides = [1, 1]} : vector<8x96xf32> to vector<8x32xf32>
    %948 = vector.extract_strided_slice %938 {offsets = [0, 96], sizes = [8, 32], strides = [1, 1]} : vector<8x128xf32> to vector<8x32xf32>
    %949 = math.tanh %948 : vector<8x32xf32>
    %950 = arith.mulf %946, %798 : vector<8x32xf32>
    %951 = arith.mulf %945, %949 : vector<8x32xf32>
    %952 = arith.addf %950, %951 : vector<8x32xf32>
    %953 = math.tanh %952 : vector<8x32xf32>
    %954 = arith.mulf %947, %953 : vector<8x32xf32>
    %955 = vector.extract_strided_slice %933 {offsets = [0, 128], sizes = [8, 32], strides = [1, 1]} : vector<8x160xf32> to vector<8x32xf32>
    %956 = vector.extract_strided_slice %841 {offsets = [0, 256], sizes = [8, 32], strides = [1, 1]} : vector<8x288xf32> to vector<8x32xf32>
    %957 = arith.addf %955, %956 : vector<8x32xf32>
    %c0_213 = arith.constant 0 : index
    %c0_214 = arith.constant 0 : index
    %958 = vector.load %arg22[%c0_213, %c0_214] : memref<32x32xf32, #tpu.memory_space<vmem>>, vector<32x32xf32>
    %cst_215 = arith.constant dense<0.000000e+00> : vector<8x32xf32>
    %959 = tpu.matmul %954, %958, %cst_215 {dimension_numbers = #tpu.dot_dimension_numbers<[1], [0], [0], [1], [0, 0, 1, 1], [], []>} : vector<8x32xf32>, vector<32x32xf32>, vector<8x32xf32> -> vector<8x32xf32>
    %960 = arith.addf %957, %959 : vector<8x32xf32>
    %961 = vector.extract_strided_slice %960 {offsets = [0, 0], sizes = [8, 16], strides = [1, 1]} : vector<8x32xf32> to vector<8x16xf32>
    %962 = vector.extract_strided_slice %960 {offsets = [0, 16], sizes = [8, 16], strides = [1, 1]} : vector<8x32xf32> to vector<8x16xf32>
    %963 = arith.maximumf %961, %962 : vector<8x16xf32>
    %c0_216 = arith.constant 0 : index
    %c0_217 = arith.constant 0 : index
    %964 = vector.load %arg25[%c0_216, %c0_217] : memref<16x24xf32, #tpu.memory_space<vmem>>, vector<16x24xf32>
    %cst_218 = arith.constant dense<0.000000e+00> : vector<8x24xf32>
    %965 = tpu.matmul %963, %964, %cst_218 {dimension_numbers = #tpu.dot_dimension_numbers<[1], [0], [0], [1], [0, 0, 1, 1], [], []>} : vector<8x16xf32>, vector<16x24xf32>, vector<8x24xf32> -> vector<8x24xf32>
    %c0_219 = arith.constant 0 : index
    %c0_220 = arith.constant 0 : index
    %966 = vector.load %arg26[%c0_219, %c0_220] : memref<1x24xf32, #tpu.memory_space<vmem>>, vector<1x24xf32>
    %967 = vector.broadcast %966 : vector<1x24xf32> to vector<8x24xf32>
    %968 = arith.addf %965, %967 : vector<8x24xf32>
    %cst_221 = arith.constant dense<0xFF800000> : vector<8xf32>
    %969 = vector.multi_reduction <maximumf>, %968, %cst_221 [1] : vector<8x24xf32> to vector<8xf32>
    %970 = vector.shape_cast %969 : vector<8xf32> to vector<8x1xf32>
    %971 = vector.broadcast %970 : vector<8x1xf32> to vector<8x24xf32>
    %972 = arith.subf %968, %971 : vector<8x24xf32>
    %973 = math.exp %972 : vector<8x24xf32>
    %cst_222 = arith.constant dense<0.000000e+00> : vector<8xf32>
    %974 = vector.multi_reduction <add>, %973, %cst_222 [1] : vector<8x24xf32> to vector<8xf32>
    %975 = vector.shape_cast %974 : vector<8xf32> to vector<8x1xf32>
    %976 = math.log %975 : vector<8x1xf32>
    %977 = vector.extract_strided_slice %679 {offsets = [8, 0], sizes = [8, 1], strides = [1, 1]} : vector<48x1xi32> to vector<8x1xi32>
    %978 = tpu.iota {dimensions = array<i32: 1>} : vector<8x24xi32>
    %979 = vector.broadcast %977 : vector<8x1xi32> to vector<8x24xi32>
    %980 = arith.cmpi eq, %978, %979 : vector<8x24xi32>
    %981 = arith.extui %980 : vector<8x24xi1> to vector<8x24xi32>
    %982 = arith.sitofp %981 : vector<8x24xi32> to vector<8x24xf32>
    %983 = arith.mulf %972, %982 : vector<8x24xf32>
    %cst_223 = arith.constant dense<0.000000e+00> : vector<8xf32>
    %984 = vector.multi_reduction <add>, %983, %cst_223 [1] : vector<8x24xf32> to vector<8xf32>
    %985 = vector.shape_cast %984 : vector<8xf32> to vector<8x1xf32>
    %986 = arith.subf %976, %985 : vector<8x1xf32>
    %987 = vector.extract_strided_slice %680 {offsets = [8, 0], sizes = [8, 1], strides = [1, 1]} : vector<48x1xf32> to vector<8x1xf32>
    %988 = arith.mulf %986, %987 : vector<8x1xf32>
    %989 = arith.addf %835, %988 : vector<8x1xf32>
    %990 = vector.extract_strided_slice %678 {offsets = [16, 0], sizes = [8, 16], strides = [1, 1]} : vector<48x16xf32> to vector<8x16xf32>
    %c0_224 = arith.constant 0 : index
    %c0_225 = arith.constant 0 : index
    %991 = vector.load %arg17[%c0_224, %c0_225] : memref<16x288xf32, #tpu.memory_space<vmem>>, vector<16x288xf32>
    %cst_226 = arith.constant dense<0.000000e+00> : vector<8x288xf32>
    %992 = tpu.matmul %990, %991, %cst_226 {dimension_numbers = #tpu.dot_dimension_numbers<[1], [0], [0], [1], [0, 0, 1, 1], [], []>} : vector<8x16xf32>, vector<16x288xf32>, vector<8x288xf32> -> vector<8x288xf32>
    %c0_227 = arith.constant 0 : index
    %c0_228 = arith.constant 0 : index
    %993 = vector.load %arg18[%c0_227, %c0_228] : memref<1x288xf32, #tpu.memory_space<vmem>>, vector<1x288xf32>
    %994 = vector.broadcast %993 : vector<1x288xf32> to vector<8x288xf32>
    %995 = arith.addf %992, %994 : vector<8x288xf32>
    %c0_229 = arith.constant 0 : index
    %c0_230 = arith.constant 0 : index
    %996 = vector.load %arg19[%c0_229, %c0_230] : memref<32x256xf32, #tpu.memory_space<vmem>>, vector<32x256xf32>
    %cst_231 = arith.constant dense<0.000000e+00> : vector<8x256xf32>
    %997 = tpu.matmul %954, %996, %cst_231 {dimension_numbers = #tpu.dot_dimension_numbers<[1], [0], [0], [1], [0, 0, 1, 1], [], []>} : vector<8x32xf32>, vector<32x256xf32>, vector<8x256xf32> -> vector<8x256xf32>
    %998 = vector.extract_strided_slice %995 {offsets = [0, 128], sizes = [8, 128], strides = [1, 1]} : vector<8x288xf32> to vector<8x128xf32>
    %999 = arith.addf %644, %998 : vector<8x128xf32>
    %1000 = vector.extract_strided_slice %997 {offsets = [0, 128], sizes = [8, 128], strides = [1, 1]} : vector<8x256xf32> to vector<8x128xf32>
    %1001 = arith.addf %999, %1000 : vector<8x128xf32>
    %1002 = math.tanh %1001 : vector<8x128xf32>
    %c0_232 = arith.constant 0 : index
    %c0_233 = arith.constant 0 : index
    %1003 = vector.load %arg23[%c0_232, %c0_233] : memref<128x8xf32, #tpu.memory_space<vmem>>, vector<128x8xf32>
    %cst_234 = arith.constant dense<0.000000e+00> : vector<8x8xf32>
    %1004 = tpu.matmul %1002, %1003, %cst_234 {dimension_numbers = #tpu.dot_dimension_numbers<[1], [0], [0], [1], [0, 0, 1, 1], [], []>} : vector<8x128xf32>, vector<128x8xf32>, vector<8x8xf32> -> vector<8x8xf32>
    %c0_235 = arith.constant 0 : index
    %c0_236 = arith.constant 0 : index
    %1005 = vector.load %arg24[%c0_235, %c0_236] : memref<1x1xf32, #tpu.memory_space<vmem>>, vector<1x1xf32>
    %1006 = vector.broadcast %1005 : vector<1x1xf32> to vector<8x8xf32>
    %1007 = arith.addf %1004, %1006 : vector<8x8xf32>
    %cst_237 = arith.constant dense<0xFF800000> : vector<8xf32>
    %1008 = vector.multi_reduction <maximumf>, %1007, %cst_237 [1] : vector<8x8xf32> to vector<8xf32>
    %1009 = vector.shape_cast %1008 : vector<8xf32> to vector<8x1xf32>
    %1010 = vector.broadcast %1009 : vector<8x1xf32> to vector<8x8xf32>
    %1011 = arith.subf %1007, %1010 : vector<8x8xf32>
    %1012 = math.exp %1011 : vector<8x8xf32>
    %1013 = arith.mulf %1012, %0 : vector<8x8xf32>
    %cst_238 = arith.constant dense<0.000000e+00> : vector<8xf32>
    %1014 = vector.multi_reduction <add>, %1013, %cst_238 [1] : vector<8x8xf32> to vector<8xf32>
    %1015 = vector.shape_cast %1014 : vector<8xf32> to vector<8x1xf32>
    %cst_239 = arith.constant 1.000000e-15 : f32
    %1016 = vector.broadcast %cst_239 : f32 to vector<8x1xf32>
    %1017 = arith.addf %1015, %1016 : vector<8x1xf32>
    %1018 = tpu.reciprocal %1017 {approx = true} : vector<8x1xf32> -> vector<8x1xf32>
    %1019 = vector.broadcast %1018 : vector<8x1xf32> to vector<8x8xf32>
    %1020 = arith.mulf %1013, %1019 : vector<8x8xf32>
    %1021 = vector.extract_strided_slice %1020 {offsets = [0, 0], sizes = [8, 1], strides = [1, 1]} : vector<8x8xf32> to vector<8x1xf32>
    %1022 = vector.broadcast %1021 : vector<8x1xf32> to vector<8x16xf32>
    %1023 = arith.mulf %1022, %88 : vector<8x16xf32>
    %1024 = vector.extract_strided_slice %1020 {offsets = [0, 0], sizes = [8, 1], strides = [1, 1]} : vector<8x8xf32> to vector<8x1xf32>
    %1025 = vector.broadcast %1024 : vector<8x1xf32> to vector<8x16xf32>
    %1026 = arith.mulf %1025, %636 : vector<8x16xf32>
    %1027 = vector.extract_strided_slice %1020 {offsets = [0, 1], sizes = [8, 1], strides = [1, 1]} : vector<8x8xf32> to vector<8x1xf32>
    %1028 = vector.broadcast %1027 : vector<8x1xf32> to vector<8x16xf32>
    %1029 = arith.mulf %1028, %168 : vector<8x16xf32>
    %1030 = arith.addf %1023, %1029 : vector<8x16xf32>
    %1031 = vector.extract_strided_slice %1020 {offsets = [0, 1], sizes = [8, 1], strides = [1, 1]} : vector<8x8xf32> to vector<8x1xf32>
    %1032 = vector.broadcast %1031 : vector<8x1xf32> to vector<8x16xf32>
    %1033 = arith.mulf %1032, %570 : vector<8x16xf32>
    %1034 = arith.addf %1026, %1033 : vector<8x16xf32>
    %1035 = vector.extract_strided_slice %1020 {offsets = [0, 2], sizes = [8, 1], strides = [1, 1]} : vector<8x8xf32> to vector<8x1xf32>
    %1036 = vector.broadcast %1035 : vector<8x1xf32> to vector<8x16xf32>
    %1037 = arith.mulf %1036, %248 : vector<8x16xf32>
    %1038 = arith.addf %1030, %1037 : vector<8x16xf32>
    %1039 = vector.extract_strided_slice %1020 {offsets = [0, 2], sizes = [8, 1], strides = [1, 1]} : vector<8x8xf32> to vector<8x1xf32>
    %1040 = vector.broadcast %1039 : vector<8x1xf32> to vector<8x16xf32>
    %1041 = arith.mulf %1040, %490 : vector<8x16xf32>
    %1042 = arith.addf %1034, %1041 : vector<8x16xf32>
    %1043 = vector.extract_strided_slice %1020 {offsets = [0, 3], sizes = [8, 1], strides = [1, 1]} : vector<8x8xf32> to vector<8x1xf32>
    %1044 = vector.broadcast %1043 : vector<8x1xf32> to vector<8x16xf32>
    %1045 = arith.mulf %1044, %328 : vector<8x16xf32>
    %1046 = arith.addf %1038, %1045 : vector<8x16xf32>
    %1047 = vector.extract_strided_slice %1020 {offsets = [0, 3], sizes = [8, 1], strides = [1, 1]} : vector<8x8xf32> to vector<8x1xf32>
    %1048 = vector.broadcast %1047 : vector<8x1xf32> to vector<8x16xf32>
    %1049 = arith.mulf %1048, %410 : vector<8x16xf32>
    %1050 = arith.addf %1042, %1049 : vector<8x16xf32>
    %1051 = vector.extract_strided_slice %1020 {offsets = [0, 4], sizes = [8, 1], strides = [1, 1]} : vector<8x8xf32> to vector<8x1xf32>
    %1052 = vector.broadcast %1051 : vector<8x1xf32> to vector<8x16xf32>
    %1053 = arith.mulf %1052, %408 : vector<8x16xf32>
    %1054 = arith.addf %1046, %1053 : vector<8x16xf32>
    %1055 = vector.extract_strided_slice %1020 {offsets = [0, 4], sizes = [8, 1], strides = [1, 1]} : vector<8x8xf32> to vector<8x1xf32>
    %1056 = vector.broadcast %1055 : vector<8x1xf32> to vector<8x16xf32>
    %1057 = arith.mulf %1056, %330 : vector<8x16xf32>
    %1058 = arith.addf %1050, %1057 : vector<8x16xf32>
    %1059 = vector.extract_strided_slice %1020 {offsets = [0, 5], sizes = [8, 1], strides = [1, 1]} : vector<8x8xf32> to vector<8x1xf32>
    %1060 = vector.broadcast %1059 : vector<8x1xf32> to vector<8x16xf32>
    %1061 = arith.mulf %1060, %488 : vector<8x16xf32>
    %1062 = arith.addf %1054, %1061 : vector<8x16xf32>
    %1063 = vector.extract_strided_slice %1020 {offsets = [0, 5], sizes = [8, 1], strides = [1, 1]} : vector<8x8xf32> to vector<8x1xf32>
    %1064 = vector.broadcast %1063 : vector<8x1xf32> to vector<8x16xf32>
    %1065 = arith.mulf %1064, %250 : vector<8x16xf32>
    %1066 = arith.addf %1058, %1065 : vector<8x16xf32>
    %1067 = vector.extract_strided_slice %1020 {offsets = [0, 6], sizes = [8, 1], strides = [1, 1]} : vector<8x8xf32> to vector<8x1xf32>
    %1068 = vector.broadcast %1067 : vector<8x1xf32> to vector<8x16xf32>
    %1069 = arith.mulf %1068, %568 : vector<8x16xf32>
    %1070 = arith.addf %1062, %1069 : vector<8x16xf32>
    %1071 = vector.extract_strided_slice %1020 {offsets = [0, 6], sizes = [8, 1], strides = [1, 1]} : vector<8x8xf32> to vector<8x1xf32>
    %1072 = vector.broadcast %1071 : vector<8x1xf32> to vector<8x16xf32>
    %1073 = arith.mulf %1072, %170 : vector<8x16xf32>
    %1074 = arith.addf %1066, %1073 : vector<8x16xf32>
    %1075 = vector.extract_strided_slice %1020 {offsets = [0, 7], sizes = [8, 1], strides = [1, 1]} : vector<8x8xf32> to vector<8x1xf32>
    %1076 = vector.broadcast %1075 : vector<8x1xf32> to vector<8x16xf32>
    %1077 = arith.mulf %1076, %634 : vector<8x16xf32>
    %1078 = arith.addf %1070, %1077 : vector<8x16xf32>
    %1079 = vector.extract_strided_slice %1020 {offsets = [0, 7], sizes = [8, 1], strides = [1, 1]} : vector<8x8xf32> to vector<8x1xf32>
    %1080 = vector.broadcast %1079 : vector<8x1xf32> to vector<8x16xf32>
    %1081 = arith.mulf %1080, %90 : vector<8x16xf32>
    %1082 = arith.addf %1074, %1081 : vector<8x16xf32>
    %c0_240 = arith.constant 0 : index
    %c0_241 = arith.constant 0 : index
    %1083 = vector.load %arg20[%c0_240, %c0_241] : memref<16x160xf32, #tpu.memory_space<vmem>>, vector<16x160xf32>
    %cst_242 = arith.constant dense<0.000000e+00> : vector<8x160xf32>
    %1084 = tpu.matmul %1078, %1083, %cst_242 {dimension_numbers = #tpu.dot_dimension_numbers<[1], [0], [0], [1], [0, 0, 1, 1], [], []>} : vector<8x16xf32>, vector<16x160xf32>, vector<8x160xf32> -> vector<8x160xf32>
    %c0_243 = arith.constant 0 : index
    %c0_244 = arith.constant 0 : index
    %1085 = vector.load %arg21[%c0_243, %c0_244] : memref<16x160xf32, #tpu.memory_space<vmem>>, vector<16x160xf32>
    %cst_245 = arith.constant dense<0.000000e+00> : vector<8x160xf32>
    %1086 = tpu.matmul %1082, %1085, %cst_245 {dimension_numbers = #tpu.dot_dimension_numbers<[1], [0], [0], [1], [0, 0, 1, 1], [], []>} : vector<8x16xf32>, vector<16x160xf32>, vector<8x160xf32> -> vector<8x160xf32>
    %1087 = arith.addf %1084, %1086 : vector<8x160xf32>
    %1088 = vector.extract_strided_slice %995 {offsets = [0, 0], sizes = [8, 128], strides = [1, 1]} : vector<8x288xf32> to vector<8x128xf32>
    %1089 = vector.extract_strided_slice %997 {offsets = [0, 0], sizes = [8, 128], strides = [1, 1]} : vector<8x256xf32> to vector<8x128xf32>
    %1090 = arith.addf %1088, %1089 : vector<8x128xf32>
    %1091 = vector.extract_strided_slice %1087 {offsets = [0, 0], sizes = [8, 128], strides = [1, 1]} : vector<8x160xf32> to vector<8x128xf32>
    %1092 = arith.addf %1090, %1091 : vector<8x128xf32>
    %1093 = vector.extract_strided_slice %1092 {offsets = [0, 0], sizes = [8, 96], strides = [1, 1]} : vector<8x128xf32> to vector<8x96xf32>
    %1094 = arith.negf %1093 : vector<8x96xf32>
    %1095 = math.exp %1094 : vector<8x96xf32>
    %cst_246 = arith.constant 1.000000e+00 : f32
    %1096 = vector.broadcast %cst_246 : f32 to vector<8x96xf32>
    %1097 = arith.addf %1096, %1095 : vector<8x96xf32>
    %1098 = arith.divf %1096, %1097 : vector<8x96xf32>
    %1099 = vector.extract_strided_slice %1098 {offsets = [0, 0], sizes = [8, 32], strides = [1, 1]} : vector<8x96xf32> to vector<8x32xf32>
    %1100 = vector.extract_strided_slice %1098 {offsets = [0, 32], sizes = [8, 32], strides = [1, 1]} : vector<8x96xf32> to vector<8x32xf32>
    %1101 = vector.extract_strided_slice %1098 {offsets = [0, 64], sizes = [8, 32], strides = [1, 1]} : vector<8x96xf32> to vector<8x32xf32>
    %1102 = vector.extract_strided_slice %1092 {offsets = [0, 96], sizes = [8, 32], strides = [1, 1]} : vector<8x128xf32> to vector<8x32xf32>
    %1103 = math.tanh %1102 : vector<8x32xf32>
    %1104 = arith.mulf %1100, %952 : vector<8x32xf32>
    %1105 = arith.mulf %1099, %1103 : vector<8x32xf32>
    %1106 = arith.addf %1104, %1105 : vector<8x32xf32>
    %1107 = math.tanh %1106 : vector<8x32xf32>
    %1108 = arith.mulf %1101, %1107 : vector<8x32xf32>
    %1109 = vector.extract_strided_slice %1087 {offsets = [0, 128], sizes = [8, 32], strides = [1, 1]} : vector<8x160xf32> to vector<8x32xf32>
    %1110 = vector.extract_strided_slice %995 {offsets = [0, 256], sizes = [8, 32], strides = [1, 1]} : vector<8x288xf32> to vector<8x32xf32>
    %1111 = arith.addf %1109, %1110 : vector<8x32xf32>
    %c0_247 = arith.constant 0 : index
    %c0_248 = arith.constant 0 : index
    %1112 = vector.load %arg22[%c0_247, %c0_248] : memref<32x32xf32, #tpu.memory_space<vmem>>, vector<32x32xf32>
    %cst_249 = arith.constant dense<0.000000e+00> : vector<8x32xf32>
    %1113 = tpu.matmul %1108, %1112, %cst_249 {dimension_numbers = #tpu.dot_dimension_numbers<[1], [0], [0], [1], [0, 0, 1, 1], [], []>} : vector<8x32xf32>, vector<32x32xf32>, vector<8x32xf32> -> vector<8x32xf32>
    %1114 = arith.addf %1111, %1113 : vector<8x32xf32>
    %1115 = vector.extract_strided_slice %1114 {offsets = [0, 0], sizes = [8, 16], strides = [1, 1]} : vector<8x32xf32> to vector<8x16xf32>
    %1116 = vector.extract_strided_slice %1114 {offsets = [0, 16], sizes = [8, 16], strides = [1, 1]} : vector<8x32xf32> to vector<8x16xf32>
    %1117 = arith.maximumf %1115, %1116 : vector<8x16xf32>
    %c0_250 = arith.constant 0 : index
    %c0_251 = arith.constant 0 : index
    %1118 = vector.load %arg25[%c0_250, %c0_251] : memref<16x24xf32, #tpu.memory_space<vmem>>, vector<16x24xf32>
    %cst_252 = arith.constant dense<0.000000e+00> : vector<8x24xf32>
    %1119 = tpu.matmul %1117, %1118, %cst_252 {dimension_numbers = #tpu.dot_dimension_numbers<[1], [0], [0], [1], [0, 0, 1, 1], [], []>} : vector<8x16xf32>, vector<16x24xf32>, vector<8x24xf32> -> vector<8x24xf32>
    %c0_253 = arith.constant 0 : index
    %c0_254 = arith.constant 0 : index
    %1120 = vector.load %arg26[%c0_253, %c0_254] : memref<1x24xf32, #tpu.memory_space<vmem>>, vector<1x24xf32>
    %1121 = vector.broadcast %1120 : vector<1x24xf32> to vector<8x24xf32>
    %1122 = arith.addf %1119, %1121 : vector<8x24xf32>
    %cst_255 = arith.constant dense<0xFF800000> : vector<8xf32>
    %1123 = vector.multi_reduction <maximumf>, %1122, %cst_255 [1] : vector<8x24xf32> to vector<8xf32>
    %1124 = vector.shape_cast %1123 : vector<8xf32> to vector<8x1xf32>
    %1125 = vector.broadcast %1124 : vector<8x1xf32> to vector<8x24xf32>
    %1126 = arith.subf %1122, %1125 : vector<8x24xf32>
    %1127 = math.exp %1126 : vector<8x24xf32>
    %cst_256 = arith.constant dense<0.000000e+00> : vector<8xf32>
    %1128 = vector.multi_reduction <add>, %1127, %cst_256 [1] : vector<8x24xf32> to vector<8xf32>
    %1129 = vector.shape_cast %1128 : vector<8xf32> to vector<8x1xf32>
    %1130 = math.log %1129 : vector<8x1xf32>
    %1131 = vector.extract_strided_slice %679 {offsets = [16, 0], sizes = [8, 1], strides = [1, 1]} : vector<48x1xi32> to vector<8x1xi32>
    %1132 = tpu.iota {dimensions = array<i32: 1>} : vector<8x24xi32>
    %1133 = vector.broadcast %1131 : vector<8x1xi32> to vector<8x24xi32>
    %1134 = arith.cmpi eq, %1132, %1133 : vector<8x24xi32>
    %1135 = arith.extui %1134 : vector<8x24xi1> to vector<8x24xi32>
    %1136 = arith.sitofp %1135 : vector<8x24xi32> to vector<8x24xf32>
    %1137 = arith.mulf %1126, %1136 : vector<8x24xf32>
    %cst_257 = arith.constant dense<0.000000e+00> : vector<8xf32>
    %1138 = vector.multi_reduction <add>, %1137, %cst_257 [1] : vector<8x24xf32> to vector<8xf32>
    %1139 = vector.shape_cast %1138 : vector<8xf32> to vector<8x1xf32>
    %1140 = arith.subf %1130, %1139 : vector<8x1xf32>
    %1141 = vector.extract_strided_slice %680 {offsets = [16, 0], sizes = [8, 1], strides = [1, 1]} : vector<48x1xf32> to vector<8x1xf32>
    %1142 = arith.mulf %1140, %1141 : vector<8x1xf32>
    %1143 = arith.addf %989, %1142 : vector<8x1xf32>
    %1144 = vector.extract_strided_slice %678 {offsets = [24, 0], sizes = [8, 16], strides = [1, 1]} : vector<48x16xf32> to vector<8x16xf32>
    %c0_258 = arith.constant 0 : index
    %c0_259 = arith.constant 0 : index
    %1145 = vector.load %arg17[%c0_258, %c0_259] : memref<16x288xf32, #tpu.memory_space<vmem>>, vector<16x288xf32>
    %cst_260 = arith.constant dense<0.000000e+00> : vector<8x288xf32>
    %1146 = tpu.matmul %1144, %1145, %cst_260 {dimension_numbers = #tpu.dot_dimension_numbers<[1], [0], [0], [1], [0, 0, 1, 1], [], []>} : vector<8x16xf32>, vector<16x288xf32>, vector<8x288xf32> -> vector<8x288xf32>
    %c0_261 = arith.constant 0 : index
    %c0_262 = arith.constant 0 : index
    %1147 = vector.load %arg18[%c0_261, %c0_262] : memref<1x288xf32, #tpu.memory_space<vmem>>, vector<1x288xf32>
    %1148 = vector.broadcast %1147 : vector<1x288xf32> to vector<8x288xf32>
    %1149 = arith.addf %1146, %1148 : vector<8x288xf32>
    %c0_263 = arith.constant 0 : index
    %c0_264 = arith.constant 0 : index
    %1150 = vector.load %arg19[%c0_263, %c0_264] : memref<32x256xf32, #tpu.memory_space<vmem>>, vector<32x256xf32>
    %cst_265 = arith.constant dense<0.000000e+00> : vector<8x256xf32>
    %1151 = tpu.matmul %1108, %1150, %cst_265 {dimension_numbers = #tpu.dot_dimension_numbers<[1], [0], [0], [1], [0, 0, 1, 1], [], []>} : vector<8x32xf32>, vector<32x256xf32>, vector<8x256xf32> -> vector<8x256xf32>
    %1152 = vector.extract_strided_slice %1149 {offsets = [0, 128], sizes = [8, 128], strides = [1, 1]} : vector<8x288xf32> to vector<8x128xf32>
    %1153 = arith.addf %644, %1152 : vector<8x128xf32>
    %1154 = vector.extract_strided_slice %1151 {offsets = [0, 128], sizes = [8, 128], strides = [1, 1]} : vector<8x256xf32> to vector<8x128xf32>
    %1155 = arith.addf %1153, %1154 : vector<8x128xf32>
    %1156 = math.tanh %1155 : vector<8x128xf32>
    %c0_266 = arith.constant 0 : index
    %c0_267 = arith.constant 0 : index
    %1157 = vector.load %arg23[%c0_266, %c0_267] : memref<128x8xf32, #tpu.memory_space<vmem>>, vector<128x8xf32>
    %cst_268 = arith.constant dense<0.000000e+00> : vector<8x8xf32>
    %1158 = tpu.matmul %1156, %1157, %cst_268 {dimension_numbers = #tpu.dot_dimension_numbers<[1], [0], [0], [1], [0, 0, 1, 1], [], []>} : vector<8x128xf32>, vector<128x8xf32>, vector<8x8xf32> -> vector<8x8xf32>
    %c0_269 = arith.constant 0 : index
    %c0_270 = arith.constant 0 : index
    %1159 = vector.load %arg24[%c0_269, %c0_270] : memref<1x1xf32, #tpu.memory_space<vmem>>, vector<1x1xf32>
    %1160 = vector.broadcast %1159 : vector<1x1xf32> to vector<8x8xf32>
    %1161 = arith.addf %1158, %1160 : vector<8x8xf32>
    %cst_271 = arith.constant dense<0xFF800000> : vector<8xf32>
    %1162 = vector.multi_reduction <maximumf>, %1161, %cst_271 [1] : vector<8x8xf32> to vector<8xf32>
    %1163 = vector.shape_cast %1162 : vector<8xf32> to vector<8x1xf32>
    %1164 = vector.broadcast %1163 : vector<8x1xf32> to vector<8x8xf32>
    %1165 = arith.subf %1161, %1164 : vector<8x8xf32>
    %1166 = math.exp %1165 : vector<8x8xf32>
    %1167 = arith.mulf %1166, %0 : vector<8x8xf32>
    %cst_272 = arith.constant dense<0.000000e+00> : vector<8xf32>
    %1168 = vector.multi_reduction <add>, %1167, %cst_272 [1] : vector<8x8xf32> to vector<8xf32>
    %1169 = vector.shape_cast %1168 : vector<8xf32> to vector<8x1xf32>
    %cst_273 = arith.constant 1.000000e-15 : f32
    %1170 = vector.broadcast %cst_273 : f32 to vector<8x1xf32>
    %1171 = arith.addf %1169, %1170 : vector<8x1xf32>
    %1172 = tpu.reciprocal %1171 {approx = true} : vector<8x1xf32> -> vector<8x1xf32>
    %1173 = vector.broadcast %1172 : vector<8x1xf32> to vector<8x8xf32>
    %1174 = arith.mulf %1167, %1173 : vector<8x8xf32>
    %1175 = vector.extract_strided_slice %1174 {offsets = [0, 0], sizes = [8, 1], strides = [1, 1]} : vector<8x8xf32> to vector<8x1xf32>
    %1176 = vector.broadcast %1175 : vector<8x1xf32> to vector<8x16xf32>
    %1177 = arith.mulf %1176, %88 : vector<8x16xf32>
    %1178 = vector.extract_strided_slice %1174 {offsets = [0, 0], sizes = [8, 1], strides = [1, 1]} : vector<8x8xf32> to vector<8x1xf32>
    %1179 = vector.broadcast %1178 : vector<8x1xf32> to vector<8x16xf32>
    %1180 = arith.mulf %1179, %636 : vector<8x16xf32>
    %1181 = vector.extract_strided_slice %1174 {offsets = [0, 1], sizes = [8, 1], strides = [1, 1]} : vector<8x8xf32> to vector<8x1xf32>
    %1182 = vector.broadcast %1181 : vector<8x1xf32> to vector<8x16xf32>
    %1183 = arith.mulf %1182, %168 : vector<8x16xf32>
    %1184 = arith.addf %1177, %1183 : vector<8x16xf32>
    %1185 = vector.extract_strided_slice %1174 {offsets = [0, 1], sizes = [8, 1], strides = [1, 1]} : vector<8x8xf32> to vector<8x1xf32>
    %1186 = vector.broadcast %1185 : vector<8x1xf32> to vector<8x16xf32>
    %1187 = arith.mulf %1186, %570 : vector<8x16xf32>
    %1188 = arith.addf %1180, %1187 : vector<8x16xf32>
    %1189 = vector.extract_strided_slice %1174 {offsets = [0, 2], sizes = [8, 1], strides = [1, 1]} : vector<8x8xf32> to vector<8x1xf32>
    %1190 = vector.broadcast %1189 : vector<8x1xf32> to vector<8x16xf32>
    %1191 = arith.mulf %1190, %248 : vector<8x16xf32>
    %1192 = arith.addf %1184, %1191 : vector<8x16xf32>
    %1193 = vector.extract_strided_slice %1174 {offsets = [0, 2], sizes = [8, 1], strides = [1, 1]} : vector<8x8xf32> to vector<8x1xf32>
    %1194 = vector.broadcast %1193 : vector<8x1xf32> to vector<8x16xf32>
    %1195 = arith.mulf %1194, %490 : vector<8x16xf32>
    %1196 = arith.addf %1188, %1195 : vector<8x16xf32>
    %1197 = vector.extract_strided_slice %1174 {offsets = [0, 3], sizes = [8, 1], strides = [1, 1]} : vector<8x8xf32> to vector<8x1xf32>
    %1198 = vector.broadcast %1197 : vector<8x1xf32> to vector<8x16xf32>
    %1199 = arith.mulf %1198, %328 : vector<8x16xf32>
    %1200 = arith.addf %1192, %1199 : vector<8x16xf32>
    %1201 = vector.extract_strided_slice %1174 {offsets = [0, 3], sizes = [8, 1], strides = [1, 1]} : vector<8x8xf32> to vector<8x1xf32>
    %1202 = vector.broadcast %1201 : vector<8x1xf32> to vector<8x16xf32>
    %1203 = arith.mulf %1202, %410 : vector<8x16xf32>
    %1204 = arith.addf %1196, %1203 : vector<8x16xf32>
    %1205 = vector.extract_strided_slice %1174 {offsets = [0, 4], sizes = [8, 1], strides = [1, 1]} : vector<8x8xf32> to vector<8x1xf32>
    %1206 = vector.broadcast %1205 : vector<8x1xf32> to vector<8x16xf32>
    %1207 = arith.mulf %1206, %408 : vector<8x16xf32>
    %1208 = arith.addf %1200, %1207 : vector<8x16xf32>
    %1209 = vector.extract_strided_slice %1174 {offsets = [0, 4], sizes = [8, 1], strides = [1, 1]} : vector<8x8xf32> to vector<8x1xf32>
    %1210 = vector.broadcast %1209 : vector<8x1xf32> to vector<8x16xf32>
    %1211 = arith.mulf %1210, %330 : vector<8x16xf32>
    %1212 = arith.addf %1204, %1211 : vector<8x16xf32>
    %1213 = vector.extract_strided_slice %1174 {offsets = [0, 5], sizes = [8, 1], strides = [1, 1]} : vector<8x8xf32> to vector<8x1xf32>
    %1214 = vector.broadcast %1213 : vector<8x1xf32> to vector<8x16xf32>
    %1215 = arith.mulf %1214, %488 : vector<8x16xf32>
    %1216 = arith.addf %1208, %1215 : vector<8x16xf32>
    %1217 = vector.extract_strided_slice %1174 {offsets = [0, 5], sizes = [8, 1], strides = [1, 1]} : vector<8x8xf32> to vector<8x1xf32>
    %1218 = vector.broadcast %1217 : vector<8x1xf32> to vector<8x16xf32>
    %1219 = arith.mulf %1218, %250 : vector<8x16xf32>
    %1220 = arith.addf %1212, %1219 : vector<8x16xf32>
    %1221 = vector.extract_strided_slice %1174 {offsets = [0, 6], sizes = [8, 1], strides = [1, 1]} : vector<8x8xf32> to vector<8x1xf32>
    %1222 = vector.broadcast %1221 : vector<8x1xf32> to vector<8x16xf32>
    %1223 = arith.mulf %1222, %568 : vector<8x16xf32>
    %1224 = arith.addf %1216, %1223 : vector<8x16xf32>
    %1225 = vector.extract_strided_slice %1174 {offsets = [0, 6], sizes = [8, 1], strides = [1, 1]} : vector<8x8xf32> to vector<8x1xf32>
    %1226 = vector.broadcast %1225 : vector<8x1xf32> to vector<8x16xf32>
    %1227 = arith.mulf %1226, %170 : vector<8x16xf32>
    %1228 = arith.addf %1220, %1227 : vector<8x16xf32>
    %1229 = vector.extract_strided_slice %1174 {offsets = [0, 7], sizes = [8, 1], strides = [1, 1]} : vector<8x8xf32> to vector<8x1xf32>
    %1230 = vector.broadcast %1229 : vector<8x1xf32> to vector<8x16xf32>
    %1231 = arith.mulf %1230, %634 : vector<8x16xf32>
    %1232 = arith.addf %1224, %1231 : vector<8x16xf32>
    %1233 = vector.extract_strided_slice %1174 {offsets = [0, 7], sizes = [8, 1], strides = [1, 1]} : vector<8x8xf32> to vector<8x1xf32>
    %1234 = vector.broadcast %1233 : vector<8x1xf32> to vector<8x16xf32>
    %1235 = arith.mulf %1234, %90 : vector<8x16xf32>
    %1236 = arith.addf %1228, %1235 : vector<8x16xf32>
    %c0_274 = arith.constant 0 : index
    %c0_275 = arith.constant 0 : index
    %1237 = vector.load %arg20[%c0_274, %c0_275] : memref<16x160xf32, #tpu.memory_space<vmem>>, vector<16x160xf32>
    %cst_276 = arith.constant dense<0.000000e+00> : vector<8x160xf32>
    %1238 = tpu.matmul %1232, %1237, %cst_276 {dimension_numbers = #tpu.dot_dimension_numbers<[1], [0], [0], [1], [0, 0, 1, 1], [], []>} : vector<8x16xf32>, vector<16x160xf32>, vector<8x160xf32> -> vector<8x160xf32>
    %c0_277 = arith.constant 0 : index
    %c0_278 = arith.constant 0 : index
    %1239 = vector.load %arg21[%c0_277, %c0_278] : memref<16x160xf32, #tpu.memory_space<vmem>>, vector<16x160xf32>
    %cst_279 = arith.constant dense<0.000000e+00> : vector<8x160xf32>
    %1240 = tpu.matmul %1236, %1239, %cst_279 {dimension_numbers = #tpu.dot_dimension_numbers<[1], [0], [0], [1], [0, 0, 1, 1], [], []>} : vector<8x16xf32>, vector<16x160xf32>, vector<8x160xf32> -> vector<8x160xf32>
    %1241 = arith.addf %1238, %1240 : vector<8x160xf32>
    %1242 = vector.extract_strided_slice %1149 {offsets = [0, 0], sizes = [8, 128], strides = [1, 1]} : vector<8x288xf32> to vector<8x128xf32>
    %1243 = vector.extract_strided_slice %1151 {offsets = [0, 0], sizes = [8, 128], strides = [1, 1]} : vector<8x256xf32> to vector<8x128xf32>
    %1244 = arith.addf %1242, %1243 : vector<8x128xf32>
    %1245 = vector.extract_strided_slice %1241 {offsets = [0, 0], sizes = [8, 128], strides = [1, 1]} : vector<8x160xf32> to vector<8x128xf32>
    %1246 = arith.addf %1244, %1245 : vector<8x128xf32>
    %1247 = vector.extract_strided_slice %1246 {offsets = [0, 0], sizes = [8, 96], strides = [1, 1]} : vector<8x128xf32> to vector<8x96xf32>
    %1248 = arith.negf %1247 : vector<8x96xf32>
    %1249 = math.exp %1248 : vector<8x96xf32>
    %cst_280 = arith.constant 1.000000e+00 : f32
    %1250 = vector.broadcast %cst_280 : f32 to vector<8x96xf32>
    %1251 = arith.addf %1250, %1249 : vector<8x96xf32>
    %1252 = arith.divf %1250, %1251 : vector<8x96xf32>
    %1253 = vector.extract_strided_slice %1252 {offsets = [0, 0], sizes = [8, 32], strides = [1, 1]} : vector<8x96xf32> to vector<8x32xf32>
    %1254 = vector.extract_strided_slice %1252 {offsets = [0, 32], sizes = [8, 32], strides = [1, 1]} : vector<8x96xf32> to vector<8x32xf32>
    %1255 = vector.extract_strided_slice %1252 {offsets = [0, 64], sizes = [8, 32], strides = [1, 1]} : vector<8x96xf32> to vector<8x32xf32>
    %1256 = vector.extract_strided_slice %1246 {offsets = [0, 96], sizes = [8, 32], strides = [1, 1]} : vector<8x128xf32> to vector<8x32xf32>
    %1257 = math.tanh %1256 : vector<8x32xf32>
    %1258 = arith.mulf %1254, %1106 : vector<8x32xf32>
    %1259 = arith.mulf %1253, %1257 : vector<8x32xf32>
    %1260 = arith.addf %1258, %1259 : vector<8x32xf32>
    %1261 = math.tanh %1260 : vector<8x32xf32>
    %1262 = arith.mulf %1255, %1261 : vector<8x32xf32>
    %1263 = vector.extract_strided_slice %1241 {offsets = [0, 128], sizes = [8, 32], strides = [1, 1]} : vector<8x160xf32> to vector<8x32xf32>
    %1264 = vector.extract_strided_slice %1149 {offsets = [0, 256], sizes = [8, 32], strides = [1, 1]} : vector<8x288xf32> to vector<8x32xf32>
    %1265 = arith.addf %1263, %1264 : vector<8x32xf32>
    %c0_281 = arith.constant 0 : index
    %c0_282 = arith.constant 0 : index
    %1266 = vector.load %arg22[%c0_281, %c0_282] : memref<32x32xf32, #tpu.memory_space<vmem>>, vector<32x32xf32>
    %cst_283 = arith.constant dense<0.000000e+00> : vector<8x32xf32>
    %1267 = tpu.matmul %1262, %1266, %cst_283 {dimension_numbers = #tpu.dot_dimension_numbers<[1], [0], [0], [1], [0, 0, 1, 1], [], []>} : vector<8x32xf32>, vector<32x32xf32>, vector<8x32xf32> -> vector<8x32xf32>
    %1268 = arith.addf %1265, %1267 : vector<8x32xf32>
    %1269 = vector.extract_strided_slice %1268 {offsets = [0, 0], sizes = [8, 16], strides = [1, 1]} : vector<8x32xf32> to vector<8x16xf32>
    %1270 = vector.extract_strided_slice %1268 {offsets = [0, 16], sizes = [8, 16], strides = [1, 1]} : vector<8x32xf32> to vector<8x16xf32>
    %1271 = arith.maximumf %1269, %1270 : vector<8x16xf32>
    %c0_284 = arith.constant 0 : index
    %c0_285 = arith.constant 0 : index
    %1272 = vector.load %arg25[%c0_284, %c0_285] : memref<16x24xf32, #tpu.memory_space<vmem>>, vector<16x24xf32>
    %cst_286 = arith.constant dense<0.000000e+00> : vector<8x24xf32>
    %1273 = tpu.matmul %1271, %1272, %cst_286 {dimension_numbers = #tpu.dot_dimension_numbers<[1], [0], [0], [1], [0, 0, 1, 1], [], []>} : vector<8x16xf32>, vector<16x24xf32>, vector<8x24xf32> -> vector<8x24xf32>
    %c0_287 = arith.constant 0 : index
    %c0_288 = arith.constant 0 : index
    %1274 = vector.load %arg26[%c0_287, %c0_288] : memref<1x24xf32, #tpu.memory_space<vmem>>, vector<1x24xf32>
    %1275 = vector.broadcast %1274 : vector<1x24xf32> to vector<8x24xf32>
    %1276 = arith.addf %1273, %1275 : vector<8x24xf32>
    %cst_289 = arith.constant dense<0xFF800000> : vector<8xf32>
    %1277 = vector.multi_reduction <maximumf>, %1276, %cst_289 [1] : vector<8x24xf32> to vector<8xf32>
    %1278 = vector.shape_cast %1277 : vector<8xf32> to vector<8x1xf32>
    %1279 = vector.broadcast %1278 : vector<8x1xf32> to vector<8x24xf32>
    %1280 = arith.subf %1276, %1279 : vector<8x24xf32>
    %1281 = math.exp %1280 : vector<8x24xf32>
    %cst_290 = arith.constant dense<0.000000e+00> : vector<8xf32>
    %1282 = vector.multi_reduction <add>, %1281, %cst_290 [1] : vector<8x24xf32> to vector<8xf32>
    %1283 = vector.shape_cast %1282 : vector<8xf32> to vector<8x1xf32>
    %1284 = math.log %1283 : vector<8x1xf32>
    %1285 = vector.extract_strided_slice %679 {offsets = [24, 0], sizes = [8, 1], strides = [1, 1]} : vector<48x1xi32> to vector<8x1xi32>
    %1286 = tpu.iota {dimensions = array<i32: 1>} : vector<8x24xi32>
    %1287 = vector.broadcast %1285 : vector<8x1xi32> to vector<8x24xi32>
    %1288 = arith.cmpi eq, %1286, %1287 : vector<8x24xi32>
    %1289 = arith.extui %1288 : vector<8x24xi1> to vector<8x24xi32>
    %1290 = arith.sitofp %1289 : vector<8x24xi32> to vector<8x24xf32>
    %1291 = arith.mulf %1280, %1290 : vector<8x24xf32>
    %cst_291 = arith.constant dense<0.000000e+00> : vector<8xf32>
    %1292 = vector.multi_reduction <add>, %1291, %cst_291 [1] : vector<8x24xf32> to vector<8xf32>
    %1293 = vector.shape_cast %1292 : vector<8xf32> to vector<8x1xf32>
    %1294 = arith.subf %1284, %1293 : vector<8x1xf32>
    %1295 = vector.extract_strided_slice %680 {offsets = [24, 0], sizes = [8, 1], strides = [1, 1]} : vector<48x1xf32> to vector<8x1xf32>
    %1296 = arith.mulf %1294, %1295 : vector<8x1xf32>
    %1297 = arith.addf %1143, %1296 : vector<8x1xf32>
    %1298 = vector.extract_strided_slice %678 {offsets = [32, 0], sizes = [8, 16], strides = [1, 1]} : vector<48x16xf32> to vector<8x16xf32>
    %c0_292 = arith.constant 0 : index
    %c0_293 = arith.constant 0 : index
    %1299 = vector.load %arg17[%c0_292, %c0_293] : memref<16x288xf32, #tpu.memory_space<vmem>>, vector<16x288xf32>
    %cst_294 = arith.constant dense<0.000000e+00> : vector<8x288xf32>
    %1300 = tpu.matmul %1298, %1299, %cst_294 {dimension_numbers = #tpu.dot_dimension_numbers<[1], [0], [0], [1], [0, 0, 1, 1], [], []>} : vector<8x16xf32>, vector<16x288xf32>, vector<8x288xf32> -> vector<8x288xf32>
    %c0_295 = arith.constant 0 : index
    %c0_296 = arith.constant 0 : index
    %1301 = vector.load %arg18[%c0_295, %c0_296] : memref<1x288xf32, #tpu.memory_space<vmem>>, vector<1x288xf32>
    %1302 = vector.broadcast %1301 : vector<1x288xf32> to vector<8x288xf32>
    %1303 = arith.addf %1300, %1302 : vector<8x288xf32>
    %c0_297 = arith.constant 0 : index
    %c0_298 = arith.constant 0 : index
    %1304 = vector.load %arg19[%c0_297, %c0_298] : memref<32x256xf32, #tpu.memory_space<vmem>>, vector<32x256xf32>
    %cst_299 = arith.constant dense<0.000000e+00> : vector<8x256xf32>
    %1305 = tpu.matmul %1262, %1304, %cst_299 {dimension_numbers = #tpu.dot_dimension_numbers<[1], [0], [0], [1], [0, 0, 1, 1], [], []>} : vector<8x32xf32>, vector<32x256xf32>, vector<8x256xf32> -> vector<8x256xf32>
    %1306 = vector.extract_strided_slice %1303 {offsets = [0, 128], sizes = [8, 128], strides = [1, 1]} : vector<8x288xf32> to vector<8x128xf32>
    %1307 = arith.addf %644, %1306 : vector<8x128xf32>
    %1308 = vector.extract_strided_slice %1305 {offsets = [0, 128], sizes = [8, 128], strides = [1, 1]} : vector<8x256xf32> to vector<8x128xf32>
    %1309 = arith.addf %1307, %1308 : vector<8x128xf32>
    %1310 = math.tanh %1309 : vector<8x128xf32>
    %c0_300 = arith.constant 0 : index
    %c0_301 = arith.constant 0 : index
    %1311 = vector.load %arg23[%c0_300, %c0_301] : memref<128x8xf32, #tpu.memory_space<vmem>>, vector<128x8xf32>
    %cst_302 = arith.constant dense<0.000000e+00> : vector<8x8xf32>
    %1312 = tpu.matmul %1310, %1311, %cst_302 {dimension_numbers = #tpu.dot_dimension_numbers<[1], [0], [0], [1], [0, 0, 1, 1], [], []>} : vector<8x128xf32>, vector<128x8xf32>, vector<8x8xf32> -> vector<8x8xf32>
    %c0_303 = arith.constant 0 : index
    %c0_304 = arith.constant 0 : index
    %1313 = vector.load %arg24[%c0_303, %c0_304] : memref<1x1xf32, #tpu.memory_space<vmem>>, vector<1x1xf32>
    %1314 = vector.broadcast %1313 : vector<1x1xf32> to vector<8x8xf32>
    %1315 = arith.addf %1312, %1314 : vector<8x8xf32>
    %cst_305 = arith.constant dense<0xFF800000> : vector<8xf32>
    %1316 = vector.multi_reduction <maximumf>, %1315, %cst_305 [1] : vector<8x8xf32> to vector<8xf32>
    %1317 = vector.shape_cast %1316 : vector<8xf32> to vector<8x1xf32>
    %1318 = vector.broadcast %1317 : vector<8x1xf32> to vector<8x8xf32>
    %1319 = arith.subf %1315, %1318 : vector<8x8xf32>
    %1320 = math.exp %1319 : vector<8x8xf32>
    %1321 = arith.mulf %1320, %0 : vector<8x8xf32>
    %cst_306 = arith.constant dense<0.000000e+00> : vector<8xf32>
    %1322 = vector.multi_reduction <add>, %1321, %cst_306 [1] : vector<8x8xf32> to vector<8xf32>
    %1323 = vector.shape_cast %1322 : vector<8xf32> to vector<8x1xf32>
    %cst_307 = arith.constant 1.000000e-15 : f32
    %1324 = vector.broadcast %cst_307 : f32 to vector<8x1xf32>
    %1325 = arith.addf %1323, %1324 : vector<8x1xf32>
    %1326 = tpu.reciprocal %1325 {approx = true} : vector<8x1xf32> -> vector<8x1xf32>
    %1327 = vector.broadcast %1326 : vector<8x1xf32> to vector<8x8xf32>
    %1328 = arith.mulf %1321, %1327 : vector<8x8xf32>
    %1329 = vector.extract_strided_slice %1328 {offsets = [0, 0], sizes = [8, 1], strides = [1, 1]} : vector<8x8xf32> to vector<8x1xf32>
    %1330 = vector.broadcast %1329 : vector<8x1xf32> to vector<8x16xf32>
    %1331 = arith.mulf %1330, %88 : vector<8x16xf32>
    %1332 = vector.extract_strided_slice %1328 {offsets = [0, 0], sizes = [8, 1], strides = [1, 1]} : vector<8x8xf32> to vector<8x1xf32>
    %1333 = vector.broadcast %1332 : vector<8x1xf32> to vector<8x16xf32>
    %1334 = arith.mulf %1333, %636 : vector<8x16xf32>
    %1335 = vector.extract_strided_slice %1328 {offsets = [0, 1], sizes = [8, 1], strides = [1, 1]} : vector<8x8xf32> to vector<8x1xf32>
    %1336 = vector.broadcast %1335 : vector<8x1xf32> to vector<8x16xf32>
    %1337 = arith.mulf %1336, %168 : vector<8x16xf32>
    %1338 = arith.addf %1331, %1337 : vector<8x16xf32>
    %1339 = vector.extract_strided_slice %1328 {offsets = [0, 1], sizes = [8, 1], strides = [1, 1]} : vector<8x8xf32> to vector<8x1xf32>
    %1340 = vector.broadcast %1339 : vector<8x1xf32> to vector<8x16xf32>
    %1341 = arith.mulf %1340, %570 : vector<8x16xf32>
    %1342 = arith.addf %1334, %1341 : vector<8x16xf32>
    %1343 = vector.extract_strided_slice %1328 {offsets = [0, 2], sizes = [8, 1], strides = [1, 1]} : vector<8x8xf32> to vector<8x1xf32>
    %1344 = vector.broadcast %1343 : vector<8x1xf32> to vector<8x16xf32>
    %1345 = arith.mulf %1344, %248 : vector<8x16xf32>
    %1346 = arith.addf %1338, %1345 : vector<8x16xf32>
    %1347 = vector.extract_strided_slice %1328 {offsets = [0, 2], sizes = [8, 1], strides = [1, 1]} : vector<8x8xf32> to vector<8x1xf32>
    %1348 = vector.broadcast %1347 : vector<8x1xf32> to vector<8x16xf32>
    %1349 = arith.mulf %1348, %490 : vector<8x16xf32>
    %1350 = arith.addf %1342, %1349 : vector<8x16xf32>
    %1351 = vector.extract_strided_slice %1328 {offsets = [0, 3], sizes = [8, 1], strides = [1, 1]} : vector<8x8xf32> to vector<8x1xf32>
    %1352 = vector.broadcast %1351 : vector<8x1xf32> to vector<8x16xf32>
    %1353 = arith.mulf %1352, %328 : vector<8x16xf32>
    %1354 = arith.addf %1346, %1353 : vector<8x16xf32>
    %1355 = vector.extract_strided_slice %1328 {offsets = [0, 3], sizes = [8, 1], strides = [1, 1]} : vector<8x8xf32> to vector<8x1xf32>
    %1356 = vector.broadcast %1355 : vector<8x1xf32> to vector<8x16xf32>
    %1357 = arith.mulf %1356, %410 : vector<8x16xf32>
    %1358 = arith.addf %1350, %1357 : vector<8x16xf32>
    %1359 = vector.extract_strided_slice %1328 {offsets = [0, 4], sizes = [8, 1], strides = [1, 1]} : vector<8x8xf32> to vector<8x1xf32>
    %1360 = vector.broadcast %1359 : vector<8x1xf32> to vector<8x16xf32>
    %1361 = arith.mulf %1360, %408 : vector<8x16xf32>
    %1362 = arith.addf %1354, %1361 : vector<8x16xf32>
    %1363 = vector.extract_strided_slice %1328 {offsets = [0, 4], sizes = [8, 1], strides = [1, 1]} : vector<8x8xf32> to vector<8x1xf32>
    %1364 = vector.broadcast %1363 : vector<8x1xf32> to vector<8x16xf32>
    %1365 = arith.mulf %1364, %330 : vector<8x16xf32>
    %1366 = arith.addf %1358, %1365 : vector<8x16xf32>
    %1367 = vector.extract_strided_slice %1328 {offsets = [0, 5], sizes = [8, 1], strides = [1, 1]} : vector<8x8xf32> to vector<8x1xf32>
    %1368 = vector.broadcast %1367 : vector<8x1xf32> to vector<8x16xf32>
    %1369 = arith.mulf %1368, %488 : vector<8x16xf32>
    %1370 = arith.addf %1362, %1369 : vector<8x16xf32>
    %1371 = vector.extract_strided_slice %1328 {offsets = [0, 5], sizes = [8, 1], strides = [1, 1]} : vector<8x8xf32> to vector<8x1xf32>
    %1372 = vector.broadcast %1371 : vector<8x1xf32> to vector<8x16xf32>
    %1373 = arith.mulf %1372, %250 : vector<8x16xf32>
    %1374 = arith.addf %1366, %1373 : vector<8x16xf32>
    %1375 = vector.extract_strided_slice %1328 {offsets = [0, 6], sizes = [8, 1], strides = [1, 1]} : vector<8x8xf32> to vector<8x1xf32>
    %1376 = vector.broadcast %1375 : vector<8x1xf32> to vector<8x16xf32>
    %1377 = arith.mulf %1376, %568 : vector<8x16xf32>
    %1378 = arith.addf %1370, %1377 : vector<8x16xf32>
    %1379 = vector.extract_strided_slice %1328 {offsets = [0, 6], sizes = [8, 1], strides = [1, 1]} : vector<8x8xf32> to vector<8x1xf32>
    %1380 = vector.broadcast %1379 : vector<8x1xf32> to vector<8x16xf32>
    %1381 = arith.mulf %1380, %170 : vector<8x16xf32>
    %1382 = arith.addf %1374, %1381 : vector<8x16xf32>
    %1383 = vector.extract_strided_slice %1328 {offsets = [0, 7], sizes = [8, 1], strides = [1, 1]} : vector<8x8xf32> to vector<8x1xf32>
    %1384 = vector.broadcast %1383 : vector<8x1xf32> to vector<8x16xf32>
    %1385 = arith.mulf %1384, %634 : vector<8x16xf32>
    %1386 = arith.addf %1378, %1385 : vector<8x16xf32>
    %1387 = vector.extract_strided_slice %1328 {offsets = [0, 7], sizes = [8, 1], strides = [1, 1]} : vector<8x8xf32> to vector<8x1xf32>
    %1388 = vector.broadcast %1387 : vector<8x1xf32> to vector<8x16xf32>
    %1389 = arith.mulf %1388, %90 : vector<8x16xf32>
    %1390 = arith.addf %1382, %1389 : vector<8x16xf32>
    %c0_308 = arith.constant 0 : index
    %c0_309 = arith.constant 0 : index
    %1391 = vector.load %arg20[%c0_308, %c0_309] : memref<16x160xf32, #tpu.memory_space<vmem>>, vector<16x160xf32>
    %cst_310 = arith.constant dense<0.000000e+00> : vector<8x160xf32>
    %1392 = tpu.matmul %1386, %1391, %cst_310 {dimension_numbers = #tpu.dot_dimension_numbers<[1], [0], [0], [1], [0, 0, 1, 1], [], []>} : vector<8x16xf32>, vector<16x160xf32>, vector<8x160xf32> -> vector<8x160xf32>
    %c0_311 = arith.constant 0 : index
    %c0_312 = arith.constant 0 : index
    %1393 = vector.load %arg21[%c0_311, %c0_312] : memref<16x160xf32, #tpu.memory_space<vmem>>, vector<16x160xf32>
    %cst_313 = arith.constant dense<0.000000e+00> : vector<8x160xf32>
    %1394 = tpu.matmul %1390, %1393, %cst_313 {dimension_numbers = #tpu.dot_dimension_numbers<[1], [0], [0], [1], [0, 0, 1, 1], [], []>} : vector<8x16xf32>, vector<16x160xf32>, vector<8x160xf32> -> vector<8x160xf32>
    %1395 = arith.addf %1392, %1394 : vector<8x160xf32>
    %1396 = vector.extract_strided_slice %1303 {offsets = [0, 0], sizes = [8, 128], strides = [1, 1]} : vector<8x288xf32> to vector<8x128xf32>
    %1397 = vector.extract_strided_slice %1305 {offsets = [0, 0], sizes = [8, 128], strides = [1, 1]} : vector<8x256xf32> to vector<8x128xf32>
    %1398 = arith.addf %1396, %1397 : vector<8x128xf32>
    %1399 = vector.extract_strided_slice %1395 {offsets = [0, 0], sizes = [8, 128], strides = [1, 1]} : vector<8x160xf32> to vector<8x128xf32>
    %1400 = arith.addf %1398, %1399 : vector<8x128xf32>
    %1401 = vector.extract_strided_slice %1400 {offsets = [0, 0], sizes = [8, 96], strides = [1, 1]} : vector<8x128xf32> to vector<8x96xf32>
    %1402 = arith.negf %1401 : vector<8x96xf32>
    %1403 = math.exp %1402 : vector<8x96xf32>
    %cst_314 = arith.constant 1.000000e+00 : f32
    %1404 = vector.broadcast %cst_314 : f32 to vector<8x96xf32>
    %1405 = arith.addf %1404, %1403 : vector<8x96xf32>
    %1406 = arith.divf %1404, %1405 : vector<8x96xf32>
    %1407 = vector.extract_strided_slice %1406 {offsets = [0, 0], sizes = [8, 32], strides = [1, 1]} : vector<8x96xf32> to vector<8x32xf32>
    %1408 = vector.extract_strided_slice %1406 {offsets = [0, 32], sizes = [8, 32], strides = [1, 1]} : vector<8x96xf32> to vector<8x32xf32>
    %1409 = vector.extract_strided_slice %1406 {offsets = [0, 64], sizes = [8, 32], strides = [1, 1]} : vector<8x96xf32> to vector<8x32xf32>
    %1410 = vector.extract_strided_slice %1400 {offsets = [0, 96], sizes = [8, 32], strides = [1, 1]} : vector<8x128xf32> to vector<8x32xf32>
    %1411 = math.tanh %1410 : vector<8x32xf32>
    %1412 = arith.mulf %1408, %1260 : vector<8x32xf32>
    %1413 = arith.mulf %1407, %1411 : vector<8x32xf32>
    %1414 = arith.addf %1412, %1413 : vector<8x32xf32>
    %1415 = math.tanh %1414 : vector<8x32xf32>
    %1416 = arith.mulf %1409, %1415 : vector<8x32xf32>
    %1417 = vector.extract_strided_slice %1395 {offsets = [0, 128], sizes = [8, 32], strides = [1, 1]} : vector<8x160xf32> to vector<8x32xf32>
    %1418 = vector.extract_strided_slice %1303 {offsets = [0, 256], sizes = [8, 32], strides = [1, 1]} : vector<8x288xf32> to vector<8x32xf32>
    %1419 = arith.addf %1417, %1418 : vector<8x32xf32>
    %c0_315 = arith.constant 0 : index
    %c0_316 = arith.constant 0 : index
    %1420 = vector.load %arg22[%c0_315, %c0_316] : memref<32x32xf32, #tpu.memory_space<vmem>>, vector<32x32xf32>
    %cst_317 = arith.constant dense<0.000000e+00> : vector<8x32xf32>
    %1421 = tpu.matmul %1416, %1420, %cst_317 {dimension_numbers = #tpu.dot_dimension_numbers<[1], [0], [0], [1], [0, 0, 1, 1], [], []>} : vector<8x32xf32>, vector<32x32xf32>, vector<8x32xf32> -> vector<8x32xf32>
    %1422 = arith.addf %1419, %1421 : vector<8x32xf32>
    %1423 = vector.extract_strided_slice %1422 {offsets = [0, 0], sizes = [8, 16], strides = [1, 1]} : vector<8x32xf32> to vector<8x16xf32>
    %1424 = vector.extract_strided_slice %1422 {offsets = [0, 16], sizes = [8, 16], strides = [1, 1]} : vector<8x32xf32> to vector<8x16xf32>
    %1425 = arith.maximumf %1423, %1424 : vector<8x16xf32>
    %c0_318 = arith.constant 0 : index
    %c0_319 = arith.constant 0 : index
    %1426 = vector.load %arg25[%c0_318, %c0_319] : memref<16x24xf32, #tpu.memory_space<vmem>>, vector<16x24xf32>
    %cst_320 = arith.constant dense<0.000000e+00> : vector<8x24xf32>
    %1427 = tpu.matmul %1425, %1426, %cst_320 {dimension_numbers = #tpu.dot_dimension_numbers<[1], [0], [0], [1], [0, 0, 1, 1], [], []>} : vector<8x16xf32>, vector<16x24xf32>, vector<8x24xf32> -> vector<8x24xf32>
    %c0_321 = arith.constant 0 : index
    %c0_322 = arith.constant 0 : index
    %1428 = vector.load %arg26[%c0_321, %c0_322] : memref<1x24xf32, #tpu.memory_space<vmem>>, vector<1x24xf32>
    %1429 = vector.broadcast %1428 : vector<1x24xf32> to vector<8x24xf32>
    %1430 = arith.addf %1427, %1429 : vector<8x24xf32>
    %cst_323 = arith.constant dense<0xFF800000> : vector<8xf32>
    %1431 = vector.multi_reduction <maximumf>, %1430, %cst_323 [1] : vector<8x24xf32> to vector<8xf32>
    %1432 = vector.shape_cast %1431 : vector<8xf32> to vector<8x1xf32>
    %1433 = vector.broadcast %1432 : vector<8x1xf32> to vector<8x24xf32>
    %1434 = arith.subf %1430, %1433 : vector<8x24xf32>
    %1435 = math.exp %1434 : vector<8x24xf32>
    %cst_324 = arith.constant dense<0.000000e+00> : vector<8xf32>
    %1436 = vector.multi_reduction <add>, %1435, %cst_324 [1] : vector<8x24xf32> to vector<8xf32>
    %1437 = vector.shape_cast %1436 : vector<8xf32> to vector<8x1xf32>
    %1438 = math.log %1437 : vector<8x1xf32>
    %1439 = vector.extract_strided_slice %679 {offsets = [32, 0], sizes = [8, 1], strides = [1, 1]} : vector<48x1xi32> to vector<8x1xi32>
    %1440 = tpu.iota {dimensions = array<i32: 1>} : vector<8x24xi32>
    %1441 = vector.broadcast %1439 : vector<8x1xi32> to vector<8x24xi32>
    %1442 = arith.cmpi eq, %1440, %1441 : vector<8x24xi32>
    %1443 = arith.extui %1442 : vector<8x24xi1> to vector<8x24xi32>
    %1444 = arith.sitofp %1443 : vector<8x24xi32> to vector<8x24xf32>
    %1445 = arith.mulf %1434, %1444 : vector<8x24xf32>
    %cst_325 = arith.constant dense<0.000000e+00> : vector<8xf32>
    %1446 = vector.multi_reduction <add>, %1445, %cst_325 [1] : vector<8x24xf32> to vector<8xf32>
    %1447 = vector.shape_cast %1446 : vector<8xf32> to vector<8x1xf32>
    %1448 = arith.subf %1438, %1447 : vector<8x1xf32>
    %1449 = vector.extract_strided_slice %680 {offsets = [32, 0], sizes = [8, 1], strides = [1, 1]} : vector<48x1xf32> to vector<8x1xf32>
    %1450 = arith.mulf %1448, %1449 : vector<8x1xf32>
    %1451 = arith.addf %1297, %1450 : vector<8x1xf32>
    %1452 = vector.extract_strided_slice %678 {offsets = [40, 0], sizes = [8, 16], strides = [1, 1]} : vector<48x16xf32> to vector<8x16xf32>
    %c0_326 = arith.constant 0 : index
    %c0_327 = arith.constant 0 : index
    %1453 = vector.load %arg17[%c0_326, %c0_327] : memref<16x288xf32, #tpu.memory_space<vmem>>, vector<16x288xf32>
    %cst_328 = arith.constant dense<0.000000e+00> : vector<8x288xf32>
    %1454 = tpu.matmul %1452, %1453, %cst_328 {dimension_numbers = #tpu.dot_dimension_numbers<[1], [0], [0], [1], [0, 0, 1, 1], [], []>} : vector<8x16xf32>, vector<16x288xf32>, vector<8x288xf32> -> vector<8x288xf32>
    %c0_329 = arith.constant 0 : index
    %c0_330 = arith.constant 0 : index
    %1455 = vector.load %arg18[%c0_329, %c0_330] : memref<1x288xf32, #tpu.memory_space<vmem>>, vector<1x288xf32>
    %1456 = vector.broadcast %1455 : vector<1x288xf32> to vector<8x288xf32>
    %1457 = arith.addf %1454, %1456 : vector<8x288xf32>
    %c0_331 = arith.constant 0 : index
    %c0_332 = arith.constant 0 : index
    %1458 = vector.load %arg19[%c0_331, %c0_332] : memref<32x256xf32, #tpu.memory_space<vmem>>, vector<32x256xf32>
    %cst_333 = arith.constant dense<0.000000e+00> : vector<8x256xf32>
    %1459 = tpu.matmul %1416, %1458, %cst_333 {dimension_numbers = #tpu.dot_dimension_numbers<[1], [0], [0], [1], [0, 0, 1, 1], [], []>} : vector<8x32xf32>, vector<32x256xf32>, vector<8x256xf32> -> vector<8x256xf32>
    %1460 = vector.extract_strided_slice %1457 {offsets = [0, 128], sizes = [8, 128], strides = [1, 1]} : vector<8x288xf32> to vector<8x128xf32>
    %1461 = arith.addf %644, %1460 : vector<8x128xf32>
    %1462 = vector.extract_strided_slice %1459 {offsets = [0, 128], sizes = [8, 128], strides = [1, 1]} : vector<8x256xf32> to vector<8x128xf32>
    %1463 = arith.addf %1461, %1462 : vector<8x128xf32>
    %1464 = math.tanh %1463 : vector<8x128xf32>
    %c0_334 = arith.constant 0 : index
    %c0_335 = arith.constant 0 : index
    %1465 = vector.load %arg23[%c0_334, %c0_335] : memref<128x8xf32, #tpu.memory_space<vmem>>, vector<128x8xf32>
    %cst_336 = arith.constant dense<0.000000e+00> : vector<8x8xf32>
    %1466 = tpu.matmul %1464, %1465, %cst_336 {dimension_numbers = #tpu.dot_dimension_numbers<[1], [0], [0], [1], [0, 0, 1, 1], [], []>} : vector<8x128xf32>, vector<128x8xf32>, vector<8x8xf32> -> vector<8x8xf32>
    %c0_337 = arith.constant 0 : index
    %c0_338 = arith.constant 0 : index
    %1467 = vector.load %arg24[%c0_337, %c0_338] : memref<1x1xf32, #tpu.memory_space<vmem>>, vector<1x1xf32>
    %1468 = vector.broadcast %1467 : vector<1x1xf32> to vector<8x8xf32>
    %1469 = arith.addf %1466, %1468 : vector<8x8xf32>
    %cst_339 = arith.constant dense<0xFF800000> : vector<8xf32>
    %1470 = vector.multi_reduction <maximumf>, %1469, %cst_339 [1] : vector<8x8xf32> to vector<8xf32>
    %1471 = vector.shape_cast %1470 : vector<8xf32> to vector<8x1xf32>
    %1472 = vector.broadcast %1471 : vector<8x1xf32> to vector<8x8xf32>
    %1473 = arith.subf %1469, %1472 : vector<8x8xf32>
    %1474 = math.exp %1473 : vector<8x8xf32>
    %1475 = arith.mulf %1474, %0 : vector<8x8xf32>
    %cst_340 = arith.constant dense<0.000000e+00> : vector<8xf32>
    %1476 = vector.multi_reduction <add>, %1475, %cst_340 [1] : vector<8x8xf32> to vector<8xf32>
    %1477 = vector.shape_cast %1476 : vector<8xf32> to vector<8x1xf32>
    %cst_341 = arith.constant 1.000000e-15 : f32
    %1478 = vector.broadcast %cst_341 : f32 to vector<8x1xf32>
    %1479 = arith.addf %1477, %1478 : vector<8x1xf32>
    %1480 = tpu.reciprocal %1479 {approx = true} : vector<8x1xf32> -> vector<8x1xf32>
    %1481 = vector.broadcast %1480 : vector<8x1xf32> to vector<8x8xf32>
    %1482 = arith.mulf %1475, %1481 : vector<8x8xf32>
    %1483 = vector.extract_strided_slice %1482 {offsets = [0, 0], sizes = [8, 1], strides = [1, 1]} : vector<8x8xf32> to vector<8x1xf32>
    %1484 = vector.broadcast %1483 : vector<8x1xf32> to vector<8x16xf32>
    %1485 = arith.mulf %1484, %88 : vector<8x16xf32>
    %1486 = vector.extract_strided_slice %1482 {offsets = [0, 0], sizes = [8, 1], strides = [1, 1]} : vector<8x8xf32> to vector<8x1xf32>
    %1487 = vector.broadcast %1486 : vector<8x1xf32> to vector<8x16xf32>
    %1488 = arith.mulf %1487, %636 : vector<8x16xf32>
    %1489 = vector.extract_strided_slice %1482 {offsets = [0, 1], sizes = [8, 1], strides = [1, 1]} : vector<8x8xf32> to vector<8x1xf32>
    %1490 = vector.broadcast %1489 : vector<8x1xf32> to vector<8x16xf32>
    %1491 = arith.mulf %1490, %168 : vector<8x16xf32>
    %1492 = arith.addf %1485, %1491 : vector<8x16xf32>
    %1493 = vector.extract_strided_slice %1482 {offsets = [0, 1], sizes = [8, 1], strides = [1, 1]} : vector<8x8xf32> to vector<8x1xf32>
    %1494 = vector.broadcast %1493 : vector<8x1xf32> to vector<8x16xf32>
    %1495 = arith.mulf %1494, %570 : vector<8x16xf32>
    %1496 = arith.addf %1488, %1495 : vector<8x16xf32>
    %1497 = vector.extract_strided_slice %1482 {offsets = [0, 2], sizes = [8, 1], strides = [1, 1]} : vector<8x8xf32> to vector<8x1xf32>
    %1498 = vector.broadcast %1497 : vector<8x1xf32> to vector<8x16xf32>
    %1499 = arith.mulf %1498, %248 : vector<8x16xf32>
    %1500 = arith.addf %1492, %1499 : vector<8x16xf32>
    %1501 = vector.extract_strided_slice %1482 {offsets = [0, 2], sizes = [8, 1], strides = [1, 1]} : vector<8x8xf32> to vector<8x1xf32>
    %1502 = vector.broadcast %1501 : vector<8x1xf32> to vector<8x16xf32>
    %1503 = arith.mulf %1502, %490 : vector<8x16xf32>
    %1504 = arith.addf %1496, %1503 : vector<8x16xf32>
    %1505 = vector.extract_strided_slice %1482 {offsets = [0, 3], sizes = [8, 1], strides = [1, 1]} : vector<8x8xf32> to vector<8x1xf32>
    %1506 = vector.broadcast %1505 : vector<8x1xf32> to vector<8x16xf32>
    %1507 = arith.mulf %1506, %328 : vector<8x16xf32>
    %1508 = arith.addf %1500, %1507 : vector<8x16xf32>
    %1509 = vector.extract_strided_slice %1482 {offsets = [0, 3], sizes = [8, 1], strides = [1, 1]} : vector<8x8xf32> to vector<8x1xf32>
    %1510 = vector.broadcast %1509 : vector<8x1xf32> to vector<8x16xf32>
    %1511 = arith.mulf %1510, %410 : vector<8x16xf32>
    %1512 = arith.addf %1504, %1511 : vector<8x16xf32>
    %1513 = vector.extract_strided_slice %1482 {offsets = [0, 4], sizes = [8, 1], strides = [1, 1]} : vector<8x8xf32> to vector<8x1xf32>
    %1514 = vector.broadcast %1513 : vector<8x1xf32> to vector<8x16xf32>
    %1515 = arith.mulf %1514, %408 : vector<8x16xf32>
    %1516 = arith.addf %1508, %1515 : vector<8x16xf32>
    %1517 = vector.extract_strided_slice %1482 {offsets = [0, 4], sizes = [8, 1], strides = [1, 1]} : vector<8x8xf32> to vector<8x1xf32>
    %1518 = vector.broadcast %1517 : vector<8x1xf32> to vector<8x16xf32>
    %1519 = arith.mulf %1518, %330 : vector<8x16xf32>
    %1520 = arith.addf %1512, %1519 : vector<8x16xf32>
    %1521 = vector.extract_strided_slice %1482 {offsets = [0, 5], sizes = [8, 1], strides = [1, 1]} : vector<8x8xf32> to vector<8x1xf32>
    %1522 = vector.broadcast %1521 : vector<8x1xf32> to vector<8x16xf32>
    %1523 = arith.mulf %1522, %488 : vector<8x16xf32>
    %1524 = arith.addf %1516, %1523 : vector<8x16xf32>
    %1525 = vector.extract_strided_slice %1482 {offsets = [0, 5], sizes = [8, 1], strides = [1, 1]} : vector<8x8xf32> to vector<8x1xf32>
    %1526 = vector.broadcast %1525 : vector<8x1xf32> to vector<8x16xf32>
    %1527 = arith.mulf %1526, %250 : vector<8x16xf32>
    %1528 = arith.addf %1520, %1527 : vector<8x16xf32>
    %1529 = vector.extract_strided_slice %1482 {offsets = [0, 6], sizes = [8, 1], strides = [1, 1]} : vector<8x8xf32> to vector<8x1xf32>
    %1530 = vector.broadcast %1529 : vector<8x1xf32> to vector<8x16xf32>
    %1531 = arith.mulf %1530, %568 : vector<8x16xf32>
    %1532 = arith.addf %1524, %1531 : vector<8x16xf32>
    %1533 = vector.extract_strided_slice %1482 {offsets = [0, 6], sizes = [8, 1], strides = [1, 1]} : vector<8x8xf32> to vector<8x1xf32>
    %1534 = vector.broadcast %1533 : vector<8x1xf32> to vector<8x16xf32>
    %1535 = arith.mulf %1534, %170 : vector<8x16xf32>
    %1536 = arith.addf %1528, %1535 : vector<8x16xf32>
    %1537 = vector.extract_strided_slice %1482 {offsets = [0, 7], sizes = [8, 1], strides = [1, 1]} : vector<8x8xf32> to vector<8x1xf32>
    %1538 = vector.broadcast %1537 : vector<8x1xf32> to vector<8x16xf32>
    %1539 = arith.mulf %1538, %634 : vector<8x16xf32>
    %1540 = arith.addf %1532, %1539 : vector<8x16xf32>
    %1541 = vector.extract_strided_slice %1482 {offsets = [0, 7], sizes = [8, 1], strides = [1, 1]} : vector<8x8xf32> to vector<8x1xf32>
    %1542 = vector.broadcast %1541 : vector<8x1xf32> to vector<8x16xf32>
    %1543 = arith.mulf %1542, %90 : vector<8x16xf32>
    %1544 = arith.addf %1536, %1543 : vector<8x16xf32>
    %c0_342 = arith.constant 0 : index
    %c0_343 = arith.constant 0 : index
    %1545 = vector.load %arg20[%c0_342, %c0_343] : memref<16x160xf32, #tpu.memory_space<vmem>>, vector<16x160xf32>
    %cst_344 = arith.constant dense<0.000000e+00> : vector<8x160xf32>
    %1546 = tpu.matmul %1540, %1545, %cst_344 {dimension_numbers = #tpu.dot_dimension_numbers<[1], [0], [0], [1], [0, 0, 1, 1], [], []>} : vector<8x16xf32>, vector<16x160xf32>, vector<8x160xf32> -> vector<8x160xf32>
    %c0_345 = arith.constant 0 : index
    %c0_346 = arith.constant 0 : index
    %1547 = vector.load %arg21[%c0_345, %c0_346] : memref<16x160xf32, #tpu.memory_space<vmem>>, vector<16x160xf32>
    %cst_347 = arith.constant dense<0.000000e+00> : vector<8x160xf32>
    %1548 = tpu.matmul %1544, %1547, %cst_347 {dimension_numbers = #tpu.dot_dimension_numbers<[1], [0], [0], [1], [0, 0, 1, 1], [], []>} : vector<8x16xf32>, vector<16x160xf32>, vector<8x160xf32> -> vector<8x160xf32>
    %1549 = arith.addf %1546, %1548 : vector<8x160xf32>
    %1550 = vector.extract_strided_slice %1457 {offsets = [0, 0], sizes = [8, 128], strides = [1, 1]} : vector<8x288xf32> to vector<8x128xf32>
    %1551 = vector.extract_strided_slice %1459 {offsets = [0, 0], sizes = [8, 128], strides = [1, 1]} : vector<8x256xf32> to vector<8x128xf32>
    %1552 = arith.addf %1550, %1551 : vector<8x128xf32>
    %1553 = vector.extract_strided_slice %1549 {offsets = [0, 0], sizes = [8, 128], strides = [1, 1]} : vector<8x160xf32> to vector<8x128xf32>
    %1554 = arith.addf %1552, %1553 : vector<8x128xf32>
    %1555 = vector.extract_strided_slice %1554 {offsets = [0, 0], sizes = [8, 96], strides = [1, 1]} : vector<8x128xf32> to vector<8x96xf32>
    %1556 = arith.negf %1555 : vector<8x96xf32>
    %1557 = math.exp %1556 : vector<8x96xf32>
    %cst_348 = arith.constant 1.000000e+00 : f32
    %1558 = vector.broadcast %cst_348 : f32 to vector<8x96xf32>
    %1559 = arith.addf %1558, %1557 : vector<8x96xf32>
    %1560 = arith.divf %1558, %1559 : vector<8x96xf32>
    %1561 = vector.extract_strided_slice %1560 {offsets = [0, 0], sizes = [8, 32], strides = [1, 1]} : vector<8x96xf32> to vector<8x32xf32>
    %1562 = vector.extract_strided_slice %1560 {offsets = [0, 32], sizes = [8, 32], strides = [1, 1]} : vector<8x96xf32> to vector<8x32xf32>
    %1563 = vector.extract_strided_slice %1560 {offsets = [0, 64], sizes = [8, 32], strides = [1, 1]} : vector<8x96xf32> to vector<8x32xf32>
    %1564 = vector.extract_strided_slice %1554 {offsets = [0, 96], sizes = [8, 32], strides = [1, 1]} : vector<8x128xf32> to vector<8x32xf32>
    %1565 = math.tanh %1564 : vector<8x32xf32>
    %1566 = arith.mulf %1562, %1414 : vector<8x32xf32>
    %1567 = arith.mulf %1561, %1565 : vector<8x32xf32>
    %1568 = arith.addf %1566, %1567 : vector<8x32xf32>
    %1569 = math.tanh %1568 : vector<8x32xf32>
    %1570 = arith.mulf %1563, %1569 : vector<8x32xf32>
    %1571 = vector.extract_strided_slice %1549 {offsets = [0, 128], sizes = [8, 32], strides = [1, 1]} : vector<8x160xf32> to vector<8x32xf32>
    %1572 = vector.extract_strided_slice %1457 {offsets = [0, 256], sizes = [8, 32], strides = [1, 1]} : vector<8x288xf32> to vector<8x32xf32>
    %1573 = arith.addf %1571, %1572 : vector<8x32xf32>
    %c0_349 = arith.constant 0 : index
    %c0_350 = arith.constant 0 : index
    %1574 = vector.load %arg22[%c0_349, %c0_350] : memref<32x32xf32, #tpu.memory_space<vmem>>, vector<32x32xf32>
    %cst_351 = arith.constant dense<0.000000e+00> : vector<8x32xf32>
    %1575 = tpu.matmul %1570, %1574, %cst_351 {dimension_numbers = #tpu.dot_dimension_numbers<[1], [0], [0], [1], [0, 0, 1, 1], [], []>} : vector<8x32xf32>, vector<32x32xf32>, vector<8x32xf32> -> vector<8x32xf32>
    %1576 = arith.addf %1573, %1575 : vector<8x32xf32>
    %1577 = vector.extract_strided_slice %1576 {offsets = [0, 0], sizes = [8, 16], strides = [1, 1]} : vector<8x32xf32> to vector<8x16xf32>
    %1578 = vector.extract_strided_slice %1576 {offsets = [0, 16], sizes = [8, 16], strides = [1, 1]} : vector<8x32xf32> to vector<8x16xf32>
    %1579 = arith.maximumf %1577, %1578 : vector<8x16xf32>
    %c0_352 = arith.constant 0 : index
    %c0_353 = arith.constant 0 : index
    %1580 = vector.load %arg25[%c0_352, %c0_353] : memref<16x24xf32, #tpu.memory_space<vmem>>, vector<16x24xf32>
    %cst_354 = arith.constant dense<0.000000e+00> : vector<8x24xf32>
    %1581 = tpu.matmul %1579, %1580, %cst_354 {dimension_numbers = #tpu.dot_dimension_numbers<[1], [0], [0], [1], [0, 0, 1, 1], [], []>} : vector<8x16xf32>, vector<16x24xf32>, vector<8x24xf32> -> vector<8x24xf32>
    %c0_355 = arith.constant 0 : index
    %c0_356 = arith.constant 0 : index
    %1582 = vector.load %arg26[%c0_355, %c0_356] : memref<1x24xf32, #tpu.memory_space<vmem>>, vector<1x24xf32>
    %1583 = vector.broadcast %1582 : vector<1x24xf32> to vector<8x24xf32>
    %1584 = arith.addf %1581, %1583 : vector<8x24xf32>
    %cst_357 = arith.constant dense<0xFF800000> : vector<8xf32>
    %1585 = vector.multi_reduction <maximumf>, %1584, %cst_357 [1] : vector<8x24xf32> to vector<8xf32>
    %1586 = vector.shape_cast %1585 : vector<8xf32> to vector<8x1xf32>
    %1587 = vector.broadcast %1586 : vector<8x1xf32> to vector<8x24xf32>
    %1588 = arith.subf %1584, %1587 : vector<8x24xf32>
    %1589 = math.exp %1588 : vector<8x24xf32>
    %cst_358 = arith.constant dense<0.000000e+00> : vector<8xf32>
    %1590 = vector.multi_reduction <add>, %1589, %cst_358 [1] : vector<8x24xf32> to vector<8xf32>
    %1591 = vector.shape_cast %1590 : vector<8xf32> to vector<8x1xf32>
    %1592 = math.log %1591 : vector<8x1xf32>
    %1593 = vector.extract_strided_slice %679 {offsets = [40, 0], sizes = [8, 1], strides = [1, 1]} : vector<48x1xi32> to vector<8x1xi32>
    %1594 = tpu.iota {dimensions = array<i32: 1>} : vector<8x24xi32>
    %1595 = vector.broadcast %1593 : vector<8x1xi32> to vector<8x24xi32>
    %1596 = arith.cmpi eq, %1594, %1595 : vector<8x24xi32>
    %1597 = arith.extui %1596 : vector<8x24xi1> to vector<8x24xi32>
    %1598 = arith.sitofp %1597 : vector<8x24xi32> to vector<8x24xf32>
    %1599 = arith.mulf %1588, %1598 : vector<8x24xf32>
    %cst_359 = arith.constant dense<0.000000e+00> : vector<8xf32>
    %1600 = vector.multi_reduction <add>, %1599, %cst_359 [1] : vector<8x24xf32> to vector<8xf32>
    %1601 = vector.shape_cast %1600 : vector<8xf32> to vector<8x1xf32>
    %1602 = arith.subf %1592, %1601 : vector<8x1xf32>
    %1603 = vector.extract_strided_slice %680 {offsets = [40, 0], sizes = [8, 1], strides = [1, 1]} : vector<48x1xf32> to vector<8x1xf32>
    %1604 = arith.mulf %1602, %1603 : vector<8x1xf32>
    %1605 = arith.addf %1451, %1604 : vector<8x1xf32>
    %cst_360 = arith.constant dense<0.000000e+00> : vector<1xf32>
    %1606 = vector.multi_reduction <add>, %1605, %cst_360 [0] : vector<8x1xf32> to vector<1xf32>
    %1607 = vector.shape_cast %1606 : vector<1xf32> to vector<1x1xf32>
    %cst_361 = arith.constant 2.500000e-01 : f32
    %1608 = vector.broadcast %cst_361 : f32 to vector<1x1xf32>
    %1609 = arith.mulf %1607, %1608 : vector<1x1xf32>
    %c0_362 = arith.constant 0 : index
    %c0_363 = arith.constant 0 : index
    %1610 = vector.load %arg27[%c0_362, %c0_363] : memref<1x1xf32, #tpu.memory_space<vmem>>, vector<1x1xf32>
    tpu.vector_store %arg27[%c0_362, %c0_363], %1609 {strides = array<i32>} : memref<1x1xf32, #tpu.memory_space<vmem>>, vector<1x1xf32>,
    return
  }
}

</mosaic_0001>

<bundles_post_ra>
// kernel: att_nmt_forward.1
= control target key start
LH: loop header
LB: loop body
LE: loop exit
PB: predicated region body
PF: predicated region fallthrough
CT: control target
= control target key end

     0   :  { %s12047_s0 = inlined_call_operand.vmem [shape: f32[64,16], index: 0, kind: input, shape index: {}]   ;;  %s12048_s1 = inlined_call_operand.vmem [shape: f32[8,8], index: 1, kind: input, shape index: {}]   ;;  %s12049_s2 = inlined_call_operand.vmem [shape: f32[48,16], index: 2, kind: input, shape index: {}]   ;;  %s12050_s3 = inlined_call_operand.vmem [shape: s32[48,1], index: 3, kind: input, shape index: {}]   ;;  %s12051_s4 = inlined_call_operand.vmem [shape: f32[48,1], index: 4, kind: input, shape index: {}]   ;;  %s12052_s5 = inlined_call_operand.vmem [shape: f32[16,64], index: 5, kind: input, shape index: {}]   ;;  %s12053_s6 = inlined_call_operand.vmem [shape: f32[16,64], index: 6, kind: input, shape index: {}]   ;;  %s12054_s7 = inlined_call_operand.vmem [shape: f32[1,64], index: 7, kind: input, shape index: {}]   ;;  %s12055_s8 = inlined_call_operand.vmem [shape: f32[16,64], index: 8, kind: input, shape index: {}]   ;;  %s12056_s9 = inlined_call_operand.vmem [shape: f32[16,64], index: 9, kind: input, shape index: {}]   ;;  %s12057_s10 = inlined_call_operand.vmem [shape: f32[1,64], index: 10, kind: input, shape index: {}]   ;;  %s12058_s11 = inlined_call_operand.vmem [shape: f32[8,16,128], index: 11, kind: input, shape index: {}]   ;;  %s12059_s12 = inlined_call_operand.vmem [shape: f32[8,16,128], index: 12, kind: input, shape index: {}]   ;;  %s12060_s13 = inlined_call_operand.vmem [shape: f32[1,128], index: 13, kind: input, shape index: {}]   ;;  %s12061_s14 = inlined_call_operand.vmem [shape: f32[16,64], index: 14, kind: input, shape index: {}]   ;;  %s12062_s15 = inlined_call_operand.vmem [shape: f32[16,64], index: 15, kind: input, shape index: {}]   ;;  %s12063_s16 = inlined_call_operand.vmem [shape: f32[1,64], index: 16, kind: input, shape index: {}]   ;;  %s12064_s17 = inlined_call_operand.vmem [shape: f32[16,288], index: 17, kind: input, shape index: {}]   ;;  %s12065_s18 = inlined_call_operand.vmem [shape: f32[1,288], index: 18, kind: input, shape index: {}]   ;;  %s12066_s19 = inlined_call_operand.vmem [shape: f32[32,256], index: 19, kind: input, shape index: {}]   ;;  %s12067_s20 = inlined_call_operand.vmem [shape: f32[16,160], index: 20, kind: input, shape index: {}]   ;;  %s12068_s21 = inlined_call_operand.vmem [shape: f32[16,160], index: 21, kind: input, shape index: {}]   ;;  %s12069_s22 = inlined_call_operand.vmem [shape: f32[32,32], index: 22, kind: input, shape index: {}]   ;;  %s12070_s23 = inlined_call_operand.vmem [shape: f32[128,8], index: 23, kind: input, shape index: {}]   ;;  %s12071_s24 = inlined_call_operand.<no memory space> [shape: f32[1,1], index: 24, kind: input, shape index: {}]   ;;  %s12072_s25 = inlined_call_operand.vmem [shape: f32[16,24], index: 25, kind: input, shape index: {}]   ;;  %s12073_s26 = inlined_call_operand.vmem [shape: f32[1,24], index: 26, kind: input, shape index: {}]   ;;  %s12074_s27 = inlined_call_operand.hbm [shape: f32[1,1], index: 27, kind: output, shape index: {}]  }
   0x1   :  { %12169 = sst [smem:[#allocation35_spill]] %s12047_s0  ;;  %v32_v0 = vstv %s12071_s24 }
   0x2   :  { %12170 = sst [smem:[#allocation36_spill]] %s12048_s1  ;;  %33 = vst [vmem:[#allocation2] sm:$0x1] %v32_v0 }
   0x3   :  { %12171 = sst [smem:[#allocation37_spill]] %s12049_s2 }
   0x4   :  { %12172 = sst [smem:[#allocation38_spill]] %s12050_s3 }
   0x5   :  { %12173 = sst [smem:[#allocation39_spill]] %s12051_s4 }
   0x6   :  { %12174 = sst [smem:[#allocation40_spill]] %s12052_s5 }
   0x7   :  { %12175 = sst [smem:[#allocation41_spill]] %s12053_s6 }
   0x8   :  { %12176 = sst [smem:[#allocation42_spill]] %s12054_s7 }
   0x9   :  { %12177 = sst [smem:[#allocation43_spill]] %s12055_s8 }
   0xa   :  { %12178 = sst [smem:[#allocation44_spill]] %s12056_s9 }
   0xb   :  { %12179 = sst [smem:[#allocation45_spill]] %s12057_s10 }
   0xc   :  { %12180 = sst [smem:[#allocation46_spill]] %s12058_s11 }
   0xd   :  { %s12181_s9 = sld [smem:[#allocation40_spill]]  ;;  %vm107_vm0 = vcmask 130048  }
   0xe   :  { %s12182_s29 = sld [smem:[#allocation35_spill]] }
   0xf   :  { %s12183_s2 = sld [smem:[#allocation43_spill]] }
  0x13   :  { %v99_v1 = vld [vmem:[%s12181_s9 + $0x8] sm:$0xff]  ;;  %v98_v2 = vld [vmem:[%s12181_s9] sm:$0xff] }
  0x14   :  { %v96_v3 = vld [vmem:[%s12182_s29 + $0x30] sm:$0xff]  ;;  %9100 = vmatprep.subr.mxu1 %v99_v1  ;;  %v97_v4 = vld [vmem:[%s12182_s29 + $0x38] sm:$0xff]  ;;  %8470 = vmatprep.subr.mxu0 %v99_v1  ;;  %v90_v6 = vld [vmem:[%s12182_s29] sm:$0xff] }
  0x15   :  { %8483 = vmatprep.mubr.msk.f32.mxu1 %vm107_vm0, %v96_v3  ;;  %9102 = vmatpush3.msra.mxu1 %v99_v1  ;;  %v238_v5 = vld [vmem:[%s12183_s2 + $0x8] sm:$0xff]  ;;  %v237_v7 = vld [vmem:[%s12183_s2] sm:$0xff] }
  0x16   :  { %9101 = vmatprep.subr.mxu1 %v98_v2  ;;  %8471 = vmatpush3.msra.mxu0 %v99_v1 }
  0x17   :  { %9103 = vmatpush3.msra.mxu1 %v98_v2  ;;  %8472 = vmatprep.subr.mxu0 %v98_v2 }
  0x18   :  { %8484 = vmatmul.mubr.msk.f32.vlgmr.msra.gmra.mxu1 %vm107_vm0, %v97_v4  ;;  %8486 = vmatprep.subr.mxu1 %v238_v5 }
  0x19   :  { %34 = vsyncpa [#allocation4], 0  ;;  %8487 = vmatpush3.msra.mxu1 %v238_v5  ;;  %8490 = vmatprep.mubr.msk.f32.mxu1 %vm107_vm0, %v90_v6  ;;  %v91_v8 = vld [vmem:[%s12182_s29 + $0x8] sm:$0xff]  ;;  %s12184_s0 = sld [smem:[#allocation44_spill]]  ;;  %v92_v10 = vld [vmem:[%s12182_s29 + $0x10] sm:$0xff]  ;;  %v12102_v11 = vmov 0.0  }
  0x1a   :  { %8488 = vmatprep.subr.mxu1 %v237_v7  ;;  %8473 = vmatpush3.msra.mxu0 %v98_v2  ;;  %v93_v13 = vld [vmem:[%s12182_s29 + $0x18] sm:$0xff]  ;;  %v94_v14 = vld [vmem:[%s12182_s29 + $0x20] sm:$0xff]  ;;  %s12185_s30 = sld [smem:[#allocation41_spill]]  ;;  %v95_v17 = vld [vmem:[%s12182_s29 + $0x28] sm:$0xff]  ;;  %vm9504_vm1 = vmmov 0   ;;  %v12085_v18 = vmov 7  }
  0x1b   :  { %8489 = vmatpush3.msra.mxu1 %v237_v7  ;;  %8474 = vmatprep.mubr.msk.f32.mxu0 %vm107_vm0, %v90_v6  ;;  %s12186_s24 = sld [smem:[#allocation42_spill]]  ;;  %s9506_s3 = smov 80   ;;  %v12087_v62 = vmov 0   ;;  %vm3403_vm2 = vcmask 64512   ;;  %vm3767_vm3 = vcmask 261120   ;;  %vm4371_vm4 = vcmask 195584  }
  0x1c   :  { %8491 = vmatmul.mubr.msk.f32.vlgmr.msra.gmra.mxu1 %vm107_vm0, %v91_v8  ;;  %8509 = vmatprep.subr.mxu1 %v12102_v11  ;;  %s12187_s2 = sld [smem:[#allocation45_spill]]  ;;  %s9508_s9 = smov 16   ;;  %vm8003_vm11 = vcmask 7168   ;;  %vm8012_vm12 = vcmask 0  }
  0x1d   :  { %8493 = vmatprep.mubr.msk.f32.mxu1 %vm107_vm0, %v92_v10  ;;  %8475 = vmatmul.mubr.msk.f32.vlgmr.msra.gmra.mxu0 %vm107_vm0, %v91_v8  ;;  %s12188_s8 = sld [smem:[#allocation36_spill]]  ;;  %s9509_s11 = smov 96  }
  0x1e   :  { %8477 = vmatprep.mubr.msk.f32.mxu0 %vm107_vm0, %v92_v10  ;;  %8502 = vmatprep.subr.mxu0 %v12102_v11  ;;  %s12189_s6 = sld [smem:[#allocation46_spill]]  ;;  %s9517_s29 = smov 64  }
  0x1f   :  { %v9693_v9 = vld [vmem:[%s12184_s0 + $0x8] sm:$0xff]  ;;  %v9704_v12 = vld [vmem:[%s12184_s0] sm:$0xff]  ;;  %9121 = vset.pattern.permute.xlu0 %v12085_v18  ;;  %9122 = vset.pattern.permute.xlu1 %v12085_v18  ;;  %s12362_s28 = sld [smem:[#allocation39_spill]] }
  0x20   :  { %8510 = vmatpush3.msra.mxu1 %v9693_v9  ;;  %v9719_v15 = vld [vmem:[%s12185_s30 + $0x8] sm:$0xff]  ;;  %v9728_v16 = vld [vmem:[%s12185_s30] sm:$0xff] }
  0x21   :  { %8511 = vmatprep.subr.mxu1 %v12102_v11  ;;  %8494 = vmatmul.mubr.msk.f32.gmra.mxu1 %vm107_vm0, %v93_v13  ;;  %v8028_v19 = vld [vmem:[%s12186_s24] ss:$0 sm:$0xff] }
  0x22   :  { %8512 = vmatpush3.msra.mxu1 %v9704_v12  ;;  %8496 = vmatprep.mubr.msk.f32.mxu1 %vm107_vm0, %v94_v14  ;;  %v8037_v23 = vld [vmem:[%s12187_s2] ss:$0 sm:$0xff] }
  0x23   :  { %8503 = vmatpush3.msra.mxu0 %v9719_v15  ;;  %8523 = vmatprep.subr.mxu1 %v12102_v11  ;;  %v9796_v61 = vld [vmem:[%s12188_s8] sm:$0xff] }
  0x24   :  { %8478 = vmatmul.mubr.msk.f32.gmra.mxu0 %vm107_vm0, %v93_v13  ;;  %8504 = vmatprep.subr.mxu0 %v12102_v11 }
  0x25   :  { %8480 = vmatprep.mubr.msk.f32.mxu0 %vm107_vm0, %v94_v14  ;;  %8505 = vmatpush3.msra.mxu0 %v9728_v16  ;;  %v9804_v14 = vsub.f32 1.0, %v9796_v61 }
  0x26   :  { %8497 = vmatmul.mubr.msk.f32.gmra.mxu1 %vm107_vm0, %v95_v17  ;;  %8516 = vmatprep.subr.mxu0 %v12102_v11 }
  0x27   :  { %8499 = vmatprep.mubr.msk.f32.mxu1 %vm107_vm0, %v96_v3 }
  0x28   :  { %8481 = vmatmul.mubr.msk.f32.gmra.mxu0 %vm107_vm0, %v95_v17 }
  0x29   :  { %8506 = vmatprep.mubr.msk.f32.mxu0 %vm9504_vm1, %v12102_v11 }
  0x2a   :  { %8500 = vmatmul.mubr.msk.f32.gmra.mxu1 %vm107_vm0, %v97_v4 }
  0x2b   :  { %8513 = vmatprep.mubr.msk.f32.mxu1 %vm9504_vm1, %v12102_v11 }
  0x2c   :  { %8507 = vmatmul.mubr.f32.vlgmr.msra.gmra.mxu0 %v12102_v11 }
  0x2d   :  { %8520 = vmatprep.mubr.msk.f32.mxu0 %vm9504_vm1, %v12102_v11 }
  0x2e   :  { %8514 = vmatmul.mubr.f32.vlgmr.msra.gmra.mxu1 %v12102_v11 }
  0x2f   :  { %8527 = vmatprep.mubr.msk.f32.mxu1 %vm9504_vm1, %v12102_v11 }
  0xd8   :  { %v8485_v20 = vpop.f32.mrf.mxu1 }
  0xd9   :  { %v9760_v21 = vadd.f32 %v8485_v20, %v8028_v19 }
  0xda   :  { %v228_v22 = vpop.f32.mrf.mxu1 }
  0xdb   :  { %v9765_v24 = vadd.f32 %v8028_v19, %v228_v22 }
  0xdc   :  { %v8492_v25 = vpop.f32.mrf.mxu1 }
  0xdd   :  { %v9767_v26 = vadd.f32 %v8492_v25, %v8037_v23  ;;  %v8476_v28 = vpop.f32.mrf.mxu0 }
  0xde   :  { %v312_v27 = vpop.f32.mrf.mxu1  ;;  %v9771_v30 = vadd.f32 %v8476_v28, %v8028_v19 }
  0xdf   :  { %v9769_v29 = vadd.f32 %v8037_v23, %v312_v27  ;;  %v198_v32 = vpop.f32.mrf.mxu0 }
  0xe0   :  { %v199_v48 = vadd.f32 %v8028_v19, %v198_v32  ;;  %v8050_v32 = vld [vmem:[%s12059_s12 + $0x70] sm:$0xff] }
  0xe1   :  { %v8495_v31 = vpop.f32.mrf.mxu1 }
  0xe2   :  { %v9773_v33 = vadd.f32 %v8495_v31, %v8037_v23  ;;  %v8051_v31 = vld [vmem:[%s12059_s12 + $0x78] sm:$0xff] }
  0xe3   :  { %v322_v34 = vpop.f32.mrf.mxu1  ;;  %8524 = vmatpush3.msra.mxu1 %v8051_v31 }
  0xe4   :  { %v8479_v35 = vpop.f32.mrf.mxu0  ;;  %v9775_v36 = vadd.f32 %v8037_v23, %v322_v34  ;;  %8525 = vmatprep.subr.mxu1 %v12102_v11 }
  0xe5   :  { %v9777_v37 = vadd.f32 %v8479_v35, %v8028_v19  ;;  %8526 = vmatpush3.msra.mxu1 %v8050_v32 }
  0xe6   :  { %v8498_v38 = vpop.f32.mrf.mxu1  ;;  %v208_v39 = vpop.f32.mrf.mxu0  ;;  %8537 = vmatprep.subr.mxu1 %v12102_v11 }
  0xe7   :  { %v9779_v40 = vadd.f32 %v8498_v38, %v8037_v23  ;;  %v9781_v41 = vadd.f32 %v8028_v19, %v208_v39  ;;  %v588_v38 = vld [vmem:[%s12189_s6 + $0x8] sm:$0xff] }
  0xe8   :  { %v332_v42 = vpop.f32.mrf.mxu1  ;;  %v8482_v43 = vpop.f32.mrf.mxu0  ;;  %8517 = vmatpush3.msra.mxu0 %v588_v38 }
  0xe9   :  { %v9783_v44 = vadd.f32 %v8037_v23, %v332_v42  ;;  %v9785_v45 = vadd.f32 %v8482_v43, %v8028_v19  ;;  %8518 = vmatprep.subr.mxu0 %v12102_v11 }
  0xea   :  { %v8501_v46 = vpop.f32.mrf.mxu1  ;;  %v218_v47 = vpop.f32.mrf.mxu0 }
  0xeb   :  { %v9787_v49 = vadd.f32 %v8028_v19, %v218_v47  ;;  %v348_v52 = vadd.f32 %v8501_v46, %v8037_v23 }
  0xec   :  { %v342_v50 = vpop.f32.mrf.mxu1  ;;  %v432_v51 = vpop.f32.mrf.mxu0 }
  0xed   :  { %v9789_v53 = vadd.f32 %v8037_v23, %v342_v50  ;;  %v436_v57 = vadd.f32 %v432_v51, %v199_v48  ;;  %v587_v50 = vld [vmem:[%s12189_s6] sm:$0xff] }
  0xee   :  { %v543_v54 = vpop.f32.mrf.mxu1  ;;  %v8508_v55 = vpop.f32.mrf.mxu0  ;;  %8519 = vmatpush3.msra.mxu0 %v587_v50 }
  0xef   :  { %v547_v56 = vadd.f32 %v543_v54, %v348_v52  ;;  %v8047_v0 = vmul.f32 -1.442695, %v436_v57  ;;  %8530 = vmatprep.subr.mxu0 %v12102_v11 }
  0xf0   :  { %v8515_v58 = vpop.f32.mrf.mxu1 }
  0xf1   :  { %9186 = vtanh.f32 %v547_v56  ;;  %v8048_v63 = vmul.f32 -1.442695, %v547_v56 }
  0xf2   :  { %9188 = vtanh.f32 %v436_v57 }
  0xf3   :  { %9190 = vpow2.f32 %v8048_v63 }
  0xf4   :  { %9192 = vpow2.f32 %v8047_v0 }
  0xfe   :  { %v9187_v59 = vpop.eup %9186 }
  0xff   :  { %557 = vrot.lane.b32.xlu0 %v9187_v59, %s9506_s3  ;;  %v9189_v60 = vpop.eup %9188 }
 0x100   :  { %v9191_v1 = vpop.eup %9190 }
 0x101   :  { %v551_v2 = vadd.f32 1.0, %v9191_v1  ;;  %v9193_v3 = vpop.eup %9192 }
 0x102   :  { %v440_v4 = vadd.f32 1.0, %v9193_v3 }
 0x103   :  { %446 = vrot.lane.b32.xlu0 %v9189_v60, %s9506_s3  ;;  %9194 = vrcp.f32 %v551_v2 }
 0x104   :  { %9196 = vrcp.f32 %v440_v4 }
 0x107   :  { %573 = vperm.xlu0 %9121, %v9796_v61  }
 0x10b   :  { %9123 = vset.pattern.permute.xlu0 %v12087_v62 }
 0x10c   :  { %463 = vperm.xlu0 %9123, %v9796_v61  }
 0x110   :  { %v9195_v5 = vpop.eup %9194 }
 0x111   :  { %v9197_v8 = vpop.eup %9196  ;;  %v555_v17 = vmul.f32 0.0, %v9195_v5 }
 0x112   :  { %v444_v23 = vmul.f32 0.0, %v9197_v8 }
 0x171   :  { %v558_v6 = vpop.permute.xlu0 %557 }
 0x172   :  { %v560_v7 = vmul.f32 %v9195_v5, %v558_v6 }
 0x174   :  { %562 = vrot.lane.b32.xlu1 %v560_v7, %s9508_s9 }
 0x175   :  { %v447_v10 = vpop.permute.xlu0 %446 }
 0x176   :  { %v449_v13 = vmul.f32 %v9197_v8, %v447_v10  ;;  %v12089_v10 = vmov 6  }
 0x177   :  { %9125 = vset.pattern.permute.xlu0 %v12089_v10 }
 0x178   :  { %451 = vrot.lane.b32.xlu1 %v449_v13, %s9508_s9  ;;  %v8046_v13 = vld [vmem:[%s12060_s13] ss:$0 sm:$0xff] }
 0x17c   :  { %578 = vperm.xlu1 %9122, %v9804_v14  }
 0x180   :  { %9124 = vset.pattern.permute.xlu1 %v12087_v62 }
 0x182   :  { %v9827_v42 = vpop.permute.xlu0 %573 }
 0x187   :  { %v9848_v51 = vpop.permute.xlu0 %463 }
 0x1e6   :  { %v563_v19 = vpop.permute.xlu1 %562 }
 0x1e7   :  { %v9808_v20 = vadd.f32 %v563_v19, %v555_v17 }
 0x1e9   :  { %9198 = vtanh.f32 %v9808_v20 }
 0x1ea   :  { %v452_v22 = vpop.permute.xlu1 %451 }
 0x1eb   :  { %v454_v25 = vadd.f32 %v452_v22, %v444_v23 }
 0x1ed   :  { %9200 = vtanh.f32 %v454_v25  ;;  %v475_v54 = vmul.f32 %v9848_v51, %v454_v25 }
 0x1f6   :  { %v9199_v27 = vpop.eup %9198 }
 0x1f7   :  { %568 = vrot.lane.b32.xlu1 %v9199_v27, %s9508_s9  ;;  %v9822_v34 = vpop.permute.xlu1 %578 }
 0x1f8   :  { %v9831_v43 = vmul.f32 0.0, %v9822_v34 }
 0x1fa   :  { %v9201_v28 = vpop.eup %9200 }
 0x1fb   :  { %470 = vperm.xlu1 %9124, %v9804_v14  }
 0x1ff   :  { %457 = vrot.lane.b32.xlu1 %v9201_v28, %s9508_s9 }
 0x200   :  { %9126 = vset.pattern.permute.xlu1 %v12089_v10 }
 0x269   :  { %v569_v35 = vpop.permute.xlu1 %568 }
 0x26a   :  { %v571_v39 = vmul.f32 %v9195_v5, %v569_v35 }
 0x26c   :  { %v576_v46 = vmul.f32 %v9827_v42, %v571_v39 }
 0x26e   :  { %v9835_v47 = vadd.f32 %v9831_v43, %v576_v46 }
 0x270   :  { %859 = vrot.lane.b32.xlu1 %v9835_v47, %s9509_s11  ;;  %v9841_v48 = vmul.f32 %v9835_v47, %v9827_v42 }
 0x272   :  { %669 = vrot.lane.b32.xlu0 %v9841_v48, %s9509_s11 }
 0x276   :  { %v9851_v52 = vpop.permute.xlu1 %470 }
 0x277   :  { %v473_v55 = vmul.f32 0.0, %v9851_v52 }
 0x279   :  { %v9855_v56 = vadd.f32 %v475_v54, %v473_v55 }
 0x27a   :  { %v458_v57 = vpop.permute.xlu1 %457 }
 0x27b   :  { %v460_v58 = vmul.f32 %v9197_v8, %v458_v57 }
 0x27d   :  { %v466_v59 = vmul.f32 %v9848_v51, %v460_v58 }
 0x27f   :  { %v9858_v60 = vadd.f32 %v473_v55, %v466_v59 }
 0x281   :  { %745 = vrot.lane.b32.xlu1 %v9858_v60, %s9509_s11  ;;  %v9864_v63 = vmul.f32 %v9858_v60, %v9848_v51 }
 0x283   :  { %12190 = vst [vmem:[#allocation6_spill] sm:$0xff] %v9864_v63  ;;  %590 = vrot.lane.b32.xlu0 %v9864_v63, %s9509_s11 }
 0x2e2   :  { %v860_v1 = vpop.permute.xlu1 %859 }
 0x2e4   :  { %v670_v0 = vpop.permute.xlu0 %669 }
 0x2e5   :  { %8528 = vmatmul.mubr.msk.f32.vlgmr.msra.gmra.mxu1 %vm107_vm0, %v670_v0 }
 0x2e6   :  { %8538 = vmatpush3.msra.mxu1 %v9693_v9  ;;  %8541 = vmatprep.mubr.msk.f32.mxu1 %vm9504_vm1, %v12102_v11 }
 0x2e7   :  { %8539 = vmatprep.subr.mxu1 %v12102_v11 }
 0x2e8   :  { %8540 = vmatpush3.msra.mxu1 %v9704_v12 }
 0x2e9   :  { %8542 = vmatmul.mubr.msk.f32.vlgmr.msra.gmra.mxu1 %vm107_vm0, %v860_v1  ;;  %8551 = vmatprep.subr.mxu1 %v12102_v11  ;;  %v583_v1 = vmul.f32 %v9827_v42, %v9808_v20  ;;  %v8061_v20 = vld [vmem:[%s12059_s12 + $0x68] sm:$0xff] }
 0x2ea   :  { %8555 = vmatprep.mubr.msk.f32.mxu1 %vm9504_vm1, %v12102_v11  ;;  %8552 = vmatpush3.msra.mxu1 %v8061_v20  ;;  %v12091_v20 = vmov 5  }
 0x2eb   :  { %8553 = vmatprep.subr.mxu1 %v12102_v11 }
 0x2f3   :  { %v746_v3 = vpop.permute.xlu1 %745 }
 0x2f5   :  { %v591_v2 = vpop.permute.xlu0 %590 }
 0x2f6   :  { %8521 = vmatmul.mubr.msk.f32.vlgmr.msra.gmra.mxu0 %vm107_vm0, %v591_v2  ;;  %v9909_v2 = vadd.f32 %v583_v1, %v9831_v43 }
 0x2f7   :  { %8531 = vmatpush3.msra.mxu0 %v9719_v15  ;;  %8534 = vmatprep.mubr.msk.f32.mxu0 %vm9504_vm1, %v12102_v11 }
 0x2f8   :  { %8532 = vmatprep.subr.mxu0 %v12102_v11 }
 0x2f9   :  { %8533 = vmatpush3.msra.mxu0 %v9728_v16 }
 0x2fa   :  { %8535 = vmatmul.mubr.msk.f32.vlgmr.msra.gmra.mxu0 %vm107_vm0, %v746_v3  ;;  %8544 = vmatprep.subr.mxu0 %v12102_v11 }
 0x2fb   :  { %8548 = vmatprep.mubr.msk.f32.mxu0 %vm9504_vm1, %v12102_v11 }
 0x3a5   :  { %v739_v4 = vpop.f32.mrf.mxu1 }
 0x3a7   :  { %v8529_v5 = vpop.f32.mrf.mxu1 }
 0x3a9   :  { %v929_v6 = vpop.f32.mrf.mxu1 }
 0x3aa   :  { %v933_v7 = vadd.f32 %v929_v6, %v9789_v53 }
 0x3ab   :  { %v8543_v8 = vpop.f32.mrf.mxu1 }
 0x3ac   :  { %9202 = vtanh.f32 %v933_v7  ;;  %v8056_v32 = vmul.f32 -1.442695, %v933_v7 }
 0x3b6   :  { %v660_v17 = vpop.f32.mrf.mxu0 }
 0x3b7   :  { %v664_v19 = vadd.f32 %v8046_v13, %v660_v17  ;;  %v8060_v17 = vld [vmem:[%s12059_s12 + $0x60] sm:$0xff] }
 0x3b8   :  { %v8522_v22 = vpop.f32.mrf.mxu0  ;;  %8554 = vmatpush3.msra.mxu1 %v8060_v17 }
 0x3b9   :  { %v9203_v23 = vpop.eup %9202  ;;  %v9894_v25 = vadd.f32 %v739_v4, %v664_v19  ;;  %8565 = vmatprep.subr.mxu1 %v12102_v11 }
 0x3ba   :  { %943 = vrot.lane.b32.xlu0 %v9203_v23, %s9506_s3  ;;  %v815_v53 = vpop.f32.mrf.mxu0  ;;  %v8058_v23 = vld [vmem:[%s12189_s6 + $0x18] sm:$0xff] }
 0x3bb   :  { %v819_v27 = vadd.f32 %v815_v53, %v9771_v30  ;;  %v12094_v30 = vmov 1   ;;  %8545 = vmatpush3.msra.mxu0 %v8058_v23 }
 0x3bc   :  { %v8536_v28 = vpop.f32.mrf.mxu0  ;;  %8546 = vmatprep.subr.mxu0 %v12102_v11 }
 0x3bd   :  { %9204 = vtanh.f32 %v819_v27  ;;  %v8054_v38 = vmul.f32 -1.442695, %v819_v27 }
 0x3be   :  { %9206 = vpow2.f32 %v8056_v32 }
 0x3bf   :  { %9208 = vpow2.f32 %v8054_v38  ;;  %v8057_v38 = vld [vmem:[%s12189_s6 + $0x10] sm:$0xff] }
 0x3c0   :  { %8547 = vmatpush3.msra.mxu0 %v8057_v38 }
 0x3c1   :  { %8558 = vmatprep.subr.mxu0 %v12102_v11 }
 0x3ca   :  { %v9205_v31 = vpop.eup %9204 }
 0x3cb   :  { %829 = vrot.lane.b32.xlu1 %v9205_v31, %s9506_s3  ;;  %v9207_v35 = vpop.eup %9206 }
 0x3cc   :  { %v937_v39 = vadd.f32 1.0, %v9207_v35  ;;  %v9209_v46 = vpop.eup %9208 }
 0x3cd   :  { %v823_v54 = vadd.f32 1.0, %v9209_v46 }
 0x3ce   :  { %9210 = vrcp.f32 %v937_v39 }
 0x3cf   :  { %9212 = vrcp.f32 %v823_v54 }
 0x3db   :  { %v9211_v50 = vpop.eup %9210 }
 0x3dc   :  { %v9213_v58 = vpop.eup %9212  ;;  %v941_v3 = vmul.f32 %v9211_v50, %v9909_v2 }
 0x3dd   :  { %v827_v7 = vmul.f32 %v9213_v58, %v9855_v56 }
 0x42c   :  { %v944_v55 = vpop.permute.xlu0 %943 }
 0x42d   :  { %v946_v57 = vmul.f32 %v9211_v50, %v944_v55 }
 0x42f   :  { %948 = vrot.lane.b32.xlu0 %v946_v57, %s9508_s9 }
 0x433   :  { %959 = vperm.xlu0 %9125, %v9796_v61  }
 0x437   :  { %9127 = vset.pattern.permute.xlu0 %v12094_v30 }
 0x438   :  { %845 = vperm.xlu0 %9127, %v9796_v61  }
 0x43c   :  { %9129 = vset.pattern.permute.xlu0 %v12091_v20 }
 0x43d   :  { %v830_v59 = vpop.permute.xlu1 %829 }
 0x43e   :  { %v832_v0 = vmul.f32 %v9213_v58, %v830_v59 }
 0x440   :  { %834 = vrot.lane.b32.xlu1 %v832_v0, %s9508_s9 }
 0x444   :  { %964 = vperm.xlu1 %9126, %v9804_v14  }
 0x448   :  { %9128 = vset.pattern.permute.xlu1 %v12094_v30 }
 0x4a1   :  { %v949_v4 = vpop.permute.xlu0 %948 }
 0x4a2   :  { %v9912_v5 = vadd.f32 %v949_v4, %v941_v3 }
 0x4a4   :  { %9214 = vtanh.f32 %v9912_v5 }
 0x4ae   :  { %v9935_v27 = vpop.permute.xlu0 %959 }
 0x4b1   :  { %v9215_v6 = vpop.eup %9214 }
 0x4b2   :  { %954 = vrot.lane.b32.xlu1 %v9215_v6, %s9508_s9  ;;  %v835_v8 = vpop.permute.xlu1 %834 }
 0x4b3   :  { %v9917_v13 = vadd.f32 %v835_v8, %v827_v7 }
 0x4b5   :  { %9216 = vtanh.f32 %v9917_v13 }
 0x4b6   :  { %850 = vperm.xlu1 %9128, %v9804_v14  }
 0x4ba   :  { %9130 = vset.pattern.permute.xlu1 %v12091_v20 }
 0x4bf   :  { %v9930_v19 = vpop.permute.xlu1 %964 }
 0x4c0   :  { %v967_v31 = vmul.f32 %v9930_v19, %v9835_v47 }
 0x4c2   :  { %v9217_v43 = vpop.eup %9216 }
 0x4c3   :  { %840 = vrot.lane.b32.xlu1 %v9217_v43, %s9508_s9 }
 0x524   :  { %v955_v22 = vpop.permute.xlu1 %954 }
 0x525   :  { %v957_v53 = vmul.f32 %v9211_v50, %v955_v22  ;;  %v9957_v50 = vpop.permute.xlu0 %845 }
 0x527   :  { %v962_v28 = vmul.f32 %v9935_v27, %v957_v53 }
 0x529   :  { %v9941_v32 = vadd.f32 %v967_v31, %v962_v28 }
 0x52b   :  { %v9945_v35 = vmul.f32 %v9941_v32, %v9935_v27  ;;  %1247 = vrot.lane.b32.xlu1 %v9941_v32, %s9509_s11 }
 0x52d   :  { %1057 = vrot.lane.b32.xlu0 %v9945_v35, %s9509_s11 }
 0x531   :  { %v9955_v47 = vpop.permute.xlu1 %850 }
 0x532   :  { %v853_v55 = vmul.f32 %v9955_v47, %v9858_v60 }
 0x535   :  { %v841_v39 = vpop.permute.xlu1 %840 }
 0x536   :  { %v843_v46 = vmul.f32 %v9213_v58, %v841_v39 }
 0x538   :  { %v848_v54 = vmul.f32 %v9957_v50, %v843_v46 }
 0x53a   :  { %v9962_v57 = vadd.f32 %v853_v55, %v848_v54 }
 0x53c   :  { %1133 = vrot.lane.b32.xlu1 %v9962_v57, %s9509_s11  ;;  %v9968_v59 = vmul.f32 %v9962_v57, %v9957_v50 }
 0x53e   :  { %12191 = vst [vmem:[#allocation7_spill] sm:$0xff] %v9968_v59  ;;  %978 = vrot.lane.b32.xlu0 %v9968_v59, %s9509_s11 }
 0x59d   :  { %v1248_v60 = vpop.permute.xlu1 %1247 }
 0x59f   :  { %v1058_v58 = vpop.permute.xlu0 %1057 }
 0x5a0   :  { %8556 = vmatmul.mubr.msk.f32.vlgmr.msra.gmra.mxu1 %vm107_vm0, %v1058_v58 }
 0x5a1   :  { %8566 = vmatpush3.msra.mxu1 %v9693_v9  ;;  %8569 = vmatprep.mubr.msk.f32.mxu1 %vm9504_vm1, %v12102_v11 }
 0x5a2   :  { %8567 = vmatprep.subr.mxu1 %v12102_v11 }
 0x5a3   :  { %8568 = vmatpush3.msra.mxu1 %v9704_v12 }
 0x5a4   :  { %8570 = vmatmul.mubr.msk.f32.vlgmr.msra.gmra.mxu1 %vm107_vm0, %v1248_v60  ;;  %8579 = vmatprep.subr.mxu1 %v12102_v11 }
 0x5a5   :  { %8583 = vmatprep.mubr.msk.f32.mxu1 %vm9504_vm1, %v12102_v11 }
 0x5ae   :  { %v1134_v1 = vpop.permute.xlu1 %1133 }
 0x5b0   :  { %v979_v0 = vpop.permute.xlu0 %978 }
 0x5b1   :  { %8549 = vmatmul.mubr.msk.f32.vlgmr.msra.gmra.mxu0 %vm107_vm0, %v979_v0 }
 0x5b2   :  { %8559 = vmatpush3.msra.mxu0 %v9719_v15  ;;  %8562 = vmatprep.mubr.msk.f32.mxu0 %vm9504_vm1, %v12102_v11 }
 0x5b3   :  { %8560 = vmatprep.subr.mxu0 %v12102_v11 }
 0x5b4   :  { %8561 = vmatpush3.msra.mxu0 %v9728_v16 }
 0x5b5   :  { %8563 = vmatmul.mubr.msk.f32.vlgmr.msra.gmra.mxu0 %vm107_vm0, %v1134_v1  ;;  %8572 = vmatprep.subr.mxu0 %v12102_v11 }
 0x5b6   :  { %8576 = vmatprep.mubr.msk.f32.mxu0 %vm9504_vm1, %v12102_v11 }
 0x660   :  { %v1127_v3 = vpop.f32.mrf.mxu1 }
 0x662   :  { %v8557_v4 = vpop.f32.mrf.mxu1 }
 0x664   :  { %v1317_v6 = vpop.f32.mrf.mxu1 }
 0x665   :  { %v1321_v7 = vadd.f32 %v1317_v6, %v9779_v40 }
 0x666   :  { %v8571_v8 = vpop.f32.mrf.mxu1 }
 0x667   :  { %9218 = vtanh.f32 %v1321_v7  ;;  %v8066_v39 = vmul.f32 -1.442695, %v1321_v7  ;;  %v970_v7 = vmul.f32 %v9930_v19, %v9909_v2  ;;  %v969_v8 = vmul.f32 %v9935_v27, %v9912_v5 }
 0x671   :  { %v1048_v43 = vpop.f32.mrf.mxu0 }
 0x672   :  { %v1052_v17 = vadd.f32 %v1048_v43, %v9894_v25  ;;  %v10012_v43 = vadd.f32 %v970_v7, %v969_v8 }
 0x673   :  { %v8550_v22 = vpop.f32.mrf.mxu0 }
 0x674   :  { %v9219_v23 = vpop.eup %9218  ;;  %v9996_v53 = vadd.f32 %v1127_v3, %v1052_v17 }
 0x675   :  { %1331 = vrot.lane.b32.xlu0 %v9219_v23, %s9506_s3  ;;  %v1203_v28 = vpop.f32.mrf.mxu0 }
 0x676   :  { %v1207_v31 = vadd.f32 %v1203_v28, %v9781_v41  ;;  %v12098_v41 = vmov 2   ;;  %v856_v28 = vmul.f32 %v9955_v47, %v9855_v56  ;;  %v8071_v56 = vld [vmem:[%s12059_s12 + $0x58] sm:$0xff] }
 0x677   :  { %v8564_v40 = vpop.f32.mrf.mxu0  ;;  %8580 = vmatpush3.msra.mxu1 %v8071_v56 }
 0x678   :  { %9220 = vtanh.f32 %v1207_v31  ;;  %v8064_v54 = vmul.f32 -1.442695, %v1207_v31  ;;  %v855_v31 = vmul.f32 %v9957_v50, %v9917_v13  ;;  %8581 = vmatprep.subr.mxu1 %v12102_v11 }
 0x679   :  { %9222 = vpow2.f32 %v8066_v39 }
 0x67a   :  { %9224 = vpow2.f32 %v8064_v54  ;;  %v10022_v40 = vadd.f32 %v856_v28, %v855_v31 }
 0x685   :  { %v9221_v38 = vpop.eup %9220 }
 0x686   :  { %1217 = vrot.lane.b32.xlu1 %v9221_v38, %s9506_s3  ;;  %v9223_v46 = vpop.eup %9222 }
 0x687   :  { %v1325_v55 = vadd.f32 1.0, %v9223_v46  ;;  %v9225_v25 = vpop.eup %9224  ;;  %v8070_v46 = vld [vmem:[%s12059_s12 + $0x50] sm:$0xff] }
 0x688   :  { %v1211_v60 = vadd.f32 1.0, %v9225_v25  ;;  %8582 = vmatpush3.msra.mxu1 %v8070_v46  ;;  %v8068_v25 = vld [vmem:[%s12189_s6 + $0x28] sm:$0xff] }
 0x689   :  { %9226 = vrcp.f32 %v1325_v55  ;;  %8593 = vmatprep.subr.mxu1 %v12102_v11  ;;  %8573 = vmatpush3.msra.mxu0 %v8068_v25 }
 0x68a   :  { %9228 = vrcp.f32 %v1211_v60  ;;  %8574 = vmatprep.subr.mxu0 %v12102_v11 }
 0x696   :  { %v9227_v58 = vpop.eup %9226 }
 0x697   :  { %v9229_v3 = vpop.eup %9228  ;;  %v1329_v17 = vmul.f32 %v9227_v58, %v10012_v43 }
 0x698   :  { %v1215_v5 = vmul.f32 %v9229_v3, %v10022_v40 }
 0x6e7   :  { %v1332_v0 = vpop.permute.xlu0 %1331 }
 0x6e8   :  { %v1334_v1 = vmul.f32 %v9227_v58, %v1332_v0 }
 0x6ea   :  { %1336 = vrot.lane.b32.xlu0 %v1334_v1, %s9508_s9 }
 0x6ee   :  { %1347 = vperm.xlu0 %9129, %v9796_v61  }
 0x6f2   :  { %9131 = vset.pattern.permute.xlu0 %v12098_v41 }
 0x6f3   :  { %1233 = vperm.xlu0 %9131, %v9796_v61  }
 0x6f8   :  { %v1218_v4 = vpop.permute.xlu1 %1217 }
 0x6f9   :  { %v1220_v6 = vmul.f32 %v9229_v3, %v1218_v4 }
 0x6fb   :  { %1222 = vrot.lane.b32.xlu1 %v1220_v6, %s9508_s9 }
 0x6ff   :  { %1352 = vperm.xlu1 %9130, %v9804_v14  }
 0x703   :  { %9132 = vset.pattern.permute.xlu1 %v12098_v41 }
 0x75c   :  { %v1337_v22 = vpop.permute.xlu0 %1336 }
 0x75d   :  { %v10015_v23 = vadd.f32 %v1337_v22, %v1329_v17 }
 0x75f   :  { %9230 = vtanh.f32 %v10015_v23 }
 0x769   :  { %v10044_v0 = vpop.permute.xlu0 %1347 }
 0x76c   :  { %v9231_v2 = vpop.eup %9230 }
 0x76d   :  { %1342 = vrot.lane.b32.xlu1 %v9231_v2, %s9508_s9  ;;  %v1223_v38 = vpop.permute.xlu1 %1222 }
 0x76e   :  { %v10026_v39 = vadd.f32 %v1223_v38, %v1215_v5  ;;  %v10066_v22 = vpop.permute.xlu0 %1233 }
 0x770   :  { %9232 = vtanh.f32 %v10026_v39 }
 0x771   :  { %1238 = vperm.xlu1 %9132, %v9804_v14  }
 0x77a   :  { %v10039_v54 = vpop.permute.xlu1 %1352 }
 0x77b   :  { %v1355_v4 = vmul.f32 %v10039_v54, %v9941_v32 }
 0x77d   :  { %v9233_v13 = vpop.eup %9232 }
 0x77e   :  { %1228 = vrot.lane.b32.xlu1 %v9233_v13, %s9508_s9 }
 0x7df   :  { %v1343_v55 = vpop.permute.xlu1 %1342 }
 0x7e0   :  { %v1345_v60 = vmul.f32 %v9227_v58, %v1343_v55  ;;  %v8067_v58 = vld [vmem:[%s12189_s6 + $0x20] sm:$0xff] }
 0x7e1   :  { %8575 = vmatpush3.msra.mxu0 %v8067_v58 }
 0x7e2   :  { %v1350_v1 = vmul.f32 %v10044_v0, %v1345_v60  ;;  %8586 = vmatprep.subr.mxu0 %v12102_v11  ;;  %v12096_v60 = vmov 4  }
 0x7e3   :  { %9133 = vset.pattern.permute.xlu0 %v12096_v60  ;;  %9134 = vset.pattern.permute.xlu1 %v12096_v60 }
 0x7e4   :  { %v10050_v6 = vadd.f32 %v1355_v4, %v1350_v1 }
 0x7e6   :  { %v10054_v7 = vmul.f32 %v10050_v6, %v10044_v0  ;;  %1635 = vrot.lane.b32.xlu1 %v10050_v6, %s9509_s11 }
 0x7e8   :  { %1445 = vrot.lane.b32.xlu0 %v10054_v7, %s9509_s11 }
 0x7ec   :  { %v10064_v32 = vpop.permute.xlu1 %1238 }
 0x7ed   :  { %v1241_v31 = vmul.f32 %v10064_v32, %v9962_v57 }
 0x7f0   :  { %v1229_v8 = vpop.permute.xlu1 %1228 }
 0x7f1   :  { %v1231_v17 = vmul.f32 %v9229_v3, %v1229_v8 }
 0x7f3   :  { %v1236_v28 = vmul.f32 %v10066_v22, %v1231_v17 }
 0x7f5   :  { %v10071_v2 = vadd.f32 %v1241_v31, %v1236_v28 }
 0x7f7   :  { %1521 = vrot.lane.b32.xlu1 %v10071_v2, %s9509_s11  ;;  %v10077_v5 = vmul.f32 %v10071_v2, %v10066_v22 }
 0x7f9   :  { %12192 = vst [vmem:[#allocation8_spill] sm:$0xff] %v10077_v5  ;;  %1366 = vrot.lane.b32.xlu0 %v10077_v5, %s9509_s11 }
 0x858   :  { %v1636_v57 = vpop.permute.xlu1 %1635 }
 0x85a   :  { %v1446_v3 = vpop.permute.xlu0 %1445 }
 0x85b   :  { %8584 = vmatmul.mubr.msk.f32.vlgmr.msra.gmra.mxu1 %vm107_vm0, %v1446_v3 }
 0x85c   :  { %8594 = vmatpush3.msra.mxu1 %v9693_v9  ;;  %8597 = vmatprep.mubr.msk.f32.mxu1 %vm9504_vm1, %v12102_v11 }
 0x85d   :  { %8595 = vmatprep.subr.mxu1 %v12102_v11 }
 0x85e   :  { %8596 = vmatpush3.msra.mxu1 %v9704_v12 }
 0x85f   :  { %8598 = vmatmul.mubr.msk.f32.vlgmr.msra.gmra.mxu1 %vm107_vm0, %v1636_v57  ;;  %8607 = vmatprep.subr.mxu1 %v12102_v11 }
 0x860   :  { %8611 = vmatprep.mubr.msk.f32.mxu1 %vm9504_vm1, %v12102_v11 }
 0x869   :  { %v1522_v9 = vpop.permute.xlu1 %1521 }
 0x86b   :  { %v1367_v38 = vpop.permute.xlu0 %1366 }
 0x86c   :  { %8577 = vmatmul.mubr.msk.f32.vlgmr.msra.gmra.mxu0 %vm107_vm0, %v1367_v38 }
 0x86d   :  { %8587 = vmatpush3.msra.mxu0 %v9719_v15  ;;  %8590 = vmatprep.mubr.msk.f32.mxu0 %vm9504_vm1, %v12102_v11 }
 0x86e   :  { %8588 = vmatprep.subr.mxu0 %v12102_v11 }
 0x86f   :  { %8589 = vmatpush3.msra.mxu0 %v9728_v16 }
 0x870   :  { %8591 = vmatmul.mubr.msk.f32.vlgmr.msra.gmra.mxu0 %vm107_vm0, %v1522_v9  ;;  %8600 = vmatprep.subr.mxu0 %v12102_v11 }
 0x871   :  { %8604 = vmatprep.mubr.msk.f32.mxu0 %vm9504_vm1, %v12102_v11 }
 0x91b   :  { %v1515_v56 = vpop.f32.mrf.mxu1 }
 0x91d   :  { %v8585_v13 = vpop.f32.mrf.mxu1 }
 0x91f   :  { %v1705_v46 = vpop.f32.mrf.mxu1 }
 0x920   :  { %v1709_v55 = vadd.f32 %v1705_v46, %v9783_v44 }
 0x921   :  { %v8599_v25 = vpop.f32.mrf.mxu1 }
 0x922   :  { %9234 = vtanh.f32 %v1709_v55  ;;  %v8076_v57 = vmul.f32 -1.442695, %v1709_v55 }
 0x92c   :  { %v1436_v1 = vpop.f32.mrf.mxu0 }
 0x92d   :  { %v1440_v4 = vadd.f32 %v1436_v1, %v9996_v53 }
 0x92e   :  { %v8578_v58 = vpop.f32.mrf.mxu0 }
 0x92f   :  { %v9235_v8 = vpop.eup %9234  ;;  %v10105_v17 = vadd.f32 %v1515_v56, %v1440_v4 }
 0x930   :  { %1719 = vrot.lane.b32.xlu0 %v9235_v8, %s9506_s3  ;;  %v1591_v28 = vpop.f32.mrf.mxu0  ;;  %v1358_v8 = vmul.f32 %v10039_v54, %v10012_v43 }
 0x931   :  { %v1595_v31 = vadd.f32 %v1591_v28, %v9777_v37  ;;  %v12100_v37 = vmov 3   ;;  %v1357_v28 = vmul.f32 %v10044_v0, %v10015_v23 }
 0x932   :  { %v8592_v44 = vpop.f32.mrf.mxu0 }
 0x933   :  { %9236 = vtanh.f32 %v1595_v31  ;;  %v8074_v9 = vmul.f32 -1.442695, %v1595_v31  ;;  %v10122_v31 = vadd.f32 %v1358_v8, %v1357_v28 }
 0x934   :  { %9238 = vpow2.f32 %v8076_v57  ;;  %v1244_v57 = vmul.f32 %v10064_v32, %v10022_v40  ;;  %v8081_v40 = vld [vmem:[%s12059_s12 + $0x48] sm:$0xff] }
 0x935   :  { %9240 = vpow2.f32 %v8074_v9  ;;  %8608 = vmatpush3.msra.mxu1 %v8081_v40 }
 0x936   :  { %8609 = vmatprep.subr.mxu1 %v12102_v11 }
 0x940   :  { %v9237_v3 = vpop.eup %9236 }
 0x941   :  { %1605 = vrot.lane.b32.xlu1 %v9237_v3, %s9506_s3  ;;  %v9239_v38 = vpop.eup %9238 }
 0x942   :  { %v1713_v13 = vadd.f32 1.0, %v9239_v38  ;;  %v9241_v53 = vpop.eup %9240  ;;  %v1243_v38 = vmul.f32 %v10066_v22, %v10026_v39 }
 0x943   :  { %v1599_v46 = vadd.f32 1.0, %v9241_v53 }
 0x944   :  { %9242 = vrcp.f32 %v1713_v13  ;;  %v10132_v9 = vadd.f32 %v1244_v57, %v1243_v38 }
 0x945   :  { %9244 = vrcp.f32 %v1599_v46  ;;  %v8080_v46 = vld [vmem:[%s12059_s12 + $0x40] sm:$0xff] }
 0x946   :  { %8610 = vmatpush3.msra.mxu1 %v8080_v46  ;;  %v10196_v46 = vld [vmem:[%s12184_s0 + $0x8] sm:$0xff] }
 0x947   :  { %8621 = vmatprep.subr.mxu1 %v12102_v11 }
 0x951   :  { %v9243_v56 = vpop.eup %9242 }
 0x952   :  { %v9245_v55 = vpop.eup %9244 }
 0x953   :  { %v1603_v23 = vmul.f32 %v9245_v55, %v10132_v9 }
 0x9a2   :  { %v1720_v25 = vpop.permute.xlu0 %1719 }
 0x9a3   :  { %v1722_v1 = vmul.f32 %v9243_v56, %v1720_v25 }
 0x9a5   :  { %1724 = vrot.lane.b32.xlu0 %v1722_v1, %s9508_s9  ;;  %v8078_v1 = vld [vmem:[%s12189_s6 + $0x38] sm:$0xff] }
 0x9a6   :  { %8601 = vmatpush3.msra.mxu0 %v8078_v1 }
 0x9a7   :  { %8602 = vmatprep.subr.mxu0 %v12102_v11 }
 0x9a9   :  { %1735 = vperm.xlu0 %9133, %v9796_v61  }
 0x9ad   :  { %9135 = vset.pattern.permute.xlu0 %v12100_v37 }
 0x9ae   :  { %1621 = vperm.xlu0 %9135, %v9796_v61   ;;  %v1717_v61 = vmul.f32 %v9243_v56, %v10122_v31 }
 0x9b2   :  { %9138 = vset.pattern.permute.xlu0 %v12087_v62 }
 0x9b3   :  { %v1606_v4 = vpop.permute.xlu1 %1605 }
 0x9b4   :  { %v1608_v58 = vmul.f32 %v9245_v55, %v1606_v4 }
 0x9b6   :  { %1610 = vrot.lane.b32.xlu1 %v1608_v58, %s9508_s9 }
 0x9ba   :  { %1740 = vperm.xlu1 %9134, %v9804_v14  }
 0x9be   :  { %9136 = vset.pattern.permute.xlu1 %v12100_v37 }
 0xa17   :  { %v1725_v44 = vpop.permute.xlu0 %1724 }
 0xa18   :  { %v10125_v3 = vadd.f32 %v1725_v44, %v1717_v61 }
 0xa1a   :  { %9246 = vtanh.f32 %v10125_v3 }
 0xa24   :  { %v10155_v58 = vpop.permute.xlu0 %1735 }
 0xa27   :  { %v9247_v43 = vpop.eup %9246 }
 0xa28   :  { %1730 = vrot.lane.b32.xlu1 %v9247_v43, %s9508_s9  ;;  %v1611_v13 = vpop.permute.xlu1 %1610 }
 0xa29   :  { %v10136_v53 = vadd.f32 %v1611_v13, %v1603_v23  ;;  %v10177_v43 = vpop.permute.xlu0 %1621 }
 0xa2b   :  { %9248 = vtanh.f32 %v10136_v53 }
 0xa2c   :  { %1626 = vperm.xlu1 %9136, %v9804_v14  }
 0xa30   :  { %9137 = vset.pattern.permute.xlu1 %v12087_v62 }
 0xa35   :  { %v10150_v14 = vpop.permute.xlu1 %1740 }
 0xa36   :  { %v1743_v28 = vmul.f32 %v10150_v14, %v10050_v6 }
 0xa38   :  { %v9249_v39 = vpop.eup %9248 }
 0xa39   :  { %1616 = vrot.lane.b32.xlu1 %v9249_v39, %s9508_s9 }
 0xa9a   :  { %v1731_v25 = vpop.permute.xlu1 %1730 }
 0xa9b   :  { %v1733_v4 = vmul.f32 %v9243_v56, %v1731_v25  ;;  %v8077_v56 = vld [vmem:[%s12189_s6 + $0x30] sm:$0xff] }
 0xa9c   :  { %8603 = vmatpush3.msra.mxu0 %v8077_v56 }
 0xa9d   :  { %v1738_v8 = vmul.f32 %v10155_v58, %v1733_v4  ;;  %8614 = vmatprep.subr.mxu0 %v12102_v11 }
 0xa9f   :  { %v10161_v61 = vadd.f32 %v1743_v28, %v1738_v8 }
 0xaa1   :  { %v10165_v44 = vmul.f32 %v10161_v61, %v10155_v58  ;;  %2015 = vrot.lane.b32.xlu1 %v10161_v61, %s9509_s11 }
 0xaa3   :  { %12193 = vst [vmem:[#allocation9_spill] sm:$0xff] %v10165_v44  ;;  %1833 = vrot.lane.b32.xlu0 %v10165_v44, %s9509_s11 }
 0xaa7   :  { %v10175_v6 = vpop.permute.xlu1 %1626 }
 0xaa8   :  { %v1629_v13 = vmul.f32 %v10175_v6, %v10071_v2 }
 0xaab   :  { %v1617_v57 = vpop.permute.xlu1 %1616 }
 0xaac   :  { %v1619_v38 = vmul.f32 %v9245_v55, %v1617_v57 }
 0xaae   :  { %v1624_v23 = vmul.f32 %v10177_v43, %v1619_v38 }
 0xab0   :  { %v10182_v40 = vadd.f32 %v1629_v13, %v1624_v23 }
 0xab2   :  { %1909 = vrot.lane.b32.xlu1 %v10182_v40, %s9509_s11  ;;  %v10188_v39 = vmul.f32 %v10182_v40, %v10177_v43 }
 0xab4   :  { %1754 = vrot.lane.b32.xlu0 %v10188_v39, %s9509_s11 }
 0xb13   :  { %v2016_v2 = vpop.permute.xlu1 %2015 }
 0xb15   :  { %v1834_v55 = vpop.permute.xlu0 %1833 }
 0xb16   :  { %8612 = vmatmul.mubr.msk.f32.vlgmr.msra.gmra.mxu1 %vm107_vm0, %v1834_v55 }
 0xb17   :  { %8622 = vmatpush3.msra.mxu1 %v10196_v46  ;;  %8625 = vmatprep.mubr.msk.f32.mxu1 %vm9504_vm1, %v12102_v11 }
 0xb18   :  { %8623 = vmatprep.subr.mxu1 %v12102_v11 }
 0xb19   :  { %8624 = vmatpush3.msra.mxu1 %v9704_v12 }
 0xb1a   :  { %8626 = vmatmul.mubr.msk.f32.vlgmr.msra.gmra.mxu1 %vm107_vm0, %v2016_v2  ;;  %8635 = vmatprep.subr.mxu1 %v12102_v11 }
 0xb1b   :  { %8639 = vmatprep.mubr.msk.f32.mxu1 %vm9504_vm1, %v12102_v11 }
 0xb24   :  { %v1910_v1 = vpop.permute.xlu1 %1909 }
 0xb26   :  { %v1755_v25 = vpop.permute.xlu0 %1754 }
 0xb27   :  { %8605 = vmatmul.mubr.msk.f32.vlgmr.msra.gmra.mxu0 %vm107_vm0, %v1755_v25 }
 0xb28   :  { %8615 = vmatpush3.msra.mxu0 %v9719_v15  ;;  %8618 = vmatprep.mubr.msk.f32.mxu0 %vm9504_vm1, %v12102_v11 }
 0xb29   :  { %8616 = vmatprep.subr.mxu0 %v12102_v11 }
 0xb2a   :  { %8617 = vmatpush3.msra.mxu0 %v9728_v16 }
 0xb2b   :  { %8619 = vmatmul.mubr.msk.f32.vlgmr.msra.gmra.mxu0 %vm107_vm0, %v1910_v1  ;;  %8628 = vmatprep.subr.mxu0 %v12102_v11 }
 0xb2c   :  { %8632 = vmatprep.mubr.msk.f32.mxu0 %vm9504_vm1, %v12102_v11 }
 0xbd6   :  { %v1903_v12 = vpop.f32.mrf.mxu1 }
 0xbd8   :  { %v8613_v4 = vpop.f32.mrf.mxu1 }
 0xbda   :  { %v2085_v8 = vpop.f32.mrf.mxu1 }
 0xbdb   :  { %v2089_v15 = vadd.f32 %v2085_v8, %v9773_v33 }
 0xbdc   :  { %v8627_v28 = vpop.f32.mrf.mxu1 }
 0xbdd   :  { %9250 = vtanh.f32 %v2089_v15  ;;  %v8086_v33 = vmul.f32 -1.442695, %v2089_v15  ;;  %v1746_v15 = vmul.f32 %v10150_v14, %v10122_v31 }
 0xbe7   :  { %v1824_v56 = vpop.f32.mrf.mxu0 }
 0xbe8   :  { %v1828_v57 = vadd.f32 %v1824_v56, %v10105_v17 }
 0xbe9   :  { %v8606_v38 = vpop.f32.mrf.mxu0 }
 0xbea   :  { %v9251_v23 = vpop.eup %9250  ;;  %v10219_v16 = vadd.f32 %v1903_v12, %v1828_v57 }
 0xbeb   :  { %2099 = vrot.lane.b32.xlu0 %v9251_v23, %s9506_s3  ;;  %v1979_v13 = vpop.f32.mrf.mxu0 }
 0xbec   :  { %v1983_v55 = vadd.f32 %v1979_v13, %v9787_v49  ;;  %v1745_v13 = vmul.f32 %v10155_v58, %v10125_v3 }
 0xbed   :  { %v8620_v2 = vpop.f32.mrf.mxu0 }
 0xbee   :  { %9252 = vtanh.f32 %v1983_v55  ;;  %v8084_v4 = vmul.f32 -1.442695, %v1983_v55  ;;  %v10230_v55 = vadd.f32 %v1746_v15, %v1745_v13  ;;  %v2115_v13 = vmul.f32 %v10161_v61, %v10175_v6 }
 0xbef   :  { %9254 = vpow2.f32 %v8086_v33 }
 0xbf0   :  { %9256 = vpow2.f32 %v8084_v4  ;;  %v1631_v4 = vmul.f32 %v10177_v43, %v10136_v53  ;;  %v8090_v53 = vld [vmem:[%s12059_s12 + $0x30] sm:$0xff] }
 0xbfb   :  { %v9253_v25 = vpop.eup %9252 }
 0xbfc   :  { %1993 = vrot.lane.b32.xlu1 %v9253_v25, %s9506_s3  ;;  %v9255_v1 = vpop.eup %9254 }
 0xbfd   :  { %v2093_v8 = vadd.f32 1.0, %v9255_v1  ;;  %v9257_v17 = vpop.eup %9256  ;;  %v1632_v1 = vmul.f32 %v10175_v6, %v10132_v9 }
 0xbfe   :  { %v1987_v28 = vadd.f32 1.0, %v9257_v17 }
 0xbff   :  { %9258 = vrcp.f32 %v2093_v8  ;;  %v10240_v8 = vadd.f32 %v1632_v1, %v1631_v4 }
 0xc00   :  { %9260 = vrcp.f32 %v1987_v28 }
 0xc0c   :  { %v9259_v12 = vpop.eup %9258 }
 0xc0d   :  { %v9261_v49 = vpop.eup %9260  ;;  %v2097_v2 = vmul.f32 %v9259_v12, %v10230_v55 }
 0xc0e   :  { %v1991_v3 = vmul.f32 %v9261_v49, %v10240_v8 }
 0xc5d   :  { %v2100_v56 = vpop.permute.xlu0 %2099 }
 0xc5e   :  { %v2102_v57 = vmul.f32 %v9259_v12, %v2100_v56  ;;  %v8091_v56 = vld [vmem:[%s12059_s12 + $0x38] sm:$0xff] }
 0xc5f   :  { %8636 = vmatpush3.msra.mxu1 %v8091_v56 }
 0xc60   :  { %2104 = vrot.lane.b32.xlu0 %v2102_v57, %s9508_s9  ;;  %8637 = vmatprep.subr.mxu1 %v12102_v11 }
 0xc61   :  { %8638 = vmatpush3.msra.mxu1 %v8090_v53  ;;  %v10309_v53 = vld [vmem:[%s12185_s30 + $0x8] sm:$0xff] }
 0xc62   :  { %8649 = vmatprep.subr.mxu1 %v12102_v11 }
 0xc6e   :  { %v1994_v38 = vpop.permute.xlu1 %1993 }
 0xc6f   :  { %v1996_v23 = vmul.f32 %v9261_v49, %v1994_v38  ;;  %v8088_v38 = vld [vmem:[%s12189_s6 + $0x48] sm:$0xff] }
 0xc70   :  { %8629 = vmatpush3.msra.mxu0 %v8088_v38  ;;  %v10318_v38 = vld [vmem:[%s12185_s30] sm:$0xff]  ;;  %s9516_s30 = smov 32  }
 0xc71   :  { %1998 = vrot.lane.b32.xlu1 %v1996_v23, %s9508_s9  ;;  %8630 = vmatprep.subr.mxu0 %v12102_v11 }
 0xcd2   :  { %v2105_v25 = vpop.permute.xlu0 %2104 }
 0xcd3   :  { %v10233_v33 = vadd.f32 %v2105_v25, %v2097_v2 }
 0xcd5   :  { %9262 = vtanh.f32 %v10233_v33 }
 0xce2   :  { %v9263_v31 = vpop.eup %9262 }
 0xce3   :  { %2110 = vrot.lane.b32.xlu0 %v9263_v31, %s9508_s9  ;;  %v1999_v17 = vpop.permute.xlu1 %1998  ;;  %v2009_v31 = vmul.f32 %v10150_v14, %v10182_v40 }
 0xce4   :  { %v10244_v28 = vadd.f32 %v1999_v17, %v1991_v3 }
 0xce6   :  { %9264 = vtanh.f32 %v10244_v28 }
 0xcf3   :  { %v9265_v9 = vpop.eup %9264 }
 0xcf4   :  { %2004 = vrot.lane.b32.xlu1 %v9265_v9, %s9508_s9 }
 0xd55   :  { %v2111_v57 = vpop.permute.xlu0 %2110 }
 0xd56   :  { %v2113_v23 = vmul.f32 %v9259_v12, %v2111_v57  ;;  %v8087_v12 = vld [vmem:[%s12189_s6 + $0x40] sm:$0xff] }
 0xd57   :  { %8631 = vmatpush3.msra.mxu0 %v8087_v12 }
 0xd58   :  { %v2114_v15 = vmul.f32 %v2113_v23, %v10177_v43  ;;  %8642 = vmatprep.subr.mxu0 %v12102_v11 }
 0xd5a   :  { %v10263_v2 = vadd.f32 %v2115_v13, %v2114_v15 }
 0xd5c   :  { %v10267_v25 = vmul.f32 %v10263_v2, %v10177_v43  ;;  %2387 = vrot.lane.b32.xlu1 %v10263_v2, %s9509_s11 }
 0xd5e   :  { %2205 = vrot.lane.b32.xlu0 %v10267_v25, %s9509_s11 }
 0xd66   :  { %v2005_v61 = vpop.permute.xlu1 %2004 }
 0xd67   :  { %v2007_v1 = vmul.f32 %v9261_v49, %v2005_v61  ;;  %v10298_v49 = vld [vmem:[%s12184_s0] sm:$0xff] }
 0xd69   :  { %v2008_v4 = vmul.f32 %v2007_v1, %v10155_v58 }
 0xd6b   :  { %v10280_v3 = vadd.f32 %v2009_v31, %v2008_v4 }
 0xd6d   :  { %2281 = vrot.lane.b32.xlu1 %v10280_v3, %s9509_s11  ;;  %v10286_v17 = vmul.f32 %v10280_v3, %v10155_v58 }
 0xd6f   :  { %12194 = vst [vmem:[#allocation10_spill] sm:$0xff] %v10286_v17  ;;  %2126 = vrot.lane.b32.xlu0 %v10286_v17, %s9509_s11 }
 0xdce   :  { %v2388_v40 = vpop.permute.xlu1 %2387 }
 0xdd0   :  { %v2206_v56 = vpop.permute.xlu0 %2205 }
 0xdd1   :  { %8640 = vmatmul.mubr.msk.f32.vlgmr.msra.gmra.mxu1 %vm107_vm0, %v2206_v56 }
 0xdd2   :  { %8650 = vmatpush3.msra.mxu1 %v10196_v46  ;;  %8653 = vmatprep.mubr.msk.f32.mxu1 %vm9504_vm1, %v12102_v11 }
 0xdd3   :  { %8651 = vmatprep.subr.mxu1 %v12102_v11 }
 0xdd4   :  { %8652 = vmatpush3.msra.mxu1 %v10298_v49 }
 0xdd5   :  { %8654 = vmatmul.mubr.msk.f32.vlgmr.msra.gmra.mxu1 %vm107_vm0, %v2388_v40  ;;  %8663 = vmatprep.subr.mxu1 %v12102_v11 }
 0xdd6   :  { %8667 = vmatprep.mubr.msk.f32.mxu1 %vm9504_vm1, %v12102_v11 }
 0xddf   :  { %v2282_v57 = vpop.permute.xlu1 %2281 }
 0xde1   :  { %v2127_v9 = vpop.permute.xlu0 %2126 }
 0xde2   :  { %8633 = vmatmul.mubr.msk.f32.vlgmr.msra.gmra.mxu0 %vm107_vm0, %v2127_v9 }
 0xde3   :  { %8643 = vmatpush3.msra.mxu0 %v10309_v53  ;;  %8646 = vmatprep.mubr.msk.f32.mxu0 %vm9504_vm1, %v12102_v11 }
 0xde4   :  { %8644 = vmatprep.subr.mxu0 %v12102_v11 }
 0xde5   :  { %8645 = vmatpush3.msra.mxu0 %v10318_v38 }
 0xde6   :  { %8647 = vmatmul.mubr.msk.f32.vlgmr.msra.gmra.mxu0 %vm107_vm0, %v2282_v57  ;;  %8656 = vmatprep.subr.mxu0 %v12102_v11 }
 0xde7   :  { %8660 = vmatprep.mubr.msk.f32.mxu0 %vm9504_vm1, %v12102_v11 }
 0xe91   :  { %v2275_v23 = vpop.f32.mrf.mxu1 }
 0xe93   :  { %v8641_v15 = vpop.f32.mrf.mxu1 }
 0xe95   :  { %v2457_v13 = vpop.f32.mrf.mxu1 }
 0xe96   :  { %v2461_v12 = vadd.f32 %v2457_v13, %v9775_v36 }
 0xe97   :  { %v8655_v61 = vpop.f32.mrf.mxu1 }
 0xe98   :  { %9266 = vtanh.f32 %v2461_v12  ;;  %v8096_v36 = vmul.f32 -1.442695, %v2461_v12  ;;  %v2117_v12 = vmul.f32 %v10233_v33, %v10177_v43 }
 0xea2   :  { %v2196_v1 = vpop.f32.mrf.mxu0 }
 0xea3   :  { %v2200_v4 = vadd.f32 %v2196_v1, %v10219_v16 }
 0xea4   :  { %v8634_v31 = vpop.f32.mrf.mxu0 }
 0xea5   :  { %v9267_v56 = vpop.eup %9266  ;;  %v10327_v40 = vadd.f32 %v2275_v23, %v2200_v4 }
 0xea6   :  { %2471 = vrot.lane.b32.xlu0 %v9267_v56, %s9506_s3  ;;  %v2351_v9 = vpop.f32.mrf.mxu0 }
 0xea7   :  { %v2355_v57 = vadd.f32 %v2351_v9, %v9785_v45  ;;  %v2118_v9 = vmul.f32 %v10230_v55, %v10175_v6 }
 0xea8   :  { %v8648_v18 = vpop.f32.mrf.mxu0 }
 0xea9   :  { %9268 = vtanh.f32 %v2355_v57  ;;  %v8094_v61 = vmul.f32 -1.442695, %v2355_v57 }
 0xeaa   :  { %9270 = vpow2.f32 %v8096_v36 }
 0xeab   :  { %9272 = vpow2.f32 %v8094_v61  ;;  %v2012_v61 = vmul.f32 %v10150_v14, %v10240_v8 }
 0xeb6   :  { %v9269_v15 = vpop.eup %9268 }
 0xeb7   :  { %2365 = vrot.lane.b32.xlu1 %v9269_v15, %s9506_s3  ;;  %v9271_v13 = vpop.eup %9270 }
 0xeb8   :  { %v2465_v62 = vadd.f32 1.0, %v9271_v13  ;;  %v9273_v16 = vpop.eup %9272  ;;  %v2011_v13 = vmul.f32 %v10244_v28, %v10155_v58  ;;  %v8100_v58 = vld [vmem:[%s12059_s12 + $0x20] sm:$0xff]  ;;  %v8098_v28 = vld [vmem:[%s12189_s6 + $0x58] sm:$0xff] }
 0xeb9   :  { %v2359_v1 = vadd.f32 1.0, %v9273_v16  ;;  %8657 = vmatpush3.msra.mxu0 %v8098_v28 }
 0xeba   :  { %9274 = vrcp.f32 %v2465_v62  ;;  %v10338_v62 = vadd.f32 %v2118_v9, %v2117_v12  ;;  %v10348_v16 = vadd.f32 %v2012_v61, %v2011_v13  ;;  %8658 = vmatprep.subr.mxu0 %v12102_v11 }
 0xebb   :  { %9276 = vrcp.f32 %v2359_v1  ;;  %v8101_v1 = vld [vmem:[%s12059_s12 + $0x28] sm:$0xff] }
 0xebc   :  { %8664 = vmatpush3.msra.mxu1 %v8101_v1 }
 0xebd   :  { %8665 = vmatprep.subr.mxu1 %v12102_v11 }
 0xebe   :  { %8666 = vmatpush3.msra.mxu1 %v8100_v58 }
 0xebf   :  { %8677 = vmatprep.subr.mxu1 %v12102_v11 }
 0xec7   :  { %v9275_v23 = vpop.eup %9274 }
 0xec8   :  { %v9277_v18 = vpop.eup %9276  ;;  %v2469_v57 = vmul.f32 %v9275_v23, %v10338_v62 }
 0xec9   :  { %v2363_v6 = vmul.f32 %v9277_v18, %v10348_v16 }
 0xf18   :  { %v2472_v4 = vpop.permute.xlu0 %2471 }
 0xf19   :  { %v2474_v31 = vmul.f32 %v9275_v23, %v2472_v4 }
 0xf1b   :  { %2476 = vrot.lane.b32.xlu0 %v2474_v31, %s9508_s9 }
 0xf29   :  { %v2366_v45 = vpop.permute.xlu1 %2365 }
 0xf2a   :  { %v2368_v56 = vmul.f32 %v9277_v18, %v2366_v45  ;;  %v2487_v45 = vmul.f32 %v10263_v2, %v10064_v32 }
 0xf2c   :  { %2370 = vrot.lane.b32.xlu1 %v2368_v56, %s9508_s9 }
 0xf8d   :  { %v2477_v15 = vpop.permute.xlu0 %2476 }
 0xf8e   :  { %v10341_v36 = vadd.f32 %v2477_v15, %v2469_v57  ;;  %v2381_v15 = vmul.f32 %v10280_v3, %v10039_v54 }
 0xf90   :  { %9278 = vtanh.f32 %v10341_v36 }
 0xf9d   :  { %v9279_v43 = vpop.eup %9278 }
 0xf9e   :  { %2482 = vrot.lane.b32.xlu0 %v9279_v43, %s9508_s9  ;;  %v2371_v55 = vpop.permute.xlu1 %2370 }
 0xf9f   :  { %v10352_v33 = vadd.f32 %v2371_v55, %v2363_v6 }
 0xfa1   :  { %9280 = vtanh.f32 %v10352_v33 }
 0xfae   :  { %v9281_v14 = vpop.eup %9280 }
 0xfaf   :  { %2376 = vrot.lane.b32.xlu1 %v9281_v14, %s9508_s9 }
0x1010   :  { %v2483_v8 = vpop.permute.xlu0 %2482 }
0x1011   :  { %v2485_v4 = vmul.f32 %v9275_v23, %v2483_v8  ;;  %v8097_v23 = vld [vmem:[%s12189_s6 + $0x50] sm:$0xff] }
0x1012   :  { %8659 = vmatpush3.msra.mxu0 %v8097_v23 }
0x1013   :  { %v2486_v31 = vmul.f32 %v2485_v4, %v10066_v22  ;;  %8670 = vmatprep.subr.mxu0 %v12102_v11 }
0x1015   :  { %v10371_v56 = vadd.f32 %v2487_v45, %v2486_v31 }
0x1017   :  { %v10375_v12 = vmul.f32 %v10371_v56, %v10066_v22  ;;  %2759 = vrot.lane.b32.xlu1 %v10371_v56, %s9509_s11 }
0x1019   :  { %12195 = vst [vmem:[#allocation11_spill] sm:$0xff] %v10375_v12  ;;  %2577 = vrot.lane.b32.xlu0 %v10375_v12, %s9509_s11 }
0x1021   :  { %v2377_v2 = vpop.permute.xlu1 %2376 }
0x1022   :  { %v2379_v9 = vmul.f32 %v9277_v18, %v2377_v2 }
0x1024   :  { %v2380_v57 = vmul.f32 %v2379_v9, %v10044_v0 }
0x1026   :  { %v10388_v13 = vadd.f32 %v2381_v15, %v2380_v57 }
0x1028   :  { %2653 = vrot.lane.b32.xlu1 %v10388_v13, %s9509_s11  ;;  %v10394_v61 = vmul.f32 %v10388_v13, %v10044_v0 }
0x102a   :  { %2498 = vrot.lane.b32.xlu0 %v10394_v61, %s9509_s11 }
0x1089   :  { %v2760_v3 = vpop.permute.xlu1 %2759 }
0x108b   :  { %v2578_v43 = vpop.permute.xlu0 %2577 }
0x108c   :  { %8668 = vmatmul.mubr.msk.f32.vlgmr.msra.gmra.mxu1 %vm107_vm0, %v2578_v43 }
0x108d   :  { %8678 = vmatpush3.msra.mxu1 %v10196_v46  ;;  %8681 = vmatprep.mubr.msk.f32.mxu1 %vm9504_vm1, %v12102_v11 }
0x108e   :  { %8679 = vmatprep.subr.mxu1 %v12102_v11 }
0x108f   :  { %8680 = vmatpush3.msra.mxu1 %v10298_v49 }
0x1090   :  { %8682 = vmatmul.mubr.msk.f32.vlgmr.msra.gmra.mxu1 %vm107_vm0, %v2760_v3  ;;  %8691 = vmatprep.subr.mxu1 %v12102_v11 }
0x1091   :  { %8695 = vmatprep.mubr.msk.f32.mxu1 %vm9504_vm1, %v12102_v11 }
0x109a   :  { %v2654_v6 = vpop.permute.xlu1 %2653 }
0x109c   :  { %v2499_v18 = vpop.permute.xlu0 %2498 }
0x109d   :  { %8661 = vmatmul.mubr.msk.f32.vlgmr.msra.gmra.mxu0 %vm107_vm0, %v2499_v18 }
0x109e   :  { %8671 = vmatpush3.msra.mxu0 %v10309_v53  ;;  %8674 = vmatprep.mubr.msk.f32.mxu0 %vm9504_vm1, %v12102_v11 }
0x109f   :  { %8672 = vmatprep.subr.mxu0 %v12102_v11 }
0x10a0   :  { %8673 = vmatpush3.msra.mxu0 %v10318_v38 }
0x10a1   :  { %8675 = vmatmul.mubr.msk.f32.vlgmr.msra.gmra.mxu0 %vm107_vm0, %v2654_v6  ;;  %8684 = vmatprep.subr.mxu0 %v12102_v11 }
0x10a2   :  { %8688 = vmatprep.mubr.msk.f32.mxu0 %vm9504_vm1, %v12102_v11 }
0x114c   :  { %v2647_v55 = vpop.f32.mrf.mxu1 }
0x114e   :  { %v8669_v1 = vpop.f32.mrf.mxu1 }
0x1150   :  { %v2829_v14 = vpop.f32.mrf.mxu1 }
0x1151   :  { %v2833_v58 = vadd.f32 %v2829_v14, %v9767_v26 }
0x1152   :  { %v8683_v8 = vpop.f32.mrf.mxu1 }
0x1153   :  { %9282 = vtanh.f32 %v2833_v58  ;;  %v8106_v26 = vmul.f32 -1.442695, %v2833_v58  ;;  %v2489_v58 = vmul.f32 %v10341_v36, %v10066_v22 }
0x115d   :  { %v2568_v28 = vpop.f32.mrf.mxu0 }
0x115e   :  { %v2572_v4 = vadd.f32 %v2568_v28, %v10327_v40 }
0x115f   :  { %v8662_v31 = vpop.f32.mrf.mxu0 }
0x1160   :  { %v9283_v45 = vpop.eup %9282  ;;  %v10420_v23 = vadd.f32 %v2647_v55, %v2572_v4  ;;  %v2490_v4 = vmul.f32 %v10338_v62, %v10064_v32 }
0x1161   :  { %2843 = vrot.lane.b32.xlu0 %v9283_v45, %s9506_s3  ;;  %v2723_v2 = vpop.f32.mrf.mxu0 }
0x1162   :  { %v2727_v9 = vadd.f32 %v2723_v2, %v9765_v24  ;;  %v10431_v31 = vadd.f32 %v2490_v4, %v2489_v58 }
0x1163   :  { %v8676_v57 = vpop.f32.mrf.mxu0 }
0x1164   :  { %9284 = vtanh.f32 %v2727_v9  ;;  %v8104_v3 = vmul.f32 -1.442695, %v2727_v9  ;;  %v2383_v57 = vmul.f32 %v10352_v33, %v10044_v0  ;;  %v8110_v0 = vld [vmem:[%s12059_s12 + $0x10] sm:$0xff]  ;;  %v8108_v33 = vld [vmem:[%s12189_s6 + $0x68] sm:$0xff] }
0x1165   :  { %9286 = vpow2.f32 %v8106_v26  ;;  %8685 = vmatpush3.msra.mxu0 %v8108_v33 }
0x1166   :  { %9288 = vpow2.f32 %v8104_v3  ;;  %8686 = vmatprep.subr.mxu0 %v12102_v11 }
0x1171   :  { %v9285_v15 = vpop.eup %9284 }
0x1172   :  { %2737 = vrot.lane.b32.xlu1 %v9285_v15, %s9506_s3  ;;  %v9287_v43 = vpop.eup %9286  ;;  %v2384_v15 = vmul.f32 %v10348_v16, %v10039_v54 }
0x1173   :  { %v2837_v18 = vadd.f32 1.0, %v9287_v43  ;;  %v9289_v40 = vpop.eup %9288  ;;  %v8111_v43 = vld [vmem:[%s12059_s12 + $0x18] sm:$0xff] }
0x1174   :  { %v2731_v55 = vadd.f32 1.0, %v9289_v40  ;;  %v10441_v26 = vadd.f32 %v2384_v15, %v2383_v57  ;;  %8692 = vmatpush3.msra.mxu1 %v8111_v43  ;;  %v2859_v40 = vmul.f32 %v10371_v56, %v9955_v47 }
0x1175   :  { %9290 = vrcp.f32 %v2837_v18  ;;  %8693 = vmatprep.subr.mxu1 %v12102_v11 }
0x1176   :  { %9292 = vrcp.f32 %v2731_v55  ;;  %8694 = vmatpush3.msra.mxu1 %v8110_v0 }
0x1177   :  { %8705 = vmatprep.subr.mxu1 %v12102_v11 }
0x1182   :  { %v9291_v6 = vpop.eup %9290 }
0x1183   :  { %v9293_v24 = vpop.eup %9292  ;;  %v2841_v45 = vmul.f32 %v9291_v6, %v10431_v31 }
0x1184   :  { %v2735_v32 = vmul.f32 %v9293_v24, %v10441_v26 }
0x11d3   :  { %v2844_v1 = vpop.permute.xlu0 %2843 }
0x11d4   :  { %v2846_v14 = vmul.f32 %v9291_v6, %v2844_v1 }
0x11d6   :  { %2848 = vrot.lane.b32.xlu0 %v2846_v14, %s9508_s9 }
0x11e4   :  { %v2738_v8 = vpop.permute.xlu1 %2737 }
0x11e5   :  { %v2740_v28 = vmul.f32 %v9293_v24, %v2738_v8 }
0x11e7   :  { %2742 = vrot.lane.b32.xlu1 %v2740_v28, %s9508_s9  ;;  %v2753_v28 = vmul.f32 %v10388_v13, %v9930_v19 }
0x1248   :  { %v2849_v2 = vpop.permute.xlu0 %2848 }
0x1249   :  { %v10434_v9 = vadd.f32 %v2849_v2, %v2841_v45 }
0x124b   :  { %9294 = vtanh.f32 %v10434_v9 }
0x1258   :  { %v9295_v22 = vpop.eup %9294 }
0x1259   :  { %2854 = vrot.lane.b32.xlu0 %v9295_v22, %s9508_s9  ;;  %v2743_v62 = vpop.permute.xlu1 %2742 }
0x125a   :  { %v10445_v36 = vadd.f32 %v2743_v62, %v2735_v32 }
0x125c   :  { %9296 = vtanh.f32 %v10445_v36 }
0x1269   :  { %v9297_v54 = vpop.eup %9296 }
0x126a   :  { %2748 = vrot.lane.b32.xlu1 %v9297_v54, %s9508_s9 }
0x12cb   :  { %v2855_v16 = vpop.permute.xlu0 %2854 }
0x12cc   :  { %v2857_v3 = vmul.f32 %v9291_v6, %v2855_v16  ;;  %v8107_v6 = vld [vmem:[%s12189_s6 + $0x60] sm:$0xff] }
0x12cd   :  { %8687 = vmatpush3.msra.mxu0 %v8107_v6 }
0x12ce   :  { %v2858_v18 = vmul.f32 %v2857_v3, %v9957_v50  ;;  %8698 = vmatprep.subr.mxu0 %v12102_v11 }
0x12d0   :  { %v10464_v55 = vadd.f32 %v2859_v40, %v2858_v18 }
0x12d2   :  { %v10468_v1 = vmul.f32 %v10464_v55, %v9957_v50  ;;  %3128 = vrot.lane.b32.xlu1 %v10464_v55, %s9509_s11 }
0x12d4   :  { %12196 = vst [vmem:[#allocation12_spill] sm:$0xff] %v10468_v1  ;;  %2949 = vrot.lane.b32.xlu0 %v10468_v1, %s9509_s11 }
0x12dc   :  { %v2749_v56 = vpop.permute.xlu1 %2748 }
0x12dd   :  { %v2751_v14 = vmul.f32 %v9293_v24, %v2749_v56 }
0x12df   :  { %v2752_v8 = vmul.f32 %v2751_v14, %v9935_v27 }
0x12e1   :  { %v10481_v58 = vadd.f32 %v2753_v28, %v2752_v8 }
0x12e3   :  { %3025 = vrot.lane.b32.xlu1 %v10481_v58, %s9509_s11  ;;  %v10487_v4 = vmul.f32 %v10481_v58, %v9935_v27 }
0x12e5   :  { %2870 = vrot.lane.b32.xlu0 %v10487_v4, %s9509_s11 }
0x1344   :  { %v3129_v13 = vpop.permute.xlu1 %3128 }
0x1346   :  { %v2950_v45 = vpop.permute.xlu0 %2949 }
0x1347   :  { %8696 = vmatmul.mubr.msk.f32.vlgmr.msra.gmra.mxu1 %vm107_vm0, %v2950_v45 }
0x1348   :  { %8706 = vmatpush3.msra.mxu1 %v10196_v46  ;;  %8709 = vmatprep.mubr.msk.f32.mxu1 %vm9504_vm1, %v12102_v11 }
0x1349   :  { %8707 = vmatprep.subr.mxu1 %v12102_v11 }
0x134a   :  { %8708 = vmatpush3.msra.mxu1 %v10298_v49 }
0x134b   :  { %8710 = vmatmul.mubr.msk.f32.vlgmr.msra.gmra.mxu1 %vm107_vm0, %v3129_v13  ;;  %8719 = vmatprep.subr.mxu1 %v12102_v11  ;;  %v10523_v13 = vld [vmem:[%s12188_s8] sm:$0xff] }
0x134c   :  { %8723 = vmatprep.mubr.msk.f32.mxu1 %vm9504_vm1, %v12102_v11  ;;  %12197 = vst [vmem:[#allocation13_spill] sm:$0xff] %v10523_v13 }
0x1355   :  { %v3026_v46 = vpop.permute.xlu1 %3025 }
0x1357   :  { %v2871_v24 = vpop.permute.xlu0 %2870 }
0x1358   :  { %8689 = vmatmul.mubr.msk.f32.vlgmr.msra.gmra.mxu0 %vm107_vm0, %v2871_v24  ;;  %v3404_v24 = vsel %vm3403_vm2, %v10523_v13, 0.0 }
0x1359   :  { %8699 = vmatpush3.msra.mxu0 %v10309_v53  ;;  %8702 = vmatprep.mubr.msk.f32.mxu0 %vm9504_vm1, %v12102_v11 }
0x135a   :  { %8700 = vmatprep.subr.mxu0 %v12102_v11 }
0x135b   :  { %8701 = vmatpush3.msra.mxu0 %v10318_v38 }
0x135c   :  { %8703 = vmatmul.mubr.msk.f32.vlgmr.msra.gmra.mxu0 %vm107_vm0, %v3026_v46  ;;  %8712 = vmatprep.subr.mxu0 %v12102_v11  ;;  %v2861_v46 = vmul.f32 %v10434_v9, %v9957_v50 }
0x135d   :  { %8716 = vmatprep.mubr.msk.f32.mxu0 %vm9504_vm1, %v12102_v11 }
0x1407   :  { %v3019_v49 = vpop.f32.mrf.mxu1 }
0x1409   :  { %v8697_v2 = vpop.f32.mrf.mxu1 }
0x140b   :  { %v3198_v57 = vpop.f32.mrf.mxu1 }
0x140c   :  { %v3202_v53 = vadd.f32 %v3198_v57, %v9769_v29 }
0x140d   :  { %v8711_v15 = vpop.f32.mrf.mxu1 }
0x140e   :  { %9298 = vtanh.f32 %v3202_v53  ;;  %v8116_v29 = vmul.f32 -1.442695, %v3202_v53 }
0x1418   :  { %v2940_v22 = vpop.f32.mrf.mxu0 }
0x1419   :  { %v2944_v32 = vadd.f32 %v2940_v22, %v10420_v23  ;;  %v2755_v22 = vmul.f32 %v10445_v36, %v9935_v27  ;;  %v8117_v27 = vld [vmem:[%s12189_s6 + $0x70] sm:$0xff]  ;;  %v3228_v36 = vmul.f32 %v10464_v55, %v9851_v52  ;;  %v3311_v52 = vld [vmem:[%s12059_s12] sm:$0xff] }
0x141a   :  { %v8690_v62 = vpop.f32.mrf.mxu0 }
0x141b   :  { %v9299_v43 = vpop.eup %9298  ;;  %v10513_v38 = vadd.f32 %v3019_v49, %v2944_v32  ;;  %v2862_v49 = vmul.f32 %v10431_v31, %v9955_v47  ;;  %v2756_v32 = vmul.f32 %v10441_v26, %v9930_v19  ;;  %v8118_v31 = vld [vmem:[%s12189_s6 + $0x78] sm:$0xff] }
0x141c   :  { %3212 = vrot.lane.b32.xlu0 %v9299_v43, %s9506_s3  ;;  %v3095_v54 = vpop.f32.mrf.mxu0  ;;  %8713 = vmatpush3.msra.mxu0 %v8118_v31  ;;  %v3411_v31 = vld [vmem:[%s12061_s14] sm:$0xff] }
0x141d   :  { %v3099_v0 = vadd.f32 %v3095_v54, %v9760_v21  ;;  %v2863_v2 = vadd.f32 %v2862_v49, %v2861_v46  ;;  %v2757_v62 = vadd.f32 %v2756_v32, %v2755_v22  ;;  %8714 = vmatprep.subr.mxu0 %v12102_v11 }
0x141e   :  { %v8704_v16 = vpop.f32.mrf.mxu0  ;;  %8715 = vmatpush3.msra.mxu0 %v8117_v27  ;;  %v10615_v27 = vld [vmem:[%s12064_s17 + $0x18] sm:$0xff] }
0x141f   :  { %9300 = vtanh.f32 %v3099_v0  ;;  %v8114_v18 = vmul.f32 -1.442695, %v3099_v0  ;;  %8726 = vmatprep.subr.mxu0 %v12102_v11 }
0x1420   :  { %9302 = vpow2.f32 %v8116_v29 }
0x1421   :  { %9304 = vpow2.f32 %v8114_v18 }
0x142c   :  { %v9301_v33 = vpop.eup %9300 }
0x142d   :  { %3109 = vrot.lane.b32.xlu1 %v9301_v33, %s9506_s3  ;;  %v9303_v3 = vpop.eup %9302 }
0x142e   :  { %v3206_v40 = vadd.f32 1.0, %v9303_v3  ;;  %v9305_v23 = vpop.eup %9304 }
0x142f   :  { %v3103_v56 = vadd.f32 1.0, %v9305_v23 }
0x1430   :  { %9306 = vrcp.f32 %v3206_v40 }
0x1431   :  { %9308 = vrcp.f32 %v3103_v56 }
0x143d   :  { %v9307_v6 = vpop.eup %9306 }
0x143e   :  { %v9309_v21 = vpop.eup %9308  ;;  %v3210_v57 = vmul.f32 %v9307_v6, %v2863_v2 }
0x143f   :  { %v3107_v54 = vmul.f32 %v9309_v21, %v2757_v62  ;;  %v3414_v62 = vld [vmem:[%s12062_s15 + $0x8] sm:$0xff] }
0x148e   :  { %v3213_v14 = vpop.permute.xlu0 %3212 }
0x148f   :  { %v3215_v8 = vmul.f32 %v9307_v6, %v3213_v14  ;;  %v3125_v14 = vmul.f32 %v10481_v58, %v9822_v34 }
0x1491   :  { %3217 = vrot.lane.b32.xlu0 %v3215_v8, %s9508_s9 }
0x149f   :  { %v3110_v28 = vpop.permute.xlu1 %3109 }
0x14a0   :  { %v3112_v45 = vmul.f32 %v9309_v21, %v3110_v28 }
0x14a2   :  { %3114 = vrot.lane.b32.xlu1 %v3112_v45, %s9508_s9  ;;  %v3389_v45 = vadd.f32 %v9968_v59, %v9864_v63 }
0x14a4   :  { %v3391_v46 = vadd.f32 %v3389_v45, %v10077_v5  ;;  %v10729_v45 = vld [vmem:[%s12070_s23 + $0x60] sm:$0xff] }
0x14b0   :  { %3405 = vadd.xlane.f32.xlu0 %v3404_v24 }
0x1503   :  { %v3218_v53 = vpop.permute.xlu0 %3217 }
0x1504   :  { %v3220_v15 = vadd.f32 %v3218_v53, %v3210_v57 }
0x1506   :  { %9310 = vtanh.f32 %v3220_v15 }
0x1513   :  { %v9311_v43 = vpop.eup %9310 }
0x1514   :  { %3223 = vrot.lane.b32.xlu1 %v9311_v43, %s9508_s9  ;;  %v3115_v50 = vpop.permute.xlu1 %3114 }
0x1515   :  { %v3117_v9 = vadd.f32 %v3115_v50, %v3107_v54  ;;  %v3413_v54 = vld [vmem:[%s12062_s15] sm:$0xff] }
0x1516   :  { %v10599_v50 = vld [vmem:[%s12064_s17 + $0x20] sm:$0xff] }
0x1517   :  { %9312 = vtanh.f32 %v3117_v9  ;;  %v3412_v9 = vld [vmem:[%s12061_s14 + $0x8] sm:$0xff]  ;;  %s9518_s14 = smov 112  }
0x1524   :  { %v9313_v47 = vpop.eup %9312 }
0x1525   :  { %3120 = vrot.lane.b32.xlu1 %v9313_v47, %s9508_s9 }
0x1539   :  { %v3406_v29 = vpop.xlane.xlu0 %3405 }
0x153a   :  { %v3407_v40 = vmax.f32 %v3406_v29, 1e-06  ;;  %v10645_v29 = vld [vmem:[%s12066_s19 + $0x38] sm:$0xff] }
0x153b   :  { %12199 = vst [vmem:[#allocation14_spill] sm:$0xff] %v10645_v29 }
0x153c   :  { %9314 = vrcp.f32 %v3407_v40  ;;  %v10661_v40 = vld [vmem:[%s12066_s19 + $0x20] sm:$0xff] }
0x153d   :  { %12202 = vst [vmem:[#allocation17_spill] sm:$0xff] %v10661_v40 }
0x1549   :  { %v9315_v53 = vpop.eup %9314 }
0x1586   :  { %v3224_v19 = vpop.permute.xlu1 %3223 }
0x1587   :  { %v3226_v26 = vmul.f32 %v9307_v6, %v3224_v19  ;;  %v3312_v6 = vld [vmem:[%s12059_s12 + $0x8] sm:$0xff]  ;;  %s12198_s12 = sld [smem:[#allocation37_spill]] }
0x1588   :  { %8720 = vmatpush3.msra.mxu1 %v3312_v6  ;;  %v10673_v6 = vld [vmem:[%s12066_s19 + $0x10] sm:$0xff] }
0x1589   :  { %v3227_v0 = vmul.f32 %v3226_v26, %v9848_v51  ;;  %8721 = vmatprep.subr.mxu1 %v12102_v11  ;;  %v10621_v26 = vld [vmem:[%s12064_s17 + $0x8] sm:$0xff]  ;;  %12204 = vst [vmem:[#allocation19_spill] sm:$0xff] %v10673_v6 }
0x158a   :  { %8722 = vmatpush3.msra.mxu1 %v3311_v52  ;;  %v10679_v52 = vld [vmem:[%s12066_s19 + $0x8] sm:$0xff] }
0x158b   :  { %v3229_v16 = vadd.f32 %v3228_v36, %v3227_v0  ;;  %8733 = vmatprep.subr.mxu1 %v12102_v11  ;;  %v10627_v36 = vld [vmem:[%s12064_s17] sm:$0xff]  ;;  %12205 = vst [vmem:[#allocation20_spill] sm:$0xff] %v10679_v52 }
0x158d   :  { %v10549_v33 = vmul.f32 %v3229_v16, %v9848_v51  ;;  %v3574_v0 = vld [vmem:[%s12198_s12] sm:$0xff] }
0x158f   :  { %v3390_v3 = vadd.f32 %v10549_v33, %v10468_v1 }
0x1591   :  { %v3392_v18 = vadd.f32 %v3390_v3, %v10375_v12  ;;  %v10650_v3 = vld [vmem:[%s12066_s19 + $0x30] sm:$0xff] }
0x1592   :  { %12200 = vst [vmem:[#allocation15_spill] sm:$0xff] %v10650_v3 }
0x1593   :  { %v3394_v23 = vadd.f32 %v3392_v18, %v10267_v25  ;;  %v10655_v18 = vld [vmem:[%s12066_s19 + $0x28] sm:$0xff] }
0x1594   :  { %12201 = vst [vmem:[#allocation16_spill] sm:$0xff] %v10655_v18 }
0x1595   :  { %v3396_v51 = vadd.f32 %v3394_v23, %v10165_v44  ;;  %v10667_v23 = vld [vmem:[%s12066_s19 + $0x18] sm:$0xff] }
0x1596   :  { %12203 = vst [vmem:[#allocation18_spill] sm:$0xff] %v10667_v23 }
0x1597   :  { %v3121_v55 = vpop.permute.xlu1 %3120  ;;  %v3398_v28 = vadd.f32 %v3396_v51, %v10054_v7  ;;  %v10685_v51 = vld [vmem:[%s12066_s19] sm:$0xff] }
0x1598   :  { %v3123_v56 = vmul.f32 %v9309_v21, %v3121_v55  ;;  %v3393_v21 = vadd.f32 %v3391_v46, %v10188_v39  ;;  %12206 = vst [vmem:[#allocation21_spill] sm:$0xff] %v10685_v51  ;;  %v10693_v55 = vld [vmem:[%s12064_s17 + $0x28] sm:$0xff]  ;;  %v10743_v46 = vld [vmem:[%s12070_s23 + $0x50] sm:$0xff] }
0x1599   :  { %v3400_v2 = vadd.f32 %v3398_v28, %v9945_v35  ;;  %v10722_v28 = vld [vmem:[%s12070_s23 + $0x68] sm:$0xff] }
0x159a   :  { %v3124_v8 = vmul.f32 %v3123_v56, %v9827_v42  ;;  %v3395_v34 = vadd.f32 %v3393_v21, %v10286_v17  ;;  %v10698_v56 = vld [vmem:[%s12064_s17 + $0x10] sm:$0xff] }
0x159b   :  { %v3402_v58 = vadd.f32 %v3400_v2, %v9841_v48 }
0x159c   :  { %v3126_v24 = vadd.f32 %v3125_v14, %v3124_v8  ;;  %v3397_v57 = vadd.f32 %v3395_v34, %v10394_v61  ;;  %v10705_v14 = vld [vmem:[%s12070_s23 + $0x78] sm:$0xff]  ;;  %v10713_v8 = vld [vmem:[%s12070_s23 + $0x70] sm:$0xff] }
0x159d   :  { %v3410_v15 = vmul.f32 %v9315_v53, %v3402_v58 }
0x159e   :  { %v10572_v49 = vmul.f32 %v3126_v24, %v9827_v42  ;;  %v3399_v42 = vadd.f32 %v3397_v57, %v10487_v4  ;;  %v10736_v24 = vld [vmem:[%s12070_s23 + $0x58] sm:$0xff] }
0x15a0   :  { %3236 = vrot.lane.b32.xlu1 %v10572_v49, %s9509_s11  ;;  %v3401_v22 = vadd.f32 %v3399_v42, %v10572_v49 }
0x15a2   :  { %v3409_v32 = vmul.f32 %v9315_v53, %v3401_v22 }
0x15a4   :  { %3314 = vrot.lane.b32.xlu1 %v10549_v33, %s9509_s11 }
0x15a8   :  { %3416 = vrot.lane.b32.xlu1 %v3410_v15, %s9509_s11 }
0x15ac   :  { %3491 = vrot.lane.b32.xlu1 %v3409_v32, %s9509_s11  ;;  %v8123_v32 = vld [vmem:[%s12063_s16] ss:$0 sm:$0xff] }
0x1612   :  { %v3237_v43 = vpop.permute.xlu1 %3236 }
0x1613   :  { %8717 = vmatmul.mubr.msk.f32.vlgmr.msra.gmra.mxu0 %vm107_vm0, %v3237_v43 }
0x1614   :  { %8727 = vmatpush3.msra.mxu0 %v3414_v62  ;;  %8730 = vmatprep.mubr.msk.f32.mxu0 %vm9504_vm1, %v12102_v11 }
0x1615   :  { %8728 = vmatprep.subr.mxu0 %v12102_v11 }
0x1616   :  { %v3315_v47 = vpop.permute.xlu1 %3314  ;;  %8729 = vmatpush3.msra.mxu0 %v3413_v54 }
0x1617   :  { %8724 = vmatmul.mubr.msk.f32.vlgmr.msra.gmra.mxu1 %vm107_vm0, %v3315_v47  ;;  %3646 = vmatprep.subr.mxu0 %v10599_v50  ;;  %v10770_v47 = vld [vmem:[%s12070_s23 + $0x40] sm:$0xff] }
0x1618   :  { %8734 = vmatpush3.msra.mxu1 %v3412_v9  ;;  %8737 = vmatprep.mubr.msk.f32.mxu1 %vm9504_vm1, %v12102_v11 }
0x1619   :  { %8735 = vmatprep.subr.mxu1 %v12102_v11 }
0x161a   :  { %v3417_v19 = vpop.permute.xlu1 %3416  ;;  %8736 = vmatpush3.msra.mxu1 %v3411_v31  ;;  %v10777_v31 = vld [vmem:[%s12070_s23 + $0x38] sm:$0xff] }
0x161b   :  { %8731 = vmatmul.mubr.msk.f32.vlgmr.msra.gmra.mxu0 %vm107_vm0, %v3417_v19  ;;  %8740 = vmatprep.subr.mxu1 %v12102_v11  ;;  %v10784_v19 = vld [vmem:[%s12070_s23 + $0x30] sm:$0xff] }
0x161c   :  { %3647 = vmatpush1.msra.mxu0 %v10615_v27  ;;  %3682 = vmatprep.mubr.f32.mxu0 %v12102_v11  ;;  %12208 = vst [vmem:[#allocation23_spill] sm:$0xff] %v10784_v19 }
0x161d   :  { %3648 = vmatprep.subr.mxu0 %v10621_v26 }
0x161e   :  { %3649 = vmatpush1.msra.mxu0 %v10627_v36  ;;  %v3492_v16 = vpop.permute.xlu1 %3491 }
0x161f   :  { %8738 = vmatmul.mubr.msk.f32.vlgmr.msra.gmra.mxu1 %vm107_vm0, %v3492_v16  ;;  %8124 = vmatmul.mubr.msk.f32.vlgmr.msra.gmra.mxu0 %vm107_vm0, %v3574_v0  ;;  %v10796_v16 = vld [vmem:[%s12070_s23 + $0x20] sm:$0xff] }
0x1620   :  { %3835 = vmatprep.mubr.f32.mxu0 %v12102_v11  ;;  %8744 = vmatprep.mubr.msk.f32.mxu1 %vm9504_vm1, %v12102_v11  ;;  %12210 = vst [vmem:[#allocation25_spill] sm:$0xff] %v10796_v16 }
0x1621   :  { %3795 = vmatprep.subr.mxu0 %v10645_v29  ;;  %8741 = vmatpush3.msra.mxu1 %v10693_v55 }
0x1622   :  { %3796 = vmatpush1.msra.mxu0 %v10650_v3  ;;  %8742 = vmatprep.subr.mxu1 %v12102_v11 }
0x1623   :  { %3797 = vmatprep.subr.mxu0 %v10655_v18  ;;  %8743 = vmatpush3.msra.mxu1 %v10698_v56 }
0x1624   :  { %3798 = vmatpush1.msra.mxu0 %v10661_v40  ;;  %8745 = vmatmul.mubr.msk.f32.vlgmr.msra.gmra.mxu1 %vm107_vm0, %v3574_v0  ;;  %v10789_v0 = vld [vmem:[%s12070_s23 + $0x28] sm:$0xff] }
0x1625   :  { %3799 = vmatprep.subr.mxu0 %v10667_v23  ;;  %8747 = vmatprep.subr.mxu1 %v12102_v11  ;;  %12209 = vst [vmem:[#allocation24_spill] sm:$0xff] %v10789_v0 }
0x1626   :  { %3800 = vmatpush1.msra.mxu0 %v10673_v6  ;;  %8748 = vmatpush3.msra.mxu1 %v10705_v14 }
0x1627   :  { %3801 = vmatprep.subr.mxu0 %v10679_v52  ;;  %8779 = vmatprep.mubr.msk.f32.mxu1 %vm9504_vm1, %v12102_v11 }
0x1628   :  { %3802 = vmatpush1.msra.mxu0 %v10685_v51  ;;  %8749 = vmatprep.subr.mxu1 %v12102_v11 }
0x1629   :  { %8750 = vmatpush3.msra.mxu1 %v10713_v8 }
0x162a   :  { %8751 = vmatprep.subr.mxu1 %v12102_v11 }
0x162b   :  { %8752 = vmatpush3.msra.mxu1 %v10722_v28 }
0x162c   :  { %8753 = vmatprep.subr.mxu1 %v12102_v11 }
0x162d   :  { %8754 = vmatpush3.msra.mxu1 %v10729_v45 }
0x162e   :  { %8755 = vmatprep.subr.mxu1 %v12102_v11 }
0x162f   :  { %8756 = vmatpush3.msra.mxu1 %v10736_v24 }
0x1630   :  { %8757 = vmatprep.subr.mxu1 %v12102_v11 }
0x1631   :  { %8758 = vmatpush3.msra.mxu1 %v10743_v46 }
0x1632   :  { %8759 = vmatprep.subr.mxu1 %v12102_v11 }
0x16d3   :  { %v3306_v2 = vpop.f32.mrf.mxu0 }
0x16d4   :  { %v3310_v21 = vadd.f32 %v3306_v2, %v10513_v38  ;;  %v10763_v38 = vld [vmem:[%s12070_s23 + $0x48] sm:$0xff]  ;;  %v10803_v2 = vld [vmem:[%s12070_s23 + $0x18] sm:$0xff] }
0x16d5   :  { %v8718_v34 = vpop.f32.mrf.mxu0  ;;  %8760 = vmatpush3.msra.mxu1 %v10763_v38  ;;  %12211 = vst [vmem:[#allocation26_spill] sm:$0xff] %v10803_v2 }
0x16d6   :  { %8761 = vmatprep.subr.mxu1 %v12102_v11  ;;  %v10817_v34 = vld [vmem:[%s12070_s23 + $0x8] sm:$0xff] }
0x16d7   :  { %v3384_v58 = vpop.f32.mrf.mxu1  ;;  %8762 = vmatpush3.msra.mxu1 %v10770_v47  ;;  %12213 = vst [vmem:[#allocation28_spill] sm:$0xff] %v10817_v34 }
0x16d8   :  { %v10750_v57 = vadd.f32 %v3384_v58, %v3310_v21  ;;  %8763 = vmatprep.subr.mxu1 %v12102_v11  ;;  %v10810_v21 = vld [vmem:[%s12070_s23 + $0x10] sm:$0xff]  ;;  %v10824_v58 = vld [vmem:[%s12070_s23] sm:$0xff] }
0x16d9   :  { %v8725_v53 = vpop.f32.mrf.mxu1  ;;  %8764 = vmatpush3.msra.mxu1 %v10777_v31  ;;  %12212 = vst [vmem:[#allocation27_spill] sm:$0xff] %v10810_v21  ;;  %12214 = vst [vmem:[#allocation29_spill] sm:$0xff] %v10824_v58 }
0x16da   :  { %12207 = vst [vmem:[#allocation22_spill] sm:$0xff] %v10750_v57  ;;  %8765 = vmatprep.subr.mxu1 %v12102_v11  ;;  %v8127_v53 = vld [vmem:[#allocation2] ss:$0 sm:$0xff] }
0x16db   :  { %v3486_v42 = vpop.f32.mrf.mxu0  ;;  %8766 = vmatpush3.msra.mxu1 %v10784_v19  ;;  %3868 = vperm.xlu1 %9137, %v8127_v53  }
0x16dc   :  { %8767 = vmatprep.subr.mxu1 %v12102_v11 }
0x16dd   :  { %v8732_v15 = vpop.f32.mrf.mxu0  ;;  %8768 = vmatpush3.msra.mxu1 %v10789_v0 }
0x16de   :  { %8769 = vmatprep.subr.mxu1 %v12102_v11 }
0x16df   :  { %v3561_v22 = vpop.f32.mrf.mxu1  ;;  %8770 = vmatpush3.msra.mxu1 %v10796_v16  ;;  %9139 = vset.pattern.permute.xlu1 %v12094_v30 }
0x16e0   :  { %v3562_v62 = vadd.f32 %v3561_v22, %v3486_v42  ;;  %8771 = vmatprep.subr.mxu1 %v12102_v11  ;;  %v12093_v22 = vlaneseq }
0x16e1   :  { %v8739_v43 = vpop.f32.mrf.mxu1  ;;  %8772 = vmatpush3.msra.mxu1 %v10803_v2 }
0x16e2   :  { %v3572_v54 = vadd.f32 %v8123_v32, %v3562_v62  ;;  %8773 = vmatprep.subr.mxu1 %v12102_v11  ;;  %v10834_v32 = vshrl.u32 %v12093_v22, 7  ;;  %v10840_v43 = vld [vmem:[%s12065_s18] sm:$0x7] }
0x16e3   :  { %8774 = vmatpush3.msra.mxu1 %v10810_v21 }
0x16e4   :  { %9316 = vtanh.f32 %v3572_v54  ;;  %8775 = vmatprep.subr.mxu1 %v12102_v11  ;;  %v10829_v42 = vpop.f32.mrf.mxu1  ;;  %v3606_v62 = vsub.s32 1, %v10834_v32  ;;  %v3684_v54 = vpop.f32.mrf.mxu0  ;;  %v3602_v10 = vsub.s32 0, %v10834_v32 }
0x16e5   :  { %8776 = vmatpush3.msra.mxu1 %v10817_v34 }
0x16e6   :  { %8777 = vmatprep.subr.mxu1 %v12102_v11  ;;  %v8746_v15 = vpop.f32.mrf.mxu1  ;;  %v10844_v20 = vrot.slane %v10840_v43, %v3606_v62  ;;  %v3686_v53 = vpop.f32.mrf.mxu0  ;;  %v12217_v62 = vmov 0.0  }
0x16e7   :  { %8778 = vmatpush3.msra.mxu1 %v10824_v58  ;;  %v10847_v15 = vrot.slane %v10840_v43, %v3602_v10 }
0x16e8   :  { %4566 = vmatprep.subr.mxu1 %v10645_v29  ;;  %12215 = vst [vmem:[#allocation30_spill] sm:$0xff] %v10844_v20  ;;  %v3687_v22 = vadd.f32 %v3686_v53, %v10844_v20 }
0x16e9   :  { %12216 = vst [vmem:[#allocation31_spill] sm:$0xff] %v10847_v15  ;;  %v3685_v30 = vadd.f32 %v3684_v54, %v10847_v15 }
0x16ea   :  { %v3842_v37 = vadd.f32 %v3687_v22, %v10750_v57 }
0x16f1   :  { %v10755_v9 = vpop.eup %9316 }
0x16f2   :  { %8126 = vmatmul.mubr.msk.f32.vlgmr.msra.gmra.mxu0 %vm3767_vm3, %v10755_v9 }
0x16f3   :  { %4094 = vmatprep.mubr.f32.mxu0 %v12102_v11 }
0x17b2   :  { %v3837_v60 = vpop.f32.mrf.mxu0 }
0x17b3   :  { %v10851_v41 = vadd.f32 %v3837_v60, %v3685_v30 }
0x17b4   :  { %v3839_v11 = vpop.f32.mrf.mxu0 }
0x17b5   :  { %v3843_v29 = vadd.f32 %v3842_v37, %v3839_v11  ;;  %v10862_v11 = vpop.permute.xlu1 %3868 }
0x17b6   :  { %12218 = vst [vmem:[#allocation32_spill] sm:$0xff] %v10862_v11 }
0x17b7   :  { %9318 = vtanh.f32 %v3843_v29 }
0x17c4   :  { %v9319_v58 = vpop.eup %9318 }
0x17c5   :  { %8780 = vmatmul.mubr.f32.vlgmr.msra.gmra.mxu1 %v9319_v58 }
0x17c6   :  { %4567 = vmatpush1.msra.mxu1 %v10650_v3  ;;  %4606 = vmatprep.mubr.f32.mxu1 %v12217_v62 }
0x17c7   :  { %4568 = vmatprep.subr.mxu1 %v10655_v18 }
0x17c8   :  { %4569 = vmatpush1.msra.mxu1 %v10661_v40 }
0x17c9   :  { %4570 = vmatprep.subr.mxu1 %v10667_v23 }
0x17ca   :  { %4571 = vmatpush1.msra.mxu1 %v10673_v6 }
0x17cb   :  { %4572 = vmatprep.subr.mxu1 %v10679_v52 }
0x17cc   :  { %4573 = vmatpush1.msra.mxu1 %v10685_v51 }
0x1885   :  { %v3937_v10 = vpop.f32.mrf.mxu1 }
0x1886   :  { %v3938_v30 = vadd.f32 %v3937_v10, %v10862_v11  ;;  %v12219_v10 = vmov 3  }
0x1887   :  { %v8781_v60 = vpop.f32.mrf.mxu1 }
0x1888   :  { %v3941_v37 = vsel %vm3403_vm2, %v3938_v30, -inf  ;;  %v12220_v60 = vmov 2  }
0x1889   :  { %3942 = vmax.xlane.f32.xlu1 %v3941_v37  ;;  %v12222_v37 = vmov 5  }
0x1912   :  { %v3943_v29 = vpop.xlane.xlu1 %3942 }
0x1913   :  { %v3944_v58 = vsub.f32 %v3938_v30, %v3943_v29  ;;  %v12221_v30 = vmov 4   ;;  %v10883_v29 = vld [vmem:[%s12068_s21 + $0x10] sm:$0xff] }
0x1915   :  { %v3945_v22 = vmul.f32 1.442695, %v3944_v58  ;;  %v10888_v58 = vld [vmem:[%s12068_s21 + $0x8] sm:$0xff] }
0x1917   :  { %9320 = vpow2.f32 %v3945_v22  ;;  %v12227_v22 = vmov 1  }
0x1924   :  { %v9321_v54 = vpop.eup %9320 }
0x1925   :  { %v3947_v53 = vmul.f32 %v10523_v13, %v9321_v54 }
0x1927   :  { %v3948_v15 = vsel %vm3403_vm2, %v3947_v53, 0.0 }
0x1928   :  { %3949 = vadd.xlane.f32.xlu0 %v3948_v15  ;;  %v12223_v15 = vmov 6  }
0x19b1   :  { %v3950_v51 = vpop.xlane.xlu0 %3949 }
0x19b2   :  { %v3951_v52 = vadd.f32 1e-15, %v3950_v51  ;;  %v12224_v51 = vmov 0  }
0x19b4   :  { %9322 = vrcp.f32 %v3951_v52  ;;  %v10878_v52 = vld [vmem:[%s12068_s21 + $0x18] sm:$0xff] }
0x19b5   :  { %12226 = vst [vmem:[#allocation33_spill] sm:$0xff] %v10878_v52  ;;  %4058 = vmatprep.subr.mxu0 %v10878_v52  ;;  %4795 = vmatprep.subr.mxu1 %v10878_v52 }
0x19b6   :  { %4059 = vmatpush1.msra.mxu0 %v10883_v29 }
0x19b7   :  { %4060 = vmatprep.subr.mxu0 %v10888_v58 }
0x19c1   :  { %v9323_v6 = vpop.eup %9322 }
0x19c2   :  { %v3953_v23 = vmul.f32 %v9323_v6, %v3947_v53  ;;  %v12225_v6 = vmov 7  }
0x19c4   :  { %3962 = vperm.xlu1 %9139, %v3953_v23   ;;  %3956 = vperm.xlu0 %9138, %v3953_v23  }
0x19c8   :  { %9141 = vset.pattern.permute.xlu1 %v12219_v10  ;;  %9140 = vset.pattern.permute.xlu0 %v12220_v60 }
0x19c9   :  { %3978 = vperm.xlu1 %9141, %v3953_v23   ;;  %3970 = vperm.xlu0 %9140, %v3953_v23  }
0x19cd   :  { %9142 = vset.pattern.permute.xlu1 %v12221_v30  ;;  %9143 = vset.pattern.permute.xlu0 %v12222_v37 }
0x19ce   :  { %3986 = vperm.xlu1 %9142, %v3953_v23   ;;  %3994 = vperm.xlu0 %9143, %v3953_v23  }
0x19d2   :  { %9144 = vset.pattern.permute.xlu1 %v12223_v15  ;;  %9146 = vset.pattern.permute.xlu0 %v12224_v51 }
0x19d3   :  { %4002 = vperm.xlu1 %9144, %v3953_v23  }
0x19d7   :  { %9145 = vset.pattern.permute.xlu1 %v12225_v6 }
0x19d8   :  { %4010 = vperm.xlu1 %9145, %v3953_v23   ;;  %v10894_v23 = vld [vmem:[%s12068_s21] sm:$0xff] }
0x19d9   :  { %4061 = vmatpush1.msra.mxu0 %v10894_v23 }
0x19dc   :  { %9147 = vset.pattern.permute.xlu1 %v12227_v22 }
0x1a3f   :  { %v3963_v54 = vpop.permute.xlu1 %3962  ;;  %v3957_v53 = vpop.permute.xlu0 %3956 }
0x1a40   :  { %v3965_v51 = vmul.f32 %v3963_v54, %v9968_v59  ;;  %v3967_v6 = vmul.f32 %v3963_v54, %v10468_v1  ;;  %v3959_v15 = vmul.f32 %v3957_v53, %v9864_v63  ;;  %v3960_v37 = vmul.f32 %v3957_v53, %v10549_v33 }
0x1a42   :  { %v3966_v60 = vadd.f32 %v3965_v51, %v3959_v15  ;;  %v3968_v13 = vadd.f32 %v3967_v6, %v3960_v37  ;;  %v10914_v37 = vld [vmem:[%s12067_s20 + $0x18] sm:$0xff] }
0x1a43   :  { %4134 = vmatprep.subr.mxu0 %v10914_v37 }
0x1a44   :  { %v3979_v30 = vpop.permute.xlu1 %3978  ;;  %v3971_v10 = vpop.permute.xlu0 %3970 }
0x1a45   :  { %v3973_v11 = vmul.f32 %v3971_v10, %v10077_v5  ;;  %v3975_v52 = vmul.f32 %v3971_v10, %v10375_v12  ;;  %v3981_v22 = vmul.f32 %v3979_v30, %v10188_v39  ;;  %v3983_v40 = vmul.f32 %v3979_v30, %v10267_v25 }
0x1a47   :  { %v3974_v18 = vadd.f32 %v3973_v11, %v3966_v60  ;;  %v3976_v59 = vadd.f32 %v3975_v52, %v3968_v13 }
0x1a49   :  { %v3982_v3 = vadd.f32 %v3981_v22, %v3974_v18  ;;  %v3984_v54 = vadd.f32 %v3983_v40, %v3976_v59  ;;  %v3987_v1 = vpop.permute.xlu1 %3986  ;;  %v3995_v15 = vpop.permute.xlu0 %3994 }
0x1a4a   :  { %v3989_v63 = vmul.f32 %v3987_v1, %v10286_v17  ;;  %v3991_v53 = vmul.f32 %v3987_v1, %v10165_v44  ;;  %v3997_v11 = vmul.f32 %v3995_v15, %v10394_v61  ;;  %v3999_v13 = vmul.f32 %v3995_v15, %v10054_v7  ;;  %v10933_v15 = vld [vmem:[%s12067_s20 + $0x8] sm:$0xff] }
0x1a4c   :  { %v3990_v10 = vadd.f32 %v3989_v63, %v3982_v3  ;;  %v3992_v51 = vadd.f32 %v3991_v53, %v3984_v54  ;;  %v10928_v54 = vld [vmem:[%s12067_s20 + $0x10] sm:$0xff] }
0x1a4e   :  { %v4003_v59 = vpop.permute.xlu1 %4002  ;;  %v3998_v18 = vadd.f32 %v3997_v11, %v3990_v10  ;;  %v4000_v40 = vadd.f32 %v3999_v13, %v3992_v51  ;;  %v3610_v51 = vsub.s32 2, %v10834_v32 }
0x1a4f   :  { %v4005_v60 = vmul.f32 %v4003_v59, %v10487_v4  ;;  %v4007_v1 = vmul.f32 %v4003_v59, %v9945_v35 }
0x1a50   :  { %v10951_v59 = vrot.slane %v10840_v43, %v3610_v51 }
0x1a51   :  { %v4006_v6 = vadd.f32 %v4005_v60, %v3998_v18  ;;  %v4008_v52 = vadd.f32 %v4007_v1, %v4000_v40 }
0x1a52   :  { %v3756_v1 = vadd.f32 %v10829_v42, %v10951_v59 }
0x1a53   :  { %v4011_v30 = vpop.permute.xlu1 %4010 }
0x1a54   :  { %v4013_v22 = vmul.f32 %v4011_v30, %v10572_v49  ;;  %v4015_v44 = vmul.f32 %v4011_v30, %v9841_v48 }
0x1a56   :  { %v4014_v63 = vadd.f32 %v4013_v22, %v4006_v6  ;;  %v4016_v3 = vadd.f32 %v4015_v44, %v4008_v52  ;;  %v10939_v44 = vld [vmem:[%s12067_s20] sm:$0xff] }
0x1a58   :  { %4026 = vrot.lane.b32.xlu0 %v4016_v3, %s9509_s11  ;;  %4102 = vrot.lane.b32.xlu1 %v4014_v63, %s9509_s11 }
0x1aca   :  { %v4027_v53 = vpop.permute.xlu0 %4026  ;;  %v4103_v10 = vpop.permute.xlu1 %4102 }
0x1acb   :  { %8128 = vmatmul.mubr.msk.f32.vlgmr.msra.gmra.mxu0 %vm107_vm0, %v4027_v53 }
0x1acc   :  { %4135 = vmatpush1.msra.mxu0 %v10928_v54  ;;  %4170 = vmatprep.mubr.f32.mxu0 %v12217_v62 }
0x1acd   :  { %4136 = vmatprep.subr.mxu0 %v10933_v15 }
0x1ace   :  { %4137 = vmatpush1.msra.mxu0 %v10939_v44 }
0x1acf   :  { %8129 = vmatmul.mubr.msk.f32.vlgmr.msra.gmra.mxu0 %vm107_vm0, %v4103_v10  ;;  %8782 = vmatprep.subr.mxu0 %v12217_v62 }
0x1ad0   :  { %8790 = vmatprep.mubr.msk.f32.mxu0 %vm9504_vm1, %v12217_v62 }
0x1b8b   :  { %v4096_v11 = vpop.f32.mrf.mxu0 }
0x1b8d   :  { %v4098_v13 = vpop.f32.mrf.mxu0 }
0x1b8f   :  { %v4172_v18 = vpop.f32.mrf.mxu0 }
0x1b90   :  { %v4173_v40 = vadd.f32 %v4172_v18, %v4096_v11  ;;  %v10965_v11 = vld [vmem:[%s12069_s22 + $0x18] sm:$0xff]  ;;  %v10984_v18 = vld [vmem:[%s12069_s22] sm:$0xff] }
0x1b91   :  { %v4174_v60 = vpop.f32.mrf.mxu0  ;;  %8783 = vmatpush3.msra.mxu0 %v10965_v11 }
0x1b92   :  { %v4178_v30 = vadd.f32 %v10851_v41, %v4173_v40  ;;  %v4175_v6 = vadd.f32 %v4174_v60, %v4098_v13  ;;  %v10970_v13 = vld [vmem:[%s12069_s22 + $0x10] sm:$0xff]  ;;  %8784 = vmatprep.subr.mxu0 %v12217_v62 }
0x1b93   :  { %8785 = vmatpush3.msra.mxu0 %v10970_v13 }
0x1b94   :  { %9324 = vtanh.f32 %v4178_v30  ;;  %v4203_v52 = vadd.f32 %v4175_v6, %v3756_v1  ;;  %v8130_v32 = vmul.f32 -1.442695, %v4178_v30  ;;  %8786 = vmatprep.subr.mxu0 %v12217_v62  ;;  %v11004_v6 = vld [vmem:[%s12072_s25 + $0x8] sm:$0xff] }
0x1b96   :  { %9326 = vpow2.f32 %v8130_v32 }
0x1ba1   :  { %v9325_v22 = vpop.eup %9324 }
0x1ba2   :  { %4188 = vrot.lane.b32.xlu0 %v9325_v22, %s9516_s30  ;;  %v11011_v22 = vld [vmem:[%s12072_s25] sm:$0xff] }
0x1ba3   :  { %v9327_v63 = vpop.eup %9326 }
0x1ba4   :  { %v4182_v43 = vadd.f32 1.0, %v9327_v63 }
0x1ba6   :  { %9328 = vrcp.f32 %v4182_v43 }
0x1bb3   :  { %v9329_v3 = vpop.eup %9328 }
0x1bb4   :  { %v4186_v42 = vmul.f32 %v9329_v3, %v10755_v9  ;;  %v10977_v9 = vld [vmem:[%s12069_s22 + $0x8] sm:$0xff] }
0x1bb5   :  { %8787 = vmatpush3.msra.mxu0 %v10977_v9 }
0x1bb6   :  { %8788 = vmatprep.subr.mxu0 %v12217_v62 }
0x1bb7   :  { %8789 = vmatpush3.msra.mxu0 %v10984_v18 }
0x1bb8   :  { %8793 = vmatprep.subr.mxu0 %v12217_v62 }
0x1c14   :  { %v4189_v53 = vpop.permute.xlu0 %4188 }
0x1c15   :  { %v4191_v10 = vmul.f32 %v9329_v3, %v4189_v53 }
0x1c17   :  { %4193 = vrot.lane.b32.xlu1 %v4191_v10, %s9516_s30  ;;  %v3575_v10 = vld [vmem:[%s12198_s12 + $0x8] sm:$0xff] }
0x1c89   :  { %v4194_v41 = vpop.permute.xlu1 %4193 }
0x1c8a   :  { %v10959_v51 = vadd.f32 %v4194_v41, %v4186_v42 }
0x1c8c   :  { %9330 = vtanh.f32 %v10959_v51 }
0x1c99   :  { %v9331_v40 = vpop.eup %9330 }
0x1c9a   :  { %4199 = vrot.lane.b32.xlu0 %v9331_v40, %s9516_s30 }
0x1d0c   :  { %v4200_v60 = vpop.permute.xlu0 %4199 }
0x1d0d   :  { %v4202_v1 = vmul.f32 %v9329_v3, %v4200_v60 }
0x1d0f   :  { %4209 = vrot.lane.b32.xlu1 %v4202_v1, %s9517_s29 }
0x1d81   :  { %v4210_v30 = vpop.permute.xlu1 %4209 }
0x1d82   :  { %8791 = vmatmul.mubr.msk.f32.vlgmr.msra.gmra.mxu0 %vm3767_vm3, %v4210_v30  ;;  %8137 = vmatmul.mubr.msk.f32.vlgmr.msra.gmra.mxu1 %vm3767_vm3, %v4210_v30 }
0x1d83   :  { %8797 = vmatprep.mubr.msk.f32.mxu0 %vm9504_vm1, %v12217_v62  ;;  %4796 = vmatpush1.msra.mxu1 %v10883_v29 }
0x1d84   :  { %4797 = vmatprep.subr.mxu1 %v10888_v58  ;;  %4831 = vmatprep.mubr.f32.mxu1 %v12217_v62 }
0x1d85   :  { %4798 = vmatpush1.msra.mxu1 %v10894_v23  ;;  %8794 = vmatpush3.msra.mxu0 %v11004_v6 }
0x1d86   :  { %4871 = vmatprep.subr.mxu1 %v10914_v37  ;;  %8795 = vmatprep.subr.mxu0 %v12217_v62 }
0x1d87   :  { %8796 = vmatpush3.msra.mxu0 %v11011_v22 }
0x1d88   :  { %4429 = vmatprep.subr.mxu0 %v10599_v50  ;;  %v12228_v50 = vld [vmem:[#allocation29_spill] sm:$0xff] }
0x1e42   :  { %v4279_v32 = vpop.f32.mrf.mxu0  ;;  %v11071_v42 = vpop.f32.mrf.mxu1 }
0x1e43   :  { %v4283_v63 = vadd.f32 %v4279_v32, %v4203_v52 }
0x1e44   :  { %v8792_v43 = vpop.f32.mrf.mxu0  ;;  %v4610_v30 = vpop.f32.mrf.mxu1 }
0x1e45   :  { %4285 = vrot.lane.b32.xlu0 %v4283_v63, %s9518_s14 }
0x1eb7   :  { %v4286_v3 = vpop.permute.xlu0 %4285 }
0x1eb8   :  { %v4288_v53 = vmax.f32 %v4283_v63, %v4286_v3  ;;  %v12231_v3 = vld [vmem:[#allocation15_spill] sm:$0xff] }
0x1eba   :  { %8798 = vmatmul.mubr.msk.f32.vlgmr.msra.gmra.mxu0 %vm107_vm0, %v4288_v53  ;;  %v12232_v53 = vld [vmem:[#allocation16_spill] sm:$0xff] }
0x1ebb   :  { %4430 = vmatpush1.msra.mxu0 %v10615_v27  ;;  %4465 = vmatprep.mubr.f32.mxu0 %v12217_v62  ;;  %v12229_v27 = vld [vmem:[#allocation14_spill] sm:$0xff] }
0x1ebc   :  { %4431 = vmatprep.subr.mxu0 %v10621_v26 }
0x1ebd   :  { %4432 = vmatpush1.msra.mxu0 %v10627_v36 }
0x1ebe   :  { %8135 = vmatmul.mubr.msk.f32.vlgmr.msra.gmra.mxu0 %vm107_vm0, %v3575_v10  ;;  %8800 = vmatprep.subr.mxu0 %v12217_v62 }
0x1ebf   :  { %8801 = vmatpush3.msra.mxu0 %v10693_v55  ;;  %8804 = vmatprep.mubr.msk.f32.mxu0 %vm9504_vm1, %v12217_v62 }
0x1ec0   :  { %8802 = vmatprep.subr.mxu0 %v12217_v62 }
0x1ec1   :  { %8803 = vmatpush3.msra.mxu0 %v10698_v56 }
0x1ec2   :  { %8805 = vmatmul.mubr.msk.f32.vlgmr.msra.gmra.mxu0 %vm107_vm0, %v3575_v10  ;;  %8807 = vmatprep.subr.mxu0 %v12217_v62  ;;  %v12233_v10 = vld [vmem:[#allocation17_spill] sm:$0xff] }
0x1ec3   :  { %8808 = vmatpush3.msra.mxu0 %v10705_v14  ;;  %8839 = vmatprep.mubr.msk.f32.mxu0 %vm9504_vm1, %v12217_v62 }
0x1ec4   :  { %8809 = vmatprep.subr.mxu0 %v12217_v62 }
0x1ec5   :  { %8810 = vmatpush3.msra.mxu0 %v10713_v8 }
0x1ec6   :  { %8811 = vmatprep.subr.mxu0 %v12217_v62 }
0x1ec7   :  { %8812 = vmatpush3.msra.mxu0 %v10722_v28 }
0x1ec8   :  { %8813 = vmatprep.subr.mxu0 %v12217_v62 }
0x1ec9   :  { %8814 = vmatpush3.msra.mxu0 %v10729_v45 }
0x1eca   :  { %8815 = vmatprep.subr.mxu0 %v12217_v62 }
0x1ecb   :  { %8816 = vmatpush3.msra.mxu0 %v10736_v24 }
0x1ecc   :  { %8817 = vmatprep.subr.mxu0 %v12217_v62 }
0x1ecd   :  { %8818 = vmatpush3.msra.mxu0 %v10743_v46 }
0x1ece   :  { %8819 = vmatprep.subr.mxu0 %v12217_v62 }
0x1ecf   :  { %8820 = vmatpush3.msra.mxu0 %v10763_v38 }
0x1ed0   :  { %8821 = vmatprep.subr.mxu0 %v12217_v62 }
0x1ed1   :  { %8822 = vmatpush3.msra.mxu0 %v10770_v47 }
0x1ed2   :  { %8823 = vmatprep.subr.mxu0 %v12217_v62 }
0x1ed3   :  { %8824 = vmatpush3.msra.mxu0 %v10777_v31 }
0x1ed4   :  { %8825 = vmatprep.subr.mxu0 %v12217_v62 }
0x1ed5   :  { %8826 = vmatpush3.msra.mxu0 %v10784_v19 }
0x1ed6   :  { %8827 = vmatprep.subr.mxu0 %v12217_v62 }
0x1ed7   :  { %8828 = vmatpush3.msra.mxu0 %v10789_v0 }
0x1ed8   :  { %8829 = vmatprep.subr.mxu0 %v12217_v62 }
0x1ed9   :  { %8830 = vmatpush3.msra.mxu0 %v10796_v16 }
0x1eda   :  { %8831 = vmatprep.subr.mxu0 %v12217_v62 }
0x1edb   :  { %8832 = vmatpush3.msra.mxu0 %v10803_v2 }
0x1edc   :  { %8833 = vmatprep.subr.mxu0 %v12217_v62 }
0x1edd   :  { %8834 = vmatpush3.msra.mxu0 %v10810_v21 }
0x1ede   :  { %8835 = vmatprep.subr.mxu0 %v12217_v62 }
0x1edf   :  { %8836 = vmatpush3.msra.mxu0 %v10817_v34 }
0x1ee0   :  { %8837 = vmatprep.subr.mxu0 %v12217_v62 }
0x1ee1   :  { %8838 = vmatpush3.msra.mxu0 %v12228_v50 }
0x1ee2   :  { %5287 = vmatprep.subr.mxu0 %v12229_v27  ;;  %v12234_v27 = vld [vmem:[#allocation18_spill] sm:$0xff] }
0x1f7a   :  { %v11067_v26 = vpop.f32.mrf.mxu0 }
0x1f7b   :  { %12230 = vst [vmem:[#allocation14_spill] sm:$0xff] %v11067_v26 }
0x1f7c   :  { %v8799_v36 = vpop.f32.mrf.mxu0 }
0x1f7d   :  { %v12235_v36 = vld [vmem:[#allocation19_spill] sm:$0xff] }
0x1f7e   :  { %v11069_v52 = vpop.f32.mrf.mxu0 }
0x1f80   :  { %v4469_v41 = vpop.f32.mrf.mxu0 }
0x1f81   :  { %v4470_v40 = vadd.f32 %v4469_v41, %v10844_v20  ;;  %v12236_v41 = vld [vmem:[#allocation20_spill] sm:$0xff] }
0x1f82   :  { %v11074_v60 = vpop.f32.mrf.mxu0 }
0x1f83   :  { %v4613_v1 = vadd.f32 %v4470_v40, %v10750_v57  ;;  %v12237_v40 = vld [vmem:[#allocation21_spill] sm:$0xff] }
0x1f84   :  { %v8806_v32 = vpop.f32.mrf.mxu0  ;;  %v12240_v57 = vld [vmem:[#allocation13_spill] sm:$0xff] }
0x1f85   :  { %v4614_v63 = vadd.f32 %v4613_v1, %v4610_v30  ;;  %v12238_v1 = vld [vmem:[#allocation33_spill] sm:$0xff]  ;;  %v12239_v32 = vld [vmem:[#allocation32_spill] sm:$0xff] }
0x1f87   :  { %9332 = vtanh.f32 %v4614_v63 }
0x1f94   :  { %v9333_v43 = vpop.eup %9332 }
0x1f95   :  { %8840 = vmatmul.mubr.f32.vlgmr.msra.gmra.mxu0 %v9333_v43 }
0x1f96   :  { %5288 = vmatpush1.msra.mxu0 %v12231_v3  ;;  %5327 = vmatprep.mubr.f32.mxu0 %v12217_v62 }
0x1f97   :  { %5289 = vmatprep.subr.mxu0 %v12232_v53 }
0x1f98   :  { %5290 = vmatpush1.msra.mxu0 %v12233_v10 }
0x1f99   :  { %5291 = vmatprep.subr.mxu0 %v12234_v27 }
0x1f9a   :  { %5292 = vmatpush1.msra.mxu0 %v12235_v36 }
0x1f9b   :  { %5293 = vmatprep.subr.mxu0 %v12236_v41 }
0x1f9c   :  { %5294 = vmatpush1.msra.mxu0 %v12237_v40 }
0x1f9d   :  { %5516 = vmatprep.subr.mxu0 %v12238_v1 }
0x2055   :  { %v4682_v30 = vpop.f32.mrf.mxu0 }
0x2056   :  { %v4683_v63 = vadd.f32 %v4682_v30, %v12239_v32  ;;  %v12241_v30 = vmov 2  }
0x2057   :  { %v8841_v43 = vpop.f32.mrf.mxu0 }
0x2058   :  { %v4686_v3 = vsel %vm3403_vm2, %v4683_v63, -inf  ;;  %v12242_v43 = vmov 3  }
0x2059   :  { %4687 = vmax.xlane.f32.xlu1 %v4686_v3 }
0x20e2   :  { %v4688_v53 = vpop.xlane.xlu1 %4687 }
0x20e3   :  { %v4689_v26 = vsub.f32 %v4683_v63, %v4688_v53  ;;  %v12245_v63 = vmov 6  }
0x20e5   :  { %v4690_v10 = vmul.f32 1.442695, %v4689_v26  ;;  %v12243_v26 = vmov 4  }
0x20e7   :  { %9334 = vpow2.f32 %v4690_v10 }
0x20f4   :  { %v9335_v27 = vpop.eup %9334 }
0x20f5   :  { %v4692_v36 = vmul.f32 %v12240_v57, %v9335_v27  ;;  %v12244_v57 = vmov 5  }
0x20f7   :  { %v4693_v41 = vsel %vm3403_vm2, %v4692_v36, 0.0 }
0x20f8   :  { %4694 = vadd.xlane.f32.xlu0 %v4693_v41  ;;  %v12248_v41 = vld [vmem:[#allocation7_spill] sm:$0xff] }
0x2181   :  { %v4695_v40 = vpop.xlane.xlu0 %4694 }
0x2182   :  { %v4696_v20 = vadd.f32 1e-15, %v4695_v40 }
0x2184   :  { %9336 = vrcp.f32 %v4696_v20  ;;  %v12246_v20 = vmov 7  }
0x2191   :  { %v9337_v1 = vpop.eup %9336 }
0x2192   :  { %v4698_v50 = vmul.f32 %v9337_v1, %v4692_v36  ;;  %v12247_v1 = vmov 1  }
0x2194   :  { %4707 = vperm.xlu1 %9147, %v4698_v50   ;;  %4701 = vperm.xlu0 %9146, %v4698_v50  }
0x2198   :  { %9148 = vset.pattern.permute.xlu1 %v12241_v30  ;;  %v12250_v30 = vld [vmem:[#allocation6_spill] sm:$0xff] }
0x2199   :  { %4715 = vperm.xlu1 %9148, %v4698_v50  }
0x219d   :  { %9149 = vset.pattern.permute.xlu1 %v12242_v43 }
0x219e   :  { %4723 = vperm.xlu1 %9149, %v4698_v50  }
0x21a2   :  { %9150 = vset.pattern.permute.xlu1 %v12243_v26  ;;  %v12249_v26 = vld [vmem:[#allocation12_spill] sm:$0xff] }
0x21a3   :  { %4731 = vperm.xlu1 %9150, %v4698_v50  }
0x21a7   :  { %9151 = vset.pattern.permute.xlu1 %v12244_v57 }
0x21a8   :  { %4739 = vperm.xlu1 %9151, %v4698_v50  }
0x21ac   :  { %9152 = vset.pattern.permute.xlu1 %v12245_v63 }
0x21ad   :  { %4747 = vperm.xlu1 %9152, %v4698_v50  }
0x21b1   :  { %9153 = vset.pattern.permute.xlu1 %v12246_v20 }
0x21b2   :  { %4755 = vperm.xlu1 %9153, %v4698_v50  }
0x21b6   :  { %9154 = vset.pattern.permute.xlu1 %v12247_v1 }
0x220f   :  { %v4708_v3 = vpop.permute.xlu1 %4707  ;;  %v4702_v27 = vpop.permute.xlu0 %4701 }
0x2210   :  { %v4710_v40 = vmul.f32 %v4708_v3, %v12248_v41  ;;  %v4712_v43 = vmul.f32 %v4708_v3, %v12249_v26  ;;  %v4704_v57 = vmul.f32 %v4702_v27, %v12250_v30  ;;  %v4705_v32 = vmul.f32 %v4702_v27, %v10549_v33  ;;  %v12251_v3 = vld [vmem:[#allocation9_spill] sm:$0xff] }
0x2212   :  { %v4711_v34 = vadd.f32 %v4710_v40, %v4704_v57  ;;  %v4713_v1 = vadd.f32 %v4712_v43, %v4705_v32 }
0x2214   :  { %v4716_v53 = vpop.permute.xlu1 %4715 }
0x2215   :  { %v4718_v63 = vmul.f32 %v4716_v53, %v10077_v5  ;;  %v4720_v20 = vmul.f32 %v4716_v53, %v10375_v12 }
0x2217   :  { %v4719_v16 = vadd.f32 %v4718_v63, %v4711_v34  ;;  %v4721_v0 = vadd.f32 %v4720_v20, %v4713_v1 }
0x2219   :  { %v4724_v10 = vpop.permute.xlu1 %4723 }
0x221a   :  { %v4726_v21 = vmul.f32 %v4724_v10, %v10188_v39  ;;  %v4728_v2 = vmul.f32 %v4724_v10, %v10267_v25 }
0x221c   :  { %v4727_v30 = vadd.f32 %v4726_v21, %v4719_v16  ;;  %v4729_v19 = vadd.f32 %v4728_v2, %v4721_v0  ;;  %v12252_v21 = vld [vmem:[#allocation31_spill] sm:$0xff] }
0x221e   :  { %v4732_v36 = vpop.permute.xlu1 %4731 }
0x221f   :  { %v4734_v41 = vmul.f32 %v4732_v36, %v10286_v17  ;;  %v4736_v26 = vmul.f32 %v4732_v36, %v12251_v3 }
0x2221   :  { %v4735_v12 = vadd.f32 %v4734_v41, %v4727_v30  ;;  %v4737_v57 = vadd.f32 %v4736_v26, %v4729_v19  ;;  %v4468_v30 = vadd.f32 %v11069_v52, %v12252_v21 }
0x2223   :  { %v4740_v50 = vpop.permute.xlu1 %4739  ;;  %v4914_v40 = vadd.f32 %v11071_v42, %v4468_v30 }
0x2224   :  { %v4742_v27 = vmul.f32 %v4740_v50, %v10394_v61  ;;  %v4744_v5 = vmul.f32 %v4740_v50, %v10054_v7 }
0x2226   :  { %v4743_v10 = vadd.f32 %v4742_v27, %v4735_v12  ;;  %v4745_v34 = vadd.f32 %v4744_v5, %v4737_v57 }
0x2228   :  { %v4748_v53 = vpop.permute.xlu1 %4747 }
0x2229   :  { %v4750_v32 = vmul.f32 %v4748_v53, %v10487_v4  ;;  %v4752_v43 = vmul.f32 %v4748_v53, %v9945_v35  ;;  %v4539_v53 = vadd.f32 %v11074_v60, %v10951_v59 }
0x222b   :  { %v4751_v20 = vadd.f32 %v4750_v32, %v4743_v10  ;;  %v4753_v1 = vadd.f32 %v4752_v43, %v4745_v34 }
0x222d   :  { %v4756_v63 = vpop.permute.xlu1 %4755 }
0x222e   :  { %v4758_v36 = vmul.f32 %v4756_v63, %v10572_v49  ;;  %v4760_v0 = vmul.f32 %v4756_v63, %v9841_v48 }
0x2230   :  { %v4759_v16 = vadd.f32 %v4758_v36, %v4751_v20  ;;  %v4761_v2 = vadd.f32 %v4760_v0, %v4753_v1 }
0x2232   :  { %4763 = vrot.lane.b32.xlu0 %v4761_v2, %s9509_s11  ;;  %4839 = vrot.lane.b32.xlu1 %v4759_v16, %s9509_s11 }
0x22a4   :  { %v4764_v19 = vpop.permute.xlu0 %4763  ;;  %v4840_v5 = vpop.permute.xlu1 %4839 }
0x22a5   :  { %8138 = vmatmul.mubr.msk.f32.vlgmr.msra.gmra.mxu1 %vm107_vm0, %v4764_v19 }
0x22a6   :  { %4872 = vmatpush1.msra.mxu1 %v10928_v54  ;;  %4907 = vmatprep.mubr.f32.mxu1 %v12217_v62 }
0x22a7   :  { %4873 = vmatprep.subr.mxu1 %v10933_v15 }
0x22a8   :  { %4874 = vmatpush1.msra.mxu1 %v10939_v44 }
0x22a9   :  { %8139 = vmatmul.mubr.msk.f32.vlgmr.msra.gmra.mxu1 %vm107_vm0, %v4840_v5  ;;  %8842 = vmatprep.subr.mxu1 %v12217_v62 }
0x22aa   :  { %8843 = vmatpush3.msra.mxu1 %v10965_v11  ;;  %8850 = vmatprep.mubr.msk.f32.mxu1 %vm9504_vm1, %v12217_v62 }
0x22ab   :  { %8844 = vmatprep.subr.mxu1 %v12217_v62 }
0x22ac   :  { %8845 = vmatpush3.msra.mxu1 %v10970_v13 }
0x22ad   :  { %8846 = vmatprep.subr.mxu1 %v12217_v62 }
0x22ae   :  { %8847 = vmatpush3.msra.mxu1 %v10977_v9 }
0x22af   :  { %8848 = vmatprep.subr.mxu1 %v12217_v62 }
0x22b0   :  { %8849 = vmatpush3.msra.mxu1 %v10984_v18 }
0x22b1   :  { %8853 = vmatprep.subr.mxu1 %v12217_v62 }
0x2365   :  { %v4833_v12 = vpop.f32.mrf.mxu1 }
0x2367   :  { %v4835_v26 = vpop.f32.mrf.mxu1 }
0x2369   :  { %v4909_v41 = vpop.f32.mrf.mxu1 }
0x236a   :  { %v4910_v50 = vadd.f32 %v4909_v41, %v4833_v12  ;;  %v11168_v41 = vld [vmem:[%s12064_s17 + $0x18] sm:$0xff] }
0x236b   :  { %v4911_v27 = vpop.f32.mrf.mxu1 }
0x236c   :  { %v4915_v57 = vadd.f32 %v4914_v40, %v4910_v50  ;;  %v4912_v32 = vadd.f32 %v4911_v27, %v4835_v26  ;;  %v11184_v40 = vld [vmem:[%s12064_s17] sm:$0xff] }
0x236e   :  { %9338 = vtanh.f32 %v4915_v57  ;;  %v4940_v43 = vadd.f32 %v4912_v32, %v4539_v53  ;;  %v8140_v34 = vmul.f32 -1.442695, %v4915_v57  ;;  %v12262_v53 = vld [vmem:[#allocation30_spill] sm:$0xff] }
0x2370   :  { %9340 = vpow2.f32 %v8140_v34 }
0x237b   :  { %v9339_v10 = vpop.eup %9338 }
0x237c   :  { %4925 = vrot.lane.b32.xlu0 %v9339_v10, %s9516_s30 }
0x237d   :  { %v9341_v63 = vpop.eup %9340 }
0x237e   :  { %v4919_v52 = vadd.f32 1.0, %v9341_v63 }
0x2380   :  { %9342 = vrcp.f32 %v4919_v52 }
0x238d   :  { %v9343_v20 = vpop.eup %9342 }
0x238e   :  { %v4923_v36 = vmul.f32 %v9343_v20, %v10959_v51  ;;  %v11157_v51 = vld [vmem:[%s12064_s17 + $0x20] sm:$0xff] }
0x23ee   :  { %v4926_v1 = vpop.permute.xlu0 %4925 }
0x23ef   :  { %v4928_v42 = vmul.f32 %v9343_v20, %v4926_v1  ;;  %v11248_v1 = vld [vmem:[%s12066_s19 + $0x30] sm:$0xff] }
0x23f0   :  { %12264 = vst [vmem:[#allocation17_spill] sm:$0xff] %v11248_v1 }
0x23f1   :  { %4930 = vrot.lane.b32.xlu1 %v4928_v42, %s9516_s30  ;;  %v11255_v42 = vld [vmem:[%s12066_s19 + $0x28] sm:$0xff] }
0x23f2   :  { %12265 = vst [vmem:[#allocation18_spill] sm:$0xff] %v11255_v42 }
0x2463   :  { %v4931_v60 = vpop.permute.xlu1 %4930 }
0x2464   :  { %v11140_v0 = vadd.f32 %v4931_v60, %v4923_v36  ;;  %v11261_v36 = vld [vmem:[%s12066_s19 + $0x20] sm:$0xff]  ;;  %v11267_v60 = vld [vmem:[%s12066_s19 + $0x18] sm:$0xff] }
0x2465   :  { %12266 = vst [vmem:[#allocation19_spill] sm:$0xff] %v11261_v36  ;;  %12267 = vst [vmem:[#allocation20_spill] sm:$0xff] %v11267_v60 }
0x2466   :  { %9344 = vtanh.f32 %v11140_v0 }
0x2473   :  { %v9345_v16 = vpop.eup %9344 }
0x2474   :  { %4936 = vrot.lane.b32.xlu0 %v9345_v16, %s9516_s30  ;;  %v11273_v16 = vld [vmem:[%s12066_s19 + $0x10] sm:$0xff] }
0x2475   :  { %12268 = vst [vmem:[#allocation21_spill] sm:$0xff] %v11273_v16 }
0x24e6   :  { %v4937_v2 = vpop.permute.xlu0 %4936 }
0x24e7   :  { %v4939_v19 = vmul.f32 %v9343_v20, %v4937_v2  ;;  %v11279_v2 = vld [vmem:[%s12066_s19 + $0x8] sm:$0xff] }
0x24e8   :  { %12269 = vst [vmem:[#allocation13_spill] sm:$0xff] %v11279_v2 }
0x24e9   :  { %4942 = vrot.lane.b32.xlu1 %v4939_v19, %s9517_s29  ;;  %v11285_v19 = vld [vmem:[%s12066_s19] sm:$0xff] }
0x24ea   :  { %12270 = vst [vmem:[#allocation31_spill] sm:$0xff] %v11285_v19 }
0x255b   :  { %v4943_v5 = vpop.permute.xlu1 %4942 }
0x255c   :  { %8851 = vmatmul.mubr.msk.f32.vlgmr.msra.gmra.mxu1 %vm3767_vm3, %v4943_v5  ;;  %8146 = vmatmul.mubr.msk.f32.vlgmr.msra.gmra.mxu0 %vm3767_vm3, %v4943_v5  ;;  %v12271_v5 = vld [vmem:[#allocation33_spill] sm:$0xff] }
0x255d   :  { %8854 = vmatpush3.msra.mxu1 %v11004_v6  ;;  %8857 = vmatprep.mubr.msk.f32.mxu1 %vm9504_vm1, %v12217_v62 }
0x255e   :  { %8855 = vmatprep.subr.mxu1 %v12217_v62  ;;  %5517 = vmatpush1.msra.mxu0 %v10883_v29 }
0x255f   :  { %8856 = vmatpush3.msra.mxu1 %v11011_v22  ;;  %5518 = vmatprep.subr.mxu0 %v10888_v58 }
0x2560   :  { %5150 = vmatprep.subr.mxu1 %v11157_v51  ;;  %5519 = vmatpush1.msra.mxu0 %v10894_v23  ;;  %v3576_v23 = vld [vmem:[%s12198_s12 + $0x10] sm:$0xff] }
0x2561   :  { %5552 = vmatprep.mubr.f32.mxu0 %v12217_v62  ;;  %5592 = vmatprep.subr.mxu0 %v10914_v37  ;;  %v11178_v37 = vld [vmem:[%s12064_s17 + $0x8] sm:$0xff] }
0x261c   :  { %v5012_v12 = vpop.f32.mrf.mxu1  ;;  %v11239_v50 = vpop.f32.mrf.mxu0 }
0x261d   :  { %v5016_v30 = vadd.f32 %v5012_v12, %v4940_v43  ;;  %v12263_v43 = vld [vmem:[#allocation22_spill] sm:$0xff] }
0x261e   :  { %v8852_v29 = vpop.f32.mrf.mxu1  ;;  %v5331_v34 = vpop.f32.mrf.mxu0 }
0x261f   :  { %5018 = vrot.lane.b32.xlu0 %v5016_v30, %s9518_s14 }
0x2691   :  { %v5019_v26 = vpop.permute.xlu0 %5018 }
0x2692   :  { %v5021_v58 = vmax.f32 %v5016_v30, %v5019_v26  ;;  %v12272_v30 = vld [vmem:[#allocation32_spill] sm:$0xff] }
0x2694   :  { %8858 = vmatmul.mubr.msk.f32.vlgmr.msra.gmra.mxu1 %vm107_vm0, %v5021_v58 }
0x2695   :  { %5151 = vmatpush1.msra.mxu1 %v11168_v41  ;;  %5186 = vmatprep.mubr.f32.mxu1 %v12217_v62 }
0x2696   :  { %5152 = vmatprep.subr.mxu1 %v11178_v37 }
0x2697   :  { %5153 = vmatpush1.msra.mxu1 %v11184_v40 }
0x2698   :  { %8144 = vmatmul.mubr.msk.f32.vlgmr.msra.gmra.mxu1 %vm107_vm0, %v3576_v23  ;;  %8860 = vmatprep.subr.mxu1 %v12217_v62 }
0x2699   :  { %8861 = vmatpush3.msra.mxu1 %v10693_v55  ;;  %8864 = vmatprep.mubr.msk.f32.mxu1 %vm9504_vm1, %v12217_v62  ;;  %v12253_v55 = vld [vmem:[#allocation23_spill] sm:$0xff] }
0x269a   :  { %8862 = vmatprep.subr.mxu1 %v12217_v62 }
0x269b   :  { %8863 = vmatpush3.msra.mxu1 %v10698_v56  ;;  %v12254_v56 = vld [vmem:[#allocation24_spill] sm:$0xff] }
0x269c   :  { %8865 = vmatmul.mubr.msk.f32.vlgmr.msra.gmra.mxu1 %vm107_vm0, %v3576_v23  ;;  %8867 = vmatprep.subr.mxu1 %v12217_v62 }
0x269d   :  { %8868 = vmatpush3.msra.mxu1 %v10705_v14  ;;  %8899 = vmatprep.mubr.msk.f32.mxu1 %vm9504_vm1, %v12217_v62  ;;  %v12255_v14 = vld [vmem:[#allocation25_spill] sm:$0xff] }
0x269e   :  { %8869 = vmatprep.subr.mxu1 %v12217_v62 }
0x269f   :  { %8870 = vmatpush3.msra.mxu1 %v10713_v8  ;;  %v12256_v8 = vld [vmem:[#allocation26_spill] sm:$0xff] }
0x26a0   :  { %8871 = vmatprep.subr.mxu1 %v12217_v62 }
0x26a1   :  { %8872 = vmatpush3.msra.mxu1 %v10722_v28  ;;  %v12257_v28 = vld [vmem:[#allocation27_spill] sm:$0xff] }
0x26a2   :  { %8873 = vmatprep.subr.mxu1 %v12217_v62 }
0x26a3   :  { %8874 = vmatpush3.msra.mxu1 %v10729_v45  ;;  %v12258_v45 = vld [vmem:[#allocation28_spill] sm:$0xff] }
0x26a4   :  { %8875 = vmatprep.subr.mxu1 %v12217_v62 }
0x26a5   :  { %8876 = vmatpush3.msra.mxu1 %v10736_v24  ;;  %v12259_v24 = vld [vmem:[#allocation29_spill] sm:$0xff] }
0x26a6   :  { %8877 = vmatprep.subr.mxu1 %v12217_v62 }
0x26a7   :  { %8878 = vmatpush3.msra.mxu1 %v10743_v46  ;;  %v11232_v46 = vld [vmem:[%s12066_s19 + $0x38] sm:$0xff] }
0x26a8   :  { %8879 = vmatprep.subr.mxu1 %v12217_v62  ;;  %12260 = vst [vmem:[#allocation15_spill] sm:$0xff] %v11232_v46 }
0x26a9   :  { %8880 = vmatpush3.msra.mxu1 %v10763_v38 }
0x26aa   :  { %8881 = vmatprep.subr.mxu1 %v12217_v62 }
0x26ab   :  { %8882 = vmatpush3.msra.mxu1 %v10770_v47 }
0x26ac   :  { %8883 = vmatprep.subr.mxu1 %v12217_v62 }
0x26ad   :  { %8884 = vmatpush3.msra.mxu1 %v10777_v31 }
0x26ae   :  { %8885 = vmatprep.subr.mxu1 %v12217_v62 }
0x26af   :  { %8886 = vmatpush3.msra.mxu1 %v12253_v55 }
0x26b0   :  { %8887 = vmatprep.subr.mxu1 %v12217_v62 }
0x26b1   :  { %8888 = vmatpush3.msra.mxu1 %v12254_v56 }
0x26b2   :  { %8889 = vmatprep.subr.mxu1 %v12217_v62 }
0x26b3   :  { %8890 = vmatpush3.msra.mxu1 %v12255_v14 }
0x26b4   :  { %8891 = vmatprep.subr.mxu1 %v12217_v62 }
0x26b5   :  { %8892 = vmatpush3.msra.mxu1 %v12256_v8  ;;  %v11294_v8 = vld [vmem:[%s12188_s8] sm:$0xff] }
0x26b6   :  { %8893 = vmatprep.subr.mxu1 %v12217_v62  ;;  %12273 = vst [vmem:[#allocation23_spill] sm:$0xff] %v11294_v8 }
0x26b7   :  { %8894 = vmatpush3.msra.mxu1 %v12257_v28 }
0x26b8   :  { %8895 = vmatprep.subr.mxu1 %v12217_v62 }
0x26b9   :  { %8896 = vmatpush3.msra.mxu1 %v12258_v45 }
0x26ba   :  { %8897 = vmatprep.subr.mxu1 %v12217_v62 }
0x26bb   :  { %8898 = vmatpush3.msra.mxu1 %v12259_v24 }
0x26bc   :  { %6008 = vmatprep.subr.mxu1 %v11232_v46 }
0x2754   :  { %v11235_v38 = vpop.f32.mrf.mxu1 }
0x2755   :  { %12261 = vst [vmem:[#allocation16_spill] sm:$0xff] %v11235_v38 }
0x2756   :  { %v8859_v47 = vpop.f32.mrf.mxu1 }
0x2758   :  { %v11237_v31 = vpop.f32.mrf.mxu1 }
0x275a   :  { %v5190_v27 = vpop.f32.mrf.mxu1 }
0x275b   :  { %v5191_v57 = vadd.f32 %v5190_v27, %v12262_v53 }
0x275c   :  { %v11242_v32 = vpop.f32.mrf.mxu1 }
0x275d   :  { %v5334_v10 = vadd.f32 %v5191_v57, %v12263_v43 }
0x275e   :  { %v8866_v63 = vpop.f32.mrf.mxu1 }
0x275f   :  { %v5335_v52 = vadd.f32 %v5334_v10, %v5331_v34  ;;  %v12274_v10 = vmov 2   ;;  %v12275_v34 = vmov 3   ;;  %v12276_v63 = vmov 4  }
0x2761   :  { %9346 = vtanh.f32 %v5335_v52  ;;  %v12277_v52 = vmov 6  }
0x276e   :  { %v9347_v20 = vpop.eup %9346 }
0x276f   :  { %8900 = vmatmul.mubr.f32.vlgmr.msra.gmra.mxu1 %v9347_v20  ;;  %v12278_v20 = vmov 5  }
0x2770   :  { %6009 = vmatpush1.msra.mxu1 %v11248_v1  ;;  %6048 = vmatprep.mubr.f32.mxu1 %v12217_v62 }
0x2771   :  { %6010 = vmatprep.subr.mxu1 %v11255_v42 }
0x2772   :  { %6011 = vmatpush1.msra.mxu1 %v11261_v36 }
0x2773   :  { %6012 = vmatprep.subr.mxu1 %v11267_v60 }
0x2774   :  { %6013 = vmatpush1.msra.mxu1 %v11273_v16 }
0x2775   :  { %6014 = vmatprep.subr.mxu1 %v11279_v2 }
0x2776   :  { %6015 = vmatpush1.msra.mxu1 %v11285_v19 }
0x2777   :  { %6237 = vmatprep.subr.mxu1 %v12271_v5  ;;  %v12279_v5 = vmov 0  }
0x282f   :  { %v5403_v12 = vpop.f32.mrf.mxu1 }
0x2830   :  { %v5404_v29 = vadd.f32 %v5403_v12, %v12272_v30  ;;  %v12280_v12 = vmov 7  }
0x2831   :  { %v8901_v26 = vpop.f32.mrf.mxu1 }
0x2832   :  { %v5407_v58 = vsel %vm3403_vm2, %v5404_v29, -inf }
0x2833   :  { %5408 = vmax.xlane.f32.xlu1 %v5407_v58 }
0x28bc   :  { %v5409_v23 = vpop.xlane.xlu1 %5408 }
0x28bd   :  { %v5410_v55 = vsub.f32 %v5404_v29, %v5409_v23  ;;  %v12281_v29 = vmov 1   ;;  %v12282_v23 = vld [vmem:[#allocation7_spill] sm:$0xff] }
0x28bf   :  { %v5411_v56 = vmul.f32 1.442695, %v5410_v55 }
0x28c1   :  { %9348 = vpow2.f32 %v5411_v56  ;;  %v12283_v56 = vld [vmem:[#allocation12_spill] sm:$0xff] }
0x28ce   :  { %v9349_v14 = vpop.eup %9348 }
0x28cf   :  { %v5413_v28 = vmul.f32 %v11294_v8, %v9349_v14 }
0x28d1   :  { %v5414_v45 = vsel %vm3403_vm2, %v5413_v28, 0.0 }
0x28d2   :  { %5415 = vadd.xlane.f32.xlu0 %v5414_v45 }
0x295b   :  { %v5416_v24 = vpop.xlane.xlu0 %5415 }
0x295c   :  { %v5417_v47 = vadd.f32 1e-15, %v5416_v24 }
0x295e   :  { %9350 = vrcp.f32 %v5417_v47 }
0x296b   :  { %v9351_v27 = vpop.eup %9350 }
0x296c   :  { %v5419_v57 = vmul.f32 %v9351_v27, %v5413_v28  ;;  %v12284_v28 = vld [vmem:[#allocation6_spill] sm:$0xff] }
0x296e   :  { %5428 = vperm.xlu1 %9154, %v5419_v57   ;;  %5422 = vperm.xlu0 %9146, %v5419_v57  }
0x2972   :  { %9155 = vset.pattern.permute.xlu1 %v12274_v10  ;;  %9156 = vset.pattern.permute.xlu0 %v12275_v34 }
0x2973   :  { %5436 = vperm.xlu1 %9155, %v5419_v57   ;;  %5444 = vperm.xlu0 %9156, %v5419_v57  }
0x2977   :  { %9157 = vset.pattern.permute.xlu1 %v12276_v63  ;;  %9159 = vset.pattern.permute.xlu0 %v12277_v52 }
0x2978   :  { %5452 = vperm.xlu1 %9157, %v5419_v57   ;;  %5468 = vperm.xlu0 %9159, %v5419_v57  }
0x297c   :  { %9158 = vset.pattern.permute.xlu1 %v12278_v20  ;;  %9161 = vset.pattern.permute.xlu0 %v12279_v5  ;;  %v12285_v5 = vld [vmem:[#allocation8_spill] sm:$0xff]  ;;  %v12286_v20 = vld [vmem:[#allocation11_spill] sm:$0xff] }
0x297d   :  { %5460 = vperm.xlu1 %9158, %v5419_v57  }
0x2981   :  { %9160 = vset.pattern.permute.xlu1 %v12280_v12 }
0x2982   :  { %5476 = vperm.xlu1 %9160, %v5419_v57  }
0x2986   :  { %9162 = vset.pattern.permute.xlu1 %v12281_v29 }
0x29e9   :  { %v5429_v26 = vpop.permute.xlu1 %5428  ;;  %v5423_v58 = vpop.permute.xlu0 %5422 }
0x29ea   :  { %v5431_v55 = vmul.f32 %v5429_v26, %v12282_v23  ;;  %v5433_v14 = vmul.f32 %v5429_v26, %v12283_v56  ;;  %v5425_v45 = vmul.f32 %v5423_v58, %v12284_v28  ;;  %v5426_v24 = vmul.f32 %v5423_v58, %v10549_v33 }
0x29ec   :  { %v5432_v27 = vadd.f32 %v5431_v55, %v5425_v45  ;;  %v5434_v38 = vadd.f32 %v5433_v14, %v5426_v24 }
0x29ee   :  { %v5437_v47 = vpop.permute.xlu1 %5436  ;;  %v5445_v57 = vpop.permute.xlu0 %5444 }
0x29ef   :  { %v5439_v52 = vmul.f32 %v5437_v47, %v12285_v5  ;;  %v5441_v12 = vmul.f32 %v5437_v47, %v12286_v20  ;;  %v5447_v34 = vmul.f32 %v5445_v57, %v10188_v39  ;;  %v5449_v23 = vmul.f32 %v5445_v57, %v10267_v25 }
0x29f1   :  { %v5440_v63 = vadd.f32 %v5439_v52, %v5432_v27  ;;  %v5442_v29 = vadd.f32 %v5441_v12, %v5434_v38 }
0x29f3   :  { %v5453_v10 = vpop.permute.xlu1 %5452  ;;  %v5448_v26 = vadd.f32 %v5447_v34, %v5440_v63  ;;  %v5450_v56 = vadd.f32 %v5449_v23, %v5442_v29  ;;  %v5469_v55 = vpop.permute.xlu0 %5468 }
0x29f4   :  { %v5455_v28 = vmul.f32 %v5453_v10, %v10286_v17  ;;  %v5457_v58 = vmul.f32 %v5453_v10, %v12251_v3  ;;  %v5471_v38 = vmul.f32 %v5469_v55, %v10487_v4  ;;  %v5473_v12 = vmul.f32 %v5469_v55, %v9945_v35 }
0x29f5   :  { %v5260_v55 = vadd.f32 %v11242_v32, %v10951_v59 }
0x29f6   :  { %v5456_v45 = vadd.f32 %v5455_v28, %v5448_v26  ;;  %v5458_v24 = vadd.f32 %v5457_v58, %v5450_v56 }
0x29f8   :  { %v5461_v14 = vpop.permute.xlu1 %5460 }
0x29f9   :  { %v5463_v47 = vmul.f32 %v5461_v14, %v10394_v61  ;;  %v5465_v52 = vmul.f32 %v5461_v14, %v10054_v7 }
0x29fb   :  { %v5464_v27 = vadd.f32 %v5463_v47, %v5456_v45  ;;  %v5466_v57 = vadd.f32 %v5465_v52, %v5458_v24 }
0x29fd   :  { %v5477_v34 = vpop.permute.xlu1 %5476  ;;  %v5472_v63 = vadd.f32 %v5471_v38, %v5464_v27  ;;  %v5474_v29 = vadd.f32 %v5473_v12, %v5466_v57 }
0x29fe   :  { %v5479_v23 = vmul.f32 %v5477_v34, %v10572_v49  ;;  %v5481_v10 = vmul.f32 %v5477_v34, %v9841_v48 }
0x2a00   :  { %v5480_v3 = vadd.f32 %v5479_v23, %v5472_v63  ;;  %v5482_v28 = vadd.f32 %v5481_v10, %v5474_v29  ;;  %v11370_v23 = vld [vmem:[%s12068_s21 + $0x8] sm:$0xff] }
0x2a02   :  { %5484 = vrot.lane.b32.xlu1 %v5482_v28, %s9509_s11  ;;  %5560 = vrot.lane.b32.xlu0 %v5480_v3, %s9509_s11 }
0x2a74   :  { %v5485_v56 = vpop.permute.xlu1 %5484  ;;  %v5561_v26 = vpop.permute.xlu0 %5560 }
0x2a75   :  { %8147 = vmatmul.mubr.msk.f32.vlgmr.msra.gmra.mxu0 %vm107_vm0, %v5485_v56 }
0x2a76   :  { %5593 = vmatpush1.msra.mxu0 %v10928_v54  ;;  %5628 = vmatprep.mubr.f32.mxu0 %v12217_v62 }
0x2a77   :  { %5594 = vmatprep.subr.mxu0 %v10933_v15  ;;  %v5189_v15 = vadd.f32 %v11237_v31, %v12252_v21 }
0x2a78   :  { %5595 = vmatpush1.msra.mxu0 %v10939_v44 }
0x2a79   :  { %8148 = vmatmul.mubr.msk.f32.vlgmr.msra.gmra.mxu0 %vm107_vm0, %v5561_v26  ;;  %8902 = vmatprep.subr.mxu0 %v12217_v62  ;;  %v5635_v3 = vadd.f32 %v11239_v50, %v5189_v15  ;;  %v3577_v15 = vld [vmem:[%s12198_s12 + $0x18] sm:$0xff] }
0x2a7a   :  { %8903 = vmatpush3.msra.mxu0 %v10965_v11  ;;  %8910 = vmatprep.mubr.msk.f32.mxu0 %vm9504_vm1, %v12217_v62 }
0x2a7b   :  { %8904 = vmatprep.subr.mxu0 %v12217_v62 }
0x2a7c   :  { %8905 = vmatpush3.msra.mxu0 %v10970_v13 }
0x2a7d   :  { %8906 = vmatprep.subr.mxu0 %v12217_v62 }
0x2a7e   :  { %8907 = vmatpush3.msra.mxu0 %v10977_v9 }
0x2a7f   :  { %8908 = vmatprep.subr.mxu0 %v12217_v62 }
0x2a80   :  { %8909 = vmatpush3.msra.mxu0 %v10984_v18 }
0x2a81   :  { %8913 = vmatprep.subr.mxu0 %v12217_v62 }
0x2b35   :  { %v5554_v54 = vpop.f32.mrf.mxu0 }
0x2b37   :  { %v5556_v44 = vpop.f32.mrf.mxu0 }
0x2b39   :  { %v5630_v11 = vpop.f32.mrf.mxu0 }
0x2b3a   :  { %v5631_v58 = vadd.f32 %v5630_v11, %v5554_v54  ;;  %v11410_v11 = vld [vmem:[%s12064_s17 + $0x10] sm:$0xff] }
0x2b3b   :  { %v5632_v13 = vpop.f32.mrf.mxu0 }
0x2b3c   :  { %v5636_v9 = vadd.f32 %v5635_v3, %v5631_v58  ;;  %v5633_v14 = vadd.f32 %v5632_v13, %v5556_v44  ;;  %v11401_v44 = vld [vmem:[%s12064_s17 + $0x28] sm:$0xff]  ;;  %v11418_v3 = vld [vmem:[%s12070_s23 + $0x78] sm:$0xff]  ;;  %v11427_v58 = vld [vmem:[%s12070_s23 + $0x70] sm:$0xff] }
0x2b3d   :  { %v11434_v13 = vld [vmem:[%s12070_s23 + $0x68] sm:$0xff] }
0x2b3e   :  { %9352 = vtanh.f32 %v5636_v9  ;;  %v5661_v45 = vadd.f32 %v5633_v14, %v5260_v55  ;;  %v8149_v24 = vmul.f32 -1.442695, %v5636_v9  ;;  %v11441_v55 = vld [vmem:[%s12070_s23 + $0x60] sm:$0xff]  ;;  %v11448_v9 = vld [vmem:[%s12070_s23 + $0x58] sm:$0xff]  ;;  %v11455_v14 = vld [vmem:[%s12070_s23 + $0x50] sm:$0xff] }
0x2b40   :  { %9354 = vpow2.f32 %v8149_v24  ;;  %v11476_v24 = vld [vmem:[%s12070_s23 + $0x38] sm:$0xff] }
0x2b4b   :  { %v9353_v18 = vpop.eup %9352 }
0x2b4c   :  { %5646 = vrot.lane.b32.xlu1 %v9353_v18, %s9516_s30  ;;  %v11469_v18 = vld [vmem:[%s12070_s23 + $0x40] sm:$0xff] }
0x2b4d   :  { %v9355_v47 = vpop.eup %9354 }
0x2b4e   :  { %v5640_v31 = vadd.f32 1.0, %v9355_v47  ;;  %v11483_v47 = vld [vmem:[%s12070_s23 + $0x30] sm:$0xff] }
0x2b50   :  { %9356 = vrcp.f32 %v5640_v31  ;;  %v11490_v31 = vld [vmem:[%s12070_s23 + $0x28] sm:$0xff] }
0x2b51   :  { %12287 = vst [vmem:[#allocation24_spill] sm:$0xff] %v11490_v31 }
0x2b5d   :  { %v9357_v52 = vpop.eup %9356 }
0x2b5e   :  { %v5644_v12 = vmul.f32 %v9357_v52, %v11140_v0  ;;  %v11363_v0 = vld [vmem:[%s12068_s21 + $0x10] sm:$0xff] }
0x2bbe   :  { %v5647_v38 = vpop.permute.xlu1 %5646 }
0x2bbf   :  { %v5649_v50 = vmul.f32 %v9357_v52, %v5647_v38  ;;  %v11504_v38 = vld [vmem:[%s12070_s23 + $0x18] sm:$0xff] }
0x2bc0   :  { %12289 = vst [vmem:[#allocation26_spill] sm:$0xff] %v11504_v38 }
0x2bc1   :  { %5651 = vrot.lane.b32.xlu0 %v5649_v50, %s9516_s30  ;;  %v11511_v50 = vld [vmem:[%s12070_s23 + $0x10] sm:$0xff] }
0x2bc2   :  { %12290 = vst [vmem:[#allocation27_spill] sm:$0xff] %v11511_v50 }
0x2c33   :  { %v5652_v32 = vpop.permute.xlu0 %5651 }
0x2c34   :  { %v11349_v27 = vadd.f32 %v5652_v32, %v5644_v12  ;;  %v11518_v12 = vld [vmem:[%s12070_s23 + $0x8] sm:$0xff]  ;;  %v11525_v32 = vld [vmem:[%s12070_s23] sm:$0xff] }
0x2c35   :  { %12291 = vst [vmem:[#allocation28_spill] sm:$0xff] %v11518_v12  ;;  %12292 = vst [vmem:[#allocation29_spill] sm:$0xff] %v11525_v32 }
0x2c36   :  { %9358 = vtanh.f32 %v11349_v27 }
0x2c43   :  { %v9359_v57 = vpop.eup %9358 }
0x2c44   :  { %5657 = vrot.lane.b32.xlu1 %v9359_v57, %s9516_s30 }
0x2cb6   :  { %v5658_v34 = vpop.permute.xlu1 %5657 }
0x2cb7   :  { %v5660_v63 = vmul.f32 %v9357_v52, %v5658_v34  ;;  %v11497_v52 = vld [vmem:[%s12070_s23 + $0x20] sm:$0xff] }
0x2cb8   :  { %12288 = vst [vmem:[#allocation25_spill] sm:$0xff] %v11497_v52 }
0x2cb9   :  { %5663 = vrot.lane.b32.xlu0 %v5660_v63, %s9517_s29 }
0x2d2b   :  { %v5664_v29 = vpop.permute.xlu0 %5663 }
0x2d2c   :  { %8911 = vmatmul.mubr.msk.f32.vlgmr.msra.gmra.mxu0 %vm3767_vm3, %v5664_v29  ;;  %8155 = vmatmul.mubr.msk.f32.vlgmr.msra.gmra.mxu1 %vm3767_vm3, %v5664_v29 }
0x2d2d   :  { %8914 = vmatpush3.msra.mxu0 %v11004_v6  ;;  %8917 = vmatprep.mubr.msk.f32.mxu0 %vm9504_vm1, %v12217_v62  ;;  %v11377_v6 = vld [vmem:[%s12068_s21] sm:$0xff] }
0x2d2e   :  { %8915 = vmatprep.subr.mxu0 %v12217_v62  ;;  %6238 = vmatpush1.msra.mxu1 %v11363_v0 }
0x2d2f   :  { %8916 = vmatpush3.msra.mxu0 %v11011_v22  ;;  %6239 = vmatprep.subr.mxu1 %v11370_v23  ;;  %v11384_v22 = vld [vmem:[%s12067_s20 + $0x18] sm:$0xff] }
0x2d30   :  { %5871 = vmatprep.subr.mxu0 %v11157_v51  ;;  %6240 = vmatpush1.msra.mxu1 %v11377_v6 }
0x2d31   :  { %6273 = vmatprep.mubr.f32.mxu1 %v12217_v62  ;;  %6313 = vmatprep.subr.mxu1 %v11384_v22 }
0x2dec   :  { %v5733_v10 = vpop.f32.mrf.mxu0  ;;  %v11533_v29 = vpop.f32.mrf.mxu1 }
0x2ded   :  { %v5737_v28 = vadd.f32 %v5733_v10, %v5661_v45  ;;  %v11462_v45 = vld [vmem:[%s12070_s23 + $0x48] sm:$0xff] }
0x2dee   :  { %v8912_v56 = vpop.f32.mrf.mxu0 }
0x2def   :  { %5739 = vrot.lane.b32.xlu1 %v5737_v28, %s9518_s14 }
0x2e61   :  { %v5740_v26 = vpop.permute.xlu1 %5739 }
0x2e62   :  { %v5742_v54 = vmax.f32 %v5737_v28, %v5740_v26 }
0x2e64   :  { %8918 = vmatmul.mubr.msk.f32.vlgmr.msra.gmra.mxu0 %vm107_vm0, %v5742_v54  ;;  %v6052_v54 = vpop.f32.mrf.mxu1 }
0x2e65   :  { %5872 = vmatpush1.msra.mxu0 %v11168_v41  ;;  %5907 = vmatprep.mubr.f32.mxu0 %v12217_v62 }
0x2e66   :  { %5873 = vmatprep.subr.mxu0 %v11178_v37 }
0x2e67   :  { %5874 = vmatpush1.msra.mxu0 %v11184_v40 }
0x2e68   :  { %8153 = vmatmul.mubr.msk.f32.vlgmr.msra.gmra.mxu0 %vm107_vm0, %v3577_v15  ;;  %8920 = vmatprep.subr.mxu0 %v12217_v62 }
0x2e69   :  { %8921 = vmatpush3.msra.mxu0 %v11401_v44  ;;  %8924 = vmatprep.mubr.msk.f32.mxu0 %vm9504_vm1, %v12217_v62 }
0x2e6a   :  { %8922 = vmatprep.subr.mxu0 %v12217_v62 }
0x2e6b   :  { %8923 = vmatpush3.msra.mxu0 %v11410_v11 }
0x2e6c   :  { %8925 = vmatmul.mubr.msk.f32.vlgmr.msra.gmra.mxu0 %vm107_vm0, %v3577_v15  ;;  %8927 = vmatprep.subr.mxu0 %v12217_v62 }
0x2e6d   :  { %8928 = vmatpush3.msra.mxu0 %v11418_v3  ;;  %8959 = vmatprep.mubr.msk.f32.mxu0 %vm9504_vm1, %v12217_v62 }
0x2e6e   :  { %8929 = vmatprep.subr.mxu0 %v12217_v62 }
0x2e6f   :  { %8930 = vmatpush3.msra.mxu0 %v11427_v58 }
0x2e70   :  { %8931 = vmatprep.subr.mxu0 %v12217_v62 }
0x2e71   :  { %8932 = vmatpush3.msra.mxu0 %v11434_v13 }
0x2e72   :  { %8933 = vmatprep.subr.mxu0 %v12217_v62 }
0x2e73   :  { %8934 = vmatpush3.msra.mxu0 %v11441_v55 }
0x2e74   :  { %8935 = vmatprep.subr.mxu0 %v12217_v62 }
0x2e75   :  { %8936 = vmatpush3.msra.mxu0 %v11448_v9 }
0x2e76   :  { %8937 = vmatprep.subr.mxu0 %v12217_v62 }
0x2e77   :  { %8938 = vmatpush3.msra.mxu0 %v11455_v14 }
0x2e78   :  { %8939 = vmatprep.subr.mxu0 %v12217_v62 }
0x2e79   :  { %8940 = vmatpush3.msra.mxu0 %v11462_v45 }
0x2e7a   :  { %8941 = vmatprep.subr.mxu0 %v12217_v62 }
0x2e7b   :  { %8942 = vmatpush3.msra.mxu0 %v11469_v18 }
0x2e7c   :  { %8943 = vmatprep.subr.mxu0 %v12217_v62 }
0x2e7d   :  { %8944 = vmatpush3.msra.mxu0 %v11476_v24 }
0x2e7e   :  { %8945 = vmatprep.subr.mxu0 %v12217_v62 }
0x2e7f   :  { %8946 = vmatpush3.msra.mxu0 %v11483_v47 }
0x2e80   :  { %8947 = vmatprep.subr.mxu0 %v12217_v62 }
0x2e81   :  { %8948 = vmatpush3.msra.mxu0 %v11490_v31 }
0x2e82   :  { %8949 = vmatprep.subr.mxu0 %v12217_v62 }
0x2e83   :  { %8950 = vmatpush3.msra.mxu0 %v11497_v52 }
0x2e84   :  { %8951 = vmatprep.subr.mxu0 %v12217_v62 }
0x2e85   :  { %8952 = vmatpush3.msra.mxu0 %v11504_v38 }
0x2e86   :  { %8953 = vmatprep.subr.mxu0 %v12217_v62 }
0x2e87   :  { %8954 = vmatpush3.msra.mxu0 %v11511_v50 }
0x2e88   :  { %8955 = vmatprep.subr.mxu0 %v12217_v62 }
0x2e89   :  { %8956 = vmatpush3.msra.mxu0 %v11518_v12 }
0x2e8a   :  { %8957 = vmatprep.subr.mxu0 %v12217_v62 }
0x2e8b   :  { %8958 = vmatpush3.msra.mxu0 %v11525_v32 }
0x2e8c   :  { %6729 = vmatprep.subr.mxu0 %v11232_v46 }
0x2f24   :  { %v11529_v57 = vpop.f32.mrf.mxu0 }
0x2f25   :  { %12293 = vst [vmem:[#allocation33_spill] sm:$0xff] %v11529_v57 }
0x2f26   :  { %v8919_v34 = vpop.f32.mrf.mxu0 }
0x2f28   :  { %v11531_v63 = vpop.f32.mrf.mxu0 }
0x2f2a   :  { %v5911_v10 = vpop.f32.mrf.mxu0 }
0x2f2b   :  { %v5912_v28 = vadd.f32 %v5911_v10, %v12262_v53 }
0x2f2c   :  { %v11536_v56 = vpop.f32.mrf.mxu0 }
0x2f2d   :  { %v6055_v26 = vadd.f32 %v5912_v28, %v12263_v43 }
0x2f2e   :  { %v8926_v15 = vpop.f32.mrf.mxu0 }
0x2f2f   :  { %v6056_v12 = vadd.f32 %v6055_v26, %v6052_v54 }
0x2f31   :  { %9360 = vtanh.f32 %v6056_v12  ;;  %v11550_v12 = vld [vmem:[%s12068_s21 + $0x18] sm:$0xff] }
0x2f32   :  { %12294 = vst [vmem:[#allocation34_spill] sm:$0xff] %v11550_v12 }
0x2f3e   :  { %v9361_v32 = vpop.eup %9360 }
0x2f3f   :  { %8960 = vmatmul.mubr.f32.vlgmr.msra.gmra.mxu0 %v9361_v32 }
0x2f40   :  { %6730 = vmatpush1.msra.mxu0 %v11248_v1  ;;  %6769 = vmatprep.mubr.f32.mxu0 %v12217_v62 }
0x2f41   :  { %6731 = vmatprep.subr.mxu0 %v11255_v42 }
0x2f42   :  { %6732 = vmatpush1.msra.mxu0 %v11261_v36 }
0x2f43   :  { %6733 = vmatprep.subr.mxu0 %v11267_v60 }
0x2f44   :  { %6734 = vmatpush1.msra.mxu0 %v11273_v16 }
0x2f45   :  { %6735 = vmatprep.subr.mxu0 %v11279_v2 }
0x2f46   :  { %6736 = vmatpush1.msra.mxu0 %v11285_v19 }
0x2f47   :  { %6958 = vmatprep.subr.mxu0 %v11550_v12 }
0x2fff   :  { %v6124_v32 = vpop.f32.mrf.mxu0 }
0x3000   :  { %v6125_v34 = vadd.f32 %v6124_v32, %v12272_v30  ;;  %v12295_v32 = vmov 2  }
0x3001   :  { %v8961_v10 = vpop.f32.mrf.mxu0 }
0x3002   :  { %v6128_v28 = vsel %vm3403_vm2, %v6125_v34, -inf  ;;  %v12296_v10 = vmov 3  }
0x3003   :  { %6129 = vmax.xlane.f32.xlu0 %v6128_v28 }
0x308c   :  { %v6130_v26 = vpop.xlane.xlu0 %6129 }
0x308d   :  { %v6131_v54 = vsub.f32 %v6125_v34, %v6130_v26  ;;  %v12297_v34 = vmov 4  }
0x308f   :  { %v6132_v15 = vmul.f32 1.442695, %v6131_v54 }
0x3091   :  { %9362 = vpow2.f32 %v6132_v15  ;;  %v12302_v15 = vld [vmem:[#allocation7_spill] sm:$0xff] }
0x309e   :  { %v9363_v57 = vpop.eup %9362 }
0x309f   :  { %v6134_v19 = vmul.f32 %v11294_v8, %v9363_v57  ;;  %v12298_v57 = vmov 5   ;;  %v12304_v8 = vld [vmem:[#allocation6_spill] sm:$0xff] }
0x30a1   :  { %v6135_v2 = vsel %vm3403_vm2, %v6134_v19, 0.0 }
0x30a2   :  { %6136 = vadd.xlane.f32.xlu1 %v6135_v2  ;;  %v12299_v2 = vmov 6  }
0x312b   :  { %v6137_v16 = vpop.xlane.xlu1 %6136 }
0x312c   :  { %v6138_v60 = vadd.f32 1e-15, %v6137_v16  ;;  %v12301_v16 = vmov 1  }
0x312e   :  { %9364 = vrcp.f32 %v6138_v60  ;;  %v12300_v60 = vmov 7  }
0x313b   :  { %v9365_v12 = vpop.eup %9364 }
0x313c   :  { %v6140_v36 = vmul.f32 %v9365_v12, %v6134_v19 }
0x313e   :  { %6149 = vperm.xlu1 %9162, %v6140_v36   ;;  %6143 = vperm.xlu0 %9161, %v6140_v36  }
0x3142   :  { %9163 = vset.pattern.permute.xlu1 %v12295_v32 }
0x3143   :  { %6157 = vperm.xlu1 %9163, %v6140_v36  }
0x3147   :  { %9164 = vset.pattern.permute.xlu1 %v12296_v10 }
0x3148   :  { %6165 = vperm.xlu1 %9164, %v6140_v36  }
0x314c   :  { %9165 = vset.pattern.permute.xlu1 %v12297_v34  ;;  %v12303_v34 = vld [vmem:[#allocation12_spill] sm:$0xff] }
0x314d   :  { %6173 = vperm.xlu1 %9165, %v6140_v36  }
0x3151   :  { %9166 = vset.pattern.permute.xlu1 %v12298_v57 }
0x3152   :  { %6181 = vperm.xlu1 %9166, %v6140_v36  }
0x3156   :  { %9167 = vset.pattern.permute.xlu1 %v12299_v2 }
0x3157   :  { %6189 = vperm.xlu1 %9167, %v6140_v36  }
0x315b   :  { %9168 = vset.pattern.permute.xlu1 %v12300_v60 }
0x315c   :  { %6197 = vperm.xlu1 %9168, %v6140_v36  }
0x3160   :  { %9169 = vset.pattern.permute.xlu1 %v12301_v16 }
0x31b9   :  { %v6150_v19 = vpop.permute.xlu1 %6149  ;;  %v6144_v26 = vpop.permute.xlu0 %6143 }
0x31ba   :  { %v6152_v10 = vmul.f32 %v6150_v19, %v12302_v15  ;;  %v6154_v32 = vmul.f32 %v6150_v19, %v12303_v34  ;;  %v6146_v57 = vmul.f32 %v6144_v26, %v12304_v8  ;;  %v6147_v30 = vmul.f32 %v6144_v26, %v10549_v33  ;;  %v12305_v19 = vld [vmem:[#allocation9_spill] sm:$0xff] }
0x31bc   :  { %v6153_v42 = vadd.f32 %v6152_v10, %v6146_v57  ;;  %v6155_v16 = vadd.f32 %v6154_v32, %v6147_v30 }
0x31be   :  { %v6158_v12 = vpop.permute.xlu1 %6157 }
0x31bf   :  { %v6160_v2 = vmul.f32 %v6158_v12, %v12285_v5  ;;  %v6162_v60 = vmul.f32 %v6158_v12, %v12286_v20 }
0x31c1   :  { %v6161_v53 = vadd.f32 %v6160_v2, %v6153_v42  ;;  %v6163_v46 = vadd.f32 %v6162_v60, %v6155_v16 }
0x31c3   :  { %v6166_v28 = vpop.permute.xlu1 %6165 }
0x31c4   :  { %v6168_v1 = vmul.f32 %v6166_v28, %v10188_v39  ;;  %v6170_v43 = vmul.f32 %v6166_v28, %v10267_v25 }
0x31c6   :  { %v6169_v8 = vadd.f32 %v6168_v1, %v6161_v53  ;;  %v6171_v50 = vadd.f32 %v6170_v43, %v6163_v46 }
0x31c8   :  { %v6174_v54 = vpop.permute.xlu1 %6173 }
0x31c9   :  { %v6176_v15 = vmul.f32 %v6174_v54, %v10286_v17  ;;  %v6178_v34 = vmul.f32 %v6174_v54, %v12305_v19  ;;  %v11616_v54 = vld [vmem:[%s12069_s22 + $0x10] sm:$0xff] }
0x31cb   :  { %v6177_v20 = vadd.f32 %v6176_v15, %v6169_v8  ;;  %v6179_v10 = vadd.f32 %v6178_v34, %v6171_v50  ;;  %v11586_v8 = vld [vmem:[%s12067_s20 + $0x10] sm:$0xff]  ;;  %v11599_v50 = vld [vmem:[%s12067_s20] sm:$0xff]  ;;  %v11607_v34 = vld [vmem:[%s12069_s22 + $0x18] sm:$0xff] }
0x31cc   :  { %v11623_v15 = vld [vmem:[%s12069_s22 + $0x8] sm:$0xff] }
0x31cd   :  { %v6182_v36 = vpop.permute.xlu1 %6181 }
0x31ce   :  { %v6184_v26 = vmul.f32 %v6182_v36, %v10394_v61  ;;  %v6186_v5 = vmul.f32 %v6182_v36, %v10054_v7  ;;  %v11630_v36 = vld [vmem:[%s12069_s22] sm:$0xff] }
0x31d0   :  { %v6185_v57 = vadd.f32 %v6184_v26, %v6177_v20  ;;  %v6187_v42 = vadd.f32 %v6186_v5, %v6179_v10  ;;  %v11593_v20 = vld [vmem:[%s12067_s20 + $0x8] sm:$0xff] }
0x31d2   :  { %v6190_v12 = vpop.permute.xlu1 %6189 }
0x31d3   :  { %v6192_v30 = vmul.f32 %v6190_v12, %v10487_v4  ;;  %v6194_v32 = vmul.f32 %v6190_v12, %v9945_v35  ;;  %v5910_v12 = vadd.f32 %v11531_v63, %v12252_v21 }
0x31d5   :  { %v6193_v60 = vadd.f32 %v6192_v30, %v6185_v57  ;;  %v6195_v16 = vadd.f32 %v6194_v32, %v6187_v42  ;;  %v6356_v32 = vadd.f32 %v11533_v29, %v5910_v12 }
0x31d7   :  { %v6198_v2 = vpop.permute.xlu1 %6197 }
0x31d8   :  { %v6200_v28 = vmul.f32 %v6198_v2, %v10572_v49  ;;  %v6202_v46 = vmul.f32 %v6198_v2, %v9841_v48  ;;  %v5981_v2 = vadd.f32 %v11536_v56, %v10951_v59 }
0x31da   :  { %v6201_v53 = vadd.f32 %v6200_v28, %v6193_v60  ;;  %v6203_v43 = vadd.f32 %v6202_v46, %v6195_v16 }
0x31dc   :  { %6205 = vrot.lane.b32.xlu0 %v6203_v43, %s9509_s11  ;;  %6281 = vrot.lane.b32.xlu1 %v6201_v53, %s9509_s11 }
0x324e   :  { %v6206_v1 = vpop.permute.xlu0 %6205  ;;  %v6282_v5 = vpop.permute.xlu1 %6281 }
0x324f   :  { %8156 = vmatmul.mubr.msk.f32.vlgmr.msra.gmra.mxu1 %vm107_vm0, %v6206_v1 }
0x3250   :  { %6314 = vmatpush1.msra.mxu1 %v11586_v8  ;;  %6349 = vmatprep.mubr.f32.mxu1 %v12217_v62 }
0x3251   :  { %6315 = vmatprep.subr.mxu1 %v11593_v20 }
0x3252   :  { %6316 = vmatpush1.msra.mxu1 %v11599_v50 }
0x3253   :  { %8157 = vmatmul.mubr.msk.f32.vlgmr.msra.gmra.mxu1 %vm107_vm0, %v6282_v5  ;;  %8962 = vmatprep.subr.mxu1 %v12217_v62 }
0x3254   :  { %8963 = vmatpush3.msra.mxu1 %v11607_v34  ;;  %8970 = vmatprep.mubr.msk.f32.mxu1 %vm9504_vm1, %v12217_v62 }
0x3255   :  { %8964 = vmatprep.subr.mxu1 %v12217_v62 }
0x3256   :  { %8965 = vmatpush3.msra.mxu1 %v11616_v54 }
0x3257   :  { %8966 = vmatprep.subr.mxu1 %v12217_v62 }
0x3258   :  { %8967 = vmatpush3.msra.mxu1 %v11623_v15 }
0x3259   :  { %8968 = vmatprep.subr.mxu1 %v12217_v62 }
0x325a   :  { %8969 = vmatpush3.msra.mxu1 %v11630_v36 }
0x325b   :  { %8973 = vmatprep.subr.mxu1 %v12217_v62 }
0x330f   :  { %v6275_v26 = vpop.f32.mrf.mxu1 }
0x3311   :  { %v6277_v10 = vpop.f32.mrf.mxu1 }
0x3313   :  { %v6351_v30 = vpop.f32.mrf.mxu1 }
0x3314   :  { %v6352_v57 = vadd.f32 %v6351_v30, %v6275_v26 }
0x3315   :  { %v6353_v42 = vpop.f32.mrf.mxu1 }
0x3316   :  { %v6357_v60 = vadd.f32 %v6356_v32, %v6352_v57  ;;  %v6354_v16 = vadd.f32 %v6353_v42, %v6277_v10  ;;  %v11662_v42 = vld [vmem:[%s12072_s25] sm:$0xff] }
0x3318   :  { %9366 = vtanh.f32 %v6357_v60  ;;  %v6382_v28 = vadd.f32 %v6354_v16, %v5981_v2  ;;  %v8158_v53 = vmul.f32 -1.442695, %v6357_v60 }
0x331a   :  { %9368 = vpow2.f32 %v8158_v53 }
0x3325   :  { %v9367_v46 = vpop.eup %9366 }
0x3326   :  { %6367 = vrot.lane.b32.xlu0 %v9367_v46, %s9516_s30 }
0x3327   :  { %v9369_v43 = vpop.eup %9368 }
0x3328   :  { %v6361_v63 = vadd.f32 1.0, %v9369_v43 }
0x332a   :  { %9370 = vrcp.f32 %v6361_v63 }
0x3337   :  { %v9371_v1 = vpop.eup %9370 }
0x3338   :  { %v6365_v26 = vmul.f32 %v9371_v1, %v11349_v27  ;;  %v11652_v27 = vld [vmem:[%s12072_s25 + $0x8] sm:$0xff] }
0x3398   :  { %v6368_v5 = vpop.permute.xlu0 %6367 }
0x3399   :  { %v6370_v29 = vmul.f32 %v9371_v1, %v6368_v5 }
0x339b   :  { %6372 = vrot.lane.b32.xlu1 %v6370_v29, %s9516_s30 }
0x340d   :  { %v6373_v56 = vpop.permute.xlu1 %6372 }
0x340e   :  { %v11642_v12 = vadd.f32 %v6373_v56, %v6365_v26  ;;  %v12311_v26 = vld [vmem:[#allocation30_spill] sm:$0xff] }
0x3410   :  { %9372 = vtanh.f32 %v11642_v12 }
0x341d   :  { %v9373_v10 = vpop.eup %9372 }
0x341e   :  { %6378 = vrot.lane.b32.xlu0 %v9373_v10, %s9516_s30 }
0x3490   :  { %v6379_v30 = vpop.permute.xlu0 %6378 }
0x3491   :  { %v6381_v32 = vmul.f32 %v9371_v1, %v6379_v30  ;;  %v12312_v30 = vld [vmem:[#allocation22_spill] sm:$0xff] }
0x3493   :  { %6384 = vrot.lane.b32.xlu1 %v6381_v32, %s9517_s29 }
0x3505   :  { %v6385_v57 = vpop.permute.xlu1 %6384 }
0x3506   :  { %8971 = vmatmul.mubr.msk.f32.vlgmr.msra.gmra.mxu1 %vm3767_vm3, %v6385_v57  ;;  %8164 = vmatmul.mubr.msk.f32.vlgmr.msra.gmra.mxu0 %vm3767_vm3, %v6385_v57 }
0x3507   :  { %8974 = vmatpush3.msra.mxu1 %v11652_v27  ;;  %8977 = vmatprep.mubr.msk.f32.mxu1 %vm9504_vm1, %v12217_v62 }
0x3508   :  { %8975 = vmatprep.subr.mxu1 %v12217_v62  ;;  %6959 = vmatpush1.msra.mxu0 %v11363_v0 }
0x3509   :  { %8976 = vmatpush3.msra.mxu1 %v11662_v42  ;;  %6960 = vmatprep.subr.mxu0 %v11370_v23 }
0x350a   :  { %6592 = vmatprep.subr.mxu1 %v11157_v51  ;;  %6961 = vmatpush1.msra.mxu0 %v11377_v6  ;;  %v3578_v51 = vld [vmem:[%s12198_s12 + $0x20] sm:$0xff] }
0x350b   :  { %6994 = vmatprep.mubr.f32.mxu0 %v12217_v62  ;;  %7034 = vmatprep.subr.mxu0 %v11384_v22 }
0x35c6   :  { %v6454_v2 = vpop.f32.mrf.mxu1  ;;  %v11726_v5 = vpop.f32.mrf.mxu0 }
0x35c7   :  { %v6458_v60 = vadd.f32 %v6454_v2, %v6382_v28  ;;  %v12309_v28 = vld [vmem:[#allocation15_spill] sm:$0xff] }
0x35c8   :  { %v8972_v16 = vpop.f32.mrf.mxu1  ;;  %v6773_v57 = vpop.f32.mrf.mxu0 }
0x35c9   :  { %6460 = vrot.lane.b32.xlu0 %v6458_v60, %s9518_s14 }
0x363b   :  { %v6461_v46 = vpop.permute.xlu0 %6460 }
0x363c   :  { %v6463_v53 = vmax.f32 %v6458_v60, %v6461_v46  ;;  %v12313_v46 = vld [vmem:[#allocation17_spill] sm:$0xff] }
0x363e   :  { %8978 = vmatmul.mubr.msk.f32.vlgmr.msra.gmra.mxu1 %vm107_vm0, %v6463_v53  ;;  %v12314_v53 = vld [vmem:[#allocation18_spill] sm:$0xff] }
0x363f   :  { %6593 = vmatpush1.msra.mxu1 %v11168_v41  ;;  %6628 = vmatprep.mubr.f32.mxu1 %v12217_v62  ;;  %v12306_v41 = vld [vmem:[#allocation27_spill] sm:$0xff] }
0x3640   :  { %6594 = vmatprep.subr.mxu1 %v11178_v37  ;;  %v12307_v37 = vld [vmem:[#allocation28_spill] sm:$0xff] }
0x3641   :  { %6595 = vmatpush1.msra.mxu1 %v11184_v40  ;;  %v12308_v40 = vld [vmem:[#allocation29_spill] sm:$0xff] }
0x3642   :  { %8162 = vmatmul.mubr.msk.f32.vlgmr.msra.gmra.mxu1 %vm107_vm0, %v3578_v51  ;;  %8980 = vmatprep.subr.mxu1 %v12217_v62 }
0x3643   :  { %8981 = vmatpush3.msra.mxu1 %v11401_v44  ;;  %8984 = vmatprep.mubr.msk.f32.mxu1 %vm9504_vm1, %v12217_v62 }
0x3644   :  { %8982 = vmatprep.subr.mxu1 %v12217_v62 }
0x3645   :  { %8983 = vmatpush3.msra.mxu1 %v11410_v11 }
0x3646   :  { %8985 = vmatmul.mubr.msk.f32.vlgmr.msra.gmra.mxu1 %vm107_vm0, %v3578_v51  ;;  %8987 = vmatprep.subr.mxu1 %v12217_v62  ;;  %v12315_v51 = vld [vmem:[#allocation19_spill] sm:$0xff] }
0x3647   :  { %8988 = vmatpush3.msra.mxu1 %v11418_v3  ;;  %9019 = vmatprep.mubr.msk.f32.mxu1 %vm9504_vm1, %v12217_v62 }
0x3648   :  { %8989 = vmatprep.subr.mxu1 %v12217_v62 }
0x3649   :  { %8990 = vmatpush3.msra.mxu1 %v11427_v58 }
0x364a   :  { %8991 = vmatprep.subr.mxu1 %v12217_v62 }
0x364b   :  { %8992 = vmatpush3.msra.mxu1 %v11434_v13 }
0x364c   :  { %8993 = vmatprep.subr.mxu1 %v12217_v62 }
0x364d   :  { %8994 = vmatpush3.msra.mxu1 %v11441_v55 }
0x364e   :  { %8995 = vmatprep.subr.mxu1 %v12217_v62 }
0x364f   :  { %8996 = vmatpush3.msra.mxu1 %v11448_v9 }
0x3650   :  { %8997 = vmatprep.subr.mxu1 %v12217_v62 }
0x3651   :  { %8998 = vmatpush3.msra.mxu1 %v11455_v14 }
0x3652   :  { %8999 = vmatprep.subr.mxu1 %v12217_v62 }
0x3653   :  { %9000 = vmatpush3.msra.mxu1 %v11462_v45 }
0x3654   :  { %9001 = vmatprep.subr.mxu1 %v12217_v62 }
0x3655   :  { %9002 = vmatpush3.msra.mxu1 %v11469_v18 }
0x3656   :  { %9003 = vmatprep.subr.mxu1 %v12217_v62 }
0x3657   :  { %9004 = vmatpush3.msra.mxu1 %v11476_v24 }
0x3658   :  { %9005 = vmatprep.subr.mxu1 %v12217_v62 }
0x3659   :  { %9006 = vmatpush3.msra.mxu1 %v11483_v47 }
0x365a   :  { %9007 = vmatprep.subr.mxu1 %v12217_v62 }
0x365b   :  { %9008 = vmatpush3.msra.mxu1 %v11490_v31 }
0x365c   :  { %9009 = vmatprep.subr.mxu1 %v12217_v62 }
0x365d   :  { %9010 = vmatpush3.msra.mxu1 %v11497_v52 }
0x365e   :  { %9011 = vmatprep.subr.mxu1 %v12217_v62 }
0x365f   :  { %9012 = vmatpush3.msra.mxu1 %v11504_v38 }
0x3660   :  { %9013 = vmatprep.subr.mxu1 %v12217_v62 }
0x3661   :  { %9014 = vmatpush3.msra.mxu1 %v12306_v41  ;;  %v12335_v41 = vld [vmem:[#allocation11_spill] sm:$0xff] }
0x3662   :  { %9015 = vmatprep.subr.mxu1 %v12217_v62 }
0x3663   :  { %9016 = vmatpush3.msra.mxu1 %v12307_v37 }
0x3664   :  { %9017 = vmatprep.subr.mxu1 %v12217_v62 }
0x3665   :  { %9018 = vmatpush3.msra.mxu1 %v12308_v40 }
0x3666   :  { %7450 = vmatprep.subr.mxu1 %v12309_v28  ;;  %v12316_v28 = vld [vmem:[#allocation20_spill] sm:$0xff] }
0x36fe   :  { %v11722_v43 = vpop.f32.mrf.mxu1 }
0x36ff   :  { %12310 = vst [vmem:[#allocation9_spill] sm:$0xff] %v11722_v43 }
0x3700   :  { %v8979_v63 = vpop.f32.mrf.mxu1 }
0x3701   :  { %v12317_v63 = vld [vmem:[#allocation21_spill] sm:$0xff] }
0x3702   :  { %v11724_v1 = vpop.f32.mrf.mxu1 }
0x3704   :  { %v6632_v29 = vpop.f32.mrf.mxu1 }
0x3705   :  { %v6633_v56 = vadd.f32 %v6632_v29, %v12311_v26  ;;  %v12318_v29 = vld [vmem:[#allocation13_spill] sm:$0xff] }
0x3706   :  { %v11729_v10 = vpop.f32.mrf.mxu1 }
0x3707   :  { %v6776_v32 = vadd.f32 %v6633_v56, %v12312_v30  ;;  %v12319_v56 = vld [vmem:[#allocation31_spill] sm:$0xff] }
0x3708   :  { %v8986_v2 = vpop.f32.mrf.mxu1  ;;  %v12322_v30 = vld [vmem:[#allocation23_spill] sm:$0xff] }
0x3709   :  { %v6777_v60 = vadd.f32 %v6776_v32, %v6773_v57  ;;  %v12320_v32 = vld [vmem:[#allocation34_spill] sm:$0xff]  ;;  %v12321_v2 = vld [vmem:[#allocation32_spill] sm:$0xff] }
0x370b   :  { %9374 = vtanh.f32 %v6777_v60 }
0x3718   :  { %v9375_v16 = vpop.eup %9374 }
0x3719   :  { %9020 = vmatmul.mubr.f32.vlgmr.msra.gmra.mxu1 %v9375_v16 }
0x371a   :  { %7451 = vmatpush1.msra.mxu1 %v12313_v46  ;;  %7490 = vmatprep.mubr.f32.mxu1 %v12217_v62 }
0x371b   :  { %7452 = vmatprep.subr.mxu1 %v12314_v53 }
0x371c   :  { %7453 = vmatpush1.msra.mxu1 %v12315_v51 }
0x371d   :  { %7454 = vmatprep.subr.mxu1 %v12316_v28 }
0x371e   :  { %7455 = vmatpush1.msra.mxu1 %v12317_v63 }
0x371f   :  { %7456 = vmatprep.subr.mxu1 %v12318_v29 }
0x3720   :  { %7457 = vmatpush1.msra.mxu1 %v12319_v56 }
0x3721   :  { %7679 = vmatprep.subr.mxu1 %v12320_v32 }
0x37d9   :  { %v6845_v57 = vpop.f32.mrf.mxu1 }
0x37da   :  { %v6846_v60 = vadd.f32 %v6845_v57, %v12321_v2  ;;  %v12323_v57 = vmov 2  }
0x37db   :  { %v9021_v16 = vpop.f32.mrf.mxu1 }
0x37dc   :  { %v6849_v46 = vsel %vm3403_vm2, %v6846_v60, -inf  ;;  %v12324_v16 = vmov 3  }
0x37dd   :  { %6850 = vmax.xlane.f32.xlu1 %v6849_v46  ;;  %v12328_v46 = vmov 0  }
0x3866   :  { %v6851_v53 = vpop.xlane.xlu1 %6850 }
0x3867   :  { %v6852_v43 = vsub.f32 %v6846_v60, %v6851_v53  ;;  %v12326_v60 = vmov 6   ;;  %v12330_v53 = vmov 1  }
0x3869   :  { %v6853_v51 = vmul.f32 1.442695, %v6852_v43  ;;  %v12325_v43 = vmov 4  }
0x386b   :  { %9376 = vpow2.f32 %v6853_v51 }
0x3878   :  { %v9377_v28 = vpop.eup %9376 }
0x3879   :  { %v6855_v63 = vmul.f32 %v12322_v30, %v9377_v28  ;;  %v12327_v30 = vmov 5  }
0x387b   :  { %v6856_v29 = vsel %vm3403_vm2, %v6855_v63, 0.0 }
0x387c   :  { %6857 = vadd.xlane.f32.xlu0 %v6856_v29 }
0x3905   :  { %v6858_v56 = vpop.xlane.xlu0 %6857 }
0x3906   :  { %v6859_v26 = vadd.f32 1e-15, %v6858_v56  ;;  %v12332_v56 = vld [vmem:[#allocation12_spill] sm:$0xff] }
0x3908   :  { %9378 = vrcp.f32 %v6859_v26  ;;  %v12329_v26 = vmov 7  }
0x3915   :  { %v9379_v32 = vpop.eup %9378 }
0x3916   :  { %v6861_v40 = vmul.f32 %v9379_v32, %v6855_v63  ;;  %v12331_v63 = vld [vmem:[#allocation7_spill] sm:$0xff] }
0x3918   :  { %6870 = vperm.xlu1 %9169, %v6861_v40   ;;  %6864 = vperm.xlu0 %9161, %v6861_v40  }
0x391c   :  { %9170 = vset.pattern.permute.xlu1 %v12323_v57  ;;  %9171 = vset.pattern.permute.xlu0 %v12324_v16 }
0x391d   :  { %6878 = vperm.xlu1 %9170, %v6861_v40   ;;  %6886 = vperm.xlu0 %9171, %v6861_v40  }
0x3921   :  { %9172 = vset.pattern.permute.xlu1 %v12325_v43  ;;  %9174 = vset.pattern.permute.xlu0 %v12326_v60  ;;  %v12333_v43 = vld [vmem:[#allocation6_spill] sm:$0xff] }
0x3922   :  { %6894 = vperm.xlu1 %9172, %v6861_v40   ;;  %6910 = vperm.xlu0 %9174, %v6861_v40  }
0x3926   :  { %9173 = vset.pattern.permute.xlu1 %v12327_v30  ;;  %9176 = vset.pattern.permute.xlu0 %v12328_v46  ;;  %v12334_v46 = vld [vmem:[#allocation8_spill] sm:$0xff] }
0x3927   :  { %6902 = vperm.xlu1 %9173, %v6861_v40  }
0x392b   :  { %9175 = vset.pattern.permute.xlu1 %v12329_v26 }
0x392c   :  { %6918 = vperm.xlu1 %9175, %v6861_v40  }
0x3930   :  { %9177 = vset.pattern.permute.xlu1 %v12330_v53 }
0x3993   :  { %v6871_v51 = vpop.permute.xlu1 %6870  ;;  %v6865_v28 = vpop.permute.xlu0 %6864 }
0x3994   :  { %v6873_v29 = vmul.f32 %v6871_v51, %v12331_v63  ;;  %v6875_v32 = vmul.f32 %v6871_v51, %v12332_v56  ;;  %v6867_v60 = vmul.f32 %v6865_v28, %v12333_v43  ;;  %v6868_v16 = vmul.f32 %v6865_v28, %v10549_v33 }
0x3996   :  { %v6874_v30 = vadd.f32 %v6873_v29, %v6867_v60  ;;  %v6876_v2 = vadd.f32 %v6875_v32, %v6868_v16 }
0x3998   :  { %v6879_v57 = vpop.permute.xlu1 %6878  ;;  %v6887_v40 = vpop.permute.xlu0 %6886 }
0x3999   :  { %v6881_v37 = vmul.f32 %v6879_v57, %v12334_v46  ;;  %v6883_v26 = vmul.f32 %v6879_v57, %v12335_v41  ;;  %v6889_v52 = vmul.f32 %v6887_v40, %v10188_v39  ;;  %v6891_v63 = vmul.f32 %v6887_v40, %v10267_v25 }
0x399b   :  { %v6882_v38 = vadd.f32 %v6881_v37, %v6874_v30  ;;  %v6884_v53 = vadd.f32 %v6883_v26, %v6876_v2 }
0x399d   :  { %v6895_v31 = vpop.permute.xlu1 %6894  ;;  %v6890_v51 = vadd.f32 %v6889_v52, %v6882_v38  ;;  %v6892_v56 = vadd.f32 %v6891_v63, %v6884_v53  ;;  %v6911_v60 = vpop.permute.xlu0 %6910 }
0x399e   :  { %v6897_v43 = vmul.f32 %v6895_v31, %v10286_v17  ;;  %v6899_v28 = vmul.f32 %v6895_v31, %v12305_v19  ;;  %v6913_v2 = vmul.f32 %v6911_v60, %v10487_v4  ;;  %v6915_v30 = vmul.f32 %v6911_v60, %v9945_v35 }
0x39a0   :  { %v6898_v29 = vadd.f32 %v6897_v43, %v6890_v51  ;;  %v6900_v32 = vadd.f32 %v6899_v28, %v6892_v56  ;;  %v6631_v28 = vadd.f32 %v11724_v1, %v12252_v21 }
0x39a2   :  { %v6903_v16 = vpop.permute.xlu1 %6902 }
0x39a3   :  { %v6905_v57 = vmul.f32 %v6903_v16, %v10394_v61  ;;  %v6907_v37 = vmul.f32 %v6903_v16, %v10054_v7 }
0x39a5   :  { %v6906_v26 = vadd.f32 %v6905_v57, %v6898_v29  ;;  %v6908_v40 = vadd.f32 %v6907_v37, %v6900_v32  ;;  %v7077_v29 = vadd.f32 %v11726_v5, %v6631_v28  ;;  %v6702_v37 = vadd.f32 %v11729_v10, %v10951_v59 }
0x39a7   :  { %v6919_v52 = vpop.permute.xlu1 %6918  ;;  %v6914_v38 = vadd.f32 %v6913_v2, %v6906_v26  ;;  %v6916_v63 = vadd.f32 %v6915_v30, %v6908_v40 }
0x39a8   :  { %v6921_v53 = vmul.f32 %v6919_v52, %v10572_v49  ;;  %v6923_v31 = vmul.f32 %v6919_v52, %v9841_v48 }
0x39aa   :  { %v6922_v17 = vadd.f32 %v6921_v53, %v6914_v38  ;;  %v6924_v43 = vadd.f32 %v6923_v31, %v6916_v63 }
0x39ac   :  { %6926 = vrot.lane.b32.xlu1 %v6924_v43, %s9509_s11  ;;  %7002 = vrot.lane.b32.xlu0 %v6922_v17, %s9509_s11 }
0x3a1e   :  { %v6927_v56 = vpop.permute.xlu1 %6926  ;;  %v7003_v51 = vpop.permute.xlu0 %7002 }
0x3a1f   :  { %8165 = vmatmul.mubr.msk.f32.vlgmr.msra.gmra.mxu0 %vm107_vm0, %v6927_v56 }
0x3a20   :  { %7035 = vmatpush1.msra.mxu0 %v11586_v8  ;;  %7070 = vmatprep.mubr.f32.mxu0 %v12217_v62 }
0x3a21   :  { %7036 = vmatprep.subr.mxu0 %v11593_v20 }
0x3a22   :  { %7037 = vmatpush1.msra.mxu0 %v11599_v50 }
0x3a23   :  { %8166 = vmatmul.mubr.msk.f32.vlgmr.msra.gmra.mxu0 %vm107_vm0, %v7003_v51  ;;  %9022 = vmatprep.subr.mxu0 %v12217_v62 }
0x3a24   :  { %9023 = vmatpush3.msra.mxu0 %v11607_v34  ;;  %9030 = vmatprep.mubr.msk.f32.mxu0 %vm9504_vm1, %v12217_v62 }
0x3a25   :  { %9024 = vmatprep.subr.mxu0 %v12217_v62 }
0x3a26   :  { %9025 = vmatpush3.msra.mxu0 %v11616_v54 }
0x3a27   :  { %9026 = vmatprep.subr.mxu0 %v12217_v62 }
0x3a28   :  { %9027 = vmatpush3.msra.mxu0 %v11623_v15 }
0x3a29   :  { %9028 = vmatprep.subr.mxu0 %v12217_v62 }
0x3a2a   :  { %9029 = vmatpush3.msra.mxu0 %v11630_v36 }
0x3a2b   :  { %9033 = vmatprep.subr.mxu0 %v12217_v62 }
0x3adf   :  { %v6996_v17 = vpop.f32.mrf.mxu0 }
0x3ae1   :  { %v6998_v60 = vpop.f32.mrf.mxu0 }
0x3ae3   :  { %v7072_v16 = vpop.f32.mrf.mxu0 }
0x3ae4   :  { %v7073_v32 = vadd.f32 %v7072_v16, %v6996_v17 }
0x3ae5   :  { %v7074_v57 = vpop.f32.mrf.mxu0 }
0x3ae6   :  { %v7078_v2 = vadd.f32 %v7077_v29, %v7073_v32  ;;  %v7075_v30 = vadd.f32 %v7074_v57, %v6998_v60  ;;  %v9479_v57 = vld [vmem:[%s12064_s17] sm:$0xff] }
0x3ae8   :  { %9380 = vtanh.f32 %v7078_v2  ;;  %v7103_v26 = vadd.f32 %v7075_v30, %v6702_v37  ;;  %v8167_v52 = vmul.f32 -1.442695, %v7078_v2  ;;  %v12343_v30 = vld [vmem:[#allocation22_spill] sm:$0xff] }
0x3aea   :  { %9382 = vpow2.f32 %v8167_v52 }
0x3af5   :  { %v9381_v40 = vpop.eup %9380 }
0x3af6   :  { %7088 = vrot.lane.b32.xlu1 %v9381_v40, %s9516_s30 }
0x3af7   :  { %v9383_v38 = vpop.eup %9382 }
0x3af8   :  { %v7082_v1 = vadd.f32 1.0, %v9383_v38 }
0x3afa   :  { %9384 = vrcp.f32 %v7082_v1 }
0x3b07   :  { %v9385_v63 = vpop.eup %9384 }
0x3b08   :  { %v7086_v31 = vmul.f32 %v9385_v63, %v11642_v12  ;;  %v9476_v12 = vld [vmem:[%s12064_s17 + $0x20] sm:$0xff] }
0x3b68   :  { %v7089_v53 = vpop.permute.xlu1 %7088 }
0x3b69   :  { %v7091_v5 = vmul.f32 %v9385_v63, %v7089_v53  ;;  %v12344_v53 = vld [vmem:[#allocation32_spill] sm:$0xff] }
0x3b6b   :  { %7093 = vrot.lane.b32.xlu0 %v7091_v5, %s9516_s30 }
0x3bdd   :  { %v7094_v10 = vpop.permute.xlu0 %7093 }
0x3bde   :  { %v11796_v43 = vadd.f32 %v7094_v10, %v7086_v31 }
0x3be0   :  { %9386 = vtanh.f32 %v11796_v43 }
0x3bed   :  { %v9387_v56 = vpop.eup %9386 }
0x3bee   :  { %7099 = vrot.lane.b32.xlu1 %v9387_v56, %s9516_s30 }
0x3c60   :  { %v7100_v51 = vpop.permute.xlu1 %7099 }
0x3c61   :  { %v7102_v17 = vmul.f32 %v9385_v63, %v7100_v51 }
0x3c63   :  { %7105 = vrot.lane.b32.xlu0 %v7102_v17, %s9517_s29 }
0x3cd5   :  { %v7106_v28 = vpop.permute.xlu0 %7105 }
0x3cd6   :  { %9031 = vmatmul.mubr.msk.f32.vlgmr.msra.gmra.mxu0 %vm3767_vm3, %v7106_v28  ;;  %8173 = vmatmul.mubr.msk.f32.vlgmr.msra.gmra.mxu1 %vm3767_vm3, %v7106_v28 }
0x3cd7   :  { %9034 = vmatpush3.msra.mxu0 %v11652_v27  ;;  %9037 = vmatprep.mubr.msk.f32.mxu0 %vm9504_vm1, %v12217_v62 }
0x3cd8   :  { %9035 = vmatprep.subr.mxu0 %v12217_v62  ;;  %7680 = vmatpush1.msra.mxu1 %v11363_v0 }
0x3cd9   :  { %9036 = vmatpush3.msra.mxu0 %v11662_v42  ;;  %7681 = vmatprep.subr.mxu1 %v11370_v23  ;;  %v9477_v23 = vld [vmem:[%s12064_s17 + $0x18] sm:$0xff] }
0x3cda   :  { %7313 = vmatprep.subr.mxu0 %v9476_v12  ;;  %7682 = vmatpush1.msra.mxu1 %v11377_v6  ;;  %v3579_v6 = vld [vmem:[%s12198_s12 + $0x28] sm:$0xff]  ;;  %v9480_v12 = vld [vmem:[%s12188_s8] sm:$0xff] }
0x3cdb   :  { %7715 = vmatprep.mubr.f32.mxu1 %v12217_v62  ;;  %7755 = vmatprep.subr.mxu1 %v11384_v22  ;;  %v9478_v22 = vld [vmem:[%s12064_s17 + $0x8] sm:$0xff]  ;;  %s9519_s17 = smov [#allocation3]  }
0x3cdc   :  { %s8020_s12 = sshll.u32 %s9519_s17, 4  ;;  %s8021_s12 = int_to_ptr.vmem [resolvable:$true] %s8020_s12 }
0x3cdd   :  { %s9481_s8 = scalar_lea.vmem %s8021_s12, 16  ;;  %p9486_p1 = scmp.lt.s32.totalorder %s8021_s12, %s8021_s12 }
0x3cde   :  { %p9482_p0 = scmp.ne.s32.totalorder %s8021_s12, %s9481_s8 }
0x3d96   :  { %v7175_v60 = vpop.f32.mrf.mxu0 }
0x3d97   :  { %v7179_v16 = vadd.f32 %v7175_v60, %v7103_v26 }
0x3d98   :  { %v9032_v29 = vpop.f32.mrf.mxu0 }
0x3d99   :  { %7181 = vrot.lane.b32.xlu1 %v7179_v16, %s9518_s14 }
0x3e0b   :  { %v7182_v0 = vpop.permute.xlu1 %7181 }
0x3e0c   :  { %v7184_v32 = vmax.f32 %v7179_v16, %v7182_v0 }
0x3e0e   :  { %9038 = vmatmul.mubr.msk.f32.vlgmr.msra.gmra.mxu0 %vm107_vm0, %v7184_v32 }
0x3e0f   :  { %7314 = vmatpush1.msra.mxu0 %v9477_v23  ;;  %7349 = vmatprep.mubr.f32.mxu0 %v12217_v62 }
0x3e10   :  { %7315 = vmatprep.subr.mxu0 %v9478_v22  ;;  %v12346_v22 = vmov 7  }
0x3e11   :  { %7316 = vmatpush1.msra.mxu0 %v9479_v57  ;;  %v12347_v57 = vmov 3  }
0x3e12   :  { %8171 = vmatmul.mubr.msk.f32.vlgmr.msra.gmra.mxu0 %vm107_vm0, %v3579_v6  ;;  %9040 = vmatprep.subr.mxu0 %v12217_v62 }
0x3e13   :  { %9041 = vmatpush3.msra.mxu0 %v11401_v44  ;;  %9044 = vmatprep.mubr.msk.f32.mxu0 %vm9504_vm1, %v12217_v62  ;;  %v12336_v44 = vld [vmem:[#allocation24_spill] sm:$0xff] }
0x3e14   :  { %9042 = vmatprep.subr.mxu0 %v12217_v62 }
0x3e15   :  { %9043 = vmatpush3.msra.mxu0 %v11410_v11  ;;  %v12337_v11 = vld [vmem:[#allocation25_spill] sm:$0xff] }
0x3e16   :  { %9045 = vmatmul.mubr.msk.f32.vlgmr.msra.gmra.mxu0 %vm107_vm0, %v3579_v6  ;;  %9047 = vmatprep.subr.mxu0 %v12217_v62  ;;  %v12345_v6 = vmov 2  }
0x3e17   :  { %9048 = vmatpush3.msra.mxu0 %v11418_v3  ;;  %9079 = vmatprep.mubr.msk.f32.mxu0 %vm9504_vm1, %v12217_v62  ;;  %v12338_v3 = vld [vmem:[#allocation26_spill] sm:$0xff] }
0x3e18   :  { %9049 = vmatprep.subr.mxu0 %v12217_v62 }
0x3e19   :  { %9050 = vmatpush3.msra.mxu0 %v11427_v58  ;;  %v12339_v58 = vld [vmem:[#allocation27_spill] sm:$0xff] }
0x3e1a   :  { %9051 = vmatprep.subr.mxu0 %v12217_v62 }
0x3e1b   :  { %9052 = vmatpush3.msra.mxu0 %v11434_v13  ;;  %v12340_v13 = vld [vmem:[#allocation28_spill] sm:$0xff] }
0x3e1c   :  { %9053 = vmatprep.subr.mxu0 %v12217_v62 }
0x3e1d   :  { %9054 = vmatpush3.msra.mxu0 %v11441_v55  ;;  %v12341_v55 = vld [vmem:[#allocation29_spill] sm:$0xff] }
0x3e1e   :  { %9055 = vmatprep.subr.mxu0 %v12217_v62 }
0x3e1f   :  { %9056 = vmatpush3.msra.mxu0 %v11448_v9 }
0x3e20   :  { %9057 = vmatprep.subr.mxu0 %v12217_v62 }
0x3e21   :  { %9058 = vmatpush3.msra.mxu0 %v11455_v14 }
0x3e22   :  { %9059 = vmatprep.subr.mxu0 %v12217_v62 }
0x3e23   :  { %9060 = vmatpush3.msra.mxu0 %v11462_v45 }
0x3e24   :  { %9061 = vmatprep.subr.mxu0 %v12217_v62 }
0x3e25   :  { %9062 = vmatpush3.msra.mxu0 %v11469_v18  ;;  %v11877_v18 = vpop.f32.mrf.mxu1 }
0x3e26   :  { %9063 = vmatprep.subr.mxu0 %v12217_v62 }
0x3e27   :  { %9064 = vmatpush3.msra.mxu0 %v11476_v24  ;;  %v7494_v40 = vpop.f32.mrf.mxu1 }
0x3e28   :  { %9065 = vmatprep.subr.mxu0 %v12217_v62 }
0x3e29   :  { %9066 = vmatpush3.msra.mxu0 %v11483_v47  ;;  %v12342_v47 = vld [vmem:[#allocation30_spill] sm:$0xff] }
0x3e2a   :  { %9067 = vmatprep.subr.mxu0 %v12217_v62 }
0x3e2b   :  { %9068 = vmatpush3.msra.mxu0 %v12336_v44  ;;  %v12348_v44 = vmov 0  }
0x3e2c   :  { %9069 = vmatprep.subr.mxu0 %v12217_v62 }
0x3e2d   :  { %9070 = vmatpush3.msra.mxu0 %v12337_v11  ;;  %v12349_v11 = vmov 4  }
0x3e2e   :  { %9071 = vmatprep.subr.mxu0 %v12217_v62 }
0x3e2f   :  { %9072 = vmatpush3.msra.mxu0 %v12338_v3  ;;  %v12350_v3 = vmov 5  }
0x3e30   :  { %9073 = vmatprep.subr.mxu0 %v12217_v62 }
0x3e31   :  { %9074 = vmatpush3.msra.mxu0 %v12339_v58  ;;  %v12351_v58 = vmov 6  }
0x3e32   :  { %9075 = vmatprep.subr.mxu0 %v12217_v62 }
0x3e33   :  { %9076 = vmatpush3.msra.mxu0 %v12340_v13 }
0x3e34   :  { %9077 = vmatprep.subr.mxu0 %v12217_v62 }
0x3e35   :  { %9078 = vmatpush3.msra.mxu0 %v12341_v55 }
0x3ece   :  { %v11873_v9 = vpop.f32.mrf.mxu0 }
0x3ed0   :  { %v9039_v14 = vpop.f32.mrf.mxu0 }
0x3ed2   :  { %v11875_v45 = vpop.f32.mrf.mxu0 }
0x3ed4   :  { %v7353_v24 = vpop.f32.mrf.mxu0 }
0x3ed5   :  { %v7354_v37 = vadd.f32 %v7353_v24, %v12342_v47  ;;  %v12352_v47 = vld [vmem:[#allocation12_spill] sm:$0xff] }
0x3ed6   :  { %v11880_v2 = vpop.f32.mrf.mxu0 }
0x3ed7   :  { %v7497_v26 = vadd.f32 %v7354_v37, %v12343_v30 }
0x3ed8   :  { %v9046_v52 = vpop.f32.mrf.mxu0 }
0x3ed9   :  { %v7498_v38 = vadd.f32 %v7497_v26, %v7494_v40  ;;  %v12353_v40 = vld [vmem:[#allocation7_spill] sm:$0xff] }
0x3edb   :  { %9388 = vtanh.f32 %v7498_v38  ;;  %v12354_v38 = vld [vmem:[#allocation6_spill] sm:$0xff] }
0x3ee8   :  { %v9389_v1 = vpop.eup %9388 }
0x3ee9   :  { %9080 = vmatmul.mubr.f32.vlgmr.msra.gmra.mxu0 %v9389_v1 }
0x3fa9   :  { %v7566_v63 = vpop.f32.mrf.mxu0 }
0x3faa   :  { %v7567_v5 = vadd.f32 %v7566_v63, %v12344_v53 }
0x3fab   :  { %v9081_v31 = vpop.f32.mrf.mxu0 }
0x3fac   :  { %v7570_v10 = vsel %vm3403_vm2, %v7567_v5, -inf }
0x3fad   :  { %7571 = vmax.xlane.f32.xlu0 %v7570_v10 }
0x4036   :  { %v7572_v56 = vpop.xlane.xlu0 %7571 }
0x4037   :  { %v7573_v51 = vsub.f32 %v7567_v5, %v7572_v56 }
0x4039   :  { %v7574_v17 = vmul.f32 1.442695, %v7573_v51 }
0x403b   :  { %9390 = vpow2.f32 %v7574_v17 }
0x4048   :  { %v9391_v28 = vpop.eup %9390 }
0x4049   :  { %v7576_v60 = vmul.f32 %v9480_v12, %v9391_v28 }
0x404b   :  { %v7577_v16 = vsel %vm3403_vm2, %v7576_v60, 0.0 }
0x404c   :  { %7578 = vadd.xlane.f32.xlu1 %v7577_v16 }
0x40d5   :  { %v7579_v29 = vpop.xlane.xlu1 %7578 }
0x40d6   :  { %v7580_v0 = vadd.f32 1e-15, %v7579_v29 }
0x40d8   :  { %9392 = vrcp.f32 %v7580_v0 }
0x40e5   :  { %v9393_v32 = vpop.eup %9392 }
0x40e6   :  { %v7582_v23 = vmul.f32 %v9393_v32, %v7576_v60  ;;  %v12355_v60 = vld [vmem:[#allocation10_spill] sm:$0xff] }
0x40e8   :  { %7591 = vperm.xlu1 %9177, %v7582_v23   ;;  %7585 = vperm.xlu0 %9176, %v7582_v23  }
0x40ec   :  { %9178 = vset.pattern.permute.xlu1 %v12345_v6  ;;  %9183 = vset.pattern.permute.xlu0 %v12346_v22 }
0x40ed   :  { %7599 = vperm.xlu1 %9178, %v7582_v23   ;;  %7639 = vperm.xlu0 %9183, %v7582_v23  }
0x40f1   :  { %9179 = vset.pattern.permute.xlu1 %v12347_v57  ;;  %9184 = vset.pattern.permute.xlu0 %v12348_v44 }
0x40f2   :  { %7607 = vperm.xlu1 %9179, %v7582_v23  }
0x40f6   :  { %9180 = vset.pattern.permute.xlu1 %v12349_v11 }
0x40f7   :  { %7615 = vperm.xlu1 %9180, %v7582_v23  }
0x40fb   :  { %9181 = vset.pattern.permute.xlu1 %v12350_v3 }
0x40fc   :  { %7623 = vperm.xlu1 %9181, %v7582_v23  }
0x4100   :  { %9182 = vset.pattern.permute.xlu1 %v12351_v58 }
0x4101   :  { %7631 = vperm.xlu1 %9182, %v7582_v23  }
0x4105   :  { %9185 = vset.pattern.permute.xlu1 %v12348_v44 }
0x4163   :  { %v7592_v13 = vpop.permute.xlu1 %7591  ;;  %v7586_v24 = vpop.permute.xlu0 %7585 }
0x4164   :  { %v7596_v37 = vmul.f32 %v7592_v13, %v12352_v47  ;;  %v7589_v30 = vmul.f32 %v7586_v24, %v10549_v33  ;;  %v7594_v52 = vmul.f32 %v7592_v13, %v12353_v40  ;;  %v7588_v1 = vmul.f32 %v7586_v24, %v12354_v38  ;;  %v12356_v38 = vld [vmem:[#allocation14_spill] sm:$0xff] }
0x4166   :  { %v7597_v53 = vadd.f32 %v7596_v37, %v7589_v30  ;;  %v7595_v10 = vadd.f32 %v7594_v52, %v7588_v1  ;;  %v11945_v52 = vld [vmem:[%s12073_s26] ss:$0 sm:$0xff] }
0x4167   :  { %v4368_v1 = vadd.f32 %v11945_v52, %v12356_v38 }
0x4168   :  { %v7600_v55 = vpop.permute.xlu1 %7599 }
0x4169   :  { %v7604_v63 = vmul.f32 %v7600_v55, %v12335_v41  ;;  %v7602_v5 = vmul.f32 %v7600_v55, %v12334_v46  ;;  %v7640_v46 = vpop.permute.xlu0 %7639 }
0x416b   :  { %v7605_v56 = vadd.f32 %v7604_v63, %v7597_v53  ;;  %v7603_v33 = vadd.f32 %v7602_v5, %v7595_v10 }
0x416d   :  { %v7608_v14 = vpop.permute.xlu1 %7607 }
0x416e   :  { %v7612_v31 = vmul.f32 %v7608_v14, %v10267_v25  ;;  %v7610_v51 = vmul.f32 %v7608_v14, %v10188_v39 }
0x4170   :  { %v7613_v12 = vadd.f32 %v7612_v31, %v7605_v56  ;;  %v7611_v0 = vadd.f32 %v7610_v51, %v7603_v33  ;;  %v12358_v33 = vld [vmem:[#allocation9_spill] sm:$0xff] }
0x4172   :  { %v7616_v26 = vpop.permute.xlu1 %7615 }
0x4173   :  { %v7620_v17 = vmul.f32 %v7616_v26, %v12305_v19  ;;  %v7618_v16 = vmul.f32 %v7616_v26, %v12355_v60  ;;  %v7644_v19 = vmul.f32 %v7640_v46, %v9841_v48 }
0x4175   :  { %v7621_v41 = vadd.f32 %v7620_v17, %v7613_v12  ;;  %v7619_v25 = vadd.f32 %v7618_v16, %v7611_v0 }
0x4177   :  { %v7624_v28 = vpop.permute.xlu1 %7623 }
0x4178   :  { %v7628_v29 = vmul.f32 %v7624_v28, %v10054_v7  ;;  %v7626_v32 = vmul.f32 %v7624_v28, %v10394_v61  ;;  %v7642_v7 = vmul.f32 %v7640_v46, %v10572_v49 }
0x417a   :  { %v7629_v6 = vadd.f32 %v7628_v29, %v7621_v41  ;;  %v7627_v57 = vadd.f32 %v7626_v32, %v7619_v25  ;;  %v12359_v41 = vlaneseq }
0x417c   :  { %v7632_v23 = vpop.permute.xlu1 %7631  ;;  %v11969_v32 = vand.u32 127, %v12359_v41 }
0x417d   :  { %v7634_v22 = vmul.f32 %v7632_v23, %v10487_v4  ;;  %v7636_v39 = vmul.f32 %v7632_v23, %v9945_v35  ;;  %v7352_v4 = vadd.f32 %v11875_v45, %v12252_v21 }
0x417f   :  { %v7637_v44 = vadd.f32 %v7636_v39, %v7629_v6  ;;  %v7635_v11 = vadd.f32 %v7634_v22, %v7627_v57  ;;  %v12360_v6 = vld [vmem:[#allocation16_spill] sm:$0xff] }
0x4180   :  { %v5092_v22 = vadd.f32 %v11945_v52, %v12360_v6 }
0x4181   :  { %v7645_v3 = vadd.f32 %v7644_v19, %v7637_v44  ;;  %v7643_v58 = vadd.f32 %v7642_v7, %v7635_v11 }
0x4182   :  { %v5095_v19 = vsel %vm4371_vm4, %v5092_v22, -inf }
0x4183   :  { %7647 = vrot.lane.b32.xlu1 %v7645_v3, %s9509_s11 }
0x4187   :  { %7723 = vrot.lane.b32.xlu1 %v7643_v58, %s9509_s11  ;;  %s9485_s11 = scalar_lea.vmem %s8021_s12, 32 }
0x4188   :  { %p9487_p2 = scmp.lt.s32.totalorder %s9485_s11, %s9481_s8 }
0x418a   :  { %p9488_p3 = por %p9487_p2, %p9486_p1 }
0x418c   :  { %p9489_p4 = pnand %p9488_p3, %p9482_p0 }
0x41f5   :  { %v7648_v61 = vpop.permute.xlu1 %7647 }
0x41f6   :  { %8174 = vmatmul.mubr.msk.f32.vlgmr.msra.gmra.mxu1 %vm107_vm0, %v7648_v61 }
0x41f7   :  { %7756 = vmatpush1.msra.mxu1 %v11586_v8  ;;  %7791 = vmatprep.mubr.f32.mxu1 %v12217_v62 }
0x41f8   :  { %7757 = vmatprep.subr.mxu1 %v11593_v20  ;;  %v7798_v20 = vadd.f32 %v11877_v18, %v7352_v4 }
0x41f9   :  { %7758 = vmatpush1.msra.mxu1 %v11599_v50  ;;  %v7724_v48 = vpop.permute.xlu1 %7723 }
0x41fa   :  { %8175 = vmatmul.mubr.msk.f32.vlgmr.msra.gmra.mxu1 %vm107_vm0, %v7724_v48  ;;  %9082 = vmatprep.subr.mxu1 %v12217_v62 }
0x41fb   :  { %9083 = vmatpush3.msra.mxu1 %v11607_v34  ;;  %9090 = vmatprep.mubr.msk.f32.mxu1 %vm9504_vm1, %v12217_v62 }
0x41fc   :  { %9084 = vmatprep.subr.mxu1 %v12217_v62 }
0x41fd   :  { %9085 = vmatpush3.msra.mxu1 %v11616_v54  ;;  %v7423_v54 = vadd.f32 %v11880_v2, %v10951_v59 }
0x41fe   :  { %9086 = vmatprep.subr.mxu1 %v12217_v62 }
0x41ff   :  { %9087 = vmatpush3.msra.mxu1 %v11623_v15 }
0x4200   :  { %9088 = vmatprep.subr.mxu1 %v12217_v62 }
0x4201   :  { %9089 = vmatpush3.msra.mxu1 %v11630_v36 }
0x4202   :  { %9093 = vmatprep.subr.mxu1 %v12217_v62 }
0x42b6   :  { %v7717_v35 = vpop.f32.mrf.mxu1 }
0x42b8   :  { %v7719_v49 = vpop.f32.mrf.mxu1 }
0x42ba   :  { %v7793_v8 = vpop.f32.mrf.mxu1 }
0x42bb   :  { %v7794_v50 = vadd.f32 %v7793_v8, %v7717_v35 }
0x42bc   :  { %v7795_v34 = vpop.f32.mrf.mxu1 }
0x42bd   :  { %v7799_v15 = vadd.f32 %v7798_v20, %v7794_v50  ;;  %v7796_v13 = vadd.f32 %v7795_v34, %v7719_v49  ;;  %v12361_v49 = vld [vmem:[#allocation33_spill] sm:$0xff]  ;;  %v7255_v50 = vadd.f32 %v11945_v52, %v11873_v9 }
0x42be   :  { %v5813_v8 = vadd.f32 %v11945_v52, %v12361_v49 }
0x42bf   :  { %9394 = vtanh.f32 %v7799_v15  ;;  %v7824_v55 = vadd.f32 %v7796_v13, %v7423_v54  ;;  %v8176_v14 = vmul.f32 -1.442695, %v7799_v15  ;;  %v7258_v54 = vsel %vm4371_vm4, %v7255_v50, -inf }
0x42c0   :  { %v5816_v34 = vsel %vm4371_vm4, %v5813_v8, -inf }
0x42c1   :  { %9396 = vpow2.f32 %v8176_v14 }
0x42cc   :  { %v9395_v36 = vpop.eup %9394 }
0x42cd   :  { %7809 = vrot.lane.b32.xlu0 %v9395_v36, %s9516_s30 }
0x42ce   :  { %v9397_v24 = vpop.eup %9396 }
0x42cf   :  { %v7803_v21 = vadd.f32 1.0, %v9397_v24 }
0x42d1   :  { %9398 = vrcp.f32 %v7803_v21 }
0x42de   :  { %v9399_v45 = vpop.eup %9398 }
0x42df   :  { %v7807_v37 = vmul.f32 %v9399_v45, %v11796_v43  ;;  %v4372_v43 = vsel %vm4371_vm4, %v4368_v1, -inf }
0x433f   :  { %v7810_v47 = vpop.permute.xlu0 %7809 }
0x4340   :  { %v7812_v18 = vmul.f32 %v9399_v45, %v7810_v47 }
0x4342   :  { %7814 = vrot.lane.b32.xlu1 %v7812_v18, %s9516_s30 }
0x43b4   :  { %v7815_v59 = vpop.permute.xlu1 %7814 }
0x43b5   :  { %v7817_v2 = vadd.f32 %v7815_v59, %v7807_v37 }
0x43b7   :  { %9400 = vtanh.f32 %v7817_v2 }
0x43c4   :  { %v9401_v30 = vpop.eup %9400 }
0x43c5   :  { %7820 = vrot.lane.b32.xlu0 %v9401_v30, %s9516_s30 }
0x4437   :  { %v7821_v26 = vpop.permute.xlu0 %7820 }
0x4438   :  { %v7823_v40 = vmul.f32 %v9399_v45, %v7821_v26 }
0x443a   :  { %7826 = vrot.lane.b32.xlu1 %v7823_v40, %s9517_s29  ;;  %s12357_s29 = sld [smem:[#allocation38_spill]] }
0x4440   :  { %v3583_v60 = vld [vmem:[%s12357_s29 + $0x18] sm:$0xff]  ;;  %v3581_v15 = vld [vmem:[%s12357_s29 + $0x8] sm:$0xff]  ;;  %v3582_v13 = vld [vmem:[%s12357_s29 + $0x10] sm:$0xff] }
0x4441   :  { %v3584_v36 = vld [vmem:[%s12357_s29 + $0x20] sm:$0xff]  ;;  %v3585_v14 = vld [vmem:[%s12357_s29 + $0x28] sm:$0xff] }
0x445e   :  { %4373 = vmax.xlane.f32.xlu1 %v4372_v43 }
0x44ac   :  { %v7827_v63 = vpop.permute.xlu1 %7826 }
0x44ad   :  { %9091 = vmatmul.mubr.msk.f32.vlgmr.msra.gmra.mxu1 %vm3767_vm3, %v7827_v63 }
0x44ae   :  { %9094 = vmatpush3.msra.mxu1 %v11652_v27  ;;  %9097 = vmatprep.mubr.msk.f32.mxu1 %vm9504_vm1, %v12217_v62  ;;  %v3580_v27 = vld [vmem:[%s12357_s29] sm:$0xff] }
0x44af   :  { %9095 = vmatprep.subr.mxu1 %v12217_v62 }
0x44b0   :  { %9096 = vmatpush3.msra.mxu1 %v11662_v42  ;;  %v6534_v42 = vadd.f32 %v11945_v52, %v12358_v33 }
0x44b2   :  { %v6537_v12 = vsel %vm4371_vm4, %v6534_v42, -inf }
0x44e7   :  { %v4374_v10 = vpop.xlane.xlu1 %4373 }
0x44e8   :  { %v4375_v56 = vsub.f32 %v4368_v1, %v4374_v10 }
0x44ea   :  { %v4376_v51 = vmul.f32 1.442695, %v4375_v56 }
0x44ec   :  { %9402 = vpow2.f32 %v4376_v51 }
0x44f9   :  { %v9403_v17 = vpop.eup %9402 }
0x44fa   :  { %v4378_v28 = vsel %vm4371_vm4, %v9403_v17, 0.0 }
0x456d   :  { %v7896_v53 = vpop.f32.mrf.mxu1 }
0x456e   :  { %v7900_v5 = vadd.f32 %v7896_v53, %v7824_v55 }
0x456f   :  { %v9092_v31 = vpop.f32.mrf.mxu1 }
0x4570   :  { %7902 = vrot.lane.b32.xlu0 %v7900_v5, %s9518_s14 }
0x458f   :  { %4379 = vadd.xlane.f32.xlu0 %v4378_v28 }
0x45a5   :  { %4386 = vperm.xlu0 %9184, %v3580_v27  }
0x45c4   :  { %6538 = vmax.xlane.f32.xlu0 %v6537_v12 }
0x45da   :  { %6549 = vperm.xlu0 %9184, %v3583_v60  }
0x45e2   :  { %v7903_v16 = vpop.permute.xlu0 %7902 }
0x45e3   :  { %v7905_v29 = vmax.f32 %v7900_v5, %v7903_v16 }
0x45e5   :  { %9098 = vmatmul.mubr.msk.f32.vlgmr.msra.gmra.mxu1 %vm107_vm0, %v7905_v29 }
0x4618   :  { %v4380_v0 = vpop.xlane.xlu0 %4379 }
0x4619   :  { %9404 = vlog2.f32 %v4380_v0 }
0x4620   :  { %v4387_v46 = vpop.permute.xlu0 %4386 }
0x4621   :  { %vm4388_vm5 = vcmp.eq.s32.totalorder %v11969_v32, %v4387_v46 }
0x4622   :  { %v8134_v23 = vsel %vm4388_vm5, 1.0, %v12217_v62 }
0x4623   :  { %v4391_v25 = vmul.f32 %v8134_v23, %v4375_v56 }
0x4625   :  { %v4392_v39 = vsel %vm4371_vm4, %v4391_v25, 0.0 }
0x4626   :  { %4393 = vadd.xlane.f32.xlu1 %v4392_v39  ;;  %v9405_v11 = vpop.eup %9404 }
0x4627   :  { %v11977_v3 = vmul.f32 0.6931472, %v9405_v11 }
0x462a   :  { %5096 = vmax.xlane.f32.xlu1 %v5095_v19 }
0x464d   :  { %v6539_v24 = vpop.xlane.xlu0 %6538 }
0x464e   :  { %v6540_v21 = vsub.f32 %v6534_v42, %v6539_v24  ;;  %v3589_v24 = vld [vmem:[%s12362_s28 + $0x18] sm:$0xff] }
0x4650   :  { %v6541_v47 = vmul.f32 1.442695, %v6540_v21 }
0x4655   :  { %v6550_v0 = vpop.permute.xlu0 %6549 }
0x4656   :  { %vm6551_vm9 = vcmp.eq.s32.totalorder %v11969_v32, %v6550_v0 }
0x4657   :  { %v8161_v46 = vsel %vm6551_vm9, 1.0, %v12217_v62 }
0x4658   :  { %v6554_v25 = vmul.f32 %v8161_v46, %v6540_v21 }
0x465a   :  { %v6555_v19 = vsel %vm4371_vm4, %v6554_v25, 0.0 }
0x46a5   :  { %v7975_v57 = vpop.f32.mrf.mxu1 }
0x46a6   :  { %v7976_v55 = vadd.f32 %v11945_v52, %v7975_v57 }
0x46a7   :  { %v9099_v44 = vpop.f32.mrf.mxu1 }
0x46a8   :  { %v7979_v9 = vsel %vm4371_vm4, %v7976_v55, -inf }
0x46af   :  { %v11979_v7 = vpop.xlane.xlu1 %4393 }
0x46b0   :  { %v4395_v58 = vsub.f32 %v11977_v3, %v11979_v7  ;;  %v3588_v3 = vld [vmem:[%s12362_s28 + $0x10] sm:$0xff] }
0x46b3   :  { %v5097_v61 = vpop.xlane.xlu1 %5096 }
0x46b4   :  { %v5098_v48 = vsub.f32 %v5092_v22, %v5097_v61  ;;  %v3587_v61 = vld [vmem:[%s12362_s28 + $0x8] sm:$0xff] }
0x46b6   :  { %v5099_v35 = vmul.f32 1.442695, %v5098_v48 }
0x46b8   :  { %9406 = vpow2.f32 %v5099_v35 }
0x46b9   :  { %9408 = vpow2.f32 %v6541_v47 }
0x46c5   :  { %v9407_v4 = vpop.eup %9406 }
0x46c6   :  { %v5101_v20 = vsel %vm4371_vm4, %v9407_v4, 0.0  ;;  %v9409_v43 = vpop.eup %9408 }
0x46c7   :  { %5102 = vadd.xlane.f32.xlu1 %v5101_v20  ;;  %v6543_v53 = vsel %vm4371_vm4, %v9409_v43, 0.0 }
0x46cb   :  { %5817 = vmax.xlane.f32.xlu1 %v5816_v34 }
0x46cf   :  { %7259 = vmax.xlane.f32.xlu1 %v7258_v54 }
0x46e0   :  { %5107 = vperm.xlu1 %9185, %v3581_v15  }
0x46e4   :  { %5828 = vperm.xlu1 %9185, %v3582_v13  }
0x4708   :  { %7980 = vmax.xlane.f32.xlu1 %v7979_v9 }
0x4719   :  { %7270 = vperm.xlu1 %9185, %v3584_v36  }
0x471d   :  { %7991 = vperm.xlu1 %9185, %v3585_v14  }
0x4750   :  { %v5103_v45 = vpop.xlane.xlu1 %5102 }
0x4754   :  { %v5818_v18 = vpop.xlane.xlu1 %5817 }
0x4755   :  { %v5819_v37 = vsub.f32 %v5813_v8, %v5818_v18 }
0x4757   :  { %v5820_v59 = vmul.f32 1.442695, %v5819_v37 }
0x4758   :  { %v7260_v2 = vpop.xlane.xlu1 %7259 }
0x4759   :  { %9410 = vpow2.f32 %v5820_v59  ;;  %v7261_v30 = vsub.f32 %v7255_v50, %v7260_v2 }
0x475b   :  { %v7262_v26 = vmul.f32 1.442695, %v7261_v30 }
0x475c   :  { %v5108_v40 = vpop.permute.xlu1 %5107 }
0x475d   :  { %9412 = vpow2.f32 %v7262_v26  ;;  %vm5109_vm6 = vcmp.eq.s32.totalorder %v11969_v32, %v5108_v40 }
0x475e   :  { %v8143_v52 = vsel %vm5109_vm6, 1.0, %v12217_v62 }
0x475f   :  { %v5112_v38 = vmul.f32 %v8143_v52, %v5098_v48  ;;  %v3591_v52 = vld [vmem:[%s12362_s28 + $0x28] sm:$0xff] }
0x4760   :  { %v5829_v63 = vpop.permute.xlu1 %5828 }
0x4761   :  { %v5113_v1 = vsel %vm4371_vm4, %v5112_v38, 0.0  ;;  %vm5830_vm7 = vcmp.eq.s32.totalorder %v11969_v32, %v5829_v63 }
0x4762   :  { %5114 = vadd.xlane.f32.xlu0 %v5113_v1  ;;  %v8152_v10 = vsel %vm5830_vm7, 1.0, %v12217_v62 }
0x4763   :  { %v5833_v51 = vmul.f32 %v8152_v10, %v5819_v37 }
0x4765   :  { %v5834_v28 = vsel %vm4371_vm4, %v5833_v51, 0.0 }
0x4766   :  { %v9411_v5 = vpop.eup %9410  ;;  %6544 = vadd.xlane.f32.xlu0 %v6543_v53 }
0x4767   :  { %v5822_v31 = vsel %vm4371_vm4, %v9411_v5, 0.0 }
0x4768   :  { %5823 = vadd.xlane.f32.xlu1 %v5822_v31 }
0x476a   :  { %v9413_v56 = vpop.eup %9412 }
0x476b   :  { %v7264_v17 = vsel %vm4371_vm4, %v9413_v56, 0.0 }
0x476c   :  { %7265 = vadd.xlane.f32.xlu0 %v7264_v17 }
0x4770   :  { %5835 = vadd.xlane.f32.xlu0 %v5834_v28 }
0x4791   :  { %v7981_v27 = vpop.xlane.xlu1 %7980 }
0x4792   :  { %v7982_v33 = vsub.f32 %v7976_v55, %v7981_v27 }
0x4794   :  { %v7983_v42 = vmul.f32 1.442695, %v7982_v33 }
0x4795   :  { %v7271_v12 = vpop.permute.xlu1 %7270 }
0x4796   :  { %9414 = vpow2.f32 %v7983_v42  ;;  %vm7272_vm8 = vcmp.eq.s32.totalorder %v11969_v32, %v7271_v12 }
0x4797   :  { %v8170_v60 = vsel %vm7272_vm8, 1.0, %v12217_v62  ;;  %9416 = vlog2.f32 %v5103_v45 }
0x4798   :  { %v7275_v16 = vmul.f32 %v8170_v60, %v7261_v30  ;;  %v3590_v30 = vld [vmem:[%s12362_s28 + $0x20] sm:$0xff] }
0x4799   :  { %v7992_v41 = vpop.permute.xlu1 %7991 }
0x479a   :  { %v7276_v29 = vsel %vm4371_vm4, %v7275_v16, 0.0  ;;  %vm7993_vm10 = vcmp.eq.s32.totalorder %v11969_v32, %v7992_v41  ;;  %v3586_v32 = vld [vmem:[%s12362_s28] sm:$0xff] }
0x479b   :  { %7277 = vadd.xlane.f32.xlu0 %v7276_v29  ;;  %v8179_v22 = vsel %vm7993_vm10, 1.0, %v12217_v62  ;;  %v4396_v35 = vmul.f32 %v4395_v58, %v3586_v32 }
0x479c   :  { %v7996_v39 = vmul.f32 %v8179_v22, %v7982_v33 }
0x479e   :  { %v7997_v57 = vsel %vm4371_vm4, %v7996_v39, 0.0 }
0x47a3   :  { %v9415_v23 = vpop.eup %9414 }
0x47a4   :  { %v7985_v6 = vsel %vm4371_vm4, %v9415_v23, 0.0  ;;  %v9417_v44 = vpop.eup %9416 }
0x47a5   :  { %7986 = vadd.xlane.f32.xlu1 %v7985_v6  ;;  %v5105_v11 = vmul.f32 0.6931472, %v9417_v44 }
0x47a9   :  { %6556 = vadd.xlane.f32.xlu1 %v6555_v19 }
0x47ad   :  { %7998 = vadd.xlane.f32.xlu1 %v7997_v57 }
0x47eb   :  { %v5115_v62 = vpop.xlane.xlu0 %5114 }
0x47ec   :  { %v5116_v48 = vsub.f32 %v5105_v11, %v5115_v62 }
0x47ee   :  { %v5117_v4 = vmul.f32 %v5116_v48, %v3587_v61 }
0x47ef   :  { %v6545_v20 = vpop.xlane.xlu0 %6544 }
0x47f0   :  { %v5118_v49 = vadd.f32 %v5117_v4, %v4396_v35 }
0x47f1   :  { %v5824_v8 = vpop.xlane.xlu1 %5823 }
0x47f2   :  { %9418 = vlog2.f32 %v5824_v8 }
0x47f3   :  { %9420 = vlog2.f32 %v6545_v20 }
0x47f5   :  { %v7266_v50 = vpop.xlane.xlu0 %7265 }
0x47f6   :  { %9422 = vlog2.f32 %v7266_v50 }
0x47f9   :  { %v5836_v55 = vpop.xlane.xlu0 %5835 }
0x47ff   :  { %v9419_v34 = vpop.eup %9418 }
0x4800   :  { %v5826_v15 = vmul.f32 0.6931472, %v9419_v34  ;;  %v9421_v13 = vpop.eup %9420 }
0x4801   :  { %v6547_v14 = vmul.f32 0.6931472, %v9421_v13 }
0x4802   :  { %v5837_v36 = vsub.f32 %v5826_v15, %v5836_v55 }
0x4803   :  { %v9423_v58 = vpop.eup %9422 }
0x4804   :  { %v5838_v21 = vmul.f32 %v5837_v36, %v3588_v3  ;;  %v7268_v47 = vmul.f32 0.6931472, %v9423_v58 }
0x4806   :  { %v5839_v37 = vadd.f32 %v5838_v21, %v5118_v49 }
0x4824   :  { %v7278_v45 = vpop.xlane.xlu0 %7277 }
0x4825   :  { %v7279_v59 = vsub.f32 %v7268_v47, %v7278_v45 }
0x4827   :  { %v7280_v1 = vmul.f32 %v7279_v59, %v3590_v30 }
0x482e   :  { %v7987_v54 = vpop.xlane.xlu1 %7986 }
0x482f   :  { %9424 = vlog2.f32 %v7987_v54 }
0x4832   :  { %v6557_v9 = vpop.xlane.xlu1 %6556 }
0x4833   :  { %v6558_v7 = vsub.f32 %v6547_v14, %v6557_v9 }
0x4835   :  { %v6559_v18 = vmul.f32 %v6558_v7, %v3589_v24 }
0x4836   :  { %v7999_v38 = vpop.xlane.xlu1 %7998 }
0x4837   :  { %v6560_v26 = vadd.f32 %v6559_v18, %v5839_v37 }
0x4839   :  { %v7281_v63 = vadd.f32 %v7280_v1, %v6560_v26 }
0x483c   :  { %v9425_v2 = vpop.eup %9424 }
0x483d   :  { %v7989_v40 = vmul.f32 0.6931472, %v9425_v2 }
0x483f   :  { %v8000_v43 = vsub.f32 %v7989_v40, %v7999_v38 }
0x4841   :  { %v8001_v53 = vmul.f32 %v8000_v43, %v3591_v52 }
0x4843   :  { %v8002_v5 = vadd.f32 %v8001_v53, %v7281_v63 }
0x4845   :  { %v8004_v31 = vsel %vm8003_vm11, %v8002_v5, 0.0 }
0x4846   :  { %v8005_v10 = vrot.slane %v8004_v31, 4 }
0x4848   :  { %v8006_v56 = vadd.f32 %v8005_v10, %v8004_v31 }
0x484a   :  { %v8007_v51 = vrot.slane %v8006_v56, 2 }
0x484c   :  { %v8008_v17 = vadd.f32 %v8007_v51, %v8006_v56 }
0x484e   :  { %v8009_v28 = vrot.slane %v8008_v17, 1 }
0x4850   :  { %v8010_v27 = vadd.f32 %v8009_v28, %v8008_v17 }
0x4852   :  { %v8011_v33 = vmul.f32 0.25, %v8010_v27 }
0x4854   :  { %8013 = vst.msk [vmem:[#allocation3] sm:$0x1] %vm8012_vm12, %v8011_v33 }
0x4855   :  { %9492 = shalt.err (!%p9489_p4)
}
0x4856   :  { %8023 = dma.vmem_to_hbm [thread:$0]  %s8021_s12, 16, %s12074_s27, [#allocation4]  }
0x4857   :  { %9501 = dma.done.wait [#allocation4], 16  }
0x4858   :  { %9502 = vsyncadd [#allocation4], 4294967280 }
0x4859   :  { %8027 = vsyncpa [#allocation4], 1 }

</bundles_post_ra>
